<compile_context>
chip_gen: v6e
topology: v6e:2x2x1
jax: 0.10.0
libtpu: 0.0.40
codegen_flags: <defaults>
</compile_context>

<pallas_src>
import math
import numpy as np
import jax
import jax.numpy as jnp
from jax.experimental import pallas as pl
from jax.experimental.pallas import tpu as pltpu


H_GEN = 500        # logical generator hidden width (as in the PyTorch module)
H_GEN_PAD = 512    # zero-padded for aligned tiles / full MXU passes
H_INT = 50         # logical MonotonicNN hidden width
H_INT_PAD = 128    # zero-padded
NB_STEPS = 100
NCHUNK = 8         # grid steps for the quadrature kernel (K padded to NCHUNK*C nodes)


# ----------------------------------------------------------------------------
# Clenshaw-Curtis quadrature weights/nodes (host-side, identical to UMNN)
# ----------------------------------------------------------------------------
def compute_cc_weights(nb_steps):
    lam = np.arange(0, nb_steps + 1, 1).reshape(-1, 1).astype(np.float64)
    lam = np.cos((lam @ lam.T) * math.pi / nb_steps)
    lam[:, 0] = 0.5
    lam[:, -1] = 0.5 * lam[:, -1]
    lam = lam * 2.0 / nb_steps
    W = np.arange(0, nb_steps + 1, 1).reshape(-1, 1).astype(np.float64)
    W[np.arange(1, nb_steps + 1, 2)] = 0.0
    W = 2.0 / (1.0 - W ** 2)
    W[0] = 1.0
    W[np.arange(1, nb_steps + 1, 2)] = 0.0
    cc_weights = (lam.T @ W).astype(np.float32).reshape(-1)            # (nb_steps+1,)
    steps = np.cos(np.arange(0, nb_steps + 1, 1) * math.pi / nb_steps).astype(np.float32)
    return cc_weights, steps


# ----------------------------------------------------------------------------
# Kernel 1: Generator.dense  ->  ksi = (Linear->ReLU->BN)^3 -> Linear (hidden padded 512)
# ----------------------------------------------------------------------------
def generator_kernel(x_ref,
                     w1_ref, b1_ref, g1_ref, be1_ref,
                     w2_ref, b2_ref, g2_ref, be2_ref,
                     w3_ref, b3_ref, g3_ref, be3_ref,
                     w4_ref, b4_ref,
                     ksi_ref):
    def lin_relu_bn(h, w_ref, b_ref, g_ref, be_ref):
        h = jnp.dot(h, w_ref[...], preferred_element_type=jnp.float32) + b_ref[...]
        h = jnp.maximum(h, 0.0)                                   # ReLU
        mean = jnp.mean(h, axis=0, keepdims=True)                 # BatchNorm1d (train mode)
        var = jnp.mean((h - mean) ** 2, axis=0, keepdims=True)
        return (h - mean) * jax.lax.rsqrt(var + 1e-5) * g_ref[...] + be_ref[...]

    h = x_ref[...]
    h = lin_relu_bn(h, w1_ref, b1_ref, g1_ref, be1_ref)
    h = lin_relu_bn(h, w2_ref, b2_ref, g2_ref, be2_ref)
    h = lin_relu_bn(h, w3_ref, b3_ref, g3_ref, be3_ref)
    ksi_ref[...] = jnp.dot(h, w4_ref[...], preferred_element_type=jnp.float32) + b4_ref[...]


# ----------------------------------------------------------------------------
# Kernel 2: shared MonotonicNN on every (batch, column) scalar, all quadrature nodes
# batched into large GEMMs, + fused per-column min/max normalization.
#
# Transposed, lane-dense layout: hidden (128) on sublanes, the C*N (node, batch*col)
# points of the current chunk on lanes.  A (1, N) VMEM accumulator carries the
# ccw-weighted node sum across the grid; the last step applies offset/scaling and the
# per-column min/max normalization and writes a single dense (1, N) block.
# ----------------------------------------------------------------------------
def make_mono_kernel(B, D, C):
    N = B * D
    n_red_steps = 0 if B <= 1 else int(math.ceil(math.log2(B)))

    def mono_kernel(xk_ref, w_ref,                       # per-chunk (1, 1, C*N) blocks
                    w1x_ref, c1_ref, wi2_ref, bi2_ref, wi3_ref,   # transposed weights
                    bi3_ref, off_ref, scale_ref,          # (1, 1) scalars
                    out_ref, acc_ref):
        c = pl.program_id(0)

        @pl.when(c == 0)
        def _():
            acc_ref[...] = jnp.zeros_like(acc_ref)

        xk = xk_ref[0]                                                   # (1, C*N)
        # integrand net (input [x, 1, 1] folded into w1x / c1), hidden on sublanes
        h1 = jnp.maximum(w1x_ref[...] * xk + c1_ref[...], 0.0)          # (P, C*N)
        h2 = jnp.maximum(
            jnp.dot(wi2_ref[...], h1, preferred_element_type=jnp.float32)
            + bi2_ref[...], 0.0)                                          # (P, C*N)
        h3 = jnp.dot(wi3_ref[...], h2, preferred_element_type=jnp.float32) \
            + bi3_ref[...]                                                # (1, C*N)
        f = jnp.where(h3 > 0.0, h3, jnp.exp(h3) - 1.0) + 1.0              # ELU + 1
        wf = f * w_ref[0]                                                 # 0.5*ccw*ksi folded in

        # reduce the C quadrature nodes of this chunk (static, lane-aligned slices)
        local = wf[:, 0:N]
        for j in range(1, C):
            local = local + wf[:, j * N:(j + 1) * N]
        acc_ref[...] += local                                             # (1, N)

        @pl.when(c == pl.num_programs(0) - 1)
        def _():
            u = scale_ref[...] * acc_ref[...] + off_ref[...]              # (1, N), n = b*D + d
            # Per-column min/max over the batch: lane n = b*D + d, and the row length
            # is exactly N = B*D, so circular rolls by multiples of D stay inside a
            # column's residue class. A ceil(log2(B))-step doubling reduction leaves
            # every lane holding its column's min / max — all full-width (1, N) ops,
            # no narrow slices or concatenation.
            mn = u
            mx = u
            shift = D
            for _ in range(n_red_steps):
                mn = jnp.minimum(mn, pltpu.roll(mn, shift, axis=1))
                mx = jnp.maximum(mx, pltpu.roll(mx, shift, axis=1))
                shift *= 2
            denom = mx - mn
            denom = jnp.where(denom == 0.0, 1.0, denom)                   # guard constant columns
            out_ref[...] = (u - mn) / denom

    return mono_kernel


# ----------------------------------------------------------------------------
# Wrapper
# ----------------------------------------------------------------------------
def mapping_forward(x, pp, t_half, ccw_half):
    B = x.shape[0]
    D = pp["w4"].shape[1]
    N = B * D
    K_pad = t_half.shape[0]
    assert K_pad % NCHUNK == 0
    C = K_pad // NCHUNK
    P = pp["wi2t"].shape[0]
    hp = jax.lax.Precision.HIGHEST

    vmem = pl.BlockSpec(memory_space=pltpu.MemorySpace.VMEM)

    # ---- Generator --------------------------------------------------------
    gen_in = [x,
              pp["w1"], pp["b1"], pp["g1"], pp["be1"],
              pp["w2"], pp["b2"], pp["g2"], pp["be2"],
              pp["w3"], pp["b3"], pp["g3"], pp["be3"],
              pp["w4"], pp["b4"]]
    ksi = pl.pallas_call(
        generator_kernel,
        out_shape=jax.ShapeDtypeStruct((B, D), jnp.float32),
        in_specs=[vmem] * len(gen_in),
        out_specs=vmem,
    )(*gen_in)

    # ---- Tiny XLA glue: node expansion + constant context net -------------
    ksi_row = ksi.reshape(1, N)                                  # n = b*D + d
    xk_all = t_half[:, None] * ksi_row                           # (K_pad, N) quadrature points
    w_all = ccw_half[:, None] * ksi_row                          # 0.5*ccw*ksi per-point weight
    xk_rows = xk_all.reshape(NCHUNK, 1, C * N)
    w_rows = w_all.reshape(NCHUNK, 1, C * N)

    # MonotonicNN context net on the constant conditioner h = [1, 1] (hoisted; it is
    # input-independent).  Gives the additive offset and exp scaling of the integral.
    z = jnp.maximum(pp["wn1"][0:1, :] + pp["wn1"][1:2, :] + pp["bn1"], 0.0)
    z = jnp.maximum(jnp.dot(z, pp["wn2"], precision=hp) + pp["bn2"], 0.0)
    z = jnp.dot(z, pp["wn3"], precision=hp) + pp["bn3"]          # (1, 2)
    offset = z[:, 0:1]                                           # (1, 1)
    scaling = jnp.exp(z[:, 1:2])                                 # (1, 1)

    mono_kernel = make_mono_kernel(B, D, C)
    grid_spec = pltpu.PrefetchScalarGridSpec(
        num_scalar_prefetch=0,
        grid=(NCHUNK,),
        in_specs=[
            pl.BlockSpec((1, 1, C * N), lambda c: (c, 0, 0)),    # xk chunk
            pl.BlockSpec((1, 1, C * N), lambda c: (c, 0, 0)),    # weight chunk
            pl.BlockSpec((P, 1), lambda c: (0, 0)),              # w1x^T
            pl.BlockSpec((P, 1), lambda c: (0, 0)),              # c1^T
            pl.BlockSpec((P, P), lambda c: (0, 0)),              # wi2^T
            pl.BlockSpec((P, 1), lambda c: (0, 0)),              # bi2^T
            pl.BlockSpec((1, P), lambda c: (0, 0)),              # wi3^T
            pl.BlockSpec((1, 1), lambda c: (0, 0)),              # bi3
            pl.BlockSpec((1, 1), lambda c: (0, 0)),              # offset
            pl.BlockSpec((1, 1), lambda c: (0, 0)),              # scaling
        ],
        out_specs=pl.BlockSpec((1, N), lambda c: (0, 0)),
        scratch_shapes=[pltpu.VMEM((1, N), jnp.float32)],
    )
    u_row = pl.pallas_call(
        mono_kernel,
        out_shape=jax.ShapeDtypeStruct((1, N), jnp.float32),
        grid_spec=grid_spec,
        compiler_params=pltpu.CompilerParams(dimension_semantics=("arbitrary",)),
    )(xk_rows, w_rows,
      pp["w1xt"], pp["c1t"], pp["wi2t"], pp["bi2t"], pp["wi3t"],
      pp["bi3v"], offset, scaling)

    u = u_row.reshape(B, D)
    return ksi, u


# ----------------------------------------------------------------------------
# Pure-JAX reference (same math, plain XLA, HIGHEST precision) for validation
# ----------------------------------------------------------------------------
def reference_forward(x, p, t_half, ccw_half):
    hp = jax.lax.Precision.HIGHEST

    def lin_relu_bn(h, w, b, g, be):
        h = jnp.maximum(jnp.dot(h, w, precision=hp) + b, 0.0)
        mean = jnp.mean(h, axis=0, keepdims=True)
        var = jnp.mean((h - mean) ** 2, axis=0, keepdims=True)
        return (h - mean) * jax.lax.rsqrt(var + 1e-5) * g + be

    h = lin_relu_bn(x, p["w1"], p["b1"], p["g1"], p["be1"])
    h = lin_relu_bn(h, p["w2"], p["b2"], p["g2"], p["be2"])
    h = lin_relu_bn(h, p["w3"], p["b3"], p["g3"], p["be3"])
    ksi = jnp.dot(h, p["w4"], precision=hp) + p["b4"]

    z = jnp.maximum(p["wn1"][0:1, :] + p["wn1"][1:2, :] + p["bn1"], 0.0)
    z = jnp.maximum(jnp.dot(z, p["wn2"], precision=hp) + p["bn2"], 0.0)
    z = jnp.dot(z, p["wn3"], precision=hp) + p["bn3"]
    offset = z[0, 0]
    scaling = jnp.exp(z[0, 1])

    w1x = p["wi1"][0, :]
    c1 = p["wi1"][1, :] + p["wi1"][2, :] + p["bi1"][0]

    xk = t_half[:, None, None] * ksi[None, :, :]                          # (K, B, D)
    h1 = jnp.maximum(xk[..., None] * w1x + c1, 0.0)                       # (K, B, D, H)
    h2 = jnp.maximum(
        jnp.einsum("kbdh,hj->kbdj", h1, p["wi2"], precision=hp) + p["bi2"][0], 0.0)
    h3 = jnp.einsum("kbdh,hj->kbdj", h2, p["wi3"], precision=hp)[..., 0] + p["bi3"][0, 0]
    f = jnp.where(h3 > 0.0, h3, jnp.expm1(h3)) + 1.0
    integral = jnp.sum(ccw_half[:, None, None] * ksi[None] * f, axis=0)   # (B, D)
    u_raw = scaling * integral + offset
    mn = jnp.min(u_raw, axis=0, keepdims=True)
    mx = jnp.max(u_raw, axis=0, keepdims=True)
    denom = jnp.where(mx - mn == 0.0, 1.0, mx - mn)
    return ksi, (u_raw - mn) / denom


# ----------------------------------------------------------------------------
# Deterministic parameter construction (PyTorch-style uniform init) + padding
# ----------------------------------------------------------------------------
def linear_params(key, fan_in, fan_out):
    kw, kb = jax.random.split(key)
    bound = 1.0 / math.sqrt(fan_in)
    w = jax.random.uniform(kw, (fan_in, fan_out), jnp.float32, -bound, bound)
    b = jax.random.uniform(kb, (1, fan_out), jnp.float32, -bound, bound)
    return w, b


def build_params(key, in_dim, out_dim):
    keys = jax.random.split(key, 10)
    p = {}
    # Generator.dense (XRMB): Linear(in,500)->ReLU->BN, x3, then Linear(500,out)
    p["w1"], p["b1"] = linear_params(keys[0], in_dim, H_GEN)
    p["g1"] = jnp.ones((1, H_GEN), jnp.float32); p["be1"] = jnp.zeros((1, H_GEN), jnp.float32)
    p["w2"], p["b2"] = linear_params(keys[1], H_GEN, H_GEN)
    p["g2"] = jnp.ones((1, H_GEN), jnp.float32); p["be2"] = jnp.zeros((1, H_GEN), jnp.float32)
    p["w3"], p["b3"] = linear_params(keys[2], H_GEN, H_GEN)
    p["g3"] = jnp.ones((1, H_GEN), jnp.float32); p["be3"] = jnp.zeros((1, H_GEN), jnp.float32)
    p["w4"], p["b4"] = linear_params(keys[3], H_GEN, out_dim)
    # shared MonotonicNN(3, [50, 50], nb_steps=100): context net 2->50->50->2
    p["wn1"], p["bn1"] = linear_params(keys[4], 2, H_INT)
    p["wn2"], p["bn2"] = linear_params(keys[5], H_INT, H_INT)
    p["wn3"], p["bn3"] = linear_params(keys[6], H_INT, 2)
    # integrand net 3->50->50->1 (ELU output, +1 in forward)
    p["wi1"], p["bi1"] = linear_params(keys[7], 3, H_INT)
    p["wi2"], p["bi2"] = linear_params(keys[8], H_INT, H_INT)
    p["wi3"], p["bi3"] = linear_params(keys[9], H_INT, 1)
    return p


def pad_params(p, h_pad=H_GEN_PAD, p_pad=H_INT_PAD):
    """Zero-pad (numerically exact) and pre-transpose weights for the kernels."""
    def pad_to(a, rows, cols, fill=0.0):
        return jnp.pad(a, ((0, rows - a.shape[0]), (0, cols - a.shape[1])),
                       constant_values=fill)

    pp = {}
    pp["w1"] = pad_to(p["w1"], p["w1"].shape[0], h_pad)
    pp["b1"] = pad_to(p["b1"], 1, h_pad)
    pp["g1"] = pad_to(p["g1"], 1, h_pad, fill=1.0)
    pp["be1"] = pad_to(p["be1"], 1, h_pad)
    pp["w2"] = pad_to(p["w2"], h_pad, h_pad)
    pp["b2"] = pad_to(p["b2"], 1, h_pad)
    pp["g2"] = pad_to(p["g2"], 1, h_pad, fill=1.0)
    pp["be2"] = pad_to(p["be2"], 1, h_pad)
    pp["w3"] = pad_to(p["w3"], h_pad, h_pad)
    pp["b3"] = pad_to(p["b3"], 1, h_pad)
    pp["g3"] = pad_to(p["g3"], 1, h_pad, fill=1.0)
    pp["be3"] = pad_to(p["be3"], 1, h_pad)
    pp["w4"] = pad_to(p["w4"], h_pad, p["w4"].shape[1])
    pp["b4"] = p["b4"]
    # context net (consumed in the wrapper)
    for k in ("wn1", "bn1", "wn2", "bn2", "wn3", "bn3"):
        pp[k] = p[k]
    # integrand net: fold the constant conditioner h=[1,1] into the first layer,
    # zero-pad hidden 50 -> p_pad, and transpose for the lane-dense kernel layout.
    w1x = p["wi1"][0:1, :]                                   # weight row for the x input
    c1 = p["wi1"][1:2, :] + p["wi1"][2:3, :] + p["bi1"]      # h=[1,1] rows + bias
    pp["w1xt"] = pad_to(w1x, 1, p_pad).T                     # (p_pad, 1)
    pp["c1t"] = pad_to(c1, 1, p_pad).T                       # (p_pad, 1)
    pp["wi2t"] = pad_to(p["wi2"], p_pad, p_pad).T            # (p_pad, p_pad)
    pp["bi2t"] = pad_to(p["bi2"], 1, p_pad).T                # (p_pad, 1)
    pp["wi3t"] = pad_to(p["wi3"], p_pad, 1).T                # (1, p_pad)
    pp["bi3v"] = p["bi3"].reshape(1, 1)
    return pp


if __name__ == "__main__":
    B, IN_DIM, OUT_DIM = 8, 64, 16          # B*OUT_DIM = 128 -> one full lane row of work

    key = jax.random.PRNGKey(0)
    kp, kx = jax.random.split(key)
    params = build_params(kp, IN_DIM, OUT_DIM)
    pp = pad_params(params)

    ccw_np, steps_np = compute_cc_weights(NB_STEPS)          # (101,)
    K = ccw_np.shape[0]
    K_pad = ((K + NCHUNK - 1) // NCHUNK) * NCHUNK            # 104 = 8 chunks of 13 nodes
    t_half_np = np.zeros((K_pad,), np.float32)
    ccw_half_np = np.zeros((K_pad,), np.float32)             # padded nodes carry zero weight
    t_half_np[:K] = (steps_np + 1.0) * 0.5                   # CC node mapped to [0, 1]
    ccw_half_np[:K] = ccw_np * 0.5                           # fold the (x - x0)/2 factor
    t_half = jnp.asarray(t_half_np)
    ccw_half = jnp.asarray(ccw_half_np)

    x = jax.random.normal(kx, (B, IN_DIM), jnp.float32)

    fwd = jax.jit(mapping_forward)
    ksi, u = fwd(x, pp, t_half, ccw_half)
    jax.block_until_ready((ksi, u))

    ksi_ref, u_ref = reference_forward(x, params, t_half, ccw_half)

    assert ksi.shape == (B, OUT_DIM) and u.shape == (B, OUT_DIM)
    assert bool(jnp.all(jnp.isfinite(ksi))) and bool(jnp.all(jnp.isfinite(u)))
    assert float(jnp.max(jnp.abs(ksi - ksi_ref))) < 2e-2
    assert float(jnp.max(jnp.abs(u - u_ref))) < 2e-2
    assert bool(jnp.all(u >= -1e-5)) and bool(jnp.all(u <= 1.0 + 1e-5))
    print("KERNEL_OK")
</pallas_src>

<mosaic_0001>
module attributes {stable_mosaic.version = 11 : i64} {
  func.func @generator_kernel(%arg0: memref<8x64xf32, #tpu.memory_space<vmem>>, %arg1: memref<64x512xf32, #tpu.memory_space<vmem>>, %arg2: memref<1x512xf32, #tpu.memory_space<vmem>>, %arg3: memref<1x512xf32, #tpu.memory_space<vmem>>, %arg4: memref<1x512xf32, #tpu.memory_space<vmem>>, %arg5: memref<512x512xf32, #tpu.memory_space<vmem>>, %arg6: memref<1x512xf32, #tpu.memory_space<vmem>>, %arg7: memref<1x512xf32, #tpu.memory_space<vmem>>, %arg8: memref<1x512xf32, #tpu.memory_space<vmem>>, %arg9: memref<512x512xf32, #tpu.memory_space<vmem>>, %arg10: memref<1x512xf32, #tpu.memory_space<vmem>>, %arg11: memref<1x512xf32, #tpu.memory_space<vmem>>, %arg12: memref<1x512xf32, #tpu.memory_space<vmem>>, %arg13: memref<512x16xf32, #tpu.memory_space<vmem>>, %arg14: memref<1x16xf32, #tpu.memory_space<vmem>>, %arg15: memref<8x16xf32, #tpu.memory_space<vmem>>) attributes {dimension_semantics = [], scalar_prefetch = 0 : i64, scratch_operands = 0 : i64, tpu.core_type = #tpu.core_type<tc>} {
    %c0 = arith.constant 0 : index
    %c0_0 = arith.constant 0 : index
    %0 = vector.load %arg0[%c0, %c0_0] : memref<8x64xf32, #tpu.memory_space<vmem>>, vector<8x64xf32>
    %c0_1 = arith.constant 0 : index
    %c0_2 = arith.constant 0 : index
    %1 = vector.load %arg1[%c0_1, %c0_2] : memref<64x512xf32, #tpu.memory_space<vmem>>, vector<64x512xf32>
    %cst = arith.constant dense<0.000000e+00> : vector<8x512xf32>
    %2 = tpu.matmul %0, %1, %cst {dimension_numbers = #tpu.dot_dimension_numbers<[1], [0], [0], [1], [0, 0, 1, 1], [], []>} : vector<8x64xf32>, vector<64x512xf32>, vector<8x512xf32> -> vector<8x512xf32>
    %c0_3 = arith.constant 0 : index
    %c0_4 = arith.constant 0 : index
    %3 = vector.load %arg2[%c0_3, %c0_4] : memref<1x512xf32, #tpu.memory_space<vmem>>, vector<1x512xf32>
    %4 = vector.broadcast %3 : vector<1x512xf32> to vector<8x512xf32>
    %5 = arith.addf %2, %4 : vector<8x512xf32>
    %cst_5 = arith.constant 0.000000e+00 : f32
    %6 = vector.broadcast %cst_5 : f32 to vector<8x512xf32>
    %7 = arith.maximumf %5, %6 : vector<8x512xf32>
    %cst_6 = arith.constant dense<0.000000e+00> : vector<512xf32>
    %8 = vector.multi_reduction <add>, %7, %cst_6 [0] : vector<8x512xf32> to vector<512xf32>
    %9 = vector.shape_cast %8 : vector<512xf32> to vector<1x512xf32>
    %cst_7 = arith.constant 8.000000e+00 : f32
    %10 = vector.broadcast %cst_7 : f32 to vector<1x512xf32>
    %11 = arith.divf %9, %10 : vector<1x512xf32>
    %12 = vector.broadcast %11 : vector<1x512xf32> to vector<8x512xf32>
    %13 = arith.subf %7, %12 : vector<8x512xf32>
    %14 = arith.mulf %13, %13 : vector<8x512xf32>
    %cst_8 = arith.constant dense<0.000000e+00> : vector<512xf32>
    %15 = vector.multi_reduction <add>, %14, %cst_8 [0] : vector<8x512xf32> to vector<512xf32>
    %16 = vector.shape_cast %15 : vector<512xf32> to vector<1x512xf32>
    %cst_9 = arith.constant 8.000000e+00 : f32
    %17 = vector.broadcast %cst_9 : f32 to vector<1x512xf32>
    %18 = arith.divf %16, %17 : vector<1x512xf32>
    %19 = vector.broadcast %11 : vector<1x512xf32> to vector<8x512xf32>
    %20 = arith.subf %7, %19 : vector<8x512xf32>
    %cst_10 = arith.constant 9.99999974E-6 : f32
    %21 = vector.broadcast %cst_10 : f32 to vector<1x512xf32>
    %22 = arith.addf %18, %21 : vector<1x512xf32>
    %23 = math.rsqrt %22 : vector<1x512xf32>
    %24 = vector.broadcast %23 : vector<1x512xf32> to vector<8x512xf32>
    %25 = arith.mulf %20, %24 : vector<8x512xf32>
    %c0_11 = arith.constant 0 : index
    %c0_12 = arith.constant 0 : index
    %26 = vector.load %arg3[%c0_11, %c0_12] : memref<1x512xf32, #tpu.memory_space<vmem>>, vector<1x512xf32>
    %27 = vector.broadcast %26 : vector<1x512xf32> to vector<8x512xf32>
    %28 = arith.mulf %25, %27 : vector<8x512xf32>
    %c0_13 = arith.constant 0 : index
    %c0_14 = arith.constant 0 : index
    %29 = vector.load %arg4[%c0_13, %c0_14] : memref<1x512xf32, #tpu.memory_space<vmem>>, vector<1x512xf32>
    %30 = vector.broadcast %29 : vector<1x512xf32> to vector<8x512xf32>
    %31 = arith.addf %28, %30 : vector<8x512xf32>
    %c0_15 = arith.constant 0 : index
    %c0_16 = arith.constant 0 : index
    %32 = vector.load %arg5[%c0_15, %c0_16] : memref<512x512xf32, #tpu.memory_space<vmem>>, vector<512x512xf32>
    %cst_17 = arith.constant dense<0.000000e+00> : vector<8x512xf32>
    %33 = tpu.matmul %31, %32, %cst_17 {dimension_numbers = #tpu.dot_dimension_numbers<[1], [0], [0], [1], [0, 0, 1, 1], [], []>} : vector<8x512xf32>, vector<512x512xf32>, vector<8x512xf32> -> vector<8x512xf32>
    %c0_18 = arith.constant 0 : index
    %c0_19 = arith.constant 0 : index
    %34 = vector.load %arg6[%c0_18, %c0_19] : memref<1x512xf32, #tpu.memory_space<vmem>>, vector<1x512xf32>
    %35 = vector.broadcast %34 : vector<1x512xf32> to vector<8x512xf32>
    %36 = arith.addf %33, %35 : vector<8x512xf32>
    %cst_20 = arith.constant 0.000000e+00 : f32
    %37 = vector.broadcast %cst_20 : f32 to vector<8x512xf32>
    %38 = arith.maximumf %36, %37 : vector<8x512xf32>
    %cst_21 = arith.constant dense<0.000000e+00> : vector<512xf32>
    %39 = vector.multi_reduction <add>, %38, %cst_21 [0] : vector<8x512xf32> to vector<512xf32>
    %40 = vector.shape_cast %39 : vector<512xf32> to vector<1x512xf32>
    %cst_22 = arith.constant 8.000000e+00 : f32
    %41 = vector.broadcast %cst_22 : f32 to vector<1x512xf32>
    %42 = arith.divf %40, %41 : vector<1x512xf32>
    %43 = vector.broadcast %42 : vector<1x512xf32> to vector<8x512xf32>
    %44 = arith.subf %38, %43 : vector<8x512xf32>
    %45 = arith.mulf %44, %44 : vector<8x512xf32>
    %cst_23 = arith.constant dense<0.000000e+00> : vector<512xf32>
    %46 = vector.multi_reduction <add>, %45, %cst_23 [0] : vector<8x512xf32> to vector<512xf32>
    %47 = vector.shape_cast %46 : vector<512xf32> to vector<1x512xf32>
    %cst_24 = arith.constant 8.000000e+00 : f32
    %48 = vector.broadcast %cst_24 : f32 to vector<1x512xf32>
    %49 = arith.divf %47, %48 : vector<1x512xf32>
    %50 = vector.broadcast %42 : vector<1x512xf32> to vector<8x512xf32>
    %51 = arith.subf %38, %50 : vector<8x512xf32>
    %cst_25 = arith.constant 9.99999974E-6 : f32
    %52 = vector.broadcast %cst_25 : f32 to vector<1x512xf32>
    %53 = arith.addf %49, %52 : vector<1x512xf32>
    %54 = math.rsqrt %53 : vector<1x512xf32>
    %55 = vector.broadcast %54 : vector<1x512xf32> to vector<8x512xf32>
    %56 = arith.mulf %51, %55 : vector<8x512xf32>
    %c0_26 = arith.constant 0 : index
    %c0_27 = arith.constant 0 : index
    %57 = vector.load %arg7[%c0_26, %c0_27] : memref<1x512xf32, #tpu.memory_space<vmem>>, vector<1x512xf32>
    %58 = vector.broadcast %57 : vector<1x512xf32> to vector<8x512xf32>
    %59 = arith.mulf %56, %58 : vector<8x512xf32>
    %c0_28 = arith.constant 0 : index
    %c0_29 = arith.constant 0 : index
    %60 = vector.load %arg8[%c0_28, %c0_29] : memref<1x512xf32, #tpu.memory_space<vmem>>, vector<1x512xf32>
    %61 = vector.broadcast %60 : vector<1x512xf32> to vector<8x512xf32>
    %62 = arith.addf %59, %61 : vector<8x512xf32>
    %c0_30 = arith.constant 0 : index
    %c0_31 = arith.constant 0 : index
    %63 = vector.load %arg9[%c0_30, %c0_31] : memref<512x512xf32, #tpu.memory_space<vmem>>, vector<512x512xf32>
    %cst_32 = arith.constant dense<0.000000e+00> : vector<8x512xf32>
    %64 = tpu.matmul %62, %63, %cst_32 {dimension_numbers = #tpu.dot_dimension_numbers<[1], [0], [0], [1], [0, 0, 1, 1], [], []>} : vector<8x512xf32>, vector<512x512xf32>, vector<8x512xf32> -> vector<8x512xf32>
    %c0_33 = arith.constant 0 : index
    %c0_34 = arith.constant 0 : index
    %65 = vector.load %arg10[%c0_33, %c0_34] : memref<1x512xf32, #tpu.memory_space<vmem>>, vector<1x512xf32>
    %66 = vector.broadcast %65 : vector<1x512xf32> to vector<8x512xf32>
    %67 = arith.addf %64, %66 : vector<8x512xf32>
    %cst_35 = arith.constant 0.000000e+00 : f32
    %68 = vector.broadcast %cst_35 : f32 to vector<8x512xf32>
    %69 = arith.maximumf %67, %68 : vector<8x512xf32>
    %cst_36 = arith.constant dense<0.000000e+00> : vector<512xf32>
    %70 = vector.multi_reduction <add>, %69, %cst_36 [0] : vector<8x512xf32> to vector<512xf32>
    %71 = vector.shape_cast %70 : vector<512xf32> to vector<1x512xf32>
    %cst_37 = arith.constant 8.000000e+00 : f32
    %72 = vector.broadcast %cst_37 : f32 to vector<1x512xf32>
    %73 = arith.divf %71, %72 : vector<1x512xf32>
    %74 = vector.broadcast %73 : vector<1x512xf32> to vector<8x512xf32>
    %75 = arith.subf %69, %74 : vector<8x512xf32>
    %76 = arith.mulf %75, %75 : vector<8x512xf32>
    %cst_38 = arith.constant dense<0.000000e+00> : vector<512xf32>
    %77 = vector.multi_reduction <add>, %76, %cst_38 [0] : vector<8x512xf32> to vector<512xf32>
    %78 = vector.shape_cast %77 : vector<512xf32> to vector<1x512xf32>
    %cst_39 = arith.constant 8.000000e+00 : f32
    %79 = vector.broadcast %cst_39 : f32 to vector<1x512xf32>
    %80 = arith.divf %78, %79 : vector<1x512xf32>
    %81 = vector.broadcast %73 : vector<1x512xf32> to vector<8x512xf32>
    %82 = arith.subf %69, %81 : vector<8x512xf32>
    %cst_40 = arith.constant 9.99999974E-6 : f32
    %83 = vector.broadcast %cst_40 : f32 to vector<1x512xf32>
    %84 = arith.addf %80, %83 : vector<1x512xf32>
    %85 = math.rsqrt %84 : vector<1x512xf32>
    %86 = vector.broadcast %85 : vector<1x512xf32> to vector<8x512xf32>
    %87 = arith.mulf %82, %86 : vector<8x512xf32>
    %c0_41 = arith.constant 0 : index
    %c0_42 = arith.constant 0 : index
    %88 = vector.load %arg11[%c0_41, %c0_42] : memref<1x512xf32, #tpu.memory_space<vmem>>, vector<1x512xf32>
    %89 = vector.broadcast %88 : vector<1x512xf32> to vector<8x512xf32>
    %90 = arith.mulf %87, %89 : vector<8x512xf32>
    %c0_43 = arith.constant 0 : index
    %c0_44 = arith.constant 0 : index
    %91 = vector.load %arg12[%c0_43, %c0_44] : memref<1x512xf32, #tpu.memory_space<vmem>>, vector<1x512xf32>
    %92 = vector.broadcast %91 : vector<1x512xf32> to vector<8x512xf32>
    %93 = arith.addf %90, %92 : vector<8x512xf32>
    %c0_45 = arith.constant 0 : index
    %c0_46 = arith.constant 0 : index
    %94 = vector.load %arg13[%c0_45, %c0_46] : memref<512x16xf32, #tpu.memory_space<vmem>>, vector<512x16xf32>
    %cst_47 = arith.constant dense<0.000000e+00> : vector<8x16xf32>
    %95 = tpu.matmul %93, %94, %cst_47 {dimension_numbers = #tpu.dot_dimension_numbers<[1], [0], [0], [1], [0, 0, 1, 1], [], []>} : vector<8x512xf32>, vector<512x16xf32>, vector<8x16xf32> -> vector<8x16xf32>
    %c0_48 = arith.constant 0 : index
    %c0_49 = arith.constant 0 : index
    %96 = vector.load %arg14[%c0_48, %c0_49] : memref<1x16xf32, #tpu.memory_space<vmem>>, vector<1x16xf32>
    %97 = vector.broadcast %96 : vector<1x16xf32> to vector<8x16xf32>
    %98 = arith.addf %95, %97 : vector<8x16xf32>
    %c0_50 = arith.constant 0 : index
    %c0_51 = arith.constant 0 : index
    %99 = vector.load %arg15[%c0_50, %c0_51] : memref<8x16xf32, #tpu.memory_space<vmem>>, vector<8x16xf32>
    tpu.vector_store %arg15[%c0_50, %c0_51], %98 {strides = array<i32>} : memref<8x16xf32, #tpu.memory_space<vmem>>, vector<8x16xf32>,
    return
  }
}

module attributes {stable_mosaic.version = 11 : i64} {
  func.func @mono_kernel(%arg0: i32, %arg1: memref<1x1x1664xf32, #tpu.memory_space<vmem>>, %arg2: memref<1x1x1664xf32, #tpu.memory_space<vmem>>, %arg3: memref<128x1xf32, #tpu.memory_space<vmem>>, %arg4: memref<128x1xf32, #tpu.memory_space<vmem>>, %arg5: memref<128x128xf32, #tpu.memory_space<vmem>>, %arg6: memref<128x1xf32, #tpu.memory_space<vmem>>, %arg7: memref<1x128xf32, #tpu.memory_space<vmem>>, %arg8: memref<1x1xf32, #tpu.memory_space<vmem>>, %arg9: memref<1x1xf32, #tpu.memory_space<vmem>>, %arg10: memref<1x1xf32, #tpu.memory_space<vmem>>, %arg11: memref<1x128xf32, #tpu.memory_space<vmem>>, %arg12: memref<1x128xf32, #tpu.memory_space<vmem>>) attributes {dimension_semantics = [#tpu.dimension_semantics<arbitrary>], iteration_bounds = array<i64: 8>, scalar_prefetch = 0 : i64, scratch_operands = 1 : i64, tpu.core_type = #tpu.core_type<tc>, window_params = [{transform_indices = @transform_0, window_bounds = array<i64: 1, 1, 1664>}, {transform_indices = @transform_1, window_bounds = array<i64: 1, 1, 1664>}, {pipeline_mode = #tpu.pipeline_mode<synchronous>, transform_indices = @transform_2, window_bounds = array<i64: 128, 1>}, {pipeline_mode = #tpu.pipeline_mode<synchronous>, transform_indices = @transform_3, window_bounds = array<i64: 128, 1>}, {pipeline_mode = #tpu.pipeline_mode<synchronous>, transform_indices = @transform_4, window_bounds = array<i64: 128, 128>}, {pipeline_mode = #tpu.pipeline_mode<synchronous>, transform_indices = @transform_5, window_bounds = array<i64: 128, 1>}, {pipeline_mode = #tpu.pipeline_mode<synchronous>, transform_indices = @transform_6, window_bounds = array<i64: 1, 128>}, {pipeline_mode = #tpu.pipeline_mode<synchronous>, transform_indices = @transform_7, window_bounds = array<i64: 1, 1>}, {pipeline_mode = #tpu.pipeline_mode<synchronous>, transform_indices = @transform_8, window_bounds = array<i64: 1, 1>}, {pipeline_mode = #tpu.pipeline_mode<synchronous>, transform_indices = @transform_9, window_bounds = array<i64: 1, 1>}, {pipeline_mode = #tpu.pipeline_mode<synchronous>, transform_indices = @transform_10, window_bounds = array<i64: 1, 128>}]} {
    %c0_i32 = arith.constant 0 : i32
    %0 = arith.cmpi eq, %arg0, %c0_i32 : i32
    %1 = arith.extui %0 : i1 to i32
    %c0_i32_0 = arith.constant 0 : i32
    %2 = arith.cmpi ne, %1, %c0_i32_0 : i32
    scf.if %2 {
      %cst_29 = arith.constant 0.000000e+00 : f32
      %68 = vector.broadcast %cst_29 : f32 to vector<1x128xf32>
      %c0_30 = arith.constant 0 : index
      %c0_31 = arith.constant 0 : index
      %69 = vector.load %arg12[%c0_30, %c0_31] : memref<1x128xf32, #tpu.memory_space<vmem>>, vector<1x128xf32>
      tpu.vector_store %arg12[%c0_30, %c0_31], %68 {strides = array<i32>} : memref<1x128xf32, #tpu.memory_space<vmem>>, vector<1x128xf32>,
    } else {
    }
    %c0 = arith.constant 0 : index
    %c0_1 = arith.constant 0 : index
    %c0_2 = arith.constant 0 : index
    %3 = vector.load %arg1[%c0, %c0_1, %c0_2] : memref<1x1x1664xf32, #tpu.memory_space<vmem>>, vector<1x1x1664xf32>
    %4 = vector.shape_cast %3 : vector<1x1x1664xf32> to vector<1x1664xf32>
    %c0_3 = arith.constant 0 : index
    %c0_4 = arith.constant 0 : index
    %5 = vector.load %arg3[%c0_3, %c0_4] : memref<128x1xf32, #tpu.memory_space<vmem>>, vector<128x1xf32>
    %6 = vector.broadcast %5 : vector<128x1xf32> to vector<128x1664xf32>
    %7 = vector.broadcast %4 : vector<1x1664xf32> to vector<128x1664xf32>
    %8 = arith.mulf %6, %7 : vector<128x1664xf32>
    %c0_5 = arith.constant 0 : index
    %c0_6 = arith.constant 0 : index
    %9 = vector.load %arg4[%c0_5, %c0_6] : memref<128x1xf32, #tpu.memory_space<vmem>>, vector<128x1xf32>
    %10 = vector.broadcast %9 : vector<128x1xf32> to vector<128x1664xf32>
    %11 = arith.addf %8, %10 : vector<128x1664xf32>
    %cst = arith.constant 0.000000e+00 : f32
    %12 = vector.broadcast %cst : f32 to vector<128x1664xf32>
    %13 = arith.maximumf %11, %12 : vector<128x1664xf32>
    %c0_7 = arith.constant 0 : index
    %c0_8 = arith.constant 0 : index
    %14 = vector.load %arg5[%c0_7, %c0_8] : memref<128x128xf32, #tpu.memory_space<vmem>>, vector<128x128xf32>
    %cst_9 = arith.constant dense<0.000000e+00> : vector<128x1664xf32>
    %15 = tpu.matmul %14, %13, %cst_9 {dimension_numbers = #tpu.dot_dimension_numbers<[1], [0], [0], [1], [0, 0, 1, 1], [], []>} : vector<128x128xf32>, vector<128x1664xf32>, vector<128x1664xf32> -> vector<128x1664xf32>
    %c0_10 = arith.constant 0 : index
    %c0_11 = arith.constant 0 : index
    %16 = vector.load %arg6[%c0_10, %c0_11] : memref<128x1xf32, #tpu.memory_space<vmem>>, vector<128x1xf32>
    %17 = vector.broadcast %16 : vector<128x1xf32> to vector<128x1664xf32>
    %18 = arith.addf %15, %17 : vector<128x1664xf32>
    %cst_12 = arith.constant 0.000000e+00 : f32
    %19 = vector.broadcast %cst_12 : f32 to vector<128x1664xf32>
    %20 = arith.maximumf %18, %19 : vector<128x1664xf32>
    %c0_13 = arith.constant 0 : index
    %c0_14 = arith.constant 0 : index
    %21 = vector.load %arg7[%c0_13, %c0_14] : memref<1x128xf32, #tpu.memory_space<vmem>>, vector<1x128xf32>
    %cst_15 = arith.constant dense<0.000000e+00> : vector<1x1664xf32>
    %22 = tpu.matmul %21, %20, %cst_15 {dimension_numbers = #tpu.dot_dimension_numbers<[1], [0], [0], [1], [0, 0, 1, 1], [], []>} : vector<1x128xf32>, vector<128x1664xf32>, vector<1x1664xf32> -> vector<1x1664xf32>
    %c0_16 = arith.constant 0 : index
    %c0_17 = arith.constant 0 : index
    %23 = vector.load %arg8[%c0_16, %c0_17] : memref<1x1xf32, #tpu.memory_space<vmem>>, vector<1x1xf32>
    %24 = vector.broadcast %23 : vector<1x1xf32> to vector<1x1664xf32>
    %25 = arith.addf %22, %24 : vector<1x1664xf32>
    %cst_18 = arith.constant 0.000000e+00 : f32
    %26 = vector.broadcast %cst_18 : f32 to vector<1x1664xf32>
    %27 = arith.cmpf ogt, %25, %26 : vector<1x1664xf32>
    %28 = math.exp %25 : vector<1x1664xf32>
    %cst_19 = arith.constant 1.000000e+00 : f32
    %29 = vector.broadcast %cst_19 : f32 to vector<1x1664xf32>
    %30 = arith.subf %28, %29 : vector<1x1664xf32>
    %31 = arith.select %27, %25, %30 : vector<1x1664xi1>, vector<1x1664xf32>
    %cst_20 = arith.constant 1.000000e+00 : f32
    %32 = vector.broadcast %cst_20 : f32 to vector<1x1664xf32>
    %33 = arith.addf %31, %32 : vector<1x1664xf32>
    %c0_21 = arith.constant 0 : index
    %c0_22 = arith.constant 0 : index
    %c0_23 = arith.constant 0 : index
    %34 = vector.load %arg2[%c0_21, %c0_22, %c0_23] : memref<1x1x1664xf32, #tpu.memory_space<vmem>>, vector<1x1x1664xf32>
    %35 = vector.shape_cast %34 : vector<1x1x1664xf32> to vector<1x1664xf32>
    %36 = arith.mulf %33, %35 : vector<1x1664xf32>
    %37 = vector.extract_strided_slice %36 {offsets = [0, 0], sizes = [1, 128], strides = [1, 1]} : vector<1x1664xf32> to vector<1x128xf32>
    %38 = vector.extract_strided_slice %36 {offsets = [0, 128], sizes = [1, 128], strides = [1, 1]} : vector<1x1664xf32> to vector<1x128xf32>
    %39 = arith.addf %37, %38 : vector<1x128xf32>
    %40 = vector.extract_strided_slice %36 {offsets = [0, 256], sizes = [1, 128], strides = [1, 1]} : vector<1x1664xf32> to vector<1x128xf32>
    %41 = arith.addf %39, %40 : vector<1x128xf32>
    %42 = vector.extract_strided_slice %36 {offsets = [0, 384], sizes = [1, 128], strides = [1, 1]} : vector<1x1664xf32> to vector<1x128xf32>
    %43 = arith.addf %41, %42 : vector<1x128xf32>
    %44 = vector.extract_strided_slice %36 {offsets = [0, 512], sizes = [1, 128], strides = [1, 1]} : vector<1x1664xf32> to vector<1x128xf32>
    %45 = arith.addf %43, %44 : vector<1x128xf32>
    %46 = vector.extract_strided_slice %36 {offsets = [0, 640], sizes = [1, 128], strides = [1, 1]} : vector<1x1664xf32> to vector<1x128xf32>
    %47 = arith.addf %45, %46 : vector<1x128xf32>
    %48 = vector.extract_strided_slice %36 {offsets = [0, 768], sizes = [1, 128], strides = [1, 1]} : vector<1x1664xf32> to vector<1x128xf32>
    %49 = arith.addf %47, %48 : vector<1x128xf32>
    %50 = vector.extract_strided_slice %36 {offsets = [0, 896], sizes = [1, 128], strides = [1, 1]} : vector<1x1664xf32> to vector<1x128xf32>
    %51 = arith.addf %49, %50 : vector<1x128xf32>
    %52 = vector.extract_strided_slice %36 {offsets = [0, 1024], sizes = [1, 128], strides = [1, 1]} : vector<1x1664xf32> to vector<1x128xf32>
    %53 = arith.addf %51, %52 : vector<1x128xf32>
    %54 = vector.extract_strided_slice %36 {offsets = [0, 1152], sizes = [1, 128], strides = [1, 1]} : vector<1x1664xf32> to vector<1x128xf32>
    %55 = arith.addf %53, %54 : vector<1x128xf32>
    %56 = vector.extract_strided_slice %36 {offsets = [0, 1280], sizes = [1, 128], strides = [1, 1]} : vector<1x1664xf32> to vector<1x128xf32>
    %57 = arith.addf %55, %56 : vector<1x128xf32>
    %58 = vector.extract_strided_slice %36 {offsets = [0, 1408], sizes = [1, 128], strides = [1, 1]} : vector<1x1664xf32> to vector<1x128xf32>
    %59 = arith.addf %57, %58 : vector<1x128xf32>
    %60 = vector.extract_strided_slice %36 {offsets = [0, 1536], sizes = [1, 128], strides = [1, 1]} : vector<1x1664xf32> to vector<1x128xf32>
    %61 = arith.addf %59, %60 : vector<1x128xf32>
    %c0_24 = arith.constant 0 : index
    %c0_25 = arith.constant 0 : index
    %62 = vector.load %arg12[%c0_24, %c0_25] : memref<1x128xf32, #tpu.memory_space<vmem>>, vector<1x128xf32>
    %63 = arith.addf %62, %61 : vector<1x128xf32>
    %c0_26 = arith.constant 0 : index
    %c0_27 = arith.constant 0 : index
    %64 = vector.load %arg12[%c0_26, %c0_27] : memref<1x128xf32, #tpu.memory_space<vmem>>, vector<1x128xf32>
    tpu.vector_store %arg12[%c0_26, %c0_27], %63 {strides = array<i32>} : memref<1x128xf32, #tpu.memory_space<vmem>>, vector<1x128xf32>,
    %c7_i32 = arith.constant 7 : i32
    %65 = arith.cmpi eq, %arg0, %c7_i32 : i32
    %66 = arith.extui %65 : i1 to i32
    %c0_i32_28 = arith.constant 0 : i32
    %67 = arith.cmpi ne, %66, %c0_i32_28 : i32
    scf.if %67 {
      %c0_29 = arith.constant 0 : index
      %c0_30 = arith.constant 0 : index
      %68 = vector.load %arg10[%c0_29, %c0_30] : memref<1x1xf32, #tpu.memory_space<vmem>>, vector<1x1xf32>
      %c0_31 = arith.constant 0 : index
      %c0_32 = arith.constant 0 : index
      %69 = vector.load %arg12[%c0_31, %c0_32] : memref<1x128xf32, #tpu.memory_space<vmem>>, vector<1x128xf32>
      %70 = vector.broadcast %68 : vector<1x1xf32> to vector<1x128xf32>
      %71 = arith.mulf %70, %69 : vector<1x128xf32>
      %c0_33 = arith.constant 0 : index
      %c0_34 = arith.constant 0 : index
      %72 = vector.load %arg9[%c0_33, %c0_34] : memref<1x1xf32, #tpu.memory_space<vmem>>, vector<1x1xf32>
      %73 = vector.broadcast %72 : vector<1x1xf32> to vector<1x128xf32>
      %74 = arith.addf %71, %73 : vector<1x128xf32>
      %c16_i32 = arith.constant 16 : i32
      %75 = tpu.dynamic_rotate %74 by %c16_i32 dim 1 : vector<1x128xf32>, i32 -> vector<1x128xf32>
      %76 = arith.minimumf %74, %75 : vector<1x128xf32>
      %c16_i32_35 = arith.constant 16 : i32
      %77 = tpu.dynamic_rotate %74 by %c16_i32_35 dim 1 : vector<1x128xf32>, i32 -> vector<1x128xf32>
      %78 = arith.maximumf %74, %77 : vector<1x128xf32>
      %c32_i32 = arith.constant 32 : i32
      %79 = tpu.dynamic_rotate %76 by %c32_i32 dim 1 : vector<1x128xf32>, i32 -> vector<1x128xf32>
      %80 = arith.minimumf %76, %79 : vector<1x128xf32>
      %c32_i32_36 = arith.constant 32 : i32
      %81 = tpu.dynamic_rotate %78 by %c32_i32_36 dim 1 : vector<1x128xf32>, i32 -> vector<1x128xf32>
      %82 = arith.maximumf %78, %81 : vector<1x128xf32>
      %c64_i32 = arith.constant 64 : i32
      %83 = tpu.dynamic_rotate %80 by %c64_i32 dim 1 : vector<1x128xf32>, i32 -> vector<1x128xf32>
      %84 = arith.minimumf %80, %83 : vector<1x128xf32>
      %c64_i32_37 = arith.constant 64 : i32
      %85 = tpu.dynamic_rotate %82 by %c64_i32_37 dim 1 : vector<1x128xf32>, i32 -> vector<1x128xf32>
      %86 = arith.maximumf %82, %85 : vector<1x128xf32>
      %87 = arith.subf %86, %84 : vector<1x128xf32>
      %cst_38 = arith.constant 0.000000e+00 : f32
      %88 = vector.broadcast %cst_38 : f32 to vector<1x128xf32>
      %89 = arith.cmpf oeq, %87, %88 : vector<1x128xf32>
      %cst_39 = arith.constant 1.000000e+00 : f32
      %90 = vector.broadcast %cst_39 : f32 to vector<1x128xf32>
      %91 = arith.select %89, %90, %87 : vector<1x128xi1>, vector<1x128xf32>
      %92 = arith.subf %74, %84 : vector<1x128xf32>
      %93 = arith.divf %92, %91 : vector<1x128xf32>
      %c0_40 = arith.constant 0 : index
      %c0_41 = arith.constant 0 : index
      %94 = vector.load %arg11[%c0_40, %c0_41] : memref<1x128xf32, #tpu.memory_space<vmem>>, vector<1x128xf32>
      tpu.vector_store %arg11[%c0_40, %c0_41], %93 {strides = array<i32>} : memref<1x128xf32, #tpu.memory_space<vmem>>, vector<1x128xf32>,
    } else {
    }
    return
  }
  func.func @transform_0(%arg0: i32) -> (i32, i32, i32) {
    %c0_i32 = arith.constant 0 : i32
    %c0_i32_0 = arith.constant 0 : i32
    %c0_i32_1 = arith.constant 0 : i32
    return %arg0, %c0_i32, %c0_i32_0 : i32, i32, i32
  }
  func.func @transform_1(%arg0: i32) -> (i32, i32, i32) {
    %c0_i32 = arith.constant 0 : i32
    %c0_i32_0 = arith.constant 0 : i32
    %c0_i32_1 = arith.constant 0 : i32
    return %arg0, %c0_i32, %c0_i32_0 : i32, i32, i32
  }
  func.func @transform_2(%arg0: i32) -> (i32, i32) {
    %c0_i32 = arith.constant 0 : i32
    %c0_i32_0 = arith.constant 0 : i32
    %c0_i32_1 = arith.constant 0 : i32
    return %c0_i32, %c0_i32_0 : i32, i32
  }
  func.func @transform_3(%arg0: i32) -> (i32, i32) {
    %c0_i32 = arith.constant 0 : i32
    %c0_i32_0 = arith.constant 0 : i32
    %c0_i32_1 = arith.constant 0 : i32
    return %c0_i32, %c0_i32_0 : i32, i32
  }
  func.func @transform_4(%arg0: i32) -> (i32, i32) {
    %c0_i32 = arith.constant 0 : i32
    %c0_i32_0 = arith.constant 0 : i32
    %c0_i32_1 = arith.constant 0 : i32
    return %c0_i32, %c0_i32_0 : i32, i32
  }
  func.func @transform_5(%arg0: i32) -> (i32, i32) {
    %c0_i32 = arith.constant 0 : i32
    %c0_i32_0 = arith.constant 0 : i32
    %c0_i32_1 = arith.constant 0 : i32
    return %c0_i32, %c0_i32_0 : i32, i32
  }
  func.func @transform_6(%arg0: i32) -> (i32, i32) {
    %c0_i32 = arith.constant 0 : i32
    %c0_i32_0 = arith.constant 0 : i32
    %c0_i32_1 = arith.constant 0 : i32
    return %c0_i32, %c0_i32_0 : i32, i32
  }
  func.func @transform_7(%arg0: i32) -> (i32, i32) {
    %c0_i32 = arith.constant 0 : i32
    %c0_i32_0 = arith.constant 0 : i32
    %c0_i32_1 = arith.constant 0 : i32
    return %c0_i32, %c0_i32_0 : i32, i32
  }
  func.func @transform_8(%arg0: i32) -> (i32, i32) {
    %c0_i32 = arith.constant 0 : i32
    %c0_i32_0 = arith.constant 0 : i32
    %c0_i32_1 = arith.constant 0 : i32
    return %c0_i32, %c0_i32_0 : i32, i32
  }
  func.func @transform_9(%arg0: i32) -> (i32, i32) {
    %c0_i32 = arith.constant 0 : i32
    %c0_i32_0 = arith.constant 0 : i32
    %c0_i32_1 = arith.constant 0 : i32
    return %c0_i32, %c0_i32_0 : i32, i32
  }
  func.func @transform_10(%arg0: i32) -> (i32, i32) {
    %c0_i32 = arith.constant 0 : i32
    %c0_i32_0 = arith.constant 0 : i32
    %c0_i32_1 = arith.constant 0 : i32
    return %c0_i32, %c0_i32_0 : i32, i32
  }
}

</mosaic_0001>

<bundles_post_ra>
// kernel: mul.18
= control target key start
LH: loop header
LB: loop body
LE: loop exit
PB: predicated region body
PF: predicated region fallthrough
CT: control target
= control target key end

     0   :  { %s69_s10 = smov 112   ;;  %s70_s11 = smov 80   ;;  %vm3_vm0 = vcmask 130048   ;;  %vm9_vm1 = vcmask 1048448   ;;  %vm15_vm2 = vcmask 917248   ;;  %vm21_vm3 = vcmask 786048   ;;  %s113_s0 = inlined_call_operand.vmem [shape: f32[8,16], index: 0, kind: input, shape index: {}]   ;;  %s114_s1 = inlined_call_operand.vmem [shape: f32[128], index: 1, kind: output, shape index: {}]  }
   0x1   :  { %v55_v0 = vld [vmem:[%s113_s0 + $0x7] sm:$0x1]   ;;  %v57_v1 = vld [vmem:[%s113_s0 + $0x5] sm:$0x1]   ;;  %v56_v2 = vld [vmem:[%s113_s0 + $0x6] sm:$0x1]  }
   0x2   :  { %7 = vrot.lane.b32.xlu0 %v55_v0, %s69_s10  ;;  %19 = vrot.lane.b32.xlu1 %v57_v1, %s70_s11  ;;  %v58_v3 = vld [vmem:[%s113_s0 + $0x4] sm:$0x1]   ;;  %v2_v4 = vld [vmem:[%s113_s0] sm:$0x1]   ;;  %s71_s18 = smov 96   ;;  %s72_s19 = smov 64  }
   0x3   :  { %4 = vst.msk [vmem:[#allocation0] sm:$0x1] %vm3_vm0, %v2_v4   ;;  %v59_v5 = vld [vmem:[%s113_s0 + $0x3] sm:$0x1]   ;;  %v60_v6 = vld [vmem:[%s113_s0 + $0x2] sm:$0x1]  }
   0x4   :  { %s73_s24 = smov 48   ;;  %s74_s25 = smov 32   ;;  %v61_v7 = vld [vmem:[%s113_s0 + $0x1] sm:$0x1]   ;;  %vm27_vm4 = vcmask 654848   ;;  %vm33_vm5 = vcmask 523648  }
   0x5   :  { %s75_s0 = smov 16   ;;  %vm39_vm6 = vcmask 392448   ;;  %vm45_vm7 = vcmask 261248  }
   0x6   :  { %13 = vrot.lane.b32.xlu0 %v56_v2, %s71_s18  ;;  %25 = vrot.lane.b32.xlu1 %v58_v3, %s72_s19 }
   0xa   :  { %31 = vrot.lane.b32.xlu0 %v59_v5, %s73_s24  ;;  %37 = vrot.lane.b32.xlu1 %v60_v6, %s74_s25 }
   0xe   :  { %43 = vrot.lane.b32.xlu0 %v61_v7, %s75_s0 }
  0x74   :  { %v8_v8 = vpop.permute.xlu0 %7   ;;  %v20_v9 = vpop.permute.xlu1 %19  }
  0x75   :  { %10 = vst.msk [vmem:[#allocation0] sm:$0x1] %vm9_vm1, %v8_v8  }
  0x78   :  { %v14_v10 = vpop.permute.xlu0 %13   ;;  %v26_v11 = vpop.permute.xlu1 %25  }
  0x79   :  { %16 = vst.msk [vmem:[#allocation0] sm:$0x1] %vm15_vm2, %v14_v10  }
  0x7a   :  { %22 = vst.msk [vmem:[#allocation0] sm:$0x1] %vm21_vm3, %v20_v9  }
  0x7b   :  { %28 = vst.msk [vmem:[#allocation0] sm:$0x1] %vm27_vm4, %v26_v11  }
  0x7c   :  { %v32_v12 = vpop.permute.xlu0 %31   ;;  %v38_v13 = vpop.permute.xlu1 %37  }
  0x7d   :  { %34 = vst.msk [vmem:[#allocation0] sm:$0x1] %vm33_vm5, %v32_v12  }
  0x7e   :  { %40 = vst.msk [vmem:[#allocation0] sm:$0x1] %vm39_vm6, %v38_v13  }
  0x80   :  { %v44_v14 = vpop.permute.xlu0 %43  }
  0x81   :  { %46 = vst.msk [vmem:[#allocation0] sm:$0x1] %vm45_vm7, %v44_v14  }
  0x88   :  { %v51_v15 = vld [vmem:[#allocation0] sm:$0x1] }
  0x89   :  { %54 = vst [vmem:[%s114_s1] sm:$0x1] %v51_v15 }

// kernel: mapping_forward.3
= control target key start
LH: loop header
LB: loop body
LE: loop exit
PB: predicated region body
PF: predicated region fallthrough
CT: control target
= control target key end

     0   :  { %s3765_s19 = smov 0   ;;  %s5866_s0 = inlined_call_operand.vmem [shape: f32[8,1,1664], index: 0, kind: input, shape index: {}]   ;;  %s5867_s1 = inlined_call_operand.vmem [shape: f32[8,1,1664], index: 1, kind: input, shape index: {}]   ;;  %s5868_s2 = inlined_call_operand.vmem [shape: f32[128,1], index: 2, kind: input, shape index: {}]   ;;  %s5869_s3 = inlined_call_operand.vmem [shape: f32[128,1], index: 3, kind: input, shape index: {}]   ;;  %s5870_s4 = inlined_call_operand.vmem [shape: f32[128,128], index: 4, kind: input, shape index: {}]   ;;  %s5871_s5 = inlined_call_operand.vmem [shape: f32[128,1], index: 5, kind: input, shape index: {}]   ;;  %s5872_s6 = inlined_call_operand.vmem [shape: f32[1,128], index: 6, kind: input, shape index: {}]   ;;  %s5873_s7 = inlined_call_operand.<no memory space> [shape: f32[1,1], index: 7, kind: input, shape index: {}]   ;;  %s5874_s10 = inlined_call_operand.vmem [shape: f32[1,128], index: 10, kind: output, shape index: {}]   ;;  %s5875_s8 = inlined_call_operand.<no memory space> [shape: f32[1,1], index: 8, kind: input, shape index: {}]   ;;  %s5876_s9 = inlined_call_operand.<no memory space> [shape: f32[1,1], index: 9, kind: input, shape index: {}]  }
   0x1   :  { %v15_v0 = vstv %s5873_s7  ;;  %v17_v1 = vstv %s5875_s8  ;;  %v19_v2 = vstv %s5876_s9 }
   0x2   :  { %16 = vst [vmem:[#allocation3] sm:$0x1] %v15_v0  ;;  %18 = vst [vmem:[#allocation4] sm:$0x1] %v17_v1 }
   0x3   :  { %20 = vst [vmem:[#allocation5] sm:$0x1] %v19_v2 }
   0x4 LB: > { %s3771_s7 = sadd.s32 4294967295, %s3691_s19   ;;  %p3461_p0 = scmp.ge.s32.totalorder %s3691_s19, 1  ;;  %s3691_s19 = sphi %s3765_s19, %s26_s19  }
   0x5   : > { %p321_p1 = scmp.lt.s32.totalorder %s3691_s19, 9 }
   0x7   : > { %p322_p2 = pnand %p3461_p0, %p321_p1 }
   0x9   : > { %325 = sbr.rel (%p322_p2) target bundleno = 1430 (0x596), region = 60 }
   0xe   : > { %p357_p3 = scmp.lt.s32.totalorder %s3771_s7, 7  ;;  %p3462_p4 = scmp.ne.s32.totalorder %s3771_s7, 0 }
  0x10   : > { %s358_s8 = scalar_select %p357_p3, %s3771_s7, 7 }
  0x11   : > { %368 = sbr.rel (%p3462_p4) target bundleno = 24 (0x18), region = 64 }
  0x12   : > { %s3619_s9 = smul.u32 13, %s358_s8 }
  0x14   : > { %s3780_s22 = scalar_lea.vmem %s5866_s0, %s3619_s9  ;;  %s3785_s25 = scalar_lea.vmem %s5867_s1, %s3619_s9 }
  0x16   : > { %v3693_v3 = vmov 0.0  }
  0x17   : > { %369 = vst [vmem:[#allocation2] sm:$0x1] %v3693_v3 }
  0x18 PF: > { %v758_v4 = vld [vmem:[%s5869_s3 + $0x78] sm:$0xff]  ;;  %v3694_v6 = vmov 0   ;;  %v386_v7 = vld [vmem:[%s5868_s2 + $0x70] sm:$0xff]  ;;  %v385_v8 = vld [vmem:[%s5868_s2 + $0x68] sm:$0xff]  ;;  %v5880_v39 = vmov 0.0   ;;  %v470_v55 = vlaneseq  ;;  %vm3696_vm0 = vmmov 0  }
  0x19   : > { %v387_v5 = vld [vmem:[%s5868_s2 + $0x78] sm:$0xff]  ;;  %3637 = vset.pattern.permute.xlu1 %v3694_v6  ;;  %3636 = vset.pattern.permute.xlu0 %v3694_v6  ;;  %v757_v9 = vld [vmem:[%s5869_s3 + $0x70] sm:$0xff]  ;;  %v384_v10 = vld [vmem:[%s5868_s2 + $0x60] sm:$0xff]  ;;  %p3476_p5 = scmp.ne.s32.totalorder %s3771_s7, 7 }
  0x1a   : > { %836 = vperm.xlu1 %3637, %v758_v4   ;;  %465 = vperm.xlu0 %3636, %v387_v5   ;;  %v756_v11 = vld [vmem:[%s5869_s3 + $0x68] sm:$0xff]  ;;  %v383_v12 = vld [vmem:[%s5868_s2 + $0x58] sm:$0xff]  ;;  %v755_v13 = vld [vmem:[%s5869_s3 + $0x60] sm:$0xff]  ;;  %v3934_v56 = vshrl.u32 %v470_v55, 7  ;;  %s3699_s7 = smov (!%p3476_p5), 32   ;;  %s3700_s16 = smov (!%p3476_p5), 64  }
  0x1b   : > { %v382_v14 = vld [vmem:[%s5868_s2 + $0x50] sm:$0xff]  ;;  %v754_v15 = vld [vmem:[%s5869_s3 + $0x58] sm:$0xff]  ;;  %v381_v16 = vld [vmem:[%s5868_s2 + $0x48] sm:$0xff]  ;;  %1431 = vmatprep.mubr.f32.mxu0 %v5880_v39  ;;  %1592 = vmatprep.mubr.f32.mxu1 %v5880_v39 }
  0x1c   : > { %v753_v17 = vld [vmem:[%s5869_s3 + $0x50] sm:$0xff]  ;;  %v380_v18 = vld [vmem:[%s5868_s2 + $0x40] sm:$0xff]  ;;  %v752_v19 = vld [vmem:[%s5869_s3 + $0x48] sm:$0xff]  ;;  %5937 = vst [vmem:[#allocation6_spill] sm:$0xff] %v3934_v56  ;;  %v3937_v57 = vsub.s32 1, %v3934_v56  ;;  %v3940_v58 = vsub.s32 3, %v3934_v56 }
  0x1d   : > { %v379_v20 = vld [vmem:[%s5868_s2 + $0x38] sm:$0xff]  ;;  %v751_v21 = vld [vmem:[%s5869_s3 + $0x40] sm:$0xff]  ;;  %v378_v22 = vld [vmem:[%s5868_s2 + $0x30] sm:$0xff]  ;;  %v3943_v59 = vsub.s32 0, %v3934_v56  ;;  %v3946_v60 = vsub.s32 2, %v3934_v56 }
  0x1e   : > { %460 = vperm.xlu0 %3636, %v386_v7   ;;  %455 = vperm.xlu1 %3637, %v385_v8   ;;  %v750_v23 = vld [vmem:[%s5869_s3 + $0x38] sm:$0xff]  ;;  %v377_v24 = vld [vmem:[%s5868_s2 + $0x28] sm:$0xff]  ;;  %v749_v25 = vld [vmem:[%s5869_s3 + $0x30] sm:$0xff]  ;;  %5938 = vst [vmem:[#allocation7_spill] sm:$0xff] %v3937_v57 }
  0x1f   : > { %v376_v26 = vld [vmem:[%s5868_s2 + $0x20] sm:$0xff]  ;;  %v748_v27 = vld [vmem:[%s5869_s3 + $0x28] sm:$0xff]  ;;  %v375_v28 = vld [vmem:[%s5868_s2 + $0x18] sm:$0xff]  ;;  %5939 = vst [vmem:[#allocation8_spill] sm:$0xff] %v3940_v58 }
  0x20   : > { %v747_v29 = vld [vmem:[%s5869_s3 + $0x20] sm:$0xff]  ;;  %v374_v30 = vld [vmem:[%s5868_s2 + $0x10] sm:$0xff]  ;;  %v746_v31 = vld [vmem:[%s5869_s3 + $0x18] sm:$0xff]  ;;  %5940 = vst [vmem:[#allocation9_spill] sm:$0xff] %v3943_v59 }
  0x21   : > { %v373_v32 = vld [vmem:[%s5868_s2 + $0x8] sm:$0xff]  ;;  %v745_v33 = vld [vmem:[%s5869_s3 + $0x10] sm:$0xff]  ;;  %v372_v34 = vld [vmem:[%s5868_s2] sm:$0xff]  ;;  %5941 = vst [vmem:[#allocation10_spill] sm:$0xff] %v3946_v60 }
  0x22   : > { %831 = vperm.xlu0 %3636, %v757_v9   ;;  %450 = vperm.xlu1 %3637, %v384_v10   ;;  %v744_v35 = vld [vmem:[%s5869_s3 + $0x8] sm:$0xff]  ;;  %v743_v36 = vld [vmem:[%s5869_s3] sm:$0xff]  ;;  %v1286_v37 = vld [vmem:[%s5871_s5 + $0x78] sm:$0xff] }
  0x23   : > { %v1285_v38 = vld [vmem:[%s5871_s5 + $0x70] sm:$0xff]  ;;  %v1284_v40 = vld [vmem:[%s5871_s5 + $0x68] sm:$0xff]  ;;  %v1283_v41 = vld [vmem:[%s5871_s5 + $0x60] sm:$0xff] }
  0x24   : > { %v1282_v42 = vld [vmem:[%s5871_s5 + $0x58] sm:$0xff]  ;;  %v1281_v43 = vld [vmem:[%s5871_s5 + $0x50] sm:$0xff]  ;;  %v1280_v44 = vld [vmem:[%s5871_s5 + $0x48] sm:$0xff] }
  0x25   : > { %v1279_v45 = vld [vmem:[%s5871_s5 + $0x40] sm:$0xff]  ;;  %v1278_v46 = vld [vmem:[%s5871_s5 + $0x38] sm:$0xff]  ;;  %v1277_v47 = vld [vmem:[%s5871_s5 + $0x30] sm:$0xff] }
  0x26   : > { %826 = vperm.xlu0 %3636, %v756_v11   ;;  %445 = vperm.xlu1 %3637, %v383_v12   ;;  %v1276_v48 = vld [vmem:[%s5871_s5 + $0x28] sm:$0xff]  ;;  %v1275_v49 = vld [vmem:[%s5871_s5 + $0x20] sm:$0xff]  ;;  %v1274_v50 = vld [vmem:[%s5871_s5 + $0x18] sm:$0xff] }
  0x27   : > { %v1273_v51 = vld [vmem:[%s5871_s5 + $0x10] sm:$0xff]  ;;  %v1272_v52 = vld [vmem:[%s5871_s5 + $0x8] sm:$0xff]  ;;  %v1271_v53 = vld [vmem:[%s5871_s5] sm:$0xff] }
  0x28   : > { %v2687_v54 = vld [vmem:[#allocation3] sm:$0x1] }
  0x29   : > { %v3949_v61 = vld [vmem:[%s3780_s22] sm:$0xff] }
  0x2a   : > { %821 = vperm.xlu0 %3636, %v755_v13   ;;  %440 = vperm.xlu1 %3637, %v382_v14   ;;  %v3953_v62 = vrot.slane %v3949_v61, %v3937_v57  ;;  %v3957_v63 = vrot.slane %v3949_v61, %v3940_v58  ;;  %v3961_v0 = vrot.slane %v3949_v61, %v3943_v59 }
  0x2b   : > { %v3965_v1 = vrot.slane %v3949_v61, %v3946_v60 }
  0x2e   : > { %816 = vperm.xlu0 %3636, %v754_v15   ;;  %435 = vperm.xlu1 %3637, %v381_v16  }
  0x32   : > { %811 = vperm.xlu0 %3636, %v753_v17   ;;  %430 = vperm.xlu1 %3637, %v380_v18  }
  0x36   : > { %806 = vperm.xlu0 %3636, %v752_v19   ;;  %425 = vperm.xlu1 %3637, %v379_v20  }
  0x3a   : > { %801 = vperm.xlu0 %3636, %v751_v21   ;;  %420 = vperm.xlu1 %3637, %v378_v22  }
  0x3e   : > { %796 = vperm.xlu0 %3636, %v750_v23   ;;  %415 = vperm.xlu1 %3637, %v377_v24  }
  0x42   : > { %791 = vperm.xlu0 %3636, %v749_v25   ;;  %410 = vperm.xlu1 %3637, %v376_v26  }
  0x46   : > { %786 = vperm.xlu0 %3636, %v748_v27   ;;  %405 = vperm.xlu1 %3637, %v375_v28  }
  0x4a   : > { %781 = vperm.xlu0 %3636, %v747_v29   ;;  %400 = vperm.xlu1 %3637, %v374_v30  }
  0x4e   : > { %776 = vperm.xlu0 %3636, %v746_v31   ;;  %395 = vperm.xlu1 %3637, %v373_v32  }
  0x52   : > { %771 = vperm.xlu0 %3636, %v745_v33   ;;  %390 = vperm.xlu1 %3637, %v372_v34  }
  0x56   : > { %766 = vperm.xlu0 %3636, %v744_v35   ;;  %761 = vperm.xlu1 %3637, %v743_v36  }
  0x5a   : > { %1364 = vperm.xlu0 %3636, %v1286_v37   ;;  %1359 = vperm.xlu1 %3637, %v1285_v38  }
  0x5e   : > { %1354 = vperm.xlu0 %3636, %v1284_v40   ;;  %1349 = vperm.xlu1 %3637, %v1283_v41  }
  0x62   : > { %1344 = vperm.xlu0 %3636, %v1282_v42   ;;  %1339 = vperm.xlu1 %3637, %v1281_v43  }
  0x66   : > { %1334 = vperm.xlu0 %3636, %v1280_v44   ;;  %1329 = vperm.xlu1 %3637, %v1279_v45  }
  0x6a   : > { %1324 = vperm.xlu0 %3636, %v1278_v46   ;;  %1319 = vperm.xlu1 %3637, %v1277_v47  }
  0x6e   : > { %1314 = vperm.xlu0 %3636, %v1276_v48   ;;  %1309 = vperm.xlu1 %3637, %v1275_v49  }
  0x72   : > { %1304 = vperm.xlu0 %3636, %v1274_v50   ;;  %1299 = vperm.xlu1 %3637, %v1273_v51  }
  0x76   : > { %1294 = vperm.xlu0 %3636, %v1272_v52   ;;  %1289 = vperm.xlu1 %3637, %v1271_v53  }
  0x7a   : > { %2690 = vperm.xlu0 %3636, %v2687_v54  }
  0x95   : > { %v3967_v2 = vpop.permute.xlu1 %836  ;;  %v3969_v3 = vpop.permute.xlu0 %465 }
  0x96   : > { %v731_v4 = vmul.f32 %v3953_v62, %v3969_v3  ;;  %v733_v5 = vmul.f32 %v3957_v63, %v3969_v3  ;;  %v730_v6 = vmul.f32 %v3961_v0, %v3969_v3  ;;  %v732_v7 = vmul.f32 %v3965_v1, %v3969_v3 }
  0x98   : > { %v1035_v8 = vadd.f32 %v3967_v2, %v731_v4  ;;  %v1037_v9 = vadd.f32 %v3967_v2, %v733_v5  ;;  %v1034_v10 = vadd.f32 %v3967_v2, %v730_v6  ;;  %v1036_v11 = vadd.f32 %v3967_v2, %v732_v7 }
  0x99   : > { %v3983_v12 = vpop.permute.xlu0 %460  ;;  %v3985_v13 = vpop.permute.xlu1 %455 }
  0x9a   : > { %5942 = vst [vmem:[#allocation11_spill] sm:$0xff] %v3983_v12  ;;  %v1243_v14 = vmax.f32 %v1035_v8, 0.0  ;;  %v1245_v15 = vmax.f32 %v1037_v9, 0.0  ;;  %v1242_v16 = vmax.f32 %v1034_v10, 0.0  ;;  %v1244_v17 = vmax.f32 %v1036_v11, 0.0 }
  0x9b   : > { %v718_v18 = vmul.f32 %v3953_v62, %v3983_v12  ;;  %v720_v19 = vmul.f32 %v3957_v63, %v3983_v12  ;;  %v717_v20 = vmul.f32 %v3961_v0, %v3983_v12  ;;  %v719_v21 = vmul.f32 %v3965_v1, %v3983_v12 }
  0x9c   : > { %1367 = vmatprep.subr.mxu0 %v1243_v14  ;;  %1528 = vmatprep.subr.mxu1 %v1245_v15  ;;  %v705_v28 = vmul.f32 %v3953_v62, %v3985_v13  ;;  %v707_v29 = vmul.f32 %v3957_v63, %v3985_v13  ;;  %v704_v30 = vmul.f32 %v3961_v0, %v3985_v13 }
  0x9d   : > { %v3995_v22 = vpop.permute.xlu0 %831  ;;  %v3997_v23 = vpop.permute.xlu1 %450  ;;  %1368 = vmatpush1.msra.mxu0 %v1242_v16  ;;  %1529 = vmatpush1.msra.mxu1 %v1244_v17  ;;  %v706_v37 = vmul.f32 %v3965_v1, %v3985_v13  ;;  %v5879_v17 = vsub.s32 5, %v3934_v56 }
  0x9e   : > { %5943 = vst [vmem:[#allocation12_spill] sm:$0xff] %v3995_v22  ;;  %5944 = vst [vmem:[#allocation13_spill] sm:$0xff] %v3997_v23  ;;  %v1022_v24 = vadd.f32 %v3995_v22, %v718_v18  ;;  %v1024_v25 = vadd.f32 %v3995_v22, %v720_v19  ;;  %v1021_v26 = vadd.f32 %v3995_v22, %v717_v20 }
  0x9f   : > { %v1023_v27 = vadd.f32 %v3995_v22, %v719_v21  ;;  %v692_v43 = vmul.f32 %v3953_v62, %v3997_v23  ;;  %v694_v44 = vmul.f32 %v3957_v63, %v3997_v23  ;;  %v691_v48 = vmul.f32 %v3961_v0, %v3997_v23 }
  0xa0   : > { %v1230_v31 = vmax.f32 %v1022_v24, 0.0  ;;  %v1232_v32 = vmax.f32 %v1024_v25, 0.0  ;;  %v1229_v33 = vmax.f32 %v1021_v26, 0.0  ;;  %v693_v52 = vmul.f32 %v3965_v1, %v3997_v23 }
  0xa1   : > { %v1231_v34 = vmax.f32 %v1023_v27, 0.0  ;;  %v4009_v35 = vpop.permute.xlu0 %826  ;;  %v4011_v36 = vpop.permute.xlu1 %445  ;;  %v5877_v26 = vsub.s32 7, %v3934_v56 }
  0xa2   : > { %5945 = vst [vmem:[#allocation14_spill] sm:$0xff] %v4009_v35  ;;  %1369 = vmatprep.subr.mxu0 %v1230_v31  ;;  %1530 = vmatprep.subr.mxu1 %v1232_v32  ;;  %v1009_v38 = vadd.f32 %v4009_v35, %v705_v28  ;;  %v1011_v40 = vadd.f32 %v4009_v35, %v707_v29 }
  0xa3   : > { %v1008_v41 = vadd.f32 %v4009_v35, %v704_v30  ;;  %1370 = vmatpush1.msra.mxu0 %v1229_v33  ;;  %1531 = vmatpush1.msra.mxu1 %v1231_v34  ;;  %v1010_v42 = vadd.f32 %v4009_v35, %v706_v37  ;;  %v679_v5 = vmul.f32 %v3953_v62, %v4011_v36 }
  0xa4   : > { %v1217_v45 = vmax.f32 %v1009_v38, 0.0  ;;  %v1219_v46 = vmax.f32 %v1011_v40, 0.0  ;;  %v681_v6 = vmul.f32 %v3957_v63, %v4011_v36  ;;  %v678_v10 = vmul.f32 %v3961_v0, %v4011_v36 }
  0xa5   : > { %v1216_v47 = vmax.f32 %v1008_v41, 0.0  ;;  %v4025_v49 = vpop.permute.xlu0 %821  ;;  %v4027_v50 = vpop.permute.xlu1 %440  ;;  %v1218_v51 = vmax.f32 %v1010_v42, 0.0  ;;  %v680_v16 = vmul.f32 %v3965_v1, %v4011_v36  ;;  %v4068_v37 = vrot.slane %v3949_v61, %v5879_v17 }
  0xa6   : > { %1371 = vmatprep.subr.mxu0 %v1217_v45  ;;  %1532 = vmatprep.subr.mxu1 %v1219_v46  ;;  %v996_v53 = vadd.f32 %v4025_v49, %v692_v43  ;;  %v998_v54 = vadd.f32 %v4025_v49, %v694_v44  ;;  %v995_v55 = vadd.f32 %v4025_v49, %v691_v48  ;;  %v4071_v38 = vsub.s32 4, %v3934_v56 }
  0xa7   : > { %1372 = vmatpush1.msra.mxu0 %v1216_v47  ;;  %1533 = vmatpush1.msra.mxu1 %v1218_v51  ;;  %v997_v4 = vadd.f32 %v4025_v49, %v693_v52  ;;  %v666_v24 = vmul.f32 %v3953_v62, %v4027_v50  ;;  %v668_v25 = vmul.f32 %v3957_v63, %v4027_v50  ;;  %v5878_v46 = vsub.s32 6, %v3934_v56 }
  0xa8   : > { %v1204_v7 = vmax.f32 %v996_v53, 0.0  ;;  %v1206_v8 = vmax.f32 %v998_v54, 0.0  ;;  %v1203_v9 = vmax.f32 %v995_v55, 0.0  ;;  %v665_v30 = vmul.f32 %v3961_v0, %v4027_v50  ;;  %5946 = vst [vmem:[#allocation15_spill] sm:$0xff] %v4071_v38 }
  0xa9   : > { %v4041_v11 = vpop.permute.xlu0 %816  ;;  %v4043_v14 = vpop.permute.xlu1 %435  ;;  %v1205_v15 = vmax.f32 %v997_v4, 0.0  ;;  %v667_v34 = vmul.f32 %v3965_v1, %v4027_v50 }
  0xaa   : > { %1373 = vmatprep.subr.mxu0 %v1204_v7  ;;  %1534 = vmatprep.subr.mxu1 %v1206_v8  ;;  %v983_v18 = vadd.f32 %v4041_v11, %v679_v5  ;;  %v985_v19 = vadd.f32 %v4041_v11, %v681_v6  ;;  %v982_v20 = vadd.f32 %v4041_v11, %v678_v10  ;;  %v4103_v10 = vld [vmem:[%s3780_s22 + $0x8] sm:$0x1f] }
  0xab   : > { %1374 = vmatpush1.msra.mxu0 %v1203_v9  ;;  %1535 = vmatpush1.msra.mxu1 %v1205_v15  ;;  %v984_v21 = vadd.f32 %v4041_v11, %v680_v16  ;;  %v653_v44 = vmul.f32 %v3953_v62, %v4043_v14  ;;  %v655_v45 = vmul.f32 %v3957_v63, %v4043_v14 }
  0xac   : > { %v1191_v27 = vmax.f32 %v983_v18, 0.0  ;;  %v1193_v28 = vmax.f32 %v985_v19, 0.0  ;;  %v1190_v29 = vmax.f32 %v982_v20, 0.0  ;;  %v652_v52 = vmul.f32 %v3961_v0, %v4043_v14  ;;  %5947 = vst [vmem:[#allocation16_spill] sm:$0xff] %v4103_v10 }
  0xad   : > { %v4059_v31 = vpop.permute.xlu0 %811  ;;  %v4061_v32 = vpop.permute.xlu1 %430  ;;  %v1192_v33 = vmax.f32 %v984_v21, 0.0  ;;  %v654_v4 = vmul.f32 %v3965_v1, %v4043_v14  ;;  %v4093_v5 = vrot.slane %v3949_v61, %v5877_v26  ;;  %v4097_v6 = vrot.slane %v3949_v61, %v4071_v38 }
  0xae   : > { %1375 = vmatprep.subr.mxu0 %v1191_v27  ;;  %1536 = vmatprep.subr.mxu1 %v1193_v28  ;;  %v970_v40 = vadd.f32 %v4059_v31, %v666_v24  ;;  %v972_v41 = vadd.f32 %v4059_v31, %v668_v25  ;;  %v969_v42 = vadd.f32 %v4059_v31, %v665_v30 }
  0xaf   : > { %1376 = vmatpush1.msra.mxu0 %v1190_v29  ;;  %1537 = vmatpush1.msra.mxu1 %v1192_v33  ;;  %v971_v43 = vadd.f32 %v4059_v31, %v667_v34  ;;  %v640_v16 = vmul.f32 %v3953_v62, %v4061_v32  ;;  %v642_v18 = vmul.f32 %v3957_v63, %v4061_v32 }
  0xb0   : > { %v1178_v47 = vmax.f32 %v970_v40, 0.0  ;;  %v1180_v48 = vmax.f32 %v972_v41, 0.0  ;;  %v1177_v51 = vmax.f32 %v969_v42, 0.0  ;;  %v639_v24 = vmul.f32 %v3961_v0, %v4061_v32 }
  0xb1   : > { %v4084_v53 = vpop.permute.xlu0 %806  ;;  %v4086_v54 = vpop.permute.xlu1 %425  ;;  %v1179_v55 = vmax.f32 %v971_v43, 0.0  ;;  %v641_v29 = vmul.f32 %v3965_v1, %v4061_v32  ;;  %v4121_v30 = vrot.slane %v3949_v61, %v5878_v46  ;;  %v4125_v33 = vrot.slane %v4103_v10, %v3937_v57 }
  0xb2   : > { %1377 = vmatprep.subr.mxu0 %v1178_v47  ;;  %1538 = vmatprep.subr.mxu1 %v1180_v48  ;;  %v957_v7 = vadd.f32 %v4084_v53, %v653_v44  ;;  %v959_v8 = vadd.f32 %v4084_v53, %v655_v45  ;;  %v956_v9 = vadd.f32 %v4084_v53, %v652_v52 }
  0xb3   : > { %1378 = vmatpush1.msra.mxu0 %v1177_v51  ;;  %1539 = vmatpush1.msra.mxu1 %v1179_v55  ;;  %v958_v15 = vadd.f32 %v4084_v53, %v654_v4  ;;  %v627_v61 = vmul.f32 %v3953_v62, %v4086_v54  ;;  %v629_v43 = vmul.f32 %v3957_v63, %v4086_v54 }
  0xb4   : > { %v1165_v19 = vmax.f32 %v957_v7, 0.0  ;;  %v1167_v20 = vmax.f32 %v959_v8, 0.0  ;;  %v1164_v21 = vmax.f32 %v956_v9, 0.0  ;;  %v626_v48 = vmul.f32 %v3961_v0, %v4086_v54 }
  0xb5   : > { %v4112_v25 = vpop.permute.xlu0 %801  ;;  %v4114_v27 = vpop.permute.xlu1 %420  ;;  %v1166_v28 = vmax.f32 %v958_v15, 0.0  ;;  %v628_v4 = vmul.f32 %v3965_v1, %v4086_v54  ;;  %v735_v7 = vmul.f32 %v4068_v37, %v3969_v3  ;;  %v4147_v8 = vrot.slane %v4103_v10, %v3940_v58 }
  0xb6   : > { %1379 = vmatprep.subr.mxu0 %v1165_v19  ;;  %1540 = vmatprep.subr.mxu1 %v1167_v20  ;;  %v944_v34 = vadd.f32 %v4112_v25, %v640_v16  ;;  %v946_v40 = vadd.f32 %v4112_v25, %v642_v18  ;;  %v943_v41 = vadd.f32 %v4112_v25, %v639_v24 }
  0xb7   : > { %1380 = vmatpush1.msra.mxu0 %v1164_v21  ;;  %1541 = vmatpush1.msra.mxu1 %v1166_v28  ;;  %v945_v42 = vadd.f32 %v4112_v25, %v641_v29  ;;  %v614_v19 = vmul.f32 %v3953_v62, %v4114_v27  ;;  %v616_v20 = vmul.f32 %v3957_v63, %v4114_v27 }
  0xb8   : > { %v1152_v44 = vmax.f32 %v944_v34, 0.0  ;;  %v1154_v45 = vmax.f32 %v946_v40, 0.0  ;;  %v1151_v47 = vmax.f32 %v943_v41, 0.0  ;;  %v613_v29 = vmul.f32 %v3961_v0, %v4114_v27 }
  0xb9   : > { %v4137_v51 = vpop.permute.xlu0 %796  ;;  %v4139_v52 = vpop.permute.xlu1 %415  ;;  %v1153_v55 = vmax.f32 %v945_v42, 0.0  ;;  %v615_v42 = vmul.f32 %v3965_v1, %v4114_v27 }
  0xba   : > { %1381 = vmatprep.subr.mxu0 %v1152_v44  ;;  %1542 = vmatprep.subr.mxu1 %v1154_v45  ;;  %v931_v9 = vadd.f32 %v4137_v51, %v627_v61  ;;  %v933_v15 = vadd.f32 %v4137_v51, %v629_v43  ;;  %v930_v16 = vadd.f32 %v4137_v51, %v626_v48 }
  0xbb   : > { %1382 = vmatpush1.msra.mxu0 %v1151_v47  ;;  %1543 = vmatpush1.msra.mxu1 %v1153_v55  ;;  %v932_v18 = vadd.f32 %v4137_v51, %v628_v4  ;;  %v737_v61 = vmul.f32 %v4093_v5, %v3969_v3  ;;  %v734_v43 = vmul.f32 %v4097_v6, %v3969_v3 }
  0xbc   : > { %v1139_v21 = vmax.f32 %v931_v9, 0.0  ;;  %v1141_v24 = vmax.f32 %v933_v15, 0.0  ;;  %v1138_v28 = vmax.f32 %v930_v16, 0.0  ;;  %v601_v55 = vmul.f32 %v3953_v62, %v4139_v52 }
  0xbd   : > { %v4159_v34 = vpop.permute.xlu0 %791  ;;  %v4161_v40 = vpop.permute.xlu1 %410  ;;  %v1140_v41 = vmax.f32 %v932_v18, 0.0  ;;  %v603_v4 = vmul.f32 %v3957_v63, %v4139_v52  ;;  %v600_v18 = vmul.f32 %v3961_v0, %v4139_v52 }
  0xbe   : > { %1383 = vmatprep.subr.mxu0 %v1139_v21  ;;  %1544 = vmatprep.subr.mxu1 %v1141_v24  ;;  %v918_v44 = vadd.f32 %v4159_v34, %v614_v19  ;;  %v920_v45 = vadd.f32 %v4159_v34, %v616_v20  ;;  %v917_v47 = vadd.f32 %v4159_v34, %v613_v29 }
  0xbf   : > { %1384 = vmatpush1.msra.mxu0 %v1138_v28  ;;  %1545 = vmatpush1.msra.mxu1 %v1140_v41  ;;  %v919_v48 = vadd.f32 %v4159_v34, %v615_v42  ;;  %v602_v24 = vmul.f32 %v3965_v1, %v4139_v52  ;;  %v4186_v28 = vadd.f32 %v3967_v2, %v735_v7 }
  0xc0   : > { %v1126_v9 = vmax.f32 %v918_v44, 0.0  ;;  %v1128_v15 = vmax.f32 %v920_v45, 0.0  ;;  %v1125_v16 = vmax.f32 %v917_v47, 0.0  ;;  %v736_v29 = vmul.f32 %v4121_v30, %v3969_v3 }
  0xc1   : > { %v4179_v19 = vpop.permute.xlu0 %786  ;;  %v4181_v20 = vpop.permute.xlu1 %405  ;;  %v1127_v21 = vmax.f32 %v919_v48, 0.0  ;;  %v588_v47 = vmul.f32 %v3953_v62, %v4161_v40  ;;  %v590_v7 = vmul.f32 %v3957_v63, %v4161_v40 }
  0xc2   : > { %5948 = vst [vmem:[#allocation17_spill] sm:$0xff] %v4181_v20  ;;  %1385 = vmatprep.subr.mxu0 %v1126_v9  ;;  %1546 = vmatprep.subr.mxu1 %v1128_v15  ;;  %v905_v41 = vadd.f32 %v4179_v19, %v601_v55  ;;  %v907_v42 = vadd.f32 %v4179_v19, %v603_v4 }
  0xc3   : > { %v904_v44 = vadd.f32 %v4179_v19, %v600_v18  ;;  %1386 = vmatpush1.msra.mxu0 %v1125_v16  ;;  %1547 = vmatpush1.msra.mxu1 %v1127_v21  ;;  %v906_v45 = vadd.f32 %v4179_v19, %v602_v24  ;;  %v587_v55 = vmul.f32 %v3961_v0, %v4161_v40 }
  0xc4   : > { %v1113_v48 = vmax.f32 %v905_v41, 0.0  ;;  %v1115_v26 = vmax.f32 %v907_v42, 0.0  ;;  %v589_v18 = vmul.f32 %v3965_v1, %v4161_v40  ;;  %v4207_v21 = vadd.f32 %v3967_v2, %v737_v61 }
  0xc5   : > { %v1112_v9 = vmax.f32 %v904_v44, 0.0  ;;  %v4200_v15 = vpop.permute.xlu0 %781  ;;  %v4202_v4 = vpop.permute.xlu1 %400  ;;  %v1114_v16 = vmax.f32 %v906_v45, 0.0  ;;  %v4210_v24 = vadd.f32 %v3967_v2, %v734_v43  ;;  %v575_v46 = vmul.f32 %v3953_v62, %v4181_v20 }
  0xc6   : > { %1387 = vmatprep.subr.mxu0 %v1113_v48  ;;  %1548 = vmatprep.subr.mxu1 %v1115_v26  ;;  %v892_v41 = vadd.f32 %v4200_v15, %v588_v47  ;;  %v894_v42 = vadd.f32 %v4200_v15, %v590_v7  ;;  %v891_v44 = vadd.f32 %v4200_v15, %v587_v55 }
  0xc7   : > { %1388 = vmatpush1.msra.mxu0 %v1112_v9  ;;  %1549 = vmatpush1.msra.mxu1 %v1114_v16  ;;  %v893_v45 = vadd.f32 %v4200_v15, %v589_v18  ;;  %v577_v61 = vmul.f32 %v3957_v63, %v4181_v20  ;;  %v574_v26 = vmul.f32 %v3961_v0, %v4181_v20 }
  0xc8   : > { %v1100_v43 = vmax.f32 %v892_v41, 0.0  ;;  %v1102_v17 = vmax.f32 %v894_v42, 0.0  ;;  %v1099_v48 = vmax.f32 %v891_v44, 0.0  ;;  %v576_v55 = vmul.f32 %v3965_v1, %v4181_v20 }
  0xc9   : > { %v4222_v47 = vpop.permute.xlu0 %776  ;;  %v4224_v7 = vpop.permute.xlu1 %395  ;;  %v1101_v9 = vmax.f32 %v893_v45, 0.0  ;;  %v4229_v16 = vadd.f32 %v3967_v2, %v736_v29  ;;  %v4233_v18 = vmul.f32 %v4068_v37, %v3983_v12  ;;  %v562_v29 = vmul.f32 %v3953_v62, %v4202_v4 }
  0xca   : > { %1389 = vmatprep.subr.mxu0 %v1100_v43  ;;  %1550 = vmatprep.subr.mxu1 %v1102_v17  ;;  %v879_v41 = vadd.f32 %v4222_v47, %v575_v46  ;;  %v881_v42 = vadd.f32 %v4222_v47, %v577_v61  ;;  %v878_v44 = vadd.f32 %v4222_v47, %v574_v26 }
  0xcb   : > { %1390 = vmatpush1.msra.mxu0 %v1099_v48  ;;  %1551 = vmatpush1.msra.mxu1 %v1101_v9  ;;  %v880_v45 = vadd.f32 %v4222_v47, %v576_v55  ;;  %v564_v39 = vmul.f32 %v3957_v63, %v4202_v4  ;;  %v561_v17 = vmul.f32 %v3961_v0, %v4202_v4 }
  0xcc   : > { %v1087_v56 = vmax.f32 %v879_v41, 0.0  ;;  %v1089_v58 = vmax.f32 %v881_v42, 0.0  ;;  %v1086_v43 = vmax.f32 %v878_v44, 0.0  ;;  %v563_v26 = vmul.f32 %v3965_v1, %v4202_v4 }
  0xcd   : > { %v4245_v46 = vpop.permute.xlu0 %771  ;;  %v4247_v61 = vpop.permute.xlu1 %390  ;;  %v1088_v48 = vmax.f32 %v880_v45, 0.0  ;;  %v549_v9 = vmul.f32 %v3953_v62, %v4224_v7  ;;  %v551_v55 = vmul.f32 %v3957_v63, %v4224_v7  ;;  %v548_v57 = vmul.f32 %v3961_v0, %v4224_v7 }
  0xce   : > { %1391 = vmatprep.subr.mxu0 %v1087_v56  ;;  %1552 = vmatprep.subr.mxu1 %v1089_v58  ;;  %v866_v41 = vadd.f32 %v4245_v46, %v562_v29  ;;  %v868_v42 = vadd.f32 %v4245_v46, %v564_v39  ;;  %v865_v44 = vadd.f32 %v4245_v46, %v561_v17 }
  0xcf   : > { %1392 = vmatpush1.msra.mxu0 %v1086_v43  ;;  %1553 = vmatpush1.msra.mxu1 %v1088_v48  ;;  %v867_v45 = vadd.f32 %v4245_v46, %v563_v26  ;;  %v550_v38 = vmul.f32 %v3965_v1, %v4224_v7  ;;  %v536_v58 = vmul.f32 %v3953_v62, %v4247_v61 }
  0xd0   : > { %v1074_v60 = vmax.f32 %v866_v41, 0.0  ;;  %v1076_v10 = vmax.f32 %v868_v42, 0.0  ;;  %v1073_v56 = vmax.f32 %v865_v44, 0.0  ;;  %v538_v17 = vmul.f32 %v3957_v63, %v4247_v61 }
  0xd1   : > { %v4265_v29 = vpop.permute.xlu0 %766  ;;  %v4267_v39 = vpop.permute.xlu1 %761  ;;  %v1075_v43 = vmax.f32 %v867_v45, 0.0  ;;  %v535_v48 = vmul.f32 %v3961_v0, %v4247_v61  ;;  %v537_v26 = vmul.f32 %v3965_v1, %v4247_v61  ;;  %v1247_v0 = vmax.f32 %v4186_v28, 0.0 }
  0xd2   : > { %1393 = vmatprep.subr.mxu0 %v1074_v60  ;;  %1554 = vmatprep.subr.mxu1 %v1076_v10  ;;  %v853_v41 = vadd.f32 %v4265_v29, %v549_v9  ;;  %v855_v62 = vadd.f32 %v4265_v29, %v551_v55  ;;  %v852_v42 = vadd.f32 %v4265_v29, %v548_v57  ;;  %v1249_v57 = vmax.f32 %v4207_v21, 0.0  ;;  %v4294_v21 = vld [vmem:[%s5870_s4] sm:$0xff] }
  0xd3   : > { %1394 = vmatpush1.msra.mxu0 %v1073_v56  ;;  %1555 = vmatpush1.msra.mxu1 %v1075_v43  ;;  %v854_v44 = vadd.f32 %v4265_v29, %v550_v38  ;;  %v840_v63 = vadd.f32 %v4267_v39, %v536_v58  ;;  %v842_v45 = vadd.f32 %v4267_v39, %v538_v17 }
  0xd4   : > { %v1061_v59 = vmax.f32 %v853_v41, 0.0  ;;  %v1063_v1 = vmax.f32 %v855_v62, 0.0  ;;  %v1060_v60 = vmax.f32 %v852_v42, 0.0  ;;  %v839_v10 = vadd.f32 %v4267_v39, %v535_v48 }
  0xd5   : > { %v1062_v9 = vmax.f32 %v854_v44, 0.0  ;;  %v841_v55 = vadd.f32 %v4267_v39, %v537_v26  ;;  %v724_v56 = vmul.f32 %v4093_v5, %v3983_v12  ;;  %v1048_v38 = vmax.f32 %v840_v63, 0.0 }
  0xd6   : > { %1395 = vmatprep.subr.mxu0 %v1061_v59  ;;  %1556 = vmatprep.subr.mxu1 %v1063_v1  ;;  %v1050_v58 = vmax.f32 %v842_v45, 0.0  ;;  %v1026_v28 = vadd.f32 %v3995_v22, %v4233_v18  ;;  %v721_v43 = vmul.f32 %v4097_v6, %v3983_v12  ;;  %v1047_v17 = vmax.f32 %v839_v10, 0.0 }
  0xd7   : > { %1396 = vmatpush1.msra.mxu0 %v1060_v60  ;;  %1557 = vmatpush1.msra.mxu1 %v1062_v9  ;;  %v1049_v48 = vmax.f32 %v841_v55, 0.0  ;;  %v1028_v59 = vadd.f32 %v3995_v22, %v724_v56  ;;  %v723_v26 = vmul.f32 %v4121_v30, %v3983_v12  ;;  %v1246_v18 = vmax.f32 %v4210_v24, 0.0 }
  0xd8   : > { %1397 = vmatprep.subr.mxu0 %v1048_v38  ;;  %1558 = vmatprep.subr.mxu1 %v1050_v58  ;;  %v1025_v41 = vadd.f32 %v3995_v22, %v721_v43  ;;  %v709_v62 = vmul.f32 %v4068_v37, %v3985_v13  ;;  %v711_v42 = vmul.f32 %v4093_v5, %v3985_v13  ;;  %v1248_v44 = vmax.f32 %v4229_v16, 0.0 }
  0xd9   : > { %1398 = vmatpush1.msra.mxu0 %v1047_v17  ;;  %1559 = vmatpush1.msra.mxu1 %v1049_v48  ;;  %v1027_v63 = vadd.f32 %v3995_v22, %v723_v26  ;;  %v708_v45 = vmul.f32 %v4097_v6, %v3985_v13  ;;  %v710_v24 = vmul.f32 %v4121_v30, %v3985_v13  ;;  %v1234_v1 = vmax.f32 %v1026_v28, 0.0  ;;  %v4329_v17 = vld [vmem:[%s5870_s4 + $0x8] sm:$0xff] }
  0xda   : > { %1432 = vmatmul.mubr.f32.vlgmr.msra.gmra.mxu0 %v4294_v21  ;;  %1593 = vmatmul.mubr.f32.vlgmr.msra.gmra.mxu1 %v4294_v21  ;;  %v1013_v60 = vadd.f32 %v4009_v35, %v709_v62  ;;  %v1015_v10 = vadd.f32 %v4009_v35, %v711_v42  ;;  %v696_v16 = vmul.f32 %v4068_v37, %v3997_v23  ;;  %v1236_v9 = vmax.f32 %v1028_v59, 0.0 }
  0xdb   : > { %1689 = vmatprep.subr.mxu0 %v1247_v0  ;;  %1850 = vmatprep.subr.mxu1 %v1249_v57  ;;  %v1012_v55 = vadd.f32 %v4009_v35, %v708_v45  ;;  %v1014_v56 = vadd.f32 %v4009_v35, %v710_v24  ;;  %v698_v38 = vmul.f32 %v4093_v5, %v3997_v23  ;;  %v1233_v58 = vmax.f32 %v1025_v41, 0.0 }
  0xdc   : > { %1690 = vmatpush1.msra.mxu0 %v1246_v18  ;;  %1851 = vmatpush1.msra.mxu1 %v1248_v44  ;;  %v1000_v28 = vadd.f32 %v4025_v49, %v696_v16  ;;  %v695_v43 = vmul.f32 %v4097_v6, %v3997_v23  ;;  %v697_v0 = vmul.f32 %v4121_v30, %v3997_v23  ;;  %v1235_v57 = vmax.f32 %v1027_v63, 0.0 }
  0xdd   : > { %1691 = vmatprep.subr.mxu0 %v1234_v1  ;;  %1852 = vmatprep.subr.mxu1 %v1236_v9  ;;  %v1002_v48 = vadd.f32 %v4025_v49, %v698_v38  ;;  %v683_v59 = vmul.f32 %v4068_v37, %v4011_v36  ;;  %v685_v26 = vmul.f32 %v4093_v5, %v4011_v36  ;;  %v5949_v18 = vmov 0.0  }
  0xde   : > { %1437 = vmatprep.mubr.f32.mxu0 %v5949_v18  ;;  %1598 = vmatprep.mubr.f32.mxu1 %v5949_v18  ;;  %v1221_v41 = vmax.f32 %v1013_v60, 0.0  ;;  %v999_v62 = vadd.f32 %v4025_v49, %v695_v43  ;;  %v1001_v42 = vadd.f32 %v4025_v49, %v697_v0  ;;  %v682_v44 = vmul.f32 %v4097_v6, %v4011_v36 }
  0xdf   : > { %1692 = vmatpush1.msra.mxu0 %v1233_v58  ;;  %1853 = vmatpush1.msra.mxu1 %v1235_v57  ;;  %v1223_v63 = vmax.f32 %v1015_v10, 0.0  ;;  %v987_v45 = vadd.f32 %v4041_v11, %v683_v59  ;;  %v989_v24 = vadd.f32 %v4041_v11, %v685_v26  ;;  %v684_v1 = vmul.f32 %v4121_v30, %v4011_v36 }
  0xe0   : > { %1438 = vmatmul.mubr.f32.gmra.mxu0 %v4329_v17  ;;  %1599 = vmatmul.mubr.f32.gmra.mxu1 %v4329_v17  ;;  %v1220_v60 = vmax.f32 %v1012_v55, 0.0  ;;  %v1222_v16 = vmax.f32 %v1014_v56, 0.0  ;;  %v986_v9 = vadd.f32 %v4041_v11, %v682_v44  ;;  %v670_v38 = vmul.f32 %v4068_v37, %v4027_v50 }
  0xe1   : > { %1693 = vmatprep.subr.mxu0 %v1221_v41  ;;  %1854 = vmatprep.subr.mxu1 %v1223_v63  ;;  %v1208_v10 = vmax.f32 %v1000_v28, 0.0  ;;  %v1210_v58 = vmax.f32 %v1002_v48, 0.0  ;;  %v988_v43 = vadd.f32 %v4041_v11, %v684_v1  ;;  %v672_v0 = vmul.f32 %v4093_v5, %v4027_v50  ;;  %v4360_v28 = vld [vmem:[%s5870_s4 + $0x10] sm:$0xff] }
  0xe2   : > { %1694 = vmatpush1.msra.mxu0 %v1220_v60  ;;  %1855 = vmatpush1.msra.mxu1 %v1222_v16  ;;  %v1207_v57 = vmax.f32 %v999_v62, 0.0  ;;  %v1209_v59 = vmax.f32 %v1001_v42, 0.0  ;;  %v974_v55 = vadd.f32 %v4059_v31, %v670_v38  ;;  %v669_v56 = vmul.f32 %v4097_v6, %v4027_v50 }
  0xe3   : > { %1695 = vmatprep.subr.mxu0 %v1208_v10  ;;  %1856 = vmatprep.subr.mxu1 %v1210_v58  ;;  %v1195_v48 = vmax.f32 %v987_v45, 0.0  ;;  %v1197_v26 = vmax.f32 %v989_v24, 0.0  ;;  %v976_v41 = vadd.f32 %v4059_v31, %v672_v0  ;;  %v671_v62 = vmul.f32 %v4121_v30, %v4027_v50 }
  0xe4   : > { %1443 = vmatprep.mubr.f32.mxu0 %v5949_v18  ;;  %1604 = vmatprep.mubr.f32.mxu1 %v5949_v18  ;;  %v1194_v42 = vmax.f32 %v986_v9, 0.0  ;;  %v973_v44 = vadd.f32 %v4059_v31, %v669_v56  ;;  %v657_v63 = vmul.f32 %v4068_v37, %v4043_v14  ;;  %v659_v1 = vmul.f32 %v4093_v5, %v4043_v14 }
  0xe5   : > { %1696 = vmatpush1.msra.mxu0 %v1207_v57  ;;  %1857 = vmatpush1.msra.mxu1 %v1209_v59  ;;  %v1196_v45 = vmax.f32 %v988_v43, 0.0  ;;  %v975_v24 = vadd.f32 %v4059_v31, %v671_v62  ;;  %v656_v60 = vmul.f32 %v4097_v6, %v4043_v14  ;;  %v658_v16 = vmul.f32 %v4121_v30, %v4043_v14 }
  0xe6   : > { %1444 = vmatmul.mubr.f32.gmra.mxu0 %v4360_v28  ;;  %1605 = vmatmul.mubr.f32.gmra.mxu1 %v4360_v28  ;;  %v1182_v9 = vmax.f32 %v974_v55, 0.0  ;;  %v961_v38 = vadd.f32 %v4084_v53, %v657_v63  ;;  %v963_v10 = vadd.f32 %v4084_v53, %v659_v1  ;;  %v644_v58 = vmul.f32 %v4068_v37, %v4061_v32 }
  0xe7   : > { %1697 = vmatprep.subr.mxu0 %v1195_v48  ;;  %1858 = vmatprep.subr.mxu1 %v1197_v26  ;;  %v1184_v43 = vmax.f32 %v976_v41, 0.0  ;;  %v960_v0 = vadd.f32 %v4084_v53, %v656_v60  ;;  %v962_v57 = vadd.f32 %v4084_v53, %v658_v16  ;;  %v646_v59 = vmul.f32 %v4093_v5, %v4061_v32  ;;  %v4395_v41 = vld [vmem:[%s5870_s4 + $0x18] sm:$0xff] }
  0xe8   : > { %1698 = vmatpush1.msra.mxu0 %v1194_v42  ;;  %1859 = vmatpush1.msra.mxu1 %v1196_v45  ;;  %v1181_v55 = vmax.f32 %v973_v44, 0.0  ;;  %v948_v56 = vadd.f32 %v4112_v25, %v644_v58  ;;  %v643_v62 = vmul.f32 %v4097_v6, %v4061_v32  ;;  %v645_v48 = vmul.f32 %v4121_v30, %v4061_v32 }
  0xe9   : > { %1699 = vmatprep.subr.mxu0 %v1182_v9  ;;  %1860 = vmatprep.subr.mxu1 %v1184_v43  ;;  %v1183_v26 = vmax.f32 %v975_v24, 0.0  ;;  %5950 = vst [vmem:[#allocation18_spill] sm:$0xff] %v4395_v41  ;;  %v950_v42 = vadd.f32 %v4112_v25, %v646_v59  ;;  %v631_v44 = vmul.f32 %v4068_v37, %v4086_v54  ;;  %v1169_v1 = vmax.f32 %v961_v38, 0.0 }
  0xea   : > { %v633_v63 = vmul.f32 %v4093_v5, %v4086_v54  ;;  %1449 = vmatprep.mubr.f32.mxu0 %v5949_v18  ;;  %1610 = vmatprep.mubr.f32.mxu1 %v5949_v18  ;;  %v947_v45 = vadd.f32 %v4112_v25, %v643_v62  ;;  %v949_v24 = vadd.f32 %v4112_v25, %v645_v48  ;;  %v1171_v16 = vmax.f32 %v963_v10, 0.0 }
  0xeb   : > { %v630_v60 = vmul.f32 %v4097_v6, %v4086_v54  ;;  %1700 = vmatpush1.msra.mxu0 %v1181_v55  ;;  %1861 = vmatpush1.msra.mxu1 %v1183_v26  ;;  %v935_v9 = vadd.f32 %v4137_v51, %v631_v44  ;;  %v632_v43 = vmul.f32 %v4121_v30, %v4086_v54  ;;  %v1168_v38 = vmax.f32 %v960_v0, 0.0 }
  0xec   : > { %v937_v58 = vadd.f32 %v4137_v51, %v633_v63  ;;  %1450 = vmatmul.mubr.f32.gmra.mxu0 %v4395_v41  ;;  %1611 = vmatmul.mubr.f32.gmra.mxu1 %v4395_v41  ;;  %v1170_v59 = vmax.f32 %v962_v57, 0.0  ;;  %v618_v55 = vmul.f32 %v4068_v37, %v4114_v27  ;;  %v1156_v10 = vmax.f32 %v948_v56, 0.0  ;;  %v4426_v56 = vld [vmem:[%s5870_s4 + $0x20] sm:$0xff] }
  0xed   : > { %v934_v62 = vadd.f32 %v4137_v51, %v630_v60  ;;  %1701 = vmatprep.subr.mxu0 %v1169_v1  ;;  %1862 = vmatprep.subr.mxu1 %v1171_v16  ;;  %v1158_v48 = vmax.f32 %v950_v42, 0.0  ;;  %v936_v26 = vadd.f32 %v4137_v51, %v632_v43  ;;  %v620_v44 = vmul.f32 %v4093_v5, %v4114_v27 }
  0xee   : > { %1702 = vmatpush1.msra.mxu0 %v1168_v38  ;;  %1863 = vmatpush1.msra.mxu1 %v1170_v59  ;;  %v1155_v63 = vmax.f32 %v947_v45, 0.0  ;;  %v1157_v41 = vmax.f32 %v949_v24, 0.0  ;;  %v922_v0 = vadd.f32 %v4159_v34, %v618_v55  ;;  %v617_v57 = vmul.f32 %v4097_v6, %v4114_v27 }
  0xef   : > { %1703 = vmatprep.subr.mxu0 %v1156_v10  ;;  %1864 = vmatprep.subr.mxu1 %v1158_v48  ;;  %v1143_v42 = vmax.f32 %v935_v9, 0.0  ;;  %v1145_v1 = vmax.f32 %v937_v58, 0.0  ;;  %v924_v60 = vadd.f32 %v4159_v34, %v620_v44  ;;  %v619_v45 = vmul.f32 %v4121_v30, %v4114_v27 }
  0xf0   : > { %1455 = vmatprep.mubr.f32.mxu0 %v5949_v18  ;;  %1616 = vmatprep.mubr.f32.mxu1 %v5949_v18  ;;  %v1142_v24 = vmax.f32 %v934_v62, 0.0  ;;  %v921_v16 = vadd.f32 %v4159_v34, %v617_v57  ;;  %v605_v43 = vmul.f32 %v4068_v37, %v4139_v52  ;;  %v607_v38 = vmul.f32 %v4093_v5, %v4139_v52 }
  0xf1   : > { %1704 = vmatpush1.msra.mxu0 %v1155_v63  ;;  %1865 = vmatpush1.msra.mxu1 %v1157_v41  ;;  %v1144_v9 = vmax.f32 %v936_v26, 0.0  ;;  %v923_v58 = vadd.f32 %v4159_v34, %v619_v45  ;;  %v604_v59 = vmul.f32 %v4097_v6, %v4139_v52  ;;  %v606_v55 = vmul.f32 %v4121_v30, %v4139_v52 }
  0xf2   : > { %1456 = vmatmul.mubr.f32.gmra.mxu0 %v4426_v56  ;;  %1617 = vmatmul.mubr.f32.gmra.mxu1 %v4426_v56  ;;  %v1130_v62 = vmax.f32 %v922_v0, 0.0  ;;  %v909_v10 = vadd.f32 %v4179_v19, %v605_v43  ;;  %v911_v48 = vadd.f32 %v4179_v19, %v607_v38  ;;  %v592_v41 = vmul.f32 %v4068_v37, %v4161_v40 }
  0xf3   : > { %1705 = vmatprep.subr.mxu0 %v1143_v42  ;;  %1866 = vmatprep.subr.mxu1 %v1145_v1  ;;  %v1132_v26 = vmax.f32 %v924_v60, 0.0  ;;  %v908_v44 = vadd.f32 %v4179_v19, %v604_v59  ;;  %v910_v63 = vadd.f32 %v4179_v19, %v606_v55  ;;  %v594_v57 = vmul.f32 %v4093_v5, %v4161_v40  ;;  %v4461_v60 = vld [vmem:[%s5870_s4 + $0x28] sm:$0xff] }
  0xf4   : > { %1706 = vmatpush1.msra.mxu0 %v1142_v24  ;;  %1867 = vmatpush1.msra.mxu1 %v1144_v9  ;;  %v1129_v0 = vmax.f32 %v921_v16, 0.0  ;;  %v896_v45 = vadd.f32 %v4200_v15, %v592_v41  ;;  %v591_v43 = vmul.f32 %v4097_v6, %v4161_v40  ;;  %v593_v42 = vmul.f32 %v4121_v30, %v4161_v40 }
  0xf5   : > { %1707 = vmatprep.subr.mxu0 %v1130_v62  ;;  %1868 = vmatprep.subr.mxu1 %v1132_v26  ;;  %v1131_v1 = vmax.f32 %v923_v58, 0.0  ;;  %v898_v24 = vadd.f32 %v4200_v15, %v594_v57  ;;  %v579_v16 = vmul.f32 %v4068_v37, %v4181_v20  ;;  %v581_v38 = vmul.f32 %v4093_v5, %v4181_v20 }
  0xf6   : > { %1461 = vmatprep.mubr.f32.mxu0 %v5949_v18  ;;  %1622 = vmatprep.mubr.f32.mxu1 %v5949_v18  ;;  %v1117_v9 = vmax.f32 %v909_v10, 0.0  ;;  %v895_v58 = vadd.f32 %v4200_v15, %v591_v43  ;;  %v897_v59 = vadd.f32 %v4200_v15, %v593_v42  ;;  %v578_v55 = vmul.f32 %v4097_v6, %v4181_v20 }
  0xf7   : > { %1708 = vmatpush1.msra.mxu0 %v1129_v0  ;;  %1869 = vmatpush1.msra.mxu1 %v1131_v1  ;;  %v1119_v62 = vmax.f32 %v911_v48, 0.0  ;;  %v883_v41 = vadd.f32 %v4222_v47, %v579_v16  ;;  %v885_v26 = vadd.f32 %v4222_v47, %v581_v38  ;;  %v580_v57 = vmul.f32 %v4121_v30, %v4181_v20 }
  0xf8   : > { %1462 = vmatmul.mubr.f32.gmra.mxu0 %v4461_v60  ;;  %1623 = vmatmul.mubr.f32.gmra.mxu1 %v4461_v60  ;;  %v1116_v10 = vmax.f32 %v908_v44, 0.0  ;;  %v1118_v43 = vmax.f32 %v910_v63, 0.0  ;;  %v882_v42 = vadd.f32 %v4222_v47, %v578_v55  ;;  %v566_v0 = vmul.f32 %v4068_v37, %v4202_v4 }
  0xf9   : > { %1709 = vmatprep.subr.mxu0 %v1117_v9  ;;  %1870 = vmatprep.subr.mxu1 %v1119_v62  ;;  %v1104_v48 = vmax.f32 %v896_v45, 0.0  ;;  %v1106_v1 = vmax.f32 %v898_v24, 0.0  ;;  %v884_v16 = vadd.f32 %v4222_v47, %v580_v57  ;;  %v568_v38 = vmul.f32 %v4093_v5, %v4202_v4  ;;  %v4494_v24 = vld [vmem:[%s5870_s4 + $0x30] sm:$0xff] }
  0xfa   : > { %1710 = vmatpush1.msra.mxu0 %v1116_v10  ;;  %1871 = vmatpush1.msra.mxu1 %v1118_v43  ;;  %v1103_v20 = vmax.f32 %v895_v58, 0.0  ;;  %v870_v44 = vadd.f32 %v4245_v46, %v566_v0  ;;  %v565_v63 = vmul.f32 %v4097_v6, %v4202_v4  ;;  %v567_v55 = vmul.f32 %v4121_v30, %v4202_v4 }
  0xfb   : > { %1711 = vmatprep.subr.mxu0 %v1104_v48  ;;  %1872 = vmatprep.subr.mxu1 %v1106_v1  ;;  %v1105_v45 = vmax.f32 %v897_v59, 0.0  ;;  %5951 = vst [vmem:[#allocation19_spill] sm:$0xff] %v4494_v24  ;;  %v1091_v9 = vmax.f32 %v883_v41, 0.0  ;;  %v1093_v62 = vmax.f32 %v885_v26, 0.0  ;;  %v872_v58 = vadd.f32 %v4245_v46, %v568_v38 }
  0xfc   : > { %1467 = vmatprep.mubr.f32.mxu0 %v5949_v18  ;;  %1628 = vmatprep.mubr.f32.mxu1 %v5949_v18  ;;  %v1090_v57 = vmax.f32 %v882_v42, 0.0  ;;  %v869_v10 = vadd.f32 %v4245_v46, %v565_v63  ;;  %v871_v43 = vadd.f32 %v4245_v46, %v567_v55  ;;  %v553_v59 = vmul.f32 %v4068_v37, %v4224_v7 }
  0xfd   : > { %1712 = vmatpush1.msra.mxu0 %v1103_v20  ;;  %1873 = vmatpush1.msra.mxu1 %v1105_v45  ;;  %v1092_v0 = vmax.f32 %v884_v16, 0.0  ;;  %v555_v41 = vmul.f32 %v4093_v5, %v4224_v7  ;;  %v552_v26 = vmul.f32 %v4097_v6, %v4224_v7  ;;  %v554_v48 = vmul.f32 %v4121_v30, %v4224_v7 }
  0xfe   : > { %1468 = vmatmul.mubr.f32.gmra.mxu0 %v4494_v24  ;;  %1629 = vmatmul.mubr.f32.gmra.mxu1 %v4494_v24  ;;  %v1078_v42 = vmax.f32 %v870_v44, 0.0  ;;  %v857_v1 = vadd.f32 %v4265_v29, %v553_v59  ;;  %v540_v20 = vmul.f32 %v4068_v37, %v4247_v61  ;;  %v542_v16 = vmul.f32 %v4093_v5, %v4247_v61 }
  0xff   : > { %1713 = vmatprep.subr.mxu0 %v1091_v9  ;;  %1874 = vmatprep.subr.mxu1 %v1093_v62  ;;  %v1080_v38 = vmax.f32 %v872_v58, 0.0  ;;  %v859_v63 = vadd.f32 %v4265_v29, %v555_v41  ;;  %v856_v55 = vadd.f32 %v4265_v29, %v552_v26  ;;  %v858_v45 = vadd.f32 %v4265_v29, %v554_v48  ;;  %v4526_v9 = vld [vmem:[%s5870_s4 + $0x38] sm:$0xff] }
 0x100   : > { %1714 = vmatpush1.msra.mxu0 %v1090_v57  ;;  %1875 = vmatpush1.msra.mxu1 %v1092_v0  ;;  %v1077_v44 = vmax.f32 %v869_v10, 0.0  ;;  %v844_v59 = vadd.f32 %v4267_v39, %v540_v20  ;;  %v846_v24 = vadd.f32 %v4267_v39, %v542_v16  ;;  %v539_v37 = vmul.f32 %v4097_v6, %v4247_v61 }
 0x101   : > { %1715 = vmatprep.subr.mxu0 %v1078_v42  ;;  %1876 = vmatprep.subr.mxu1 %v1080_v38  ;;  %v1079_v5 = vmax.f32 %v871_v43, 0.0  ;;  %v541_v62 = vmul.f32 %v4121_v30, %v4247_v61  ;;  %v739_v58 = vmul.f32 %v4125_v33, %v3969_v3  ;;  %v741_v57 = vmul.f32 %v4147_v8, %v3969_v3  ;;  %v4545_v38 = vld [vmem:[%s5870_s4 + $0x40] sm:$0xff] }
 0x102   : > { %1473 = vmatprep.mubr.f32.mxu0 %v5949_v18  ;;  %1634 = vmatprep.mubr.f32.mxu1 %v5949_v18  ;;  %v1065_v6 = vmax.f32 %v857_v1, 0.0  ;;  %v1067_v10 = vmax.f32 %v859_v63, 0.0  ;;  %v843_v43 = vadd.f32 %v4267_v39, %v539_v37  ;;  %v1064_v30 = vmax.f32 %v856_v55, 0.0  ;;  %v4554_v55 = vld [vmem:[%s5870_s4 + $0x48] sm:$0xff] }
 0x103   : > { %1716 = vmatpush1.msra.mxu0 %v1077_v44  ;;  %1877 = vmatpush1.msra.mxu1 %v1079_v5  ;;  %v845_v0 = vadd.f32 %v4267_v39, %v541_v62  ;;  %v1066_v41 = vmax.f32 %v858_v45, 0.0  ;;  %v1052_v26 = vmax.f32 %v844_v59, 0.0  ;;  %v1054_v48 = vmax.f32 %v846_v24, 0.0  ;;  %v4565_v45 = vld [vmem:[%s5870_s4 + $0x50] sm:$0xff]  ;;  %v4574_v44 = vld [vmem:[%s5870_s4 + $0x58] sm:$0xff]  ;;  %v4583_v59 = vld [vmem:[%s5870_s4 + $0x60] sm:$0xff] }
 0x104   : > { %1474 = vmatmul.mubr.f32.gmra.mxu0 %v4526_v9  ;;  %1635 = vmatmul.mubr.f32.gmra.mxu1 %v4526_v9  ;;  %v1043_v42 = vadd.f32 %v3967_v2, %v739_v58  ;;  %v1045_v20 = vadd.f32 %v3967_v2, %v741_v57  ;;  %v1051_v1 = vmax.f32 %v843_v43, 0.0  ;;  %v4592_v37 = vld [vmem:[%s5870_s4 + $0x68] sm:$0xff]  ;;  %v5952_v5 = vld [vmem:[#allocation9_spill] sm:$0xff]  ;;  %v5953_v62 = vld [vmem:[#allocation16_spill] sm:$0xff] }
 0x105   : > { %1717 = vmatprep.subr.mxu0 %v1065_v6  ;;  %1878 = vmatprep.subr.mxu1 %v1067_v10  ;;  %v1053_v16 = vmax.f32 %v845_v0, 0.0  ;;  %v4596_v58 = vrot.slane %v5953_v62, %v5952_v5  ;;  %v5954_v57 = vld [vmem:[#allocation10_spill] sm:$0xff]  ;;  %v4609_v10 = vld [vmem:[%s5870_s4 + $0x70] sm:$0xff] }
 0x106   : > { %1718 = vmatpush1.msra.mxu0 %v1064_v30  ;;  %1879 = vmatpush1.msra.mxu1 %v1066_v41  ;;  %v1251_v24 = vmax.f32 %v1043_v42, 0.0  ;;  %v1253_v63 = vmax.f32 %v1045_v20, 0.0  ;;  %v4600_v6 = vrot.slane %v5953_v62, %v5954_v57  ;;  %5955 = vst [vmem:[#allocation16_spill] sm:$0xff] %v4609_v10  ;;  %v726_v30 = vmul.f32 %v4125_v33, %v3983_v12  ;;  %v4624_v41 = vld [vmem:[%s5870_s4 + $0x78] sm:$0xff] }
 0x107   : > { %1719 = vmatprep.subr.mxu0 %v1052_v26  ;;  %1880 = vmatprep.subr.mxu1 %v1054_v48  ;;  %v738_v43 = vmul.f32 %v4596_v58, %v3969_v3  ;;  %5956 = vst [vmem:[#allocation20_spill] sm:$0xff] %v4624_v41  ;;  %v728_v48 = vmul.f32 %v4147_v8, %v3983_v12 }
 0x108   : > { %1479 = vmatprep.mubr.f32.mxu0 %v5949_v18  ;;  %1640 = vmatprep.mubr.f32.mxu1 %v5949_v18  ;;  %v740_v0 = vmul.f32 %v4600_v6, %v3969_v3  ;;  %v1030_v20 = vadd.f32 %v3995_v22, %v726_v30  ;;  %v713_v62 = vmul.f32 %v4125_v33, %v3985_v13 }
 0x109   : > { %1720 = vmatpush1.msra.mxu0 %v1051_v1  ;;  %1881 = vmatpush1.msra.mxu1 %v1053_v16  ;;  %v1042_v26 = vadd.f32 %v3967_v2, %v738_v43  ;;  %v725_v1 = vmul.f32 %v4596_v58, %v3983_v12  ;;  %v1032_v16 = vadd.f32 %v3995_v22, %v728_v48 }
 0x10a   : > { %1480 = vmatmul.mubr.f32.gmra.mxu0 %v4545_v38  ;;  %1641 = vmatmul.mubr.f32.gmra.mxu1 %v4545_v38  ;;  %v1044_v42 = vadd.f32 %v3967_v2, %v740_v0  ;;  %v715_v30 = vmul.f32 %v4147_v8, %v3985_v13  ;;  %v712_v48 = vmul.f32 %v4596_v58, %v3985_v13  ;;  %v1238_v5 = vmax.f32 %v1030_v20, 0.0 }
 0x10b   : > { %2011 = vmatprep.subr.mxu0 %v1251_v24  ;;  %2172 = vmatprep.subr.mxu1 %v1253_v63  ;;  %v727_v24 = vmul.f32 %v4600_v6, %v3983_v12  ;;  %v1029_v63 = vadd.f32 %v3995_v22, %v725_v1  ;;  %v1250_v43 = vmax.f32 %v1042_v26, 0.0  ;;  %v1017_v1 = vadd.f32 %v4009_v35, %v713_v62 }
 0x10c   : > { %1485 = vmatprep.mubr.f32.mxu0 %v5949_v18  ;;  %1646 = vmatprep.mubr.f32.mxu1 %v5949_v18  ;;  %v1252_v57 = vmax.f32 %v1044_v42, 0.0  ;;  %v1240_v12 = vmax.f32 %v1032_v16, 0.0  ;;  %v1016_v26 = vadd.f32 %v4009_v35, %v712_v48  ;;  %v702_v20 = vmul.f32 %v4147_v8, %v3997_v23 }
 0x10d   : > { %v1031_v0 = vadd.f32 %v3995_v22, %v727_v24  ;;  %v700_v24 = vmul.f32 %v4125_v33, %v3997_v23  ;;  %v1237_v22 = vmax.f32 %v1029_v63, 0.0  ;;  %v699_v16 = vmul.f32 %v4596_v58, %v3997_v23 }
 0x10e   : > { %1486 = vmatmul.mubr.f32.gmra.mxu0 %v4554_v55  ;;  %1647 = vmatmul.mubr.f32.gmra.mxu1 %v4554_v55  ;;  %v701_v48 = vmul.f32 %v4600_v6, %v3997_v23  ;;  %v1006_v63 = vadd.f32 %v4025_v49, %v702_v20  ;;  %v686_v23 = vmul.f32 %v4596_v58, %v4011_v36 }
 0x10f   : > { %1491 = vmatprep.mubr.f32.mxu0 %v5949_v18  ;;  %1652 = vmatprep.mubr.f32.mxu1 %v5949_v18  ;;  %v1239_v62 = vmax.f32 %v1031_v0, 0.0 }
 0x110   : > { %v1005_v0 = vadd.f32 %v4025_v49, %v701_v48 }
 0x112   : > { %1492 = vmatmul.mubr.f32.gmra.mxu0 %v4565_v45  ;;  %1653 = vmatmul.mubr.f32.gmra.mxu1 %v4565_v45 }
 0x113   : > { %1497 = vmatprep.mubr.f32.mxu0 %v5949_v18  ;;  %1658 = vmatprep.mubr.f32.mxu1 %v5949_v18 }
 0x116   : > { %1498 = vmatmul.mubr.f32.gmra.mxu0 %v4574_v44  ;;  %1659 = vmatmul.mubr.f32.gmra.mxu1 %v4574_v44 }
 0x117   : > { %1503 = vmatprep.mubr.f32.mxu0 %v5949_v18  ;;  %1664 = vmatprep.mubr.f32.mxu1 %v5949_v18 }
 0x11a   : > { %1504 = vmatmul.mubr.f32.gmra.mxu0 %v4583_v59  ;;  %1665 = vmatmul.mubr.f32.gmra.mxu1 %v4583_v59 }
 0x11b   : > { %1509 = vmatprep.mubr.f32.mxu0 %v5949_v18  ;;  %1670 = vmatprep.mubr.f32.mxu1 %v5949_v18 }
 0x11e   : > { %1510 = vmatmul.mubr.f32.gmra.mxu0 %v4592_v37  ;;  %1671 = vmatmul.mubr.f32.gmra.mxu1 %v4592_v37 }
 0x11f   : > { %1515 = vmatprep.mubr.f32.mxu0 %v5949_v18  ;;  %1676 = vmatprep.mubr.f32.mxu1 %v5949_v18 }
 0x122   : > { %1516 = vmatmul.mubr.f32.gmra.mxu0 %v4609_v10  ;;  %1677 = vmatmul.mubr.f32.gmra.mxu1 %v4609_v10  ;;  %v1019_v10 = vadd.f32 %v4009_v35, %v715_v30  ;;  %v1004_v30 = vadd.f32 %v4025_v49, %v700_v24 }
 0x123   : > { %1521 = vmatprep.mubr.f32.mxu0 %v5949_v18  ;;  %1682 = vmatprep.mubr.f32.mxu1 %v5949_v18 }
 0x124   : > { %v1212_v20 = vmax.f32 %v1004_v30, 0.0  ;;  %v1213_v30 = vmax.f32 %v1005_v0, 0.0  ;;  %v663_v0 = vmul.f32 %v4147_v8, %v4043_v14 }
 0x126   : > { %1522 = vmatmul.mubr.f32.gmra.mxu0 %v4624_v41  ;;  %1683 = vmatmul.mubr.f32.gmra.mxu1 %v4624_v41  ;;  %v714_v41 = vmul.f32 %v4600_v6, %v3985_v13 }
 0x127   : > { %1753 = vmatprep.mubr.f32.mxu0 %v5949_v18  ;;  %1914 = vmatprep.mubr.f32.mxu1 %v5949_v18 }
 0x128   : > { %v1018_v42 = vadd.f32 %v4009_v35, %v714_v41  ;;  %v1225_v41 = vmax.f32 %v1017_v1, 0.0  ;;  %v1003_v35 = vadd.f32 %v4025_v49, %v699_v16  ;;  %v688_v1 = vmul.f32 %v4600_v6, %v4011_v36 }
 0x129   : > { %v990_v16 = vadd.f32 %v4041_v11, %v686_v23 }
 0x12a   : > { %1754 = vmatmul.mubr.f32.vlgmr.msra.gmra.mxu0 %v4294_v21  ;;  %1915 = vmatmul.mubr.f32.vlgmr.msra.gmra.mxu1 %v4294_v21  ;;  %v687_v21 = vmul.f32 %v4125_v33, %v4011_v36  ;;  %v992_v48 = vadd.f32 %v4041_v11, %v688_v1  ;;  %v661_v1 = vmul.f32 %v4125_v33, %v4043_v14 }
 0x12b   : > { %2012 = vmatpush1.msra.mxu0 %v1250_v43  ;;  %2173 = vmatpush1.msra.mxu1 %v1252_v57  ;;  %v689_v43 = vmul.f32 %v4147_v8, %v4011_v36  ;;  %v1227_v57 = vmax.f32 %v1019_v10, 0.0  ;;  %v1226_v10 = vmax.f32 %v1018_v42, 0.0  ;;  %v1211_v42 = vmax.f32 %v1003_v35, 0.0 }
 0x12c   : > { %2013 = vmatprep.subr.mxu0 %v1238_v5  ;;  %2174 = vmatprep.subr.mxu1 %v1240_v12  ;;  %v991_v24 = vadd.f32 %v4041_v11, %v687_v21  ;;  %v1224_v12 = vmax.f32 %v1016_v26, 0.0  ;;  %v1214_v26 = vmax.f32 %v1006_v63, 0.0 }
 0x12d   : > { %2014 = vmatpush1.msra.mxu0 %v1237_v22  ;;  %2175 = vmatpush1.msra.mxu1 %v1239_v62  ;;  %v993_v5 = vadd.f32 %v4041_v11, %v689_v43  ;;  %v674_v22 = vmul.f32 %v4125_v33, %v4027_v50  ;;  %v676_v62 = vmul.f32 %v4147_v8, %v4027_v50 }
 0x12e   : > { %1759 = vmatprep.mubr.f32.mxu0 %v5949_v18  ;;  %1920 = vmatprep.mubr.f32.mxu1 %v5949_v18  ;;  %v675_v43 = vmul.f32 %v4600_v6, %v4027_v50 }
 0x12f   : > { %2015 = vmatprep.subr.mxu0 %v1225_v41  ;;  %2176 = vmatprep.subr.mxu1 %v1227_v57  ;;  %v978_v21 = vadd.f32 %v4059_v31, %v674_v22  ;;  %v673_v41 = vmul.f32 %v4596_v58, %v4027_v50  ;;  %v980_v23 = vadd.f32 %v4059_v31, %v676_v62  ;;  %v1201_v63 = vmax.f32 %v993_v5, 0.0 }
 0x130   : > { %1760 = vmatmul.mubr.f32.gmra.mxu0 %v4329_v17  ;;  %1921 = vmatmul.mubr.f32.gmra.mxu1 %v4329_v17  ;;  %v1199_v17 = vmax.f32 %v991_v24, 0.0  ;;  %v979_v35 = vadd.f32 %v4059_v31, %v675_v43  ;;  %v660_v22 = vmul.f32 %v4596_v58, %v4043_v14  ;;  %v1200_v24 = vmax.f32 %v992_v48, 0.0 }
 0x131   : > { %2016 = vmatpush1.msra.mxu0 %v1224_v12  ;;  %2177 = vmatpush1.msra.mxu1 %v1226_v10  ;;  %v977_v57 = vadd.f32 %v4059_v31, %v673_v41  ;;  %v1198_v12 = vmax.f32 %v990_v16, 0.0  ;;  %v1186_v5 = vmax.f32 %v978_v21, 0.0  ;;  %v965_v10 = vadd.f32 %v4084_v53, %v661_v1 }
 0x132   : > { %2017 = vmatprep.subr.mxu0 %v1212_v20  ;;  %2178 = vmatprep.subr.mxu1 %v1214_v26  ;;  %v662_v20 = vmul.f32 %v4600_v6, %v4043_v14  ;;  %v1188_v16 = vmax.f32 %v980_v23, 0.0  ;;  %v967_v62 = vadd.f32 %v4084_v53, %v663_v0  ;;  %v964_v26 = vadd.f32 %v4084_v53, %v660_v22 }
 0x133   : > { %2018 = vmatpush1.msra.mxu0 %v1211_v42  ;;  %2179 = vmatpush1.msra.mxu1 %v1213_v30  ;;  %v648_v41 = vmul.f32 %v4125_v33, %v4061_v32  ;;  %v1185_v48 = vmax.f32 %v977_v57, 0.0  ;;  %v650_v42 = vmul.f32 %v4147_v8, %v4061_v32  ;;  %v647_v30 = vmul.f32 %v4596_v58, %v4061_v32 }
 0x134   : > { %1765 = vmatprep.mubr.f32.mxu0 %v5949_v18  ;;  %1926 = vmatprep.mubr.f32.mxu1 %v5949_v18  ;;  %v966_v21 = vadd.f32 %v4084_v53, %v662_v20  ;;  %v1187_v23 = vmax.f32 %v979_v35, 0.0  ;;  %v1175_v35 = vmax.f32 %v967_v62, 0.0  ;;  %v636_v20 = vmul.f32 %v4600_v6, %v4086_v54 }
 0x135   : > { %2019 = vmatprep.subr.mxu0 %v1199_v17  ;;  %2180 = vmatprep.subr.mxu1 %v1201_v63  ;;  %v952_v43 = vadd.f32 %v4112_v25, %v648_v41  ;;  %v649_v17 = vmul.f32 %v4600_v6, %v4061_v32  ;;  %v1173_v63 = vmax.f32 %v965_v10, 0.0  ;;  %v954_v57 = vadd.f32 %v4112_v25, %v650_v42 }
 0x136   : > { %1766 = vmatmul.mubr.f32.gmra.mxu0 %v4360_v28  ;;  %1927 = vmatmul.mubr.f32.gmra.mxu1 %v4360_v28  ;;  %v635_v28 = vmul.f32 %v4125_v33, %v4086_v54  ;;  %v951_v1 = vadd.f32 %v4112_v25, %v647_v30  ;;  %v1174_v62 = vmax.f32 %v966_v21, 0.0  ;;  %v624_v42 = vmul.f32 %v4147_v8, %v4114_v27  ;;  %v5957_v30 = vld [vmem:[#allocation18_spill] sm:$0xff] }
 0x137   : > { %2020 = vmatpush1.msra.mxu0 %v1198_v12  ;;  %2181 = vmatpush1.msra.mxu1 %v1200_v24  ;;  %v637_v12 = vmul.f32 %v4147_v8, %v4086_v54  ;;  %v953_v0 = vadd.f32 %v4112_v25, %v649_v17  ;;  %v634_v24 = vmul.f32 %v4596_v58, %v4086_v54  ;;  %v1160_v41 = vmax.f32 %v952_v43, 0.0 }
 0x138   : > { %2021 = vmatprep.subr.mxu0 %v1186_v5  ;;  %2182 = vmatprep.subr.mxu1 %v1188_v16  ;;  %v939_v22 = vadd.f32 %v4137_v51, %v635_v28  ;;  %v1172_v5 = vmax.f32 %v964_v26, 0.0  ;;  %v622_v16 = vmul.f32 %v4125_v33, %v4114_v27  ;;  %v1162_v26 = vmax.f32 %v954_v57, 0.0 }
 0x139   : > { %2022 = vmatpush1.msra.mxu0 %v1185_v48  ;;  %2183 = vmatpush1.msra.mxu1 %v1187_v23  ;;  %v941_v10 = vadd.f32 %v4137_v51, %v637_v12  ;;  %v938_v48 = vadd.f32 %v4137_v51, %v634_v24  ;;  %v940_v23 = vadd.f32 %v4137_v51, %v636_v20  ;;  %v1159_v21 = vmax.f32 %v951_v1, 0.0 }
 0x13a   : > { %1771 = vmatprep.mubr.f32.mxu0 %v5949_v18  ;;  %1932 = vmatprep.mubr.f32.mxu1 %v5949_v18  ;;  %v926_v17 = vadd.f32 %v4159_v34, %v622_v16  ;;  %v621_v28 = vmul.f32 %v4596_v58, %v4114_v27  ;;  %v1161_v43 = vmax.f32 %v953_v0, 0.0  ;;  %v623_v12 = vmul.f32 %v4600_v6, %v4114_v27 }
 0x13b   : > { %2023 = vmatprep.subr.mxu0 %v1173_v63  ;;  %2184 = vmatprep.subr.mxu1 %v1175_v35  ;;  %v928_v63 = vadd.f32 %v4159_v34, %v624_v42  ;;  %v1147_v35 = vmax.f32 %v939_v22, 0.0  ;;  %v1149_v57 = vmax.f32 %v941_v10, 0.0  ;;  %v609_v20 = vmul.f32 %v4125_v33, %v4139_v52 }
 0x13c   : > { %1772 = vmatmul.mubr.f32.gmra.mxu0 %v5957_v30  ;;  %1933 = vmatmul.mubr.f32.gmra.mxu1 %v5957_v30  ;;  %v925_v24 = vadd.f32 %v4159_v34, %v621_v28  ;;  %v927_v1 = vadd.f32 %v4159_v34, %v623_v12  ;;  %v611_v0 = vmul.f32 %v4147_v8, %v4139_v52  ;;  %v1148_v22 = vmax.f32 %v940_v23, 0.0 }
 0x13d   : > { %2024 = vmatpush1.msra.mxu0 %v1172_v5  ;;  %2185 = vmatpush1.msra.mxu1 %v1174_v62  ;;  %v1146_v5 = vmax.f32 %v938_v48, 0.0  ;;  %v608_v16 = vmul.f32 %v4596_v58, %v4139_v52  ;;  %v1134_v10 = vmax.f32 %v926_v17, 0.0  ;;  %v913_v62 = vadd.f32 %v4179_v19, %v609_v20 }
 0x13e   : > { %2025 = vmatprep.subr.mxu0 %v1160_v41  ;;  %2186 = vmatprep.subr.mxu1 %v1162_v26  ;;  %v610_v41 = vmul.f32 %v4600_v6, %v4139_v52  ;;  %v1136_v48 = vmax.f32 %v928_v63, 0.0  ;;  %v915_v42 = vadd.f32 %v4179_v19, %v611_v0  ;;  %v596_v26 = vmul.f32 %v4125_v33, %v4161_v40 }
 0x13f   : > { %2026 = vmatpush1.msra.mxu0 %v1159_v21  ;;  %2187 = vmatpush1.msra.mxu1 %v1161_v43  ;;  %v912_v30 = vadd.f32 %v4179_v19, %v608_v16  ;;  %v1133_v23 = vmax.f32 %v925_v24, 0.0  ;;  %v598_v28 = vmul.f32 %v4147_v8, %v4161_v40  ;;  %v595_v21 = vmul.f32 %v4596_v58, %v4161_v40 }
 0x140   : > { %1777 = vmatprep.mubr.f32.mxu0 %v5949_v18  ;;  %1938 = vmatprep.mubr.f32.mxu1 %v5949_v18  ;;  %v914_v17 = vadd.f32 %v4179_v19, %v610_v41  ;;  %v1135_v43 = vmax.f32 %v927_v1, 0.0  ;;  %v900_v63 = vadd.f32 %v4200_v15, %v596_v26  ;;  %v597_v12 = vmul.f32 %v4600_v6, %v4161_v40 }
 0x141   : > { %2027 = vmatprep.subr.mxu0 %v1147_v35  ;;  %2188 = vmatprep.subr.mxu1 %v1149_v57  ;;  %v5958_v35 = vld [vmem:[#allocation17_spill] sm:$0xff]  ;;  %v1121_v57 = vmax.f32 %v913_v62, 0.0  ;;  %v902_v24 = vadd.f32 %v4200_v15, %v598_v28  ;;  %v899_v20 = vadd.f32 %v4200_v15, %v595_v21  ;;  %v1123_v1 = vmax.f32 %v915_v42, 0.0 }
 0x142   : > { %1778 = vmatmul.mubr.f32.gmra.mxu0 %v4426_v56  ;;  %1939 = vmatmul.mubr.f32.gmra.mxu1 %v4426_v56  ;;  %v583_v56 = vmul.f32 %v4125_v33, %v5958_v35  ;;  %v901_v0 = vadd.f32 %v4200_v15, %v597_v12  ;;  %v584_v41 = vmul.f32 %v4600_v6, %v5958_v35  ;;  %v1122_v42 = vmax.f32 %v914_v17, 0.0 }
 0x143   : > { %2028 = vmatpush1.msra.mxu0 %v1146_v5  ;;  %2189 = vmatpush1.msra.mxu1 %v1148_v22  ;;  %v585_v5 = vmul.f32 %v4147_v8, %v5958_v35  ;;  %v582_v22 = vmul.f32 %v4596_v58, %v5958_v35  ;;  %v1108_v26 = vmax.f32 %v900_v63, 0.0  ;;  %v572_v28 = vmul.f32 %v4147_v8, %v4202_v4 }
 0x144   : > { %2029 = vmatprep.subr.mxu0 %v1134_v10  ;;  %2190 = vmatprep.subr.mxu1 %v1136_v48  ;;  %v887_v16 = vadd.f32 %v4222_v47, %v583_v56  ;;  %v1120_v10 = vmax.f32 %v912_v30, 0.0  ;;  %v570_v48 = vmul.f32 %v4125_v33, %v4202_v4  ;;  %v1110_v30 = vmax.f32 %v902_v24, 0.0 }
 0x145   : > { %2030 = vmatpush1.msra.mxu0 %v1133_v23  ;;  %2191 = vmatpush1.msra.mxu1 %v1135_v43  ;;  %v889_v62 = vadd.f32 %v4222_v47, %v585_v5  ;;  %v886_v23 = vadd.f32 %v4222_v47, %v582_v22  ;;  %v888_v21 = vadd.f32 %v4222_v47, %v584_v41  ;;  %v1107_v17 = vmax.f32 %v899_v20, 0.0  ;;  %v5959_v22 = vld [vmem:[#allocation15_spill] sm:$0xff] }
 0x146   : > { %1783 = vmatprep.mubr.f32.mxu0 %v5949_v18  ;;  %1944 = vmatprep.mubr.f32.mxu1 %v5949_v18  ;;  %v874_v43 = vadd.f32 %v4245_v46, %v570_v48  ;;  %v569_v12 = vmul.f32 %v4596_v58, %v4202_v4  ;;  %v1109_v63 = vmax.f32 %v901_v0, 0.0  ;;  %v876_v56 = vadd.f32 %v4245_v46, %v572_v28 }
 0x147   : > { %2031 = vmatprep.subr.mxu0 %v1121_v57  ;;  %2192 = vmatprep.subr.mxu1 %v1123_v1  ;;  %v571_v57 = vmul.f32 %v4600_v6, %v4202_v4  ;;  %v1097_v24 = vmax.f32 %v889_v62, 0.0  ;;  %v3664_v1 = vld [vmem:[%s3780_s22 + $0x8] sm:$0x1f]  ;;  %v557_v0 = vmul.f32 %v4125_v33, %v4224_v7  ;;  %v559_v48 = vmul.f32 %v4147_v8, %v4224_v7 }
 0x148   : > { %1784 = vmatmul.mubr.f32.gmra.mxu0 %v4461_v60  ;;  %1945 = vmatmul.mubr.f32.gmra.mxu1 %v4461_v60  ;;  %v1095_v60 = vmax.f32 %v887_v16, 0.0  ;;  %v873_v5 = vadd.f32 %v4245_v46, %v569_v12  ;;  %v4809_v41 = vrot.slane %v3664_v1, %v5959_v22  ;;  %v1096_v16 = vmax.f32 %v888_v21, 0.0 }
 0x149   : > { %2032 = vmatpush1.msra.mxu0 %v1120_v10  ;;  %2193 = vmatpush1.msra.mxu1 %v1122_v42  ;;  %v1094_v10 = vmax.f32 %v886_v23, 0.0  ;;  %v875_v20 = vadd.f32 %v4245_v46, %v571_v57  ;;  %v1082_v62 = vmax.f32 %v874_v43, 0.0  ;;  %v556_v42 = vmul.f32 %v4596_v58, %v4224_v7 }
 0x14a   : > { %2033 = vmatprep.subr.mxu0 %v1108_v26  ;;  %2194 = vmatprep.subr.mxu1 %v1110_v30  ;;  %v558_v26 = vmul.f32 %v4600_v6, %v4224_v7  ;;  %v1084_v23 = vmax.f32 %v876_v56, 0.0  ;;  %v861_v28 = vadd.f32 %v4265_v29, %v557_v0  ;;  %v863_v30 = vadd.f32 %v4265_v29, %v559_v48 }
 0x14b   : > { %2034 = vmatpush1.msra.mxu0 %v1107_v17  ;;  %2195 = vmatpush1.msra.mxu1 %v1109_v63  ;;  %v544_v12 = vmul.f32 %v4125_v33, %v4247_v61  ;;  %v5960_v17 = vld [vmem:[#allocation19_spill] sm:$0xff]  ;;  %v1081_v21 = vmax.f32 %v873_v5, 0.0  ;;  %v860_v43 = vadd.f32 %v4265_v29, %v556_v42  ;;  %v546_v57 = vmul.f32 %v4147_v8, %v4247_v61 }
 0x14c   : > { %1789 = vmatprep.mubr.f32.mxu0 %v5949_v18  ;;  %1950 = vmatprep.mubr.f32.mxu1 %v5949_v18  ;;  %v862_v63 = vadd.f32 %v4265_v29, %v558_v26  ;;  %v1083_v56 = vmax.f32 %v875_v20, 0.0  ;;  %v545_v33 = vmul.f32 %v4600_v6, %v4247_v61  ;;  %v1069_v8 = vmax.f32 %v861_v28, 0.0 }
 0x14d   : > { %2035 = vmatprep.subr.mxu0 %v1095_v60  ;;  %2196 = vmatprep.subr.mxu1 %v1097_v24  ;;  %v543_v60 = vmul.f32 %v4596_v58, %v4247_v61  ;;  %v742_v24 = vmul.f32 %v4809_v41, %v3969_v3  ;;  %v848_v5 = vadd.f32 %v4267_v39, %v544_v12  ;;  %v1068_v3 = vmax.f32 %v860_v43, 0.0  ;;  %v5964_v12 = vld [vmem:[#allocation12_spill] sm:$0xff]  ;;  %v5965_v43 = vld [vmem:[#allocation14_spill] sm:$0xff] }
 0x14e   : > { %1790 = vmatmul.mubr.f32.gmra.mxu0 %v5960_v17  ;;  %1951 = vmatmul.mubr.f32.gmra.mxu1 %v5960_v17  ;;  %v850_v1 = vadd.f32 %v4267_v39, %v546_v57  ;;  %v849_v58 = vadd.f32 %v4267_v39, %v545_v33  ;;  %v1070_v6 = vmax.f32 %v862_v63, 0.0  ;;  %v5966_v57 = vld [vmem:[#allocation13_spill] sm:$0xff] }
 0x14f   : > { %2036 = vmatpush1.msra.mxu0 %v1094_v10  ;;  %2197 = vmatpush1.msra.mxu1 %v1096_v16  ;;  %v1071_v10 = vmax.f32 %v863_v30, 0.0  ;;  %v847_v20 = vadd.f32 %v4267_v39, %v543_v60  ;;  %v1046_v0 = vadd.f32 %v3967_v2, %v742_v24  ;;  %v1056_v48 = vmax.f32 %v848_v5, 0.0  ;;  %v5961_v2 = vld [vmem:[#allocation16_spill] sm:$0xff]  ;;  %v4892_v60 = vld [vmem:[%s5870_s4] sm:$0xff] }
 0x150   : > { %2037 = vmatprep.subr.mxu0 %v1082_v62  ;;  %2198 = vmatprep.subr.mxu1 %v1084_v23  ;;  %v1058_v16 = vmax.f32 %v850_v1, 0.0  ;;  %v1057_v42 = vmax.f32 %v849_v58, 0.0  ;;  %v5962_v23 = vld [vmem:[#allocation11_spill] sm:$0xff]  ;;  %v5963_v30 = vld [vmem:[#allocation20_spill] sm:$0xff]  ;;  %v690_v24 = vmul.f32 %v4809_v41, %v4011_v36  ;;  %v651_v58 = vmul.f32 %v4809_v41, %v4061_v32 }
 0x151   : > { %2038 = vmatpush1.msra.mxu0 %v1081_v21  ;;  %2199 = vmatpush1.msra.mxu1 %v1083_v56  ;;  %v1055_v62 = vmax.f32 %v847_v20, 0.0  ;;  %v1254_v26 = vmax.f32 %v1046_v0, 0.0  ;;  %v729_v28 = vmul.f32 %v4809_v41, %v5962_v23  ;;  %v716_v21 = vmul.f32 %v4809_v41, %v3985_v13  ;;  %v4907_v36 = vld [vmem:[%s5870_s4 + $0x8] sm:$0xff] }
 0x152   : > { %1795 = vmatprep.mubr.f32.mxu0 %v5949_v18  ;;  %1956 = vmatprep.mubr.f32.mxu1 %v5949_v18  ;;  %v703_v56 = vmul.f32 %v4809_v41, %v5966_v57  ;;  %v994_v1 = vadd.f32 %v4041_v11, %v690_v24  ;;  %v664_v11 = vmul.f32 %v4809_v41, %v4043_v14  ;;  %v4922_v14 = vld [vmem:[%s5870_s4 + $0x10] sm:$0xff] }
 0x153   : > { %2039 = vmatprep.subr.mxu0 %v1069_v8  ;;  %2200 = vmatprep.subr.mxu1 %v1071_v10  ;;  %v1033_v17 = vadd.f32 %v5964_v12, %v729_v28  ;;  %v1020_v63 = vadd.f32 %v5965_v43, %v716_v21  ;;  %v677_v8 = vmul.f32 %v4809_v41, %v4027_v50 }
 0x154   : > { %1796 = vmatmul.mubr.f32.gmra.mxu0 %v4526_v9  ;;  %1957 = vmatmul.mubr.f32.gmra.mxu1 %v4526_v9  ;;  %v1007_v13 = vadd.f32 %v4025_v49, %v703_v56  ;;  %v1202_v50 = vmax.f32 %v994_v1, 0.0  ;;  %v968_v20 = vadd.f32 %v4084_v53, %v664_v11  ;;  %v638_v53 = vmul.f32 %v4809_v41, %v4086_v54  ;;  %v4937_v54 = vld [vmem:[%s5870_s4 + $0x18] sm:$0xff] }
 0x155   : > { %2040 = vmatpush1.msra.mxu0 %v1068_v3  ;;  %2201 = vmatpush1.msra.mxu1 %v1070_v6  ;;  %v1241_v33 = vmax.f32 %v1033_v17, 0.0  ;;  %v1228_v5 = vmax.f32 %v1020_v63, 0.0  ;;  %v981_v10 = vadd.f32 %v4059_v31, %v677_v8  ;;  %v955_v3 = vadd.f32 %v4112_v25, %v651_v58 }
 0x156   : > { %2041 = vmatprep.subr.mxu0 %v1056_v48  ;;  %2202 = vmatprep.subr.mxu1 %v1058_v16  ;;  %v1215_v49 = vmax.f32 %v1007_v13, 0.0  ;;  %v1176_v32 = vmax.f32 %v968_v20, 0.0  ;;  %v942_v6 = vadd.f32 %v4137_v51, %v638_v53  ;;  %v625_v0 = vmul.f32 %v4809_v41, %v4114_v27 }
 0x157   : > { %2042 = vmatpush1.msra.mxu0 %v1055_v62  ;;  %2203 = vmatpush1.msra.mxu1 %v1057_v42  ;;  %v1189_v31 = vmax.f32 %v981_v10, 0.0  ;;  %v1163_v25 = vmax.f32 %v955_v3, 0.0  ;;  %v612_v51 = vmul.f32 %v4809_v41, %v4139_v52  ;;  %v599_v62 = vmul.f32 %v4809_v41, %v4161_v40  ;;  %v4952_v52 = vld [vmem:[%s5870_s4 + $0x20] sm:$0xff] }
 0x158   : > { %1801 = vmatprep.mubr.f32.mxu0 %v5949_v18  ;;  %1962 = vmatprep.mubr.f32.mxu1 %v5949_v18  ;;  %v929_v48 = vadd.f32 %v4159_v34, %v625_v0  ;;  %v1150_v27 = vmax.f32 %v942_v6, 0.0  ;;  %v573_v23 = vmul.f32 %v4809_v41, %v4202_v4  ;;  %v547_v17 = vmul.f32 %v4809_v41, %v4247_v61  ;;  %v3673_v3 = vld [vmem:[%s5870_s4 + $0x40] sm:$0xff]  ;;  %v3674_v6 = vld [vmem:[%s5870_s4 + $0x48] sm:$0xff]  ;;  %v3675_v0 = vld [vmem:[%s5870_s4 + $0x50] sm:$0xff] }
 0x159   : > { %3528 = vmatprep.subr.mxu0 %v1254_v26  ;;  %1802 = vmatmul.mubr.f32.gmra.mxu0 %v4545_v38  ;;  %v916_v16 = vadd.f32 %v4179_v19, %v612_v51  ;;  %v903_v42 = vadd.f32 %v4200_v15, %v599_v62  ;;  %v586_v19 = vmul.f32 %v4809_v41, %v5958_v35  ;;  %v4967_v15 = vld [vmem:[%s5870_s4 + $0x28] sm:$0xff] }
 0x15a   : > { %1963 = vmatmul.mubr.f32.gmra.mxu1 %v4545_v38  ;;  %1807 = vmatprep.mubr.f32.mxu0 %v5949_v18  ;;  %v1137_v34 = vmax.f32 %v929_v48, 0.0  ;;  %v877_v28 = vadd.f32 %v4245_v46, %v573_v23  ;;  %v851_v21 = vadd.f32 %v4267_v39, %v547_v17 }
 0x15b   : > { %1968 = vmatprep.mubr.f32.mxu1 %v5949_v18  ;;  %v1124_v40 = vmax.f32 %v916_v16, 0.0  ;;  %v1111_v35 = vmax.f32 %v903_v42, 0.0  ;;  %v3677_v16 = vld [vmem:[%s5870_s4 + $0x60] sm:$0xff] }
 0x15c   : > { %v1085_v46 = vmax.f32 %v877_v28, 0.0  ;;  %v3680_v28 = vld [vmem:[%s5870_s4 + $0x78] sm:$0xff] }
 0x15d   : > { %1808 = vmatmul.mubr.f32.gmra.mxu0 %v4554_v55 }
 0x15e   : > { %1969 = vmatmul.mubr.f32.gmra.mxu1 %v4554_v55  ;;  %1813 = vmatprep.mubr.f32.mxu0 %v5949_v18 }
 0x15f   : > { %1974 = vmatprep.mubr.f32.mxu1 %v5949_v18 }
 0x161   : > { %1814 = vmatmul.mubr.f32.gmra.mxu0 %v4565_v45 }
 0x162   : > { %1975 = vmatmul.mubr.f32.gmra.mxu1 %v4565_v45  ;;  %1819 = vmatprep.mubr.f32.mxu0 %v5949_v18 }
 0x163   : > { %1980 = vmatprep.mubr.f32.mxu1 %v5949_v18 }
 0x165   : > { %1820 = vmatmul.mubr.f32.gmra.mxu0 %v4574_v44 }
 0x166   : > { %1981 = vmatmul.mubr.f32.gmra.mxu1 %v4574_v44  ;;  %1825 = vmatprep.mubr.f32.mxu0 %v5949_v18 }
 0x167   : > { %1986 = vmatprep.mubr.f32.mxu1 %v5949_v18 }
 0x169   : > { %1826 = vmatmul.mubr.f32.gmra.mxu0 %v4583_v59 }
 0x16a   : > { %1987 = vmatmul.mubr.f32.gmra.mxu1 %v4583_v59  ;;  %1831 = vmatprep.mubr.f32.mxu0 %v5949_v18 }
 0x16b   : > { %1992 = vmatprep.mubr.f32.mxu1 %v5949_v18 }
 0x16d   : > { %1832 = vmatmul.mubr.f32.gmra.mxu0 %v4592_v37 }
 0x16e   : > { %1993 = vmatmul.mubr.f32.gmra.mxu1 %v4592_v37  ;;  %1837 = vmatprep.mubr.f32.mxu0 %v5949_v18 }
 0x16f   : > { %1998 = vmatprep.mubr.f32.mxu1 %v5949_v18 }
 0x171   : > { %1838 = vmatmul.mubr.f32.gmra.mxu0 %v5961_v2 }
 0x172   : > { %1999 = vmatmul.mubr.f32.gmra.mxu1 %v5961_v2  ;;  %1843 = vmatprep.mubr.f32.mxu0 %v5949_v18 }
 0x173   : > { %2004 = vmatprep.mubr.f32.mxu1 %v5949_v18 }
 0x175   : > { %1844 = vmatmul.mubr.f32.gmra.mxu0 %v5963_v30 }
 0x176   : > { %2005 = vmatmul.mubr.f32.gmra.mxu1 %v5963_v30  ;;  %2075 = vmatprep.mubr.f32.mxu0 %v5949_v18 }
 0x177   : > { %2236 = vmatprep.mubr.f32.mxu1 %v5949_v18 }
 0x179   : > { %2076 = vmatmul.mubr.f32.vlgmr.msra.gmra.mxu0 %v4892_v60 }
 0x17a   : > { %2237 = vmatmul.mubr.f32.vlgmr.msra.gmra.mxu1 %v4892_v60  ;;  %3529 = vmatpush3.msra.mxu0 %v1254_v26  ;;  %v890_v26 = vadd.f32 %v4222_v47, %v586_v19  ;;  %v560_v47 = vmul.f32 %v4809_v41, %v4224_v7  ;;  %v4982_v7 = vld [vmem:[%s5870_s4 + $0x30] sm:$0xff]  ;;  %v3678_v19 = vld [vmem:[%s5870_s4 + $0x68] sm:$0xff] }
 0x17b   : > { %3530 = vmatprep.subr.mxu0 %v1241_v33  ;;  %2081 = vmatprep.mubr.f32.mxu0 %v5949_v18 }
 0x17c   : > { %3531 = vmatpush3.msra.mxu0 %v1241_v33  ;;  %2242 = vmatprep.mubr.f32.mxu1 %v5949_v18  ;;  %v1098_v4 = vmax.f32 %v890_v26, 0.0  ;;  %v864_v12 = vadd.f32 %v4265_v29, %v560_v47  ;;  %v1059_v29 = vmax.f32 %v851_v21, 0.0 }
 0x17d   : > { %3532 = vmatprep.subr.mxu0 %v1228_v5  ;;  %2082 = vmatmul.mubr.f32.gmra.mxu0 %v4907_v36 }
 0x17e   : > { %2243 = vmatmul.mubr.f32.gmra.mxu1 %v4907_v36  ;;  %3533 = vmatpush3.msra.mxu0 %v1228_v5  ;;  %v1072_v61 = vmax.f32 %v864_v12, 0.0  ;;  %v5151_v12 = vpop.permute.xlu0 %1364 }
 0x17f   : > { %3534 = vmatprep.subr.mxu0 %v1215_v49  ;;  %2087 = vmatprep.mubr.f32.mxu0 %v5949_v18  ;;  %5986 = vst [vmem:[#allocation31_spill] sm:$0xff] %v5151_v12 }
 0x180   : > { %3535 = vmatpush3.msra.mxu0 %v1215_v49  ;;  %2248 = vmatprep.mubr.f32.mxu1 %v5949_v18 }
 0x181   : > { %3536 = vmatprep.subr.mxu0 %v1202_v50  ;;  %2088 = vmatmul.mubr.f32.gmra.mxu0 %v4922_v14 }
 0x182   : > { %2249 = vmatmul.mubr.f32.gmra.mxu1 %v4922_v14  ;;  %3537 = vmatpush3.msra.mxu0 %v1202_v50 }
 0x183   : > { %3538 = vmatprep.subr.mxu0 %v1189_v31  ;;  %2093 = vmatprep.mubr.f32.mxu0 %v5949_v18 }
 0x184   : > { %3539 = vmatpush3.msra.mxu0 %v1189_v31  ;;  %2254 = vmatprep.mubr.f32.mxu1 %v5949_v18  ;;  %v3672_v31 = vld [vmem:[%s5870_s4 + $0x38] sm:$0xff] }
 0x185   : > { %3540 = vmatprep.subr.mxu0 %v1176_v32  ;;  %2094 = vmatmul.mubr.f32.gmra.mxu0 %v4937_v54 }
 0x186   : > { %2255 = vmatmul.mubr.f32.gmra.mxu1 %v4937_v54  ;;  %3541 = vmatpush3.msra.mxu0 %v1176_v32 }
 0x187   : > { %3542 = vmatprep.subr.mxu0 %v1163_v25  ;;  %2099 = vmatprep.mubr.f32.mxu0 %v5949_v18 }
 0x188   : > { %3543 = vmatpush3.msra.mxu0 %v1163_v25  ;;  %2260 = vmatprep.mubr.f32.mxu1 %v5949_v18 }
 0x189   : > { %3544 = vmatprep.subr.mxu0 %v1150_v27  ;;  %2100 = vmatmul.mubr.f32.gmra.mxu0 %v4952_v52 }
 0x18a   : > { %2261 = vmatmul.mubr.f32.gmra.mxu1 %v4952_v52  ;;  %3545 = vmatpush3.msra.mxu0 %v1150_v27  ;;  %v3676_v27 = vld [vmem:[%s5870_s4 + $0x58] sm:$0xff] }
 0x18b   : > { %3546 = vmatprep.subr.mxu0 %v1137_v34  ;;  %2105 = vmatprep.mubr.f32.mxu0 %v5949_v18 }
 0x18c   : > { %3547 = vmatpush3.msra.mxu0 %v1137_v34  ;;  %2266 = vmatprep.mubr.f32.mxu1 %v5949_v18 }
 0x18d   : > { %3548 = vmatprep.subr.mxu0 %v1124_v40  ;;  %2106 = vmatmul.mubr.f32.gmra.mxu0 %v4967_v15 }
 0x18e   : > { %2267 = vmatmul.mubr.f32.gmra.mxu1 %v4967_v15  ;;  %3549 = vmatpush3.msra.mxu0 %v1124_v40  ;;  %v3679_v40 = vld [vmem:[%s5870_s4 + $0x70] sm:$0xff] }
 0x18f   : > { %3550 = vmatprep.subr.mxu0 %v1111_v35  ;;  %2111 = vmatprep.mubr.f32.mxu0 %v5949_v18 }
 0x190   : > { %3551 = vmatpush3.msra.mxu0 %v1111_v35  ;;  %2272 = vmatprep.mubr.f32.mxu1 %v5949_v18 }
 0x191   : > { %3552 = vmatprep.subr.mxu0 %v1098_v4  ;;  %2112 = vmatmul.mubr.f32.gmra.mxu0 %v4982_v7 }
 0x192   : > { %2273 = vmatmul.mubr.f32.gmra.mxu1 %v4982_v7  ;;  %3553 = vmatpush3.msra.mxu0 %v1098_v4 }
 0x193   : > { %3554 = vmatprep.subr.mxu0 %v1085_v46  ;;  %2117 = vmatprep.mubr.f32.mxu0 %v5949_v18 }
 0x194   : > { %3555 = vmatpush3.msra.mxu0 %v1085_v46  ;;  %2278 = vmatprep.mubr.f32.mxu1 %v5949_v18  ;;  %v5153_v46 = vpop.permute.xlu1 %1359 }
 0x195   : > { %3556 = vmatprep.subr.mxu0 %v1072_v61  ;;  %2118 = vmatmul.mubr.f32.gmra.mxu0 %v4526_v9  ;;  %5987 = vst [vmem:[#allocation32_spill] sm:$0xff] %v5153_v46 }
 0x196   : > { %2279 = vmatmul.mubr.f32.gmra.mxu1 %v4526_v9  ;;  %3557 = vmatpush3.msra.mxu0 %v1072_v61 }
 0x197   : > { %3558 = vmatprep.subr.mxu0 %v1059_v29  ;;  %2123 = vmatprep.mubr.f32.mxu0 %v5949_v18 }
 0x198   : > { %3559 = vmatpush3.msra.mxu0 %v1059_v29  ;;  %2284 = vmatprep.mubr.f32.mxu1 %v5949_v18 }
 0x199   : > { %2124 = vmatmul.mubr.f32.gmra.mxu0 %v4545_v38 }
 0x19a   : > { %2285 = vmatmul.mubr.f32.gmra.mxu1 %v4545_v38  ;;  %2129 = vmatprep.mubr.f32.mxu0 %v5949_v18  ;;  %v4996_v39 = vpop.f32.mrf.mxu0  ;;  %v4998_v41 = vpop.f32.mrf.mxu1 }
 0x19b   : > { %5967 = vst [vmem:[#allocation18_spill] sm:$0xff] %v4996_v39  ;;  %5968 = vst [vmem:[#allocation17_spill] sm:$0xff] %v4998_v41  ;;  %2290 = vmatprep.mubr.f32.mxu1 %v5949_v18 }
 0x19c   : > { %v5001_v9 = vpop.f32.mrf.mxu0  ;;  %v5003_v43 = vpop.f32.mrf.mxu1 }
 0x19d   : > { %5969 = vst [vmem:[#allocation19_spill] sm:$0xff] %v5001_v9  ;;  %5970 = vst [vmem:[#allocation16_spill] sm:$0xff] %v5003_v43  ;;  %2130 = vmatmul.mubr.f32.gmra.mxu0 %v4554_v55 }
 0x19e   : > { %2291 = vmatmul.mubr.f32.gmra.mxu1 %v4554_v55  ;;  %2135 = vmatprep.mubr.f32.mxu0 %v5949_v18 }
 0x19f   : > { %2296 = vmatprep.mubr.f32.mxu1 %v5949_v18 }
 0x1a0   : > { %v5009_v38 = vpop.f32.mrf.mxu0  ;;  %v5011_v63 = vpop.f32.mrf.mxu1 }
 0x1a1   : > { %5971 = vst [vmem:[#allocation11_spill] sm:$0xff] %v5009_v38  ;;  %5972 = vst [vmem:[#allocation20_spill] sm:$0xff] %v5011_v63  ;;  %2136 = vmatmul.mubr.f32.gmra.mxu0 %v4565_v45 }
 0x1a2   : > { %2297 = vmatmul.mubr.f32.gmra.mxu1 %v4565_v45  ;;  %2141 = vmatprep.mubr.f32.mxu0 %v5949_v18  ;;  %v5016_v57 = vpop.f32.mrf.mxu0  ;;  %v5018_v56 = vpop.f32.mrf.mxu1 }
 0x1a3   : > { %5973 = vst [vmem:[#allocation12_spill] sm:$0xff] %v5016_v57  ;;  %5974 = vst [vmem:[#allocation14_spill] sm:$0xff] %v5018_v56  ;;  %2302 = vmatprep.mubr.f32.mxu1 %v5949_v18 }
 0x1a5   : > { %2142 = vmatmul.mubr.f32.gmra.mxu0 %v4574_v44 }
 0x1a6   : > { %2303 = vmatmul.mubr.f32.gmra.mxu1 %v4574_v44  ;;  %2147 = vmatprep.mubr.f32.mxu0 %v5949_v18  ;;  %v5024_v55 = vpop.f32.mrf.mxu0  ;;  %v5026_v33 = vpop.f32.mrf.mxu1 }
 0x1a7   : > { %5975 = vst [vmem:[#allocation13_spill] sm:$0xff] %v5024_v55  ;;  %5976 = vst [vmem:[#allocation21_spill] sm:$0xff] %v5026_v33  ;;  %2308 = vmatprep.mubr.f32.mxu1 %v5949_v18 }
 0x1a8   : > { %v5029_v45 = vpop.f32.mrf.mxu0  ;;  %v5031_v13 = vpop.f32.mrf.mxu1 }
 0x1a9   : > { %5977 = vst [vmem:[#allocation22_spill] sm:$0xff] %v5029_v45  ;;  %5978 = vst [vmem:[#allocation23_spill] sm:$0xff] %v5031_v13  ;;  %2148 = vmatmul.mubr.f32.gmra.mxu0 %v4583_v59 }
 0x1aa   : > { %2309 = vmatmul.mubr.f32.gmra.mxu1 %v4583_v59  ;;  %2153 = vmatprep.mubr.f32.mxu0 %v5949_v18 }
 0x1ab   : > { %2314 = vmatprep.mubr.f32.mxu1 %v5949_v18 }
 0x1ac   : > { %v5037_v44 = vpop.f32.mrf.mxu0  ;;  %v5039_v24 = vpop.f32.mrf.mxu1 }
 0x1ad   : > { %5979 = vst [vmem:[#allocation24_spill] sm:$0xff] %v5037_v44  ;;  %5980 = vst [vmem:[#allocation25_spill] sm:$0xff] %v5039_v24  ;;  %2154 = vmatmul.mubr.f32.gmra.mxu0 %v4592_v37 }
 0x1ae   : > { %2315 = vmatmul.mubr.f32.gmra.mxu1 %v4592_v37  ;;  %2159 = vmatprep.mubr.f32.mxu0 %v5949_v18  ;;  %v5044_v5 = vpop.f32.mrf.mxu0  ;;  %v5046_v1 = vpop.f32.mrf.mxu1 }
 0x1af   : > { %5981 = vst [vmem:[#allocation26_spill] sm:$0xff] %v5044_v5  ;;  %5982 = vst [vmem:[#allocation27_spill] sm:$0xff] %v5046_v1  ;;  %2320 = vmatprep.mubr.f32.mxu1 %v5949_v18 }
 0x1b1   : > { %2160 = vmatmul.mubr.f32.gmra.mxu0 %v5961_v2 }
 0x1b2   : > { %2321 = vmatmul.mubr.f32.gmra.mxu1 %v5961_v2  ;;  %2165 = vmatprep.mubr.f32.mxu0 %v5949_v18  ;;  %v5052_v59 = vpop.f32.mrf.mxu0  ;;  %v5054_v8 = vpop.f32.mrf.mxu1 }
 0x1b3   : > { %5983 = vst [vmem:[#allocation28_spill] sm:$0xff] %v5052_v59  ;;  %5984 = vst [vmem:[#allocation29_spill] sm:$0xff] %v5054_v8  ;;  %2326 = vmatprep.mubr.f32.mxu1 %v5949_v18 }
 0x1b4   : > { %v5057_v37 = vpop.f32.mrf.mxu0  ;;  %v5059_v49 = vpop.f32.mrf.mxu1 }
 0x1b5   : > { %5985 = vst [vmem:[#allocation30_spill] sm:$0xff] %v5059_v49  ;;  %2166 = vmatmul.mubr.f32.gmra.mxu0 %v5963_v30 }
 0x1b6   : > { %2327 = vmatmul.mubr.f32.gmra.mxu1 %v5963_v30  ;;  %3560 = vmatprep.mubr.f32.mxu0 %v4892_v60 }
 0x1b7   : > { %2761 = vmatprep.mubr.f32.mxu1 %v5949_v18 }
 0x1b8   : > { %v5065_v2 = vpop.f32.mrf.mxu0  ;;  %v5067_v10 = vpop.f32.mrf.mxu1 }
 0x1b9   : > { %3561 = vmatmul.mubr.f32.vlgmr.msra.gmra.mxu0 %v4907_v36 }
 0x1ba   : > { %3563 = vmatprep.mubr.f32.mxu0 %v4922_v14  ;;  %v5071_v11 = vpop.f32.mrf.mxu0  ;;  %v5073_v50 = vpop.f32.mrf.mxu1 }
 0x1bd   : > { %3564 = vmatmul.mubr.f32.gmra.mxu0 %v4937_v54 }
 0x1be   : > { %3566 = vmatprep.mubr.f32.mxu0 %v4952_v52  ;;  %v5077_v30 = vpop.f32.mrf.mxu0  ;;  %v5079_v60 = vpop.f32.mrf.mxu1 }
 0x1c0   : > { %v5081_v20 = vpop.f32.mrf.mxu0  ;;  %v5083_v58 = vpop.f32.mrf.mxu1 }
 0x1c1   : > { %3567 = vmatmul.mubr.f32.gmra.mxu0 %v4967_v15 }
 0x1c2   : > { %3569 = vmatprep.mubr.f32.mxu0 %v4982_v7 }
 0x1c4   : > { %v5087_v36 = vpop.f32.mrf.mxu0  ;;  %v5089_v14 = vpop.f32.mrf.mxu1 }
 0x1c5   : > { %3570 = vmatmul.mubr.f32.gmra.mxu0 %v3672_v31 }
 0x1c6   : > { %3572 = vmatprep.mubr.f32.mxu0 %v3673_v3  ;;  %v5097_v53 = vpop.f32.mrf.mxu0  ;;  %v5099_v32 = vpop.f32.mrf.mxu1 }
 0x1c7   : > { %v5155_v3 = vpop.permute.xlu0 %1354 }
 0x1c9   : > { %3573 = vmatmul.mubr.f32.gmra.mxu0 %v3674_v6 }
 0x1ca   : > { %3575 = vmatprep.mubr.f32.mxu0 %v3675_v0  ;;  %v5107_v54 = vpop.f32.mrf.mxu0  ;;  %v5109_v25 = vpop.f32.mrf.mxu1 }
 0x1cb   : > { %v5159_v22 = vpop.permute.xlu0 %1344 }
 0x1cc   : > { %v5111_v48 = vpop.f32.mrf.mxu0  ;;  %v5113_v51 = vpop.f32.mrf.mxu1 }
 0x1cd   : > { %3576 = vmatmul.mubr.f32.gmra.mxu0 %v3676_v27  ;;  %v5157_v27 = vpop.permute.xlu1 %1349 }
 0x1ce   : > { %3578 = vmatprep.mubr.f32.mxu0 %v3677_v16  ;;  %v5121_v62 = vpop.f32.mrf.mxu0  ;;  %v5123_v52 = vpop.f32.mrf.mxu1 }
 0x1cf   : > { %v5165_v33 = vpop.permute.xlu0 %1334 }
 0x1d0   : > { %v5125_v34 = vpop.f32.mrf.mxu0  ;;  %v5127_v42 = vpop.f32.mrf.mxu1 }
 0x1d1   : > { %3579 = vmatmul.mubr.f32.gmra.mxu0 %v3678_v19  ;;  %v5161_v39 = vpop.permute.xlu1 %1339 }
 0x1d2   : > { %3581 = vmatprep.mubr.f32.mxu0 %v3679_v40  ;;  %v5135_v26 = vpop.f32.mrf.mxu0  ;;  %v5137_v23 = vpop.f32.mrf.mxu1 }
 0x1d4   : > { %v5139_v15 = vpop.f32.mrf.mxu0  ;;  %v5141_v35 = vpop.f32.mrf.mxu1 }
 0x1d5   : > { %3582 = vmatmul.mubr.f32.gmra.mxu0 %v3680_v28 }
 0x1d6   : > { %v5146_v47 = vpop.f32.mrf.mxu0  ;;  %v5148_v4 = vpop.f32.mrf.mxu1  ;;  %2832 = vmatprep.mubr.f32.mxu0 %v5949_v18 }
 0x1d8   : > { %v1501_v17 = vpop.f32.mrf.mxu0  ;;  %v1662_v7 = vpop.f32.mrf.mxu1 }
 0x1da   : > { %v1505_v21 = vpop.f32.mrf.mxu0  ;;  %v1666_v61 = vpop.f32.mrf.mxu1 }
 0x1dc   : > { %v1507_v29 = vpop.f32.mrf.mxu0  ;;  %v1668_v31 = vpop.f32.mrf.mxu1 }
 0x1de   : > { %v1511_v6 = vpop.f32.mrf.mxu0  ;;  %v1672_v0 = vpop.f32.mrf.mxu1 }
 0x1e0   : > { %v1513_v16 = vpop.f32.mrf.mxu0  ;;  %v1674_v19 = vpop.f32.mrf.mxu1 }
 0x1e1   : > { %v1514_v8 = vadd.f32 %v1513_v16, %v5155_v3 }
 0x1e2   : > { %v1517_v40 = vpop.f32.mrf.mxu0  ;;  %v1678_v28 = vpop.f32.mrf.mxu1 }
 0x1e3   : > { %v1518_v44 = vadd.f32 %v1517_v40, %v5153_v46  ;;  %v1679_v1 = vadd.f32 %v1678_v28, %v5153_v46 }
 0x1e4   : > { %v1519_v18 = vpop.f32.mrf.mxu0  ;;  %v1680_v41 = vpop.f32.mrf.mxu1 }
 0x1e5   : > { %v1520_v55 = vadd.f32 %v1519_v18, %v5153_v46  ;;  %v1681_v13 = vadd.f32 %v1680_v41, %v5153_v46  ;;  %v1675_v18 = vadd.f32 %v1674_v19, %v5155_v3  ;;  %v2648_v19 = vmax.f32 %v1514_v8, 0.0 }
 0x1e6   : > { %v1523_v43 = vpop.f32.mrf.mxu0  ;;  %v1684_v9 = vpop.f32.mrf.mxu1  ;;  %v1496_v8 = vadd.f32 %v5139_v15, %v5161_v39  ;;  %v1490_v15 = vadd.f32 %v5125_v34, %v5165_v33 }
 0x1e7   : > { %v1524_v63 = vadd.f32 %v1523_v43, %v5151_v12  ;;  %v1685_v38 = vadd.f32 %v1684_v9, %v5151_v12  ;;  %v5177_v9 = vpop.permute.xlu1 %1329  ;;  %v2661_v46 = vmax.f32 %v1520_v55, 0.0  ;;  %v2663_v16 = vmax.f32 %v1681_v13, 0.0 }
 0x1e8   : > { %v1525_v56 = vpop.f32.mrf.mxu0  ;;  %v1686_v57 = vpop.f32.mrf.mxu1  ;;  %v1500_v55 = vadd.f32 %v5146_v47, %v5159_v22  ;;  %v1661_v13 = vadd.f32 %v5148_v4, %v5159_v22  ;;  %v1494_v4 = vadd.f32 %v5135_v26, %v5161_v39  ;;  %v1488_v26 = vadd.f32 %v5121_v62, %v5165_v33 }
 0x1e9   : > { %v1526_v45 = vadd.f32 %v1525_v56, %v5151_v12  ;;  %v1687_v24 = vadd.f32 %v1686_v57, %v5151_v12  ;;  %v1512_v56 = vadd.f32 %v1511_v6, %v5155_v3  ;;  %v1673_v57 = vadd.f32 %v1672_v0, %v5155_v3 }
 0x1ea   : > { %v5173_v5 = vpop.f32.mrf.mxu0  ;;  %v5175_v43 = vpop.f32.mrf.mxu1  ;;  %v2673_v12 = vmax.f32 %v1524_v63, 0.0  ;;  %v2675_v40 = vmax.f32 %v1685_v38, 0.0  ;;  %v2660_v6 = vmax.f32 %v1518_v44, 0.0  ;;  %v2662_v0 = vmax.f32 %v1679_v1, 0.0 }
 0x1eb   : > { %5988 = vst [vmem:[#allocation33_spill] sm:$0xff] %v5173_v5  ;;  %5989 = vst [vmem:[#allocation34_spill] sm:$0xff] %v5175_v43  ;;  %v2674_v59 = vmax.f32 %v1526_v45, 0.0  ;;  %v2676_v41 = vmax.f32 %v1687_v24, 0.0  ;;  %v1508_v43 = vadd.f32 %v1507_v29, %v5157_v27  ;;  %v1669_v5 = vadd.f32 %v1668_v31, %v5157_v27  ;;  %v5191_v38 = vpop.permute.xlu0 %1324 }
 0x1ec   : > { %v5183_v49 = vpop.f32.mrf.mxu0  ;;  %v5185_v28 = vpop.f32.mrf.mxu1  ;;  %v1506_v45 = vadd.f32 %v1505_v21, %v5157_v27  ;;  %v1667_v24 = vadd.f32 %v1666_v61, %v5157_v27  ;;  %v1502_v63 = vadd.f32 %v1501_v17, %v5159_v22  ;;  %v1663_v29 = vadd.f32 %v1662_v7, %v5159_v22 }
 0x1ed   : > { %5990 = vst [vmem:[#allocation35_spill] sm:$0xff] %v5183_v49  ;;  %5991 = vst [vmem:[#allocation36_spill] sm:$0xff] %v5185_v28  ;;  %2697 = vmatprep.subr.mxu1 %v2674_v59  ;;  %2768 = vmatprep.subr.mxu0 %v2676_v41  ;;  %v2650_v31 = vmax.f32 %v1675_v18, 0.0  ;;  %v2647_v44 = vmax.f32 %v1512_v56, 0.0  ;;  %v2649_v1 = vmax.f32 %v1673_v57, 0.0  ;;  %v5203_v17 = vpop.permute.xlu1 %1319  ;;  %v1657_v7 = vadd.f32 %v5141_v35, %v5161_v39 }
 0x1ee   : > { %2698 = vmatpush1.msra.mxu1 %v2673_v12  ;;  %2769 = vmatpush1.msra.mxu0 %v2675_v40  ;;  %v2635_v47 = vmax.f32 %v1508_v43, 0.0  ;;  %v1655_v21 = vadd.f32 %v5137_v23, %v5161_v39  ;;  %v2634_v61 = vmax.f32 %v1506_v45, 0.0  ;;  %v2636_v18 = vmax.f32 %v1667_v24, 0.0 }
 0x1ef   : > { %2699 = vmatprep.subr.mxu1 %v2661_v46  ;;  %2770 = vmatprep.subr.mxu0 %v2663_v16  ;;  %v2637_v46 = vmax.f32 %v1669_v5, 0.0  ;;  %v1651_v5 = vadd.f32 %v5127_v42, %v5165_v33  ;;  %v2622_v35 = vmax.f32 %v1502_v63, 0.0  ;;  %v2624_v43 = vmax.f32 %v1663_v29, 0.0  ;;  %v5225_v16 = vpop.permute.xlu0 %1314 }
 0x1f0   : > { %v5199_v59 = vpop.f32.mrf.mxu0  ;;  %v5201_v12 = vpop.f32.mrf.mxu1  ;;  %2700 = vmatpush1.msra.mxu1 %v2660_v6  ;;  %2771 = vmatpush1.msra.mxu0 %v2662_v0  ;;  %v1649_v23 = vadd.f32 %v5123_v52, %v5165_v33  ;;  %v2621_v57 = vmax.f32 %v1500_v55, 0.0  ;;  %v2623_v40 = vmax.f32 %v1661_v13, 0.0  ;;  %v1484_v34 = vadd.f32 %v5111_v48, %v5177_v9 }
 0x1f1   : > { %5992 = vst [vmem:[#allocation37_spill] sm:$0xff] %v5199_v59  ;;  %5993 = vst [vmem:[#allocation38_spill] sm:$0xff] %v5201_v12  ;;  %2701 = vmatprep.subr.mxu1 %v2648_v19  ;;  %2772 = vmatprep.subr.mxu0 %v2650_v31  ;;  %v1645_v42 = vadd.f32 %v5113_v51, %v5177_v9  ;;  %v2609_v45 = vmax.f32 %v1496_v8, 0.0  ;;  %v2611_v24 = vmax.f32 %v1657_v7, 0.0  ;;  %v2608_v6 = vmax.f32 %v1494_v4, 0.0  ;;  %v5239_v48 = vpop.permute.xlu1 %1309 }
 0x1f2   : > { %v5213_v41 = vpop.f32.mrf.mxu0  ;;  %v5215_v56 = vpop.f32.mrf.mxu1  ;;  %2702 = vmatpush1.msra.mxu1 %v2647_v44  ;;  %2773 = vmatpush1.msra.mxu0 %v2649_v1  ;;  %v1482_v62 = vadd.f32 %v5107_v54, %v5177_v9  ;;  %v1643_v52 = vadd.f32 %v5109_v25, %v5177_v9  ;;  %v2610_v0 = vmax.f32 %v1655_v21, 0.0  ;;  %5998 = vst [vmem:[#allocation43_spill] sm:$0xff] %v5239_v48  ;;  %v2596_v54 = vmax.f32 %v1490_v15, 0.0 }
 0x1f3   : > { %5994 = vst [vmem:[#allocation39_spill] sm:$0xff] %v5213_v41  ;;  %5995 = vst [vmem:[#allocation40_spill] sm:$0xff] %v5215_v56  ;;  %2703 = vmatprep.subr.mxu1 %v2635_v47  ;;  %2774 = vmatprep.subr.mxu0 %v2637_v46  ;;  %v1478_v51 = vadd.f32 %v5097_v53, %v5191_v38  ;;  %v1639_v19 = vadd.f32 %v5099_v32, %v5191_v38  ;;  %v2598_v31 = vmax.f32 %v1651_v5, 0.0  ;;  %v5261_v21 = vpop.permute.xlu0 %1304 }
 0x1f4   : > { %2704 = vmatpush1.msra.mxu1 %v2634_v61  ;;  %2775 = vmatpush1.msra.mxu0 %v2636_v18  ;;  %v1476_v25 = vadd.f32 %v5087_v36, %v5191_v38  ;;  %v1637_v55 = vadd.f32 %v5089_v14, %v5191_v38  ;;  %v2595_v13 = vmax.f32 %v1488_v26, 0.0  ;;  %v2597_v44 = vmax.f32 %v1649_v23, 0.0  ;;  %6001 = vst [vmem:[#allocation46_spill] sm:$0xff] %v5261_v21  ;;  %v6005_v26 = vld [vmem:[#allocation30_spill] sm:$0xff] }
 0x1f5   : > { %2705 = vmatprep.subr.mxu1 %v2622_v35  ;;  %2776 = vmatprep.subr.mxu0 %v2624_v43  ;;  %v1472_v53 = vadd.f32 %v5081_v20, %v5203_v17  ;;  %v1633_v32 = vadd.f32 %v5083_v58, %v5203_v17  ;;  %v2583_v7 = vmax.f32 %v1484_v34, 0.0  ;;  %v2585_v47 = vmax.f32 %v1645_v42, 0.0  ;;  %v6007_v34 = vld [vmem:[#allocation29_spill] sm:$0xff] }
 0x1f6   : > { %v5235_v63 = vpop.f32.mrf.mxu0  ;;  %v5237_v29 = vpop.f32.mrf.mxu1  ;;  %2706 = vmatpush1.msra.mxu1 %v2621_v57  ;;  %2777 = vmatpush1.msra.mxu0 %v2623_v40  ;;  %v1470_v36 = vadd.f32 %v5077_v30, %v5203_v17  ;;  %v1631_v14 = vadd.f32 %v5079_v60, %v5203_v17  ;;  %v2582_v46 = vmax.f32 %v1482_v62, 0.0  ;;  %v2584_v4 = vmax.f32 %v1643_v52, 0.0 }
 0x1f7   : > { %5996 = vst [vmem:[#allocation41_spill] sm:$0xff] %v5235_v63  ;;  %5997 = vst [vmem:[#allocation42_spill] sm:$0xff] %v5237_v29  ;;  %2707 = vmatprep.subr.mxu1 %v2609_v45  ;;  %2778 = vmatprep.subr.mxu0 %v2611_v24  ;;  %v1466_v20 = vadd.f32 %v5071_v11, %v5225_v16  ;;  %v1627_v58 = vadd.f32 %v5073_v50, %v5225_v16  ;;  %v2570_v61 = vmax.f32 %v1478_v51, 0.0  ;;  %v5275_v11 = vpop.permute.xlu1 %1299  ;;  %v6037_v63 = vld [vmem:[#allocation31_spill] sm:$0xff] }
 0x1f8   : > { %v5249_v1 = vpop.f32.mrf.mxu0  ;;  %v5251_v8 = vpop.f32.mrf.mxu1  ;;  %2708 = vmatpush1.msra.mxu1 %v2608_v6  ;;  %2779 = vmatpush1.msra.mxu0 %v2610_v0  ;;  %v2572_v18 = vmax.f32 %v1639_v19, 0.0  ;;  %v1464_v30 = vadd.f32 %v5065_v2, %v5225_v16  ;;  %v1625_v60 = vadd.f32 %v5067_v10, %v5225_v16  ;;  %v2569_v15 = vmax.f32 %v1476_v25, 0.0  ;;  %6004 = vst [vmem:[#allocation49_spill] sm:$0xff] %v5275_v11  ;;  %v6006_v10 = vld [vmem:[#allocation28_spill] sm:$0xff]  ;;  %v6011_v0 = vld [vmem:[#allocation27_spill] sm:$0xff] }
 0x1f9   : > { %5999 = vst [vmem:[#allocation44_spill] sm:$0xff] %v5249_v1  ;;  %6000 = vst [vmem:[#allocation45_spill] sm:$0xff] %v5251_v8  ;;  %2709 = vmatprep.subr.mxu1 %v2596_v54  ;;  %2780 = vmatprep.subr.mxu0 %v2598_v31  ;;  %v2571_v5 = vmax.f32 %v1637_v55, 0.0  ;;  %v1460_v50 = vadd.f32 %v5057_v37, %v5239_v48  ;;  %v1621_v23 = vadd.f32 %v6005_v26, %v5239_v48  ;;  %v6010_v37 = vld [vmem:[#allocation26_spill] sm:$0xff]  ;;  %v6012_v31 = vld [vmem:[#allocation24_spill] sm:$0xff] }
 0x1fa   : > { %2710 = vmatpush1.msra.mxu1 %v2595_v13  ;;  %2781 = vmatpush1.msra.mxu0 %v2597_v44  ;;  %v2557_v2 = vmax.f32 %v1472_v53, 0.0  ;;  %v2559_v57 = vmax.f32 %v1633_v32, 0.0  ;;  %v1458_v40 = vadd.f32 %v6006_v10, %v5239_v48  ;;  %v1619_v42 = vadd.f32 %v6007_v34, %v5239_v48  ;;  %v6013_v55 = vld [vmem:[#allocation25_spill] sm:$0xff]  ;;  %v5297_v32 = vpop.permute.xlu0 %1294 }
 0x1fb   : > { %2711 = vmatprep.subr.mxu1 %v2583_v7  ;;  %2782 = vmatprep.subr.mxu0 %v2585_v47  ;;  %v2556_v45 = vmax.f32 %v1470_v36, 0.0  ;;  %v2558_v24 = vmax.f32 %v1631_v14, 0.0  ;;  %v1454_v6 = vadd.f32 %v6010_v37, %v5261_v21  ;;  %v1615_v51 = vadd.f32 %v6011_v0, %v5261_v21  ;;  %6014 = vst [vmem:[#allocation29_spill] sm:$0xff] %v5297_v32  ;;  %v6015_v7 = vld [vmem:[#allocation22_spill] sm:$0xff]  ;;  %v6016_v36 = vld [vmem:[#allocation23_spill] sm:$0xff]  ;;  %v5311_v26 = vpop.permute.xlu1 %1289 }
 0x1fc   : > { %v5271_v35 = vpop.f32.mrf.mxu0  ;;  %v5273_v43 = vpop.f32.mrf.mxu1  ;;  %2712 = vmatpush1.msra.mxu1 %v2582_v46  ;;  %2783 = vmatpush1.msra.mxu0 %v2584_v4  ;;  %v2544_v19 = vmax.f32 %v1466_v20, 0.0  ;;  %v2546_v54 = vmax.f32 %v1627_v58, 0.0  ;;  %v1452_v25 = vadd.f32 %v6012_v31, %v5261_v21  ;;  %v1613_v13 = vadd.f32 %v6013_v55, %v5261_v21  ;;  %v6017_v20 = vld [vmem:[#allocation13_spill] sm:$0xff]  ;;  %6021 = vst [vmem:[#allocation24_spill] sm:$0xff] %v5311_v26  ;;  %v6028_v31 = vld [vmem:[#allocation19_spill] sm:$0xff] }
 0x1fd   : > { %6002 = vst [vmem:[#allocation47_spill] sm:$0xff] %v5271_v35  ;;  %6003 = vst [vmem:[#allocation48_spill] sm:$0xff] %v5273_v43  ;;  %2713 = vmatprep.subr.mxu1 %v2570_v61  ;;  %2784 = vmatprep.subr.mxu0 %v2572_v18  ;;  %v2543_v44 = vmax.f32 %v1464_v30, 0.0  ;;  %v2545_v53 = vmax.f32 %v1625_v60, 0.0  ;;  %v1448_v47 = vadd.f32 %v6015_v7, %v5275_v11  ;;  %v2531_v46 = vmax.f32 %v1460_v50, 0.0  ;;  %v6018_v61 = vld [vmem:[#allocation21_spill] sm:$0xff] }
 0x1fe   : > { %v5285_v62 = vpop.f32.mrf.mxu0  ;;  %v5287_v52 = vpop.f32.mrf.mxu1  ;;  %2714 = vmatpush1.msra.mxu1 %v2569_v15  ;;  %2785 = vmatpush1.msra.mxu0 %v2571_v5  ;;  %v1609_v14 = vadd.f32 %v6016_v36, %v5275_v11  ;;  %v2533_v4 = vmax.f32 %v1621_v23, 0.0  ;;  %v1446_v58 = vadd.f32 %v6017_v20, %v5275_v11  ;;  %v1607_v18 = vadd.f32 %v6018_v61, %v5275_v11  ;;  %v6022_v50 = vld [vmem:[#allocation12_spill] sm:$0xff]  ;;  %v6030_v7 = vld [vmem:[#allocation18_spill] sm:$0xff] }
 0x1ff   : > { %6008 = vst [vmem:[#allocation30_spill] sm:$0xff] %v5285_v62  ;;  %6009 = vst [vmem:[#allocation28_spill] sm:$0xff] %v5287_v52  ;;  %2715 = vmatprep.subr.mxu1 %v2557_v2  ;;  %2786 = vmatprep.subr.mxu0 %v2559_v57  ;;  %v2530_v30 = vmax.f32 %v1458_v40, 0.0  ;;  %v2532_v60 = vmax.f32 %v1619_v42, 0.0  ;;  %v1442_v23 = vadd.f32 %v6022_v50, %v5297_v32  ;;  %v6023_v2 = vld [vmem:[#allocation14_spill] sm:$0xff]  ;;  %v2518_v10 = vmax.f32 %v1454_v6, 0.0 }
 0x200   : > { %2716 = vmatpush1.msra.mxu1 %v2556_v45  ;;  %2787 = vmatpush1.msra.mxu0 %v2558_v24  ;;  %v1603_v57 = vadd.f32 %v6023_v2, %v5297_v32  ;;  %v2520_v34 = vmax.f32 %v1615_v51, 0.0  ;;  %v6024_v40 = vld [vmem:[#allocation11_spill] sm:$0xff]  ;;  %v6025_v45 = vld [vmem:[#allocation20_spill] sm:$0xff]  ;;  %v2517_v37 = vmax.f32 %v1452_v25, 0.0  ;;  %v2519_v0 = vmax.f32 %v1613_v13, 0.0  ;;  %v6031_v13 = vld [vmem:[#allocation17_spill] sm:$0xff] }
 0x201   : > { %2717 = vmatprep.subr.mxu1 %v2544_v19  ;;  %2788 = vmatprep.subr.mxu0 %v2546_v54  ;;  %v1440_v42 = vadd.f32 %v6024_v40, %v5297_v32  ;;  %v1601_v24 = vadd.f32 %v6025_v45, %v5297_v32  ;;  %v1436_v6 = vadd.f32 %v6028_v31, %v5311_v26  ;;  %v6029_v51 = vld [vmem:[#allocation16_spill] sm:$0xff]  ;;  %v2492_v20 = vmax.f32 %v1442_v23, 0.0 }
 0x202   : > { %v5307_v15 = vpop.f32.mrf.mxu0  ;;  %v5309_v5 = vpop.f32.mrf.mxu1  ;;  %2718 = vmatpush1.msra.mxu1 %v2543_v44  ;;  %2789 = vmatpush1.msra.mxu0 %v2545_v53  ;;  %v1597_v55 = vadd.f32 %v6029_v51, %v5311_v26  ;;  %v2505_v44 = vmax.f32 %v1448_v47, 0.0  ;;  %v2507_v53 = vmax.f32 %v1609_v14, 0.0  ;;  %v1434_v25 = vadd.f32 %v6030_v7, %v5311_v26  ;;  %v6038_v11 = vld [vmem:[#allocation32_spill] sm:$0xff] }
 0x203   : > { %6019 = vst [vmem:[#allocation26_spill] sm:$0xff] %v5307_v15  ;;  %6020 = vst [vmem:[#allocation27_spill] sm:$0xff] %v5309_v5  ;;  %2719 = vmatprep.subr.mxu1 %v2531_v46  ;;  %2790 = vmatprep.subr.mxu0 %v2533_v4  ;;  %v1595_v36 = vadd.f32 %v6031_v13, %v5311_v26  ;;  %v2504_v46 = vmax.f32 %v1446_v58, 0.0  ;;  %v2506_v4 = vmax.f32 %v1607_v18, 0.0  ;;  %v2494_v61 = vmax.f32 %v1603_v57, 0.0 }
 0x204   : > { %v5321_v19 = vpop.f32.mrf.mxu0  ;;  %v5323_v54 = vpop.f32.mrf.mxu1  ;;  %2720 = vmatpush1.msra.mxu1 %v2530_v30  ;;  %2791 = vmatpush1.msra.mxu0 %v2532_v60  ;;  %v2491_v30 = vmax.f32 %v1440_v42, 0.0  ;;  %v2493_v60 = vmax.f32 %v1601_v24, 0.0  ;;  %v2479_v50 = vmax.f32 %v1436_v6, 0.0  ;;  %v2481_v2 = vmax.f32 %v1597_v55, 0.0  ;;  %v5344_v57 = vld [vmem:[%s5872_s6] sm:$0x1] }
 0x205   : > { %6026 = vst [vmem:[#allocation25_spill] sm:$0xff] %v5321_v19  ;;  %6027 = vst [vmem:[#allocation22_spill] sm:$0xff] %v5323_v54  ;;  %2721 = vmatprep.subr.mxu1 %v2518_v10  ;;  %2792 = vmatprep.subr.mxu0 %v2520_v34  ;;  %v2478_v58 = vmax.f32 %v1434_v25, 0.0  ;;  %v2480_v18 = vmax.f32 %v1595_v36, 0.0  ;;  %v6036_v42 = vmov 0.0  }
 0x206   : > { %2722 = vmatpush1.msra.mxu1 %v2517_v37  ;;  %2793 = vmatpush1.msra.mxu0 %v2519_v0  ;;  %6035 = vst [vmem:[#allocation12_spill] sm:$0xff] %v5344_v57 }
 0x207   : > { %2723 = vmatprep.subr.mxu1 %v2505_v44  ;;  %2794 = vmatprep.subr.mxu0 %v2507_v53 }
 0x208   : > { %v5333_v47 = vpop.f32.mrf.mxu0  ;;  %v5335_v14 = vpop.f32.mrf.mxu1  ;;  %2724 = vmatpush1.msra.mxu1 %v2504_v46  ;;  %2795 = vmatpush1.msra.mxu0 %v2506_v4 }
 0x209   : > { %6032 = vst [vmem:[#allocation23_spill] sm:$0xff] %v5333_v47  ;;  %6033 = vst [vmem:[#allocation13_spill] sm:$0xff] %v5335_v14  ;;  %2725 = vmatprep.subr.mxu1 %v2492_v20  ;;  %2796 = vmatprep.subr.mxu0 %v2494_v61 }
 0x20a   : > { %v5337_v10 = vpop.f32.mrf.mxu0  ;;  %v5339_v23 = vpop.f32.mrf.mxu1  ;;  %2726 = vmatpush1.msra.mxu1 %v2491_v30  ;;  %2797 = vmatpush1.msra.mxu0 %v2493_v60 }
 0x20b   : > { %6034 = vst [vmem:[#allocation21_spill] sm:$0xff] %v5339_v23  ;;  %2727 = vmatprep.subr.mxu1 %v2479_v50  ;;  %2798 = vmatprep.subr.mxu0 %v2481_v2 }
 0x20c   : > { %2728 = vmatpush1.msra.mxu1 %v2478_v58  ;;  %2799 = vmatpush1.msra.mxu0 %v2480_v18 }
 0x20d   : > { %2762 = vmatmul.mubr.f32.vlgmr.msra.gmra.mxu1 %v5344_v57  ;;  %2833 = vmatmul.mubr.f32.vlgmr.msra.gmra.mxu0 %v5344_v57 }
 0x20e   : > { %v5348_v34 = vpop.f32.mrf.mxu0  ;;  %v5350_v40 = vpop.f32.mrf.mxu1  ;;  %2903 = vmatprep.mubr.f32.mxu1 %v6036_v42  ;;  %2974 = vmatprep.mubr.f32.mxu0 %v6036_v42 }
 0x210   : > { %v5354_v45 = vpop.f32.mrf.mxu0  ;;  %v5356_v24 = vpop.f32.mrf.mxu1 }
 0x214   : > { %v5358_v37 = vpop.f32.mrf.mxu0  ;;  %v5360_v0 = vpop.f32.mrf.mxu1 }
 0x216   : > { %v5362_v31 = vpop.f32.mrf.mxu0  ;;  %v5364_v6 = vpop.f32.mrf.mxu1 }
 0x219   : > { %v5366_v51 = vpop.f32.mrf.mxu0 }
 0x21a   : > { %v5368_v55 = vpop.f32.mrf.mxu1 }
 0x21b   : > { %v5370_v44 = vpop.f32.mrf.mxu0 }
 0x21c   : > { %v5372_v53 = vpop.f32.mrf.mxu1 }
 0x21d   : > { %v5374_v7 = vpop.f32.mrf.mxu0 }
 0x21e   : > { %v5376_v25 = vpop.f32.mrf.mxu1 }
 0x21f   : > { %v5378_v13 = vpop.f32.mrf.mxu0 }
 0x220   : > { %v5380_v36 = vpop.f32.mrf.mxu1 }
 0x221   : > { %v5382_v46 = vpop.f32.mrf.mxu0 }
 0x222   : > { %v5384_v4 = vpop.f32.mrf.mxu1 }
 0x223   : > { %v5386_v20 = vpop.f32.mrf.mxu0 }
 0x224   : > { %v5388_v61 = vpop.f32.mrf.mxu1 }
 0x225   : > { %v1821_v30 = vpop.f32.mrf.mxu0 }
 0x226   : > { %v5390_v60 = vpop.f32.mrf.mxu1 }
 0x227   : > { %v1823_v50 = vpop.f32.mrf.mxu0 }
 0x228   : > { %v1984_v2 = vpop.f32.mrf.mxu1 }
 0x229   : > { %v1827_v58 = vpop.f32.mrf.mxu0 }
 0x22a   : > { %v1988_v18 = vpop.f32.mrf.mxu1 }
 0x22b   : > { %v1829_v42 = vpop.f32.mrf.mxu0 }
 0x22c   : > { %v1990_v57 = vpop.f32.mrf.mxu1 }
 0x22d   : > { %v1833_v28 = vpop.f32.mrf.mxu0 }
 0x22e   : > { %v1994_v12 = vpop.f32.mrf.mxu1 }
 0x22f   : > { %v1835_v49 = vpop.f32.mrf.mxu0 }
 0x230   : > { %v1996_v26 = vpop.f32.mrf.mxu1  ;;  %v1836_v19 = vadd.f32 %v1835_v49, %v5155_v3 }
 0x231   : > { %v1839_v56 = vpop.f32.mrf.mxu0 }
 0x232   : > { %v2000_v59 = vpop.f32.mrf.mxu1  ;;  %v1840_v21 = vadd.f32 %v1839_v56, %v6038_v11 }
 0x233   : > { %v1841_v29 = vpop.f32.mrf.mxu0 }
 0x234   : > { %v2002_v41 = vpop.f32.mrf.mxu1  ;;  %v1842_v52 = vadd.f32 %v1841_v29, %v6038_v11  ;;  %v1834_v29 = vadd.f32 %v1833_v28, %v5155_v3  ;;  %v2664_v28 = vmax.f32 %v1840_v21, 0.0 }
 0x235   : > { %v1845_v32 = vpop.f32.mrf.mxu0  ;;  %v2003_v54 = vadd.f32 %v2002_v41, %v6038_v11  ;;  %v1830_v41 = vadd.f32 %v1829_v42, %v5157_v27  ;;  %v1818_v42 = vadd.f32 %v5386_v20, %v5161_v39  ;;  %v1812_v20 = vadd.f32 %v5378_v13, %v5165_v33 }
 0x236   : > { %v2006_v8 = vpop.f32.mrf.mxu1  ;;  %v1846_v43 = vadd.f32 %v1845_v32, %v6037_v63  ;;  %v2001_v32 = vadd.f32 %v2000_v59, %v6038_v11  ;;  %v1828_v59 = vadd.f32 %v1827_v58, %v5157_v27  ;;  %v2651_v21 = vmax.f32 %v1834_v29, 0.0 }
 0x237   : > { %v1847_v1 = vpop.f32.mrf.mxu0  ;;  %v2007_v35 = vadd.f32 %v2006_v8, %v6037_v63  ;;  %v1806_v13 = vadd.f32 %v5370_v44, %v5177_v9  ;;  %v1800_v44 = vadd.f32 %v5362_v31, %v5191_v38  ;;  %v1794_v31 = vadd.f32 %v5354_v45, %v5203_v17 }
 0x238   : > { %v1848_v5 = vadd.f32 %v1847_v1, %v6037_v63  ;;  %v2008_v62 = vpop.f32.mrf.mxu1  ;;  %v1997_v1 = vadd.f32 %v1996_v26, %v5155_v3  ;;  %v2677_v8 = vmax.f32 %v1846_v43, 0.0  ;;  %v1989_v26 = vadd.f32 %v1988_v18, %v5157_v27 }
 0x239   : > { %v2009_v15 = vadd.f32 %v2008_v62, %v6037_v63  ;;  %v5399_v14 = vpop.f32.mrf.mxu0  ;;  %v1995_v62 = vadd.f32 %v1994_v12, %v5155_v3  ;;  %v2679_v63 = vmax.f32 %v2007_v35, 0.0  ;;  %v2652_v12 = vmax.f32 %v1836_v19, 0.0 }
 0x23a   : > { %6039 = vst [vmem:[#allocation14_spill] sm:$0xff] %v5399_v14  ;;  %v2678_v48 = vmax.f32 %v1848_v5, 0.0  ;;  %v5403_v23 = vpop.f32.mrf.mxu1  ;;  %v2665_v14 = vmax.f32 %v1842_v52, 0.0  ;;  %v1991_v5 = vadd.f32 %v1990_v57, %v5157_v27  ;;  %v2666_v52 = vmax.f32 %v2001_v32, 0.0 }
 0x23b   : > { %6040 = vst [vmem:[#allocation11_spill] sm:$0xff] %v5403_v23  ;;  %v2680_v47 = vmax.f32 %v2009_v15, 0.0  ;;  %v5407_v56 = vpop.f32.mrf.mxu0  ;;  %v2667_v23 = vmax.f32 %v2003_v54, 0.0  ;;  %v1824_v15 = vadd.f32 %v1823_v50, %v5159_v22  ;;  %v1985_v57 = vadd.f32 %v1984_v2, %v5159_v22 }
 0x23c   : > { %6041 = vst [vmem:[#allocation20_spill] sm:$0xff] %v5407_v56  ;;  %v5411_v49 = vpop.f32.mrf.mxu1  ;;  %2839 = vmatprep.subr.mxu1 %v2678_v48  ;;  %v1822_v48 = vadd.f32 %v1821_v30, %v5159_v22  ;;  %v2654_v54 = vmax.f32 %v1997_v1, 0.0  ;;  %v1983_v19 = vadd.f32 %v5390_v60, %v5159_v22  ;;  %v2639_v50 = vmax.f32 %v1830_v41, 0.0 }
 0x23d   : > { %6042 = vst [vmem:[#allocation19_spill] sm:$0xff] %v5411_v49  ;;  %2910 = vmatprep.subr.mxu0 %v2680_v47  ;;  %v5415_v43 = vpop.f32.mrf.mxu0  ;;  %2840 = vmatpush1.msra.mxu1 %v2677_v8  ;;  %v2653_v58 = vmax.f32 %v1995_v62, 0.0  ;;  %v2638_v30 = vmax.f32 %v1828_v59, 0.0  ;;  %v2641_v2 = vmax.f32 %v1991_v5, 0.0  ;;  %v1977_v60 = vadd.f32 %v5384_v4, %v5161_v39 }
 0x23e   : > { %6043 = vst [vmem:[#allocation16_spill] sm:$0xff] %v5415_v43  ;;  %v5419_v35 = vpop.f32.mrf.mxu1  ;;  %2911 = vmatpush1.msra.mxu0 %v2679_v63  ;;  %2841 = vmatprep.subr.mxu1 %v2665_v14  ;;  %v1816_v14 = vadd.f32 %v5382_v46, %v5161_v39  ;;  %v2626_v32 = vmax.f32 %v1824_v15, 0.0  ;;  %v2640_v29 = vmax.f32 %v1989_v26, 0.0  ;;  %v1810_v46 = vadd.f32 %v5374_v7, %v5165_v33 }
 0x23f   : > { %6044 = vst [vmem:[#allocation18_spill] sm:$0xff] %v5419_v35  ;;  %2912 = vmatprep.subr.mxu0 %v2667_v23  ;;  %v5423_v47 = vpop.f32.mrf.mxu0  ;;  %2842 = vmatpush1.msra.mxu1 %v2664_v28  ;;  %v1979_v23 = vadd.f32 %v5388_v61, %v5161_v39  ;;  %v1973_v61 = vadd.f32 %v5380_v36, %v5165_v33  ;;  %v2625_v8 = vmax.f32 %v1822_v48, 0.0  ;;  %v2628_v41 = vmax.f32 %v1985_v57, 0.0 }
 0x240   : > { %6045 = vst [vmem:[#allocation17_spill] sm:$0xff] %v5423_v47  ;;  %v5429_v63 = vpop.f32.mrf.mxu1  ;;  %2913 = vmatpush1.msra.mxu0 %v2666_v52  ;;  %2843 = vmatprep.subr.mxu1 %v2652_v12  ;;  %v1971_v4 = vadd.f32 %v5376_v25, %v5165_v33  ;;  %v2613_v59 = vmax.f32 %v1818_v42, 0.0  ;;  %v2627_v5 = vmax.f32 %v1983_v19, 0.0  ;;  %v1804_v7 = vadd.f32 %v5366_v51, %v5177_v9 }
 0x241   : > { %6046 = vst [vmem:[#allocation32_spill] sm:$0xff] %v5429_v63  ;;  %2914 = vmatprep.subr.mxu0 %v2654_v54  ;;  %v5435_v18 = vpop.f32.mrf.mxu0  ;;  %2844 = vmatpush1.msra.mxu1 %v2651_v21  ;;  %v1967_v36 = vadd.f32 %v5372_v53, %v5177_v9  ;;  %v2612_v15 = vmax.f32 %v1816_v14, 0.0  ;;  %v2615_v26 = vmax.f32 %v1979_v23, 0.0  ;;  %v1965_v25 = vadd.f32 %v5368_v55, %v5177_v9 }
 0x242   : > { %6047 = vst [vmem:[#allocation50_spill] sm:$0xff] %v5435_v18  ;;  %v5441_v1 = vpop.f32.mrf.mxu1  ;;  %2915 = vmatpush1.msra.mxu0 %v2653_v58  ;;  %2845 = vmatprep.subr.mxu1 %v2639_v50  ;;  %v2600_v52 = vmax.f32 %v1812_v20, 0.0  ;;  %v2614_v48 = vmax.f32 %v1977_v60, 0.0  ;;  %v1798_v51 = vadd.f32 %v5358_v37, %v5191_v38  ;;  %v1961_v53 = vadd.f32 %v5364_v6, %v5191_v38 }
 0x243   : > { %6048 = vst [vmem:[#allocation51_spill] sm:$0xff] %v5441_v1  ;;  %2916 = vmatprep.subr.mxu0 %v2641_v2  ;;  %v5447_v62 = vpop.f32.mrf.mxu0  ;;  %2846 = vmatpush1.msra.mxu1 %v2638_v30  ;;  %v2599_v21 = vmax.f32 %v1810_v46, 0.0  ;;  %v2602_v54 = vmax.f32 %v1973_v61, 0.0  ;;  %v1959_v55 = vadd.f32 %v5360_v0, %v5191_v38  ;;  %v2587_v19 = vmax.f32 %v1806_v13, 0.0  ;;  %v6062_v13 = vld [vmem:[#allocation13_spill] sm:$0xff] }
 0x244   : > { %6049 = vst [vmem:[#allocation52_spill] sm:$0xff] %v5447_v62  ;;  %v5453_v28 = vpop.f32.mrf.mxu1  ;;  %2917 = vmatpush1.msra.mxu0 %v2640_v29  ;;  %2847 = vmatprep.subr.mxu1 %v2626_v32  ;;  %v2601_v50 = vmax.f32 %v1971_v4, 0.0  ;;  %v1792_v37 = vadd.f32 %v5348_v34, %v5203_v17  ;;  %v1955_v6 = vadd.f32 %v5356_v24, %v5203_v17  ;;  %v2586_v14 = vmax.f32 %v1804_v7, 0.0  ;;  %v6057_v34 = vld [vmem:[#allocation23_spill] sm:$0xff]  ;;  %v6058_v32 = vld [vmem:[#allocation21_spill] sm:$0xff] }
 0x245   : > { %6050 = vst [vmem:[#allocation53_spill] sm:$0xff] %v5453_v28  ;;  %2918 = vmatprep.subr.mxu0 %v2628_v41  ;;  %v5459_v12 = vpop.f32.mrf.mxu0  ;;  %2848 = vmatpush1.msra.mxu1 %v2625_v8  ;;  %v2589_v23 = vmax.f32 %v1967_v36, 0.0  ;;  %v1788_v45 = vadd.f32 %v5337_v10, %v5225_v16  ;;  %v1953_v0 = vadd.f32 %v5350_v40, %v5203_v17  ;;  %v2574_v2 = vmax.f32 %v1800_v44, 0.0  ;;  %v6060_v10 = vld [vmem:[#allocation43_spill] sm:$0xff]  ;;  %v6061_v40 = vld [vmem:[#allocation25_spill] sm:$0xff]  ;;  %v6064_v36 = vld [vmem:[#allocation26_spill] sm:$0xff] }
 0x246   : > { %6051 = vst [vmem:[#allocation54_spill] sm:$0xff] %v5459_v12  ;;  %v5465_v57 = vpop.f32.mrf.mxu1  ;;  %2919 = vmatpush1.msra.mxu0 %v2627_v5  ;;  %2849 = vmatprep.subr.mxu1 %v2613_v59  ;;  %v2588_v20 = vmax.f32 %v1965_v25, 0.0  ;;  %v1786_v24 = vadd.f32 %v6057_v34, %v5225_v16  ;;  %v1949_v29 = vadd.f32 %v6058_v32, %v5225_v16  ;;  %v2573_v46 = vmax.f32 %v1798_v51, 0.0  ;;  %v6067_v51 = vld [vmem:[#allocation46_spill] sm:$0xff]  ;;  %v6073_v32 = vld [vmem:[#allocation49_spill] sm:$0xff] }
 0x247   : > { %6052 = vst [vmem:[#allocation55_spill] sm:$0xff] %v5465_v57  ;;  %2920 = vmatprep.subr.mxu0 %v2615_v26  ;;  %v5471_v42 = vpop.f32.mrf.mxu0  ;;  %2850 = vmatpush1.msra.mxu1 %v2612_v15  ;;  %v2576_v61 = vmax.f32 %v1961_v53, 0.0  ;;  %v1782_v41 = vadd.f32 %v6061_v40, %v6060_v10  ;;  %v1947_v4 = vadd.f32 %v6062_v13, %v5225_v16  ;;  %v2561_v59 = vmax.f32 %v1794_v31, 0.0  ;;  %v6065_v26 = vld [vmem:[#allocation22_spill] sm:$0xff]  ;;  %v6092_v57 = vld [vmem:[#allocation31_spill] sm:$0xff] }
 0x248   : > { %6053 = vst [vmem:[#allocation56_spill] sm:$0xff] %v5471_v42  ;;  %v5477_v58 = vpop.f32.mrf.mxu1  ;;  %2921 = vmatpush1.msra.mxu0 %v2614_v48  ;;  %2851 = vmatprep.subr.mxu1 %v2600_v52  ;;  %v2575_v5 = vmax.f32 %v1959_v55, 0.0  ;;  %v1780_v15 = vadd.f32 %v6064_v36, %v6060_v10  ;;  %v1943_v44 = vadd.f32 %v6065_v26, %v6060_v10  ;;  %v2560_v25 = vmax.f32 %v1792_v37, 0.0  ;;  %v6068_v53 = vld [vmem:[#allocation30_spill] sm:$0xff] }
 0x249   : > { %6054 = vst [vmem:[#allocation57_spill] sm:$0xff] %v5477_v58  ;;  %2922 = vmatprep.subr.mxu0 %v2602_v54  ;;  %v5483_v30 = vpop.f32.mrf.mxu0  ;;  %2852 = vmatpush1.msra.mxu1 %v2599_v21  ;;  %v2563_v52 = vmax.f32 %v1955_v6, 0.0  ;;  %v1776_v21 = vadd.f32 %v6068_v53, %v6067_v51  ;;  %v6069_v54 = vld [vmem:[#allocation27_spill] sm:$0xff]  ;;  %v2548_v55 = vmax.f32 %v1788_v45, 0.0  ;;  %v6072_v6 = vld [vmem:[#allocation28_spill] sm:$0xff]  ;;  %v2535_v40 = vmax.f32 %v1782_v41, 0.0 }
 0x24a   : > { %6055 = vst [vmem:[#allocation58_spill] sm:$0xff] %v5483_v30  ;;  %v5489_v60 = vpop.f32.mrf.mxu1  ;;  %2923 = vmatpush1.msra.mxu0 %v2601_v50  ;;  %2853 = vmatprep.subr.mxu1 %v2587_v19  ;;  %v1941_v31 = vadd.f32 %v6069_v54, %v6060_v10  ;;  %v2562_v19 = vmax.f32 %v1953_v0, 0.0  ;;  %v6075_v0 = vld [vmem:[#allocation48_spill] sm:$0xff]  ;;  %v2549_v13 = vmax.f32 %v1947_v4, 0.0  ;;  %v2534_v26 = vmax.f32 %v1780_v15, 0.0  ;;  %v6079_v53 = vld [vmem:[#allocation29_spill] sm:$0xff] }
 0x24b   : > { %6056 = vst [vmem:[#allocation59_spill] sm:$0xff] %v5489_v60  ;;  %2924 = vmatprep.subr.mxu0 %v2589_v23  ;;  %v5495_v8 = vpop.f32.mrf.mxu0  ;;  %2854 = vmatpush1.msra.mxu1 %v2586_v14  ;;  %v6071_v14 = vld [vmem:[#allocation47_spill] sm:$0xff]  ;;  %v1937_v23 = vadd.f32 %v6072_v6, %v6067_v51  ;;  %v6081_v4 = vld [vmem:[#allocation42_spill] sm:$0xff] }
 0x24c   : > { %6059 = vst [vmem:[#allocation23_spill] sm:$0xff] %v5495_v8  ;;  %v5501_v7 = vpop.f32.mrf.mxu1  ;;  %2925 = vmatpush1.msra.mxu0 %v2588_v20  ;;  %2855 = vmatprep.subr.mxu1 %v2574_v2  ;;  %v1774_v37 = vadd.f32 %v6071_v14, %v6067_v51  ;;  %v2547_v2 = vmax.f32 %v1786_v24, 0.0  ;;  %v2550_v20 = vmax.f32 %v1949_v29, 0.0  ;;  %v6078_v29 = vld [vmem:[#allocation45_spill] sm:$0xff]  ;;  %v6080_v54 = vld [vmem:[#allocation39_spill] sm:$0xff]  ;;  %v1929_v14 = vadd.f32 %v6081_v4, %v6073_v32 }
 0x24d   : > { %6063 = vst [vmem:[#allocation21_spill] sm:$0xff] %v5501_v7  ;;  %2926 = vmatprep.subr.mxu0 %v2576_v61  ;;  %v5507_v48 = vpop.f32.mrf.mxu0  ;;  %2856 = vmatpush1.msra.mxu1 %v2573_v46  ;;  %v6074_v46 = vld [vmem:[#allocation44_spill] sm:$0xff]  ;;  %v1935_v61 = vadd.f32 %v6075_v0, %v6067_v51  ;;  %v1931_v36 = vadd.f32 %v6078_v29, %v6073_v32 }
 0x24e   : > { %6066 = vst [vmem:[#allocation25_spill] sm:$0xff] %v5507_v48  ;;  %v5513_v50 = vpop.f32.mrf.mxu1  ;;  %2927 = vmatpush1.msra.mxu0 %v2575_v5  ;;  %2857 = vmatprep.subr.mxu1 %v2561_v59  ;;  %v1770_v45 = vadd.f32 %v6074_v46, %v6073_v32  ;;  %v6077_v5 = vld [vmem:[#allocation41_spill] sm:$0xff]  ;;  %v1764_v41 = vadd.f32 %v6080_v54, %v6079_v53  ;;  %v2521_v0 = vmax.f32 %v1774_v37, 0.0  ;;  %v6084_v29 = vld [vmem:[#allocation24_spill] sm:$0xff]  ;;  %v6085_v54 = vld [vmem:[#allocation35_spill] sm:$0xff] }
 0x24f   : > { %6070 = vst [vmem:[#allocation13_spill] sm:$0xff] %v5513_v50  ;;  %2928 = vmatprep.subr.mxu0 %v2563_v52  ;;  %v5519_v34 = vpop.f32.mrf.mxu0  ;;  %2858 = vmatpush1.msra.mxu1 %v2560_v25  ;;  %v1768_v24 = vadd.f32 %v6077_v5, %v6073_v32  ;;  %v2537_v25 = vmax.f32 %v1943_v44, 0.0  ;;  %v6082_v46 = vld [vmem:[#allocation37_spill] sm:$0xff]  ;;  %v6083_v44 = vld [vmem:[#allocation40_spill] sm:$0xff] }
 0x250   : > { %v5525_v59 = vpop.f32.mrf.mxu1  ;;  %2929 = vmatpush1.msra.mxu0 %v2562_v19  ;;  %2859 = vmatprep.subr.mxu1 %v2548_v55  ;;  %v2522_v19 = vmax.f32 %v1776_v21, 0.0  ;;  %v2536_v55 = vmax.f32 %v1941_v31, 0.0  ;;  %v1762_v15 = vadd.f32 %v6082_v46, %v6079_v53  ;;  %v1758_v21 = vadd.f32 %v6085_v54, %v6084_v29  ;;  %v6086_v31 = vld [vmem:[#allocation38_spill] sm:$0xff]  ;;  %v6087_v46 = vld [vmem:[#allocation33_spill] sm:$0xff] }
 0x251   : > { %6076 = vst [vmem:[#allocation26_spill] sm:$0xff] %v5525_v59  ;;  %2930 = vmatprep.subr.mxu0 %v2550_v20  ;;  %v5531_v52 = vpop.f32.mrf.mxu0  ;;  %2860 = vmatpush1.msra.mxu1 %v2547_v2  ;;  %v1925_v20 = vadd.f32 %v6083_v44, %v6079_v53  ;;  %v2524_v2 = vmax.f32 %v1937_v23, 0.0  ;;  %v1923_v4 = vadd.f32 %v6086_v31, %v6079_v53  ;;  %v6088_v23 = vld [vmem:[#allocation36_spill] sm:$0xff]  ;;  %v2508_v44 = vmax.f32 %v1768_v24, 0.0  ;;  %v6089_v54 = vld [vmem:[#allocation34_spill] sm:$0xff] }
 0x252   : > { %v5537_v6 = vpop.f32.mrf.mxu1  ;;  %2931 = vmatpush1.msra.mxu0 %v2549_v13  ;;  %2861 = vmatprep.subr.mxu1 %v2535_v40  ;;  %v2509_v13 = vmax.f32 %v1770_v45, 0.0  ;;  %v2523_v40 = vmax.f32 %v1935_v61, 0.0  ;;  %v1756_v37 = vadd.f32 %v6087_v46, %v6084_v29  ;;  %v1917_v45 = vadd.f32 %v6089_v54, %v6084_v29 }
 0x253   : > { %2932 = vmatprep.subr.mxu0 %v2537_v25  ;;  %v5543_v5 = vpop.f32.mrf.mxu0  ;;  %2862 = vmatpush1.msra.mxu1 %v2534_v26  ;;  %v1919_v25 = vadd.f32 %v6088_v23, %v6084_v29  ;;  %v2511_v26 = vmax.f32 %v1931_v36, 0.0  ;;  %v2496_v61 = vmax.f32 %v1764_v41, 0.0  ;;  %v2510_v31 = vmax.f32 %v1929_v14, 0.0 }
 0x254   : > { %v5549_v49 = vpop.f32.mrf.mxu1  ;;  %2933 = vmatpush1.msra.mxu0 %v2536_v55  ;;  %2863 = vmatprep.subr.mxu1 %v2522_v19  ;;  %v2495_v19 = vmax.f32 %v1762_v15, 0.0  ;;  %v2498_v55 = vmax.f32 %v1925_v20, 0.0  ;;  %v2483_v24 = vmax.f32 %v1758_v21, 0.0  ;;  %v2497_v36 = vmax.f32 %v1923_v4, 0.0  ;;  %v6090_v21 = vld [vmem:[#allocation12_spill] sm:$0xff] }
 0x255   : > { %2934 = vmatprep.subr.mxu0 %v2524_v2  ;;  %v5555_v35 = vpop.f32.mrf.mxu0  ;;  %2864 = vmatpush1.msra.mxu1 %v2521_v0  ;;  %v2482_v0 = vmax.f32 %v1756_v37, 0.0  ;;  %v2485_v23 = vmax.f32 %v1919_v25, 0.0  ;;  %v2484_v14 = vmax.f32 %v1917_v45, 0.0 }
 0x256   : > { %v5559_v56 = vpop.f32.mrf.mxu1  ;;  %2935 = vmatpush1.msra.mxu0 %v2523_v40  ;;  %2865 = vmatprep.subr.mxu1 %v2509_v13  ;;  %v6091_v40 = vmov 0.0  }
 0x257   : > { %2936 = vmatprep.subr.mxu0 %v2511_v26  ;;  %v5561_v46 = vpop.f32.mrf.mxu0  ;;  %2866 = vmatpush1.msra.mxu1 %v2508_v44 }
 0x258   : > { %v5563_v2 = vpop.f32.mrf.mxu1  ;;  %2937 = vmatpush1.msra.mxu0 %v2510_v31  ;;  %2867 = vmatprep.subr.mxu1 %v2496_v61 }
 0x259   : > { %2938 = vmatprep.subr.mxu0 %v2498_v55  ;;  %v5565_v41 = vpop.f32.mrf.mxu0  ;;  %2868 = vmatpush1.msra.mxu1 %v2495_v19 }
 0x25a   : > { %v5567_v13 = vpop.f32.mrf.mxu1  ;;  %2939 = vmatpush1.msra.mxu0 %v2497_v36  ;;  %2869 = vmatprep.subr.mxu1 %v2483_v24 }
 0x25b   : > { %2940 = vmatprep.subr.mxu0 %v2485_v23  ;;  %v5569_v15 = vpop.f32.mrf.mxu0  ;;  %2870 = vmatpush1.msra.mxu1 %v2482_v0 }
 0x25c   : > { %v5571_v20 = vpop.f32.mrf.mxu1  ;;  %2941 = vmatpush1.msra.mxu0 %v2484_v14  ;;  %2904 = vmatmul.mubr.f32.vlgmr.msra.gmra.mxu1 %v6090_v21 }
 0x25d   : > { %2975 = vmatmul.mubr.f32.vlgmr.msra.gmra.mxu0 %v6090_v21  ;;  %v5575_v4 = vpop.f32.mrf.mxu0  ;;  %3045 = vmatprep.mubr.f32.mxu1 %v6091_v40 }
 0x25e   : > { %v5578_v37 = vpop.f32.mrf.mxu1  ;;  %3116 = vmatprep.mubr.f32.mxu0 %v6091_v40 }
 0x25f   : > { %v5581_v25 = vpop.f32.mrf.mxu0 }
 0x260   : > { %v5583_v44 = vpop.f32.mrf.mxu1 }
 0x261   : > { %v5585_v26 = vpop.f32.mrf.mxu0 }
 0x262   : > { %v5587_v54 = vpop.f32.mrf.mxu1 }
 0x263   : > { %v5589_v45 = vpop.f32.mrf.mxu0 }
 0x264   : > { %v5591_v61 = vpop.f32.mrf.mxu1 }
 0x265   : > { %v2143_v31 = vpop.f32.mrf.mxu0 }
 0x266   : > { %v2304_v19 = vpop.f32.mrf.mxu1 }
 0x267   : > { %v2145_v55 = vpop.f32.mrf.mxu0 }
 0x268   : > { %v2306_v24 = vpop.f32.mrf.mxu1 }
 0x269   : > { %v2149_v36 = vpop.f32.mrf.mxu0 }
 0x26a   : > { %v2310_v0 = vpop.f32.mrf.mxu1 }
 0x26b   : > { %v2151_v23 = vpop.f32.mrf.mxu0 }
 0x26c   : > { %v2312_v14 = vpop.f32.mrf.mxu1 }
 0x26d   : > { %v2155_v21 = vpop.f32.mrf.mxu0 }
 0x26e   : > { %v2316_v40 = vpop.f32.mrf.mxu1 }
 0x26f   : > { %v2157_v29 = vpop.f32.mrf.mxu0 }
 0x270   : > { %v2318_v63 = vpop.f32.mrf.mxu1  ;;  %v2158_v8 = vadd.f32 %v2157_v29, %v5155_v3  ;;  %v2150_v29 = vadd.f32 %v2149_v36, %v5157_v27 }
 0x271   : > { %v2161_v43 = vpop.f32.mrf.mxu0 }
 0x272   : > { %v2322_v1 = vpop.f32.mrf.mxu1  ;;  %v2162_v51 = vadd.f32 %v2161_v43, %v6038_v11  ;;  %v2152_v43 = vadd.f32 %v2151_v23, %v5157_v27 }
 0x273   : > { %v2163_v47 = vpop.f32.mrf.mxu0 }
 0x274   : > { %v2324_v53 = vpop.f32.mrf.mxu1  ;;  %v2164_v58 = vadd.f32 %v2163_v47, %v6038_v11  ;;  %v2156_v47 = vadd.f32 %v2155_v21, %v5155_v3 }
 0x275   : > { %v2167_v28 = vpop.f32.mrf.mxu0  ;;  %v2325_v7 = vadd.f32 %v2324_v53, %v6038_v11  ;;  %v2317_v53 = vadd.f32 %v2316_v40, %v5155_v3 }
 0x276   : > { %v2328_v18 = vpop.f32.mrf.mxu1  ;;  %v2168_v62 = vadd.f32 %v2167_v28, %v6092_v57  ;;  %v2323_v28 = vadd.f32 %v2322_v1, %v6038_v11  ;;  %v2313_v1 = vadd.f32 %v2312_v14, %v5157_v27 }
 0x277   : > { %v2169_v32 = vpop.f32.mrf.mxu0  ;;  %v2329_v12 = vadd.f32 %v2328_v18, %v6092_v57  ;;  %v2319_v18 = vadd.f32 %v2318_v63, %v5155_v3  ;;  %v2146_v63 = vadd.f32 %v2145_v55, %v5159_v22  ;;  %v2643_v55 = vmax.f32 %v2152_v43, 0.0 }
 0x278   : > { %v2170_v60 = vadd.f32 %v2169_v32, %v6092_v57  ;;  %v2330_v42 = vpop.f32.mrf.mxu1  ;;  %v2681_v59 = vmax.f32 %v2168_v62, 0.0  ;;  %v2311_v62 = vadd.f32 %v2310_v0, %v5157_v27  ;;  %v2670_v23 = vmax.f32 %v2323_v28, 0.0 }
 0x279   : > { %v2331_v30 = vadd.f32 %v2330_v42, %v6092_v57  ;;  %v5600_v50 = vpop.f32.mrf.mxu0  ;;  %v2669_v42 = vmax.f32 %v2164_v58, 0.0  ;;  %v2683_v57 = vmax.f32 %v2329_v12, 0.0  ;;  %v2144_v12 = vadd.f32 %v2143_v31, %v5159_v22 }
 0x27a   : > { %6093 = vst [vmem:[#allocation22_spill] sm:$0xff] %v5600_v50  ;;  %v2682_v10 = vmax.f32 %v2170_v60, 0.0  ;;  %v2668_v60 = vmax.f32 %v2162_v51, 0.0  ;;  %v2671_v50 = vmax.f32 %v2325_v7, 0.0  ;;  %v2307_v58 = vadd.f32 %v2306_v24, %v5159_v22 }
 0x27b   : > { %v2684_v32 = vmax.f32 %v2331_v30, 0.0  ;;  %v5606_v48 = vpop.f32.mrf.mxu0  ;;  %v2656_v30 = vmax.f32 %v2158_v8, 0.0  ;;  %v2658_v40 = vmax.f32 %v2319_v18, 0.0  ;;  %v2140_v51 = vadd.f32 %v5589_v45, %v5161_v39 }
 0x27c   : > { %2981 = vmatprep.subr.mxu1 %v2682_v10  ;;  %v2655_v10 = vmax.f32 %v2156_v47, 0.0  ;;  %v2657_v8 = vmax.f32 %v2317_v53, 0.0  ;;  %v2301_v31 = vadd.f32 %v5591_v61, %v5161_v39  ;;  %v2642_v24 = vmax.f32 %v2150_v29, 0.0 }
 0x27d   : > { %3052 = vmatprep.subr.mxu0 %v2684_v32  ;;  %v5612_v21 = vpop.f32.mrf.mxu0  ;;  %2982 = vmatpush1.msra.mxu1 %v2681_v59  ;;  %v2305_v59 = vadd.f32 %v2304_v19, %v5159_v22  ;;  %v2134_v45 = vadd.f32 %v5581_v25, %v5165_v33  ;;  %v2299_v19 = vadd.f32 %v5587_v54, %v5161_v39  ;;  %v2630_v0 = vmax.f32 %v2146_v63, 0.0 }
 0x27e   : > { %3053 = vmatpush1.msra.mxu0 %v2683_v57  ;;  %2983 = vmatprep.subr.mxu1 %v2669_v42  ;;  %v2138_v57 = vadd.f32 %v5585_v26, %v5161_v39  ;;  %v2644_v14 = vmax.f32 %v2311_v62, 0.0  ;;  %v2132_v26 = vadd.f32 %v5575_v4, %v5165_v33  ;;  %v2295_v61 = vadd.f32 %v5583_v44, %v5165_v33 }
 0x27f   : > { %3054 = vmatprep.subr.mxu0 %v2671_v50  ;;  %v5618_v7 = vpop.f32.mrf.mxu0  ;;  %2984 = vmatpush1.msra.mxu1 %v2668_v60  ;;  %v2645_v50 = vmax.f32 %v2313_v1, 0.0  ;;  %v2629_v28 = vmax.f32 %v2144_v12, 0.0  ;;  %v2632_v47 = vmax.f32 %v2307_v58, 0.0  ;;  %v2128_v25 = vadd.f32 %v5569_v15, %v5177_v9 }
 0x280   : > { %3055 = vmatpush1.msra.mxu0 %v2670_v23  ;;  %2985 = vmatprep.subr.mxu1 %v2656_v30  ;;  %v2293_v54 = vadd.f32 %v5578_v37, %v5165_v33  ;;  %v2617_v32 = vmax.f32 %v2140_v51, 0.0  ;;  %v2631_v43 = vmax.f32 %v2305_v59, 0.0  ;;  %v2126_v4 = vadd.f32 %v5565_v41, %v5177_v9 }
 0x281   : > { %3056 = vmatprep.subr.mxu0 %v2658_v40  ;;  %v5627_v36 = vpop.f32.mrf.mxu0  ;;  %2986 = vmatpush1.msra.mxu1 %v2655_v10  ;;  %v2289_v44 = vadd.f32 %v5571_v20, %v5177_v9  ;;  %v2616_v53 = vmax.f32 %v2138_v57, 0.0  ;;  %v2619_v42 = vmax.f32 %v2301_v31, 0.0  ;;  %v2122_v15 = vadd.f32 %v5561_v46, %v5191_v38 }
 0x282   : > { %3057 = vmatpush1.msra.mxu0 %v2657_v8  ;;  %2987 = vmatprep.subr.mxu1 %v2643_v55  ;;  %v2287_v37 = vadd.f32 %v5567_v13, %v5177_v9  ;;  %v2604_v1 = vmax.f32 %v2134_v45, 0.0  ;;  %v2618_v60 = vmax.f32 %v2299_v19, 0.0  ;;  %v2120_v41 = vadd.f32 %v5555_v35, %v5191_v38 }
 0x283   : > { %3058 = vmatprep.subr.mxu0 %v2645_v50  ;;  %v5637_v18 = vpop.f32.mrf.mxu0  ;;  %2988 = vmatpush1.msra.mxu1 %v2642_v24  ;;  %v2283_v20 = vadd.f32 %v5563_v2, %v5191_v38  ;;  %v2603_v63 = vmax.f32 %v2132_v26, 0.0  ;;  %v2606_v62 = vmax.f32 %v2295_v61, 0.0  ;;  %v2116_v46 = vadd.f32 %v5543_v5, %v5203_v17  ;;  %v6097_v50 = vld [vmem:[#allocation23_spill] sm:$0xff]  ;;  %v6099_v26 = vld [vmem:[#allocation58_spill] sm:$0xff] }
 0x284   : > { %3059 = vmatpush1.msra.mxu0 %v2644_v14  ;;  %2989 = vmatprep.subr.mxu1 %v2630_v0  ;;  %v2281_v13 = vadd.f32 %v5559_v56, %v5191_v38  ;;  %v2591_v23 = vmax.f32 %v2128_v25, 0.0  ;;  %v2605_v12 = vmax.f32 %v2293_v54, 0.0  ;;  %v2114_v35 = vadd.f32 %v5531_v52, %v5203_v17  ;;  %v6094_v52 = vld [vmem:[#allocation25_spill] sm:$0xff] }
 0x285   : > { %3060 = vmatprep.subr.mxu0 %v2632_v47  ;;  %v5647_v29 = vpop.f32.mrf.mxu0  ;;  %2990 = vmatpush1.msra.mxu1 %v2629_v28  ;;  %v2277_v2 = vadd.f32 %v5549_v49, %v5203_v17  ;;  %v2590_v58 = vmax.f32 %v2126_v4, 0.0  ;;  %v2593_v10 = vmax.f32 %v2289_v44, 0.0  ;;  %v2110_v5 = vadd.f32 %v5519_v34, %v5225_v16  ;;  %v6095_v49 = vld [vmem:[#allocation26_spill] sm:$0xff]  ;;  %v6096_v34 = vld [vmem:[#allocation43_spill] sm:$0xff]  ;;  %v6100_v28 = vld [vmem:[#allocation21_spill] sm:$0xff] }
 0x286   : > { %3061 = vmatpush1.msra.mxu0 %v2631_v43  ;;  %2991 = vmatprep.subr.mxu1 %v2617_v32  ;;  %v2275_v56 = vadd.f32 %v5537_v6, %v5203_v17  ;;  %v2578_v51 = vmax.f32 %v2122_v15, 0.0  ;;  %v2592_v59 = vmax.f32 %v2287_v37, 0.0  ;;  %v2108_v55 = vadd.f32 %v6094_v52, %v5225_v16  ;;  %v6098_v6 = vld [vmem:[#allocation13_spill] sm:$0xff]  ;;  %v6101_v43 = vld [vmem:[#allocation46_spill] sm:$0xff]  ;;  %v6102_v4 = vld [vmem:[#allocation56_spill] sm:$0xff] }
 0x287   : > { %3062 = vmatprep.subr.mxu0 %v2619_v42  ;;  %v5657_v30 = vpop.f32.mrf.mxu0  ;;  %2992 = vmatpush1.msra.mxu1 %v2616_v53  ;;  %v2271_v8 = vadd.f32 %v6095_v49, %v5225_v16  ;;  %v2577_v57 = vmax.f32 %v2120_v41, 0.0  ;;  %v2580_v31 = vmax.f32 %v2283_v20, 0.0  ;;  %v2104_v45 = vadd.f32 %v6097_v50, %v6096_v34  ;;  %v6103_v53 = vld [vmem:[#allocation59_spill] sm:$0xff]  ;;  %v6105_v41 = vld [vmem:[#allocation57_spill] sm:$0xff] }
 0x288   : > { %3063 = vmatpush1.msra.mxu0 %v2618_v60  ;;  %2993 = vmatprep.subr.mxu1 %v2604_v1  ;;  %v2269_v19 = vadd.f32 %v6098_v6, %v5225_v16  ;;  %v2565_v0 = vmax.f32 %v2116_v46, 0.0  ;;  %v2579_v14 = vmax.f32 %v2281_v13, 0.0  ;;  %v2102_v61 = vadd.f32 %v6099_v26, %v6096_v34  ;;  %v6104_v1 = vld [vmem:[#allocation54_spill] sm:$0xff]  ;;  %v6106_v13 = vld [vmem:[#allocation49_spill] sm:$0xff]  ;;  %v6113_v50 = vld [vmem:[#allocation51_spill] sm:$0xff] }
 0x289   : > { %3064 = vmatprep.subr.mxu0 %v2606_v62  ;;  %v5667_v40 = vpop.f32.mrf.mxu0  ;;  %2994 = vmatpush1.msra.mxu1 %v2603_v63  ;;  %v2265_v47 = vadd.f32 %v6100_v28, %v6096_v34  ;;  %v2564_v25 = vmax.f32 %v2114_v35, 0.0  ;;  %v2567_v54 = vmax.f32 %v2277_v2, 0.0  ;;  %v2098_v44 = vadd.f32 %v6102_v4, %v6101_v43  ;;  %v6108_v35 = vld [vmem:[#allocation55_spill] sm:$0xff]  ;;  %v6115_v26 = vld [vmem:[#allocation32_spill] sm:$0xff] }
 0x28a   : > { %3065 = vmatpush1.msra.mxu0 %v2605_v12  ;;  %2995 = vmatprep.subr.mxu1 %v2591_v23  ;;  %v2263_v42 = vadd.f32 %v6103_v53, %v6096_v34  ;;  %v2552_v15 = vmax.f32 %v2110_v5, 0.0  ;;  %v2566_v37 = vmax.f32 %v2275_v56, 0.0  ;;  %v2096_v60 = vadd.f32 %v6104_v1, %v6101_v43  ;;  %v6107_v23 = vld [vmem:[#allocation52_spill] sm:$0xff]  ;;  %v6109_v5 = vld [vmem:[#allocation50_spill] sm:$0xff] }
 0x28b   : > { %3066 = vmatprep.subr.mxu0 %v2593_v10  ;;  %v5677_v24 = vpop.f32.mrf.mxu0  ;;  %2996 = vmatpush1.msra.mxu1 %v2590_v58  ;;  %v2259_v20 = vadd.f32 %v6105_v41, %v6101_v43  ;;  %v2551_v63 = vmax.f32 %v2108_v55, 0.0  ;;  %v2554_v62 = vmax.f32 %v2271_v8, 0.0  ;;  %v2092_v12 = vadd.f32 %v6107_v23, %v6106_v13  ;;  %v6111_v8 = vld [vmem:[#allocation29_spill] sm:$0xff]  ;;  %v6117_v4 = vld [vmem:[#allocation20_spill] sm:$0xff]  ;;  %v6119_v1 = vld [vmem:[#allocation14_spill] sm:$0xff] }
 0x28c   : > { %3067 = vmatpush1.msra.mxu0 %v2592_v59  ;;  %2997 = vmatprep.subr.mxu1 %v2578_v51  ;;  %v2257_v2 = vadd.f32 %v6108_v35, %v6101_v43  ;;  %v2539_v58 = vmax.f32 %v2104_v45, 0.0  ;;  %v2553_v10 = vmax.f32 %v2269_v19, 0.0  ;;  %v2090_v56 = vadd.f32 %v6109_v5, %v6106_v13  ;;  %v6110_v51 = vld [vmem:[#allocation53_spill] sm:$0xff]  ;;  %v6121_v35 = vld [vmem:[#allocation11_spill] sm:$0xff] }
 0x28d   : > { %3068 = vmatprep.subr.mxu0 %v2580_v31  ;;  %v5687_v32 = vpop.f32.mrf.mxu0  ;;  %2998 = vmatpush1.msra.mxu1 %v2577_v57  ;;  %v2253_v59 = vadd.f32 %v6110_v51, %v6106_v13  ;;  %v2538_v52 = vmax.f32 %v2102_v61, 0.0  ;;  %v2541_v55 = vmax.f32 %v2265_v47, 0.0  ;;  %v6112_v57 = vld [vmem:[#allocation17_spill] sm:$0xff]  ;;  %v2251_v45 = vadd.f32 %v6113_v50, %v6106_v13 }
 0x28e   : > { %3069 = vmatpush1.msra.mxu0 %v2579_v14  ;;  %2999 = vmatprep.subr.mxu1 %v2565_v0  ;;  %v2086_v31 = vadd.f32 %v6112_v57, %v6111_v8  ;;  %v2526_v6 = vmax.f32 %v2098_v44, 0.0  ;;  %v2540_v19 = vmax.f32 %v2263_v42, 0.0  ;;  %v6114_v0 = vld [vmem:[#allocation16_spill] sm:$0xff]  ;;  %v2247_v61 = vadd.f32 %v6115_v26, %v6111_v8  ;;  %v6122_v57 = vld [vmem:[#allocation31_spill] sm:$0xff] }
 0x28f   : > { %3070 = vmatprep.subr.mxu0 %v2567_v54  ;;  %v5697_v46 = vpop.f32.mrf.mxu0  ;;  %3000 = vmatpush1.msra.mxu1 %v2564_v25  ;;  %v2084_v14 = vadd.f32 %v6114_v0, %v6111_v8  ;;  %v2525_v28 = vmax.f32 %v2096_v60, 0.0  ;;  %v2528_v47 = vmax.f32 %v2259_v20, 0.0  ;;  %v6116_v54 = vld [vmem:[#allocation24_spill] sm:$0xff]  ;;  %v2513_v42 = vmax.f32 %v2092_v12, 0.0  ;;  %v5731_v0 = vld [vmem:[%s5872_s6] sm:$0x1] }
 0x290   : > { %3071 = vmatpush1.msra.mxu0 %v2566_v37  ;;  %3001 = vmatprep.subr.mxu1 %v2552_v15  ;;  %v2080_v53 = vadd.f32 %v6117_v4, %v6116_v54  ;;  %v6118_v15 = vld [vmem:[#allocation18_spill] sm:$0xff]  ;;  %v2527_v37 = vmax.f32 %v2257_v2, 0.0  ;;  %v2078_v41 = vadd.f32 %v6119_v1, %v6116_v54  ;;  %v2512_v20 = vmax.f32 %v2090_v56, 0.0 }
 0x291   : > { %3072 = vmatprep.subr.mxu0 %v2554_v62  ;;  %v3580_v49 = vpop.f32.mrf.mxu0  ;;  %3002 = vmatpush1.msra.mxu1 %v2551_v63  ;;  %v2245_v44 = vadd.f32 %v6118_v15, %v6111_v8  ;;  %v6120_v63 = vld [vmem:[#allocation19_spill] sm:$0xff]  ;;  %v2515_v62 = vmax.f32 %v2253_v59, 0.0  ;;  %v2514_v5 = vmax.f32 %v2251_v45, 0.0  ;;  %v2499_v12 = vmax.f32 %v2084_v14, 0.0  ;;  %v6125_v15 = vld [vmem:[#allocation9_spill] sm:$0xff] }
 0x292   : > { %3073 = vmatpush1.msra.mxu0 %v2553_v10  ;;  %3003 = vmatprep.subr.mxu1 %v2539_v58  ;;  %v2241_v60 = vadd.f32 %v6120_v63, %v6116_v54  ;;  %v2239_v58 = vadd.f32 %v6121_v35, %v6116_v54  ;;  %v2500_v10 = vmax.f32 %v2086_v31, 0.0  ;;  %v2502_v2 = vmax.f32 %v2247_v61, 0.0 }
 0x293   : > { %3074 = vmatprep.subr.mxu0 %v2541_v55  ;;  %v2459_v25 = vpop.f32.mrf.mxu0  ;;  %3004 = vmatpush1.msra.mxu1 %v2538_v52  ;;  %v2487_v52 = vmax.f32 %v2080_v53, 0.0  ;;  %v2501_v55 = vmax.f32 %v2245_v44, 0.0  ;;  %v2486_v59 = vmax.f32 %v2078_v41, 0.0  ;;  %v2465_v45 = vadd.f32 %v3580_v49, %v5155_v3 }
 0x294   : > { %3075 = vmatpush1.msra.mxu0 %v2540_v19  ;;  %3005 = vmatprep.subr.mxu1 %v2526_v6  ;;  %v2489_v50 = vmax.f32 %v2241_v60, 0.0  ;;  %v2488_v6 = vmax.f32 %v2239_v58, 0.0  ;;  %v6123_v14 = vmov 0.0   ;;  %v2455_v3 = vadd.f32 %v5687_v32, %v5159_v22 }
 0x295   : > { %3076 = vmatprep.subr.mxu0 %v2528_v47  ;;  %v3583_v23 = vpop.f32.mrf.mxu0  ;;  %3006 = vmatpush1.msra.mxu1 %v2525_v28  ;;  %v2659_v49 = vmax.f32 %v2465_v45, 0.0  ;;  %v2450_v61 = vadd.f32 %v5697_v46, %v5161_v39  ;;  %v2440_v22 = vadd.f32 %v5677_v24, %v5177_v9  ;;  %v2435_v39 = vadd.f32 %v5647_v29, %v5191_v38 }
 0x296   : > { %3077 = vmatpush1.msra.mxu0 %v2527_v37  ;;  %3007 = vmatprep.subr.mxu1 %v2513_v42  ;;  %v2475_v56 = vadd.f32 %v3583_v23, %v6122_v57  ;;  %v2633_v47 = vmax.f32 %v2455_v3, 0.0  ;;  %v2425_v9 = vadd.f32 %v5627_v36, %v5225_v16  ;;  %v2420_v38 = vadd.f32 %v5637_v18, %v6096_v34  ;;  %v6124_v18 = vld [vmem:[#allocation22_spill] sm:$0xff] }
 0x297   : > { %3078 = vmatprep.subr.mxu0 %v2515_v62  ;;  %v2469_v51 = vpop.f32.mrf.mxu0  ;;  %3008 = vmatpush1.msra.mxu1 %v2512_v20  ;;  %v2620_v32 = vmax.f32 %v2450_v61, 0.0  ;;  %v2581_v24 = vmax.f32 %v2435_v39, 0.0  ;;  %v2410_v16 = vadd.f32 %v5618_v7, %v6106_v13  ;;  %v2405_v34 = vadd.f32 %v6124_v18, %v6111_v8  ;;  %v2691_v8 = vpop.permute.xlu0 %2690  ;;  %v6127_v18 = vld [vmem:[#allocation10_spill] sm:$0xff] }
 0x298   : > { %3079 = vmatpush1.msra.mxu0 %v2514_v5  ;;  %3009 = vmatprep.subr.mxu1 %v2500_v10  ;;  %v2470_v31 = vadd.f32 %v2469_v51, %v6038_v11  ;;  %v2685_v19 = vmax.f32 %v2475_v56, 0.0  ;;  %v2460_v11 = vadd.f32 %v2459_v25, %v5157_v27  ;;  %v2445_v27 = vadd.f32 %v5667_v40, %v5165_v33 }
 0x299   : > { %3080 = vmatprep.subr.mxu0 %v2502_v2  ;;  %3010 = vmatpush1.msra.mxu1 %v2499_v12  ;;  %v2430_v33 = vadd.f32 %v5657_v30, %v5203_v17  ;;  %v2594_v40 = vmax.f32 %v2440_v22, 0.0  ;;  %v2415_v17 = vadd.f32 %v5612_v21, %v6101_v43  ;;  %v2555_v30 = vmax.f32 %v2425_v9, 0.0 }
 0x29a   : > { %3081 = vmatpush1.msra.mxu0 %v2501_v55  ;;  %3011 = vmatprep.subr.mxu1 %v2487_v52  ;;  %v2672_v26 = vmax.f32 %v2470_v31, 0.0  ;;  %v2646_v28 = vmax.f32 %v2460_v11, 0.0  ;;  %v2607_v46 = vmax.f32 %v2445_v27, 0.0  ;;  %v2542_v36 = vmax.f32 %v2420_v38, 0.0 }
 0x29b   : > { %3082 = vmatprep.subr.mxu0 %v2489_v50  ;;  %3012 = vmatpush1.msra.mxu1 %v2486_v59  ;;  %v2568_v29 = vmax.f32 %v2430_v33, 0.0  ;;  %v2529_v25 = vmax.f32 %v2415_v17, 0.0  ;;  %v2400_v21 = vadd.f32 %v5606_v48, %v6116_v54  ;;  %v2516_v43 = vmax.f32 %v2410_v16, 0.0 }
 0x29c   : > { %3083 = vmatpush1.msra.mxu0 %v2488_v6  ;;  %3046 = vmatmul.mubr.f32.vlgmr.msra.gmra.mxu1 %v5731_v0  ;;  %v2503_v4 = vmax.f32 %v2405_v34, 0.0  ;;  %v5779_v48 = vrot.slane %v2691_v8, %v6125_v15 }
 0x29d   : > { %3117 = vmatmul.mubr.f32.vlgmr.msra.gmra.mxu0 %v5731_v0  ;;  %3584 = vmatprep.subr.mxu1 %v6123_v14  ;;  %v2490_v7 = vmax.f32 %v2400_v21, 0.0 }
 0x29e   : > { %3585 = vmatpush3.msra.mxu1 %v2685_v19  ;;  %3616 = vmatprep.mubr.msk.f32.mxu1 %vm3696_vm0, %v6123_v14 }
 0x29f   : > { %3586 = vmatprep.subr.mxu1 %v6123_v14 }
 0x2a0   : > { %3587 = vmatpush3.msra.mxu1 %v2672_v26 }
 0x2a1   : > { %3588 = vmatprep.subr.mxu1 %v6123_v14 }
 0x2a2   : > { %3589 = vmatpush3.msra.mxu1 %v2659_v49 }
 0x2a3   : > { %3590 = vmatprep.subr.mxu1 %v6123_v14 }
 0x2a4   : > { %3591 = vmatpush3.msra.mxu1 %v2646_v28  ;;  %v5806_v28 = vld [vmem:[%s3785_s25] sm:$0xff] }
 0x2a5   : > { %3592 = vmatprep.subr.mxu1 %v6123_v14  ;;  %v3278_v9 = vrot.slane %v5806_v28, %v6125_v15  ;;  %v3286_v34 = vrot.slane %v5806_v28, %v6127_v18 }
 0x2a6   : > { %3593 = vmatpush3.msra.mxu1 %v2633_v47 }
 0x2a7   : > { %3594 = vmatprep.subr.mxu1 %v6123_v14 }
 0x2a8   : > { %3595 = vmatpush3.msra.mxu1 %v2620_v32  ;;  %v6126_v32 = vld [vmem:[#allocation7_spill] sm:$0xff] }
 0x2a9   : > { %3596 = vmatprep.subr.mxu1 %v6123_v14  ;;  %v3282_v39 = vrot.slane %v5806_v28, %v6126_v32 }
 0x2aa   : > { %3597 = vmatpush3.msra.mxu1 %v2607_v46 }
 0x2ab   : > { %3598 = vmatprep.subr.mxu1 %v6123_v14 }
 0x2ac   : > { %3599 = vmatpush3.msra.mxu1 %v2594_v40 }
 0x2ad   : > { %3600 = vmatprep.subr.mxu1 %v6123_v14 }
 0x2ae   : > { %3601 = vmatpush3.msra.mxu1 %v2581_v24 }
 0x2af   : > { %3602 = vmatprep.subr.mxu1 %v6123_v14 }
 0x2b0   : > { %3603 = vmatpush3.msra.mxu1 %v2568_v29 }
 0x2b1   : > { %3604 = vmatprep.subr.mxu1 %v6123_v14 }
 0x2b2   : > { %3605 = vmatpush3.msra.mxu1 %v2555_v30 }
 0x2b3   : > { %3606 = vmatprep.subr.mxu1 %v6123_v14 }
 0x2b4   : > { %3607 = vmatpush3.msra.mxu1 %v2542_v36 }
 0x2b5   : > { %3608 = vmatprep.subr.mxu1 %v6123_v14 }
 0x2b6   : > { %3609 = vmatpush3.msra.mxu1 %v2529_v25 }
 0x2b7   : > { %3610 = vmatprep.subr.mxu1 %v6123_v14 }
 0x2b8   : > { %3611 = vmatpush3.msra.mxu1 %v2516_v43 }
 0x2b9   : > { %3612 = vmatprep.subr.mxu1 %v6123_v14 }
 0x2ba   : > { %3613 = vmatpush3.msra.mxu1 %v2503_v4 }
 0x2bb   : > { %3614 = vmatprep.subr.mxu1 %v6123_v14 }
 0x2bc   : > { %3615 = vmatpush3.msra.mxu1 %v2490_v7 }
 0x2bd   : > { %3617 = vmatmul.mubr.f32.vlgmr.msra.gmra.mxu1 %v5731_v0 }
 0x2cd   : > { %v2763_v13 = vpop.f32.mrf.mxu1  ;;  %v2834_v42 = vpop.f32.mrf.mxu0 }
 0x2ce   : > { %v2764_v44 = vadd.f32 %v2763_v13, %v5779_v48  ;;  %v2835_v41 = vadd.f32 %v2834_v42, %v5779_v48  ;;  %v6129_v42 = vld [vmem:[#allocation15_spill] sm:$0xff] }
 0x2cf   : > { %v2765_v53 = vpop.f32.mrf.mxu1  ;;  %v2836_v63 = vpop.f32.mrf.mxu0 }
 0x2d0   : > { %v2766_v54 = vadd.f32 %v2765_v53, %v5779_v48  ;;  %v3206_v1 = vmul.f32 1.442695, %v2764_v44  ;;  %v2837_v20 = vadd.f32 %v2836_v63, %v5779_v48  ;;  %v3210_v62 = vmul.f32 1.442695, %v2835_v41 }
 0x2d1   : > { %vm3193_vm2 = vcmp.gt.f32.partialorder %v2764_v44, 0.0  ;;  %vm3195_vm3 = vcmp.gt.f32.partialorder %v2835_v41, 0.0 }
 0x2d2   : > { %v3208_v37 = vmul.f32 1.442695, %v2766_v54  ;;  %v3212_v58 = vmul.f32 1.442695, %v2837_v20  ;;  %vm3194_vm1 = vcmp.gt.f32.partialorder %v2766_v54, 0.0  ;;  %vm3196_vm4 = vcmp.gt.f32.partialorder %v2837_v20, 0.0 }
 0x2d4   : > { %3638 = vpow2.f32 %v3208_v37  ;;  %v3294_v37 = vrot.slane %v5806_v28, %v6129_v42 }
 0x2d5   : > { %3640 = vpow2.f32 %v3206_v1 }
 0x2d6   : > { %3642 = vpow2.f32 %v3210_v62 }
 0x2d7   : > { %3644 = vpow2.f32 %v3212_v58 }
 0x2e1   : > { %v3639_v55 = vpop.eup %3638 }
 0x2e2   : > { %v3641_v56 = vpop.eup %3640  ;;  %v3464_v50 = vadd.f32 -1.0, %v3639_v55  ;;  %v6130_v55 = vld [vmem:[#allocation6_spill] sm:$0xff] }
 0x2e3   : > { %v3463_v19 = vadd.f32 -1.0, %v3641_v56  ;;  %v3643_v0 = vpop.eup %3642 }
 0x2e4   : > { %v3246_v11 = vsel %vm3194_vm1, %v2766_v54, %v3464_v50  ;;  %v3645_v49 = vpop.eup %3644  ;;  %v3465_v27 = vadd.f32 -1.0, %v3643_v0  ;;  %v6128_v54 = vld [vmem:[#allocation8_spill] sm:$0xff] }
 0x2e5   : > { %v3245_v61 = vsel %vm3193_vm2, %v2764_v44, %v3463_v19  ;;  %v3259_v22 = vadd.f32 1.0, %v3246_v11  ;;  %v3466_v24 = vadd.f32 -1.0, %v3645_v49  ;;  %v3290_v44 = vrot.slane %v5806_v28, %v6128_v54 }
 0x2e6   : > { %v3258_v40 = vadd.f32 1.0, %v3245_v61  ;;  %v3247_v38 = vsel %vm3195_vm3, %v2835_v41, %v3465_v27  ;;  %v3272_v61 = vld [vmem:[%s3785_s25 + $0x8] sm:$0x1f]  ;;  %s3698_s25 = smov (!%p3476_p5), 16  }
 0x2e7   : > { %v3341_v16 = vmul.f32 %v3282_v39, %v3259_v22  ;;  %v3260_v21 = vadd.f32 1.0, %v3247_v38  ;;  %v3248_v43 = vsel %vm3196_vm4, %v2837_v20, %v3466_v24  ;;  %v3310_v24 = vrot.slane %v3272_v61, %v6125_v15 }
 0x2e8   : > { %v3340_v25 = vmul.f32 %v3278_v9, %v3258_v40  ;;  %v3261_v63 = vadd.f32 1.0, %v3248_v43  ;;  %v6133_v40 = vsub.s32 7, %v6130_v55 }
 0x2e9   : > { %v3342_v41 = vmul.f32 %v3286_v34, %v3260_v21 }
 0x2ea   : > { %v3353_v53 = vadd.f32 %v3341_v16, %v3340_v25  ;;  %v3306_v9 = vrot.slane %v5806_v28, %v6133_v40 }
 0x31c   : > { %v2905_v60 = vpop.f32.mrf.mxu1 }
 0x31d   : > { %v2906_v23 = vadd.f32 %v2905_v60, %v5779_v48  ;;  %v2976_v12 = vpop.f32.mrf.mxu0 }
 0x31e   : > { %v2907_v35 = vpop.f32.mrf.mxu1  ;;  %v5791_v51 = vadd.f32 %v2976_v12, %v5779_v48  ;;  %v3343_v12 = vmul.f32 %v3290_v44, %v3261_v63 }
 0x31f   : > { %v3214_v10 = vmul.f32 1.442695, %v2906_v23  ;;  %v5787_v5 = vadd.f32 %v2907_v35, %v5779_v48  ;;  %v2978_v52 = vpop.f32.mrf.mxu0  ;;  %vm3197_vm5 = vcmp.gt.f32.partialorder %v2906_v23, 0.0 }
 0x320   : > { %v5794_v59 = vadd.f32 %v2978_v52, %v5779_v48  ;;  %v3218_v6 = vmul.f32 1.442695, %v5791_v51  ;;  %vm3199_vm7 = vcmp.gt.f32.partialorder %v5791_v51, 0.0 }
 0x321   : > { %3646 = vpow2.f32 %v3214_v10  ;;  %v3216_v2 = vmul.f32 1.442695, %v5787_v5  ;;  %vm3198_vm6 = vcmp.gt.f32.partialorder %v5787_v5, 0.0 }
 0x322   : > { %v3220_v14 = vmul.f32 1.442695, %v5794_v59  ;;  %vm3200_vm8 = vcmp.gt.f32.partialorder %v5794_v59, 0.0 }
 0x323   : > { %3648 = vpow2.f32 %v3216_v2 }
 0x324   : > { %3650 = vpow2.f32 %v3218_v6 }
 0x325   : > { %3652 = vpow2.f32 %v3220_v14 }
 0x32e   : > { %v3647_v47 = vpop.eup %3646 }
 0x32f   : > { %v3467_v29 = vadd.f32 -1.0, %v3647_v47 }
 0x330   : > { %v3649_v30 = vpop.eup %3648 }
 0x331   : > { %v3249_v4 = vsel %vm3197_vm5, %v2906_v23, %v3467_v29  ;;  %v3468_v7 = vadd.f32 -1.0, %v3649_v30  ;;  %v3651_v1 = vpop.eup %3650  ;;  %v3354_v23 = vadd.f32 %v3353_v53, %v3342_v41 }
 0x332   : > { %v3262_v60 = vadd.f32 1.0, %v3249_v4  ;;  %v3653_v35 = vpop.eup %3652  ;;  %v3469_v58 = vadd.f32 -1.0, %v3651_v1 }
 0x333   : > { %v3250_v20 = vsel %vm3198_vm6, %v5787_v5, %v3468_v7  ;;  %v3355_v50 = vadd.f32 %v3354_v23, %v3343_v12  ;;  %v3470_v6 = vadd.f32 -1.0, %v3653_v35  ;;  %v3365_v12 = vld [vmem:[#allocation2] sm:$0x1] }
 0x334   : > { %v3344_v2 = vmul.f32 %v3294_v37, %v3262_v60  ;;  %v3263_v52 = vadd.f32 1.0, %v3250_v20  ;;  %v3251_v5 = vsel %vm3199_vm7, %v5791_v51, %v3469_v58 }
 0x335   : > { %v3264_v11 = vadd.f32 1.0, %v3251_v5  ;;  %v3252_v47 = vsel %vm3200_vm8, %v5794_v59, %v3470_v6 }
 0x336   : > { %v3356_v0 = vadd.f32 %v3355_v50, %v3344_v2  ;;  %v3265_v16 = vadd.f32 1.0, %v3252_v47 }
 0x338   : > { %v3347_v25 = vmul.f32 %v3306_v9, %v3265_v16 }
 0x35c   : > { %v3047_v57 = vpop.f32.mrf.mxu1 }
 0x35d   : > { %v5798_v31 = vadd.f32 %v3047_v57, %v5779_v48  ;;  %v3118_v46 = vpop.f32.mrf.mxu0  ;;  %v6131_v57 = vsub.s32 5, %v6130_v55 }
 0x35e   : > { %v3049_v45 = vpop.f32.mrf.mxu1  ;;  %v5814_v17 = vadd.f32 %v3118_v46, %v5779_v48 }
 0x35f   : > { %v3222_v26 = vmul.f32 1.442695, %v5798_v31  ;;  %v5803_v3 = vadd.f32 %v3049_v45, %v5779_v48  ;;  %v3120_v36 = vpop.f32.mrf.mxu0  ;;  %v3298_v56 = vrot.slane %v5806_v28, %v6131_v57  ;;  %vm3201_vm9 = vcmp.gt.f32.partialorder %v5798_v31, 0.0 }
 0x360   : > { %v3226_v13 = vmul.f32 1.442695, %v5814_v17  ;;  %v5820_v8 = vadd.f32 %v3120_v36, %v5779_v48  ;;  %vm3203_vm11 = vcmp.gt.f32.partialorder %v5814_v17, 0.0 }
 0x361   : > { %3654 = vpow2.f32 %v3222_v26  ;;  %v3224_v33 = vmul.f32 1.442695, %v5803_v3  ;;  %v3345_v14 = vmul.f32 %v3298_v56, %v3263_v52  ;;  %v6132_v26 = vsub.s32 6, %v6130_v55 }
 0x362   : > { %v3228_v62 = vmul.f32 1.442695, %v5820_v8  ;;  %vm3202_vm10 = vcmp.gt.f32.partialorder %v5803_v3, 0.0  ;;  %vm3204_vm12 = vcmp.gt.f32.partialorder %v5820_v8, 0.0 }
 0x363   : > { %3656 = vpow2.f32 %v3224_v33  ;;  %v3302_v49 = vrot.slane %v5806_v28, %v6132_v26  ;;  %v3357_v46 = vadd.f32 %v3356_v0, %v3345_v14  ;;  %v3314_v28 = vrot.slane %v3272_v61, %v6126_v32 }
 0x364   : > { %3658 = vpow2.f32 %v3226_v13  ;;  %v3322_v32 = vrot.slane %v3272_v61, %v6128_v54 }
 0x365   : > { %3660 = vpow2.f32 %v3228_v62  ;;  %v3346_v30 = vmul.f32 %v3302_v49, %v3264_v11 }
 0x36e   : > { %v3655_v10 = vpop.eup %3654 }
 0x36f   : > { %v3471_v45 = vadd.f32 -1.0, %v3655_v10 }
 0x370   : > { %v3657_v19 = vpop.eup %3656 }
 0x371   : > { %v3253_v51 = vsel %vm3201_vm9, %v5798_v31, %v3471_v45  ;;  %v3472_v22 = vadd.f32 -1.0, %v3657_v19  ;;  %v3659_v29 = vpop.eup %3658  ;;  %v3358_v31 = vadd.f32 %v3357_v46, %v3346_v30 }
 0x372   : > { %v3266_v36 = vadd.f32 1.0, %v3253_v51  ;;  %v3661_v34 = vpop.eup %3660 }
 0x373   : > { %v3254_v59 = vsel %vm3202_vm10, %v5803_v3, %v3472_v22  ;;  %v3359_v4 = vadd.f32 %v3358_v31, %v3347_v25  ;;  %v3474_v7 = vadd.f32 -1.0, %v3661_v34  ;;  %v3318_v3 = vrot.slane %v3272_v61, %v6127_v18 }
 0x374   : > { %v3348_v21 = vmul.f32 %v3310_v24, %v3266_v36  ;;  %v3267_v43 = vadd.f32 1.0, %v3254_v59 }
 0x375   : > { %v3256_v37 = vsel %vm3204_vm12, %v5820_v8, %v3474_v7 }
 0x376   : > { %v3360_v13 = vadd.f32 %v3359_v4, %v3348_v21  ;;  %v3349_v53 = vmul.f32 %v3314_v28, %v3267_v43  ;;  %v3269_v60 = vadd.f32 1.0, %v3256_v37 }
 0x378   : > { %v3361_v1 = vadd.f32 %v3360_v13, %v3349_v53  ;;  %v3351_v35 = vmul.f32 %v3322_v32, %v3269_v60 }
 0x37d   : > { %v3189_v27 = vpop.f32.mrf.mxu1 }
 0x37e   : > { %v3190_v39 = vadd.f32 %v3189_v27, %v5779_v48  ;;  %v3473_v48 = vadd.f32 -1.0, %v3659_v29 }
 0x37f   : > { %v3618_v33 = vpop.f32.mrf.mxu1 }
 0x380   : > { %v3230_v38 = vmul.f32 1.442695, %v3190_v39  ;;  %v3255_v15 = vsel %vm3203_vm11, %v5814_v17, %v3473_v48  ;;  %vm3205_vm13 = vcmp.gt.f32.partialorder %v3190_v39, 0.0  ;;  %v3326_v17 = vrot.slane %v3272_v61, %v6129_v42 }
 0x381   : > { %v3268_v44 = vadd.f32 1.0, %v3255_v15 }
 0x382   : > { %3662 = vpow2.f32 %v3230_v38 }
 0x383   : > { %v3350_v63 = vmul.f32 %v3318_v3, %v3268_v44 }
 0x385   : > { %v3362_v62 = vadd.f32 %v3361_v1, %v3350_v63 }
 0x387   : > { %v3363_v10 = vadd.f32 %v3362_v62, %v3351_v35 }
 0x38f   : > { %v3663_v41 = vpop.eup %3662 }
 0x390   : > { %v3475_v20 = vadd.f32 -1.0, %v3663_v41 }
 0x392   : > { %v3257_v23 = vsel %vm3205_vm13, %v3190_v39, %v3475_v20 }
 0x393   : > { %v3270_v58 = vadd.f32 1.0, %v3257_v23 }
 0x395   : > { %v3352_v18 = vmul.f32 %v3326_v17, %v3270_v58 }
 0x397   : > { %v3364_v2 = vadd.f32 %v3363_v10, %v3352_v18  ;;  %3371 = sbr.rel (%p3476_p5) target bundleno = 1430 (0x596), region = 68 }
 0x399   : > { %v3366_v52 = vadd.f32 %v3365_v12, %v3364_v2 }
 0x39b   : > { %3367 = vst [vmem:[#allocation2] sm:$0x1] %v3366_v52 }
 0x39c   : > { %v3372_v8 = vld [vmem:[#allocation5] sm:$0x1]  ;;  %v3697_v55 = vmov 0   ;;  %v3384_v54 = vld [vmem:[#allocation4] sm:$0x1] }
 0x39d   : > { %3682 = vset.pattern.permute.xlu0 %v3697_v55  ;;  %v6134_v42 = vld [vmem:[#allocation9_spill] sm:$0xff] }
 0x39e   : > { %3376 = vperm.xlu0 %3682, %v3372_v8  }
 0x3a2   : > { %3387 = vperm.xlu0 %3682, %v3384_v54   ;;  %v3373_v50 = vld [vmem:[#allocation2] sm:$0x1] }
 0x419   : > { %v3377_v57 = vpop.permute.xlu0 %3376 }
 0x41a   : > { %v3382_v56 = vrot.slane %v3377_v57, %v6134_v42 }
 0x41c   : > { %v3383_v6 = vmul.f32 %v3382_v56, %v3373_v50 }
 0x41d   : > { %v3388_v5 = vpop.permute.xlu0 %3387 }
 0x41e   : > { %v3393_v45 = vrot.slane %v3388_v5, %v6134_v42 }
 0x420   : > { %v3394_v19 = vadd.f32 %v3393_v45, %v3383_v6 }
 0x422   : > { %3395 = vrot.lane.b32.xlu1 %v3394_v19, %s3698_s25 }
 0x494   : > { %v3396_v0 = vpop.permute.xlu1 %3395 }
 0x495   : > { %v3397_v14 = vmin.f32 %v3394_v19, %v3396_v0  ;;  %v3398_v11 = vmax.f32 %v3394_v19, %v3396_v0 }
 0x497   : > { %3402 = vrot.lane.b32.xlu0 %v3398_v11, %s3699_s7  ;;  %3399 = vrot.lane.b32.xlu1 %v3397_v14, %s3699_s7 }
 0x509   : > { %v3403_v26 = vpop.permute.xlu0 %3402  ;;  %v3400_v49 = vpop.permute.xlu1 %3399 }
 0x50a   : > { %v3404_v61 = vmax.f32 %v3398_v11, %v3403_v26  ;;  %v3401_v27 = vmin.f32 %v3397_v14, %v3400_v49 }
 0x50c   : > { %3408 = vrot.lane.b32.xlu0 %v3404_v61, %s3700_s16  ;;  %3405 = vrot.lane.b32.xlu1 %v3401_v27, %s3700_s16 }
 0x57e   : > { %v3409_v47 = vpop.permute.xlu0 %3408  ;;  %v3406_v51 = vpop.permute.xlu1 %3405 }
 0x57f   : > { %v3410_v22 = vmax.f32 %v3404_v61, %v3409_v47  ;;  %v3407_v39 = vmin.f32 %v3401_v27, %v3406_v51 }
 0x581   : > { %v3411_v46 = vsub.f32 %v3410_v22, %v3407_v39  ;;  %v3414_v40 = vsub.f32 %v3394_v19, %v3407_v39 }
 0x583   : > { %vm3412_vm14 = vcmp.eq.f32.partialorder %v3411_v46, 0.0 }
 0x584   : > { %v3413_v33 = vsel %vm3412_vm14, 1.0, %v3411_v46 }
 0x585   : > { %3683 = vrcp.f32 %v3413_v33 }
 0x592   : > { %v3684_v9 = vpop.eup %3683 }
 0x593   : > { %v3416_v24 = vmul.f32 %v3684_v9, %v3414_v40 }
 0x595   : > { %3417 = vst [vmem:[%s5874_s10] sm:$0x1] %v3416_v24 }
 0x596 PF: > { %s26_s19 = sadd.s32 1, %s3691_s19  }
 0x597   : > { %p23_p6 = scmp.ge.s32.totalorder %s26_s19, 10  }
 0x599   :  { %25 = sbr.rel (!%p23_p6) target bundleno = 4 (0x4), region = 97 }

// kernel: mapping_forward.2
= control target key start
LH: loop header
LB: loop body
LE: loop exit
PB: predicated region body
PF: predicated region fallthrough
CT: control target
= control target key end

     0   :  { %20 = vsyncpa [#allocation3], 0  ;;  %s2686_s0 = inlined_call_operand.vmem [shape: f32[8,64], index: 0, kind: input, shape index: {}]   ;;  %s2687_s1 = inlined_call_operand.vmem [shape: f32[64,512], index: 1, kind: input, shape index: {}]   ;;  %s2688_s2 = inlined_call_operand.vmem [shape: f32[1,512], index: 2, kind: input, shape index: {}]   ;;  %s2689_s3 = inlined_call_operand.vmem [shape: f32[1,512], index: 3, kind: input, shape index: {}]   ;;  %s2690_s4 = inlined_call_operand.vmem [shape: f32[1,512], index: 4, kind: input, shape index: {}]   ;;  %s2691_s5 = inlined_call_operand.hbm [shape: f32[512,512], index: 5, kind: input, shape index: {}]   ;;  %s2692_s6 = inlined_call_operand.vmem [shape: f32[1,512], index: 6, kind: input, shape index: {}]   ;;  %s2693_s7 = inlined_call_operand.vmem [shape: f32[1,512], index: 7, kind: input, shape index: {}]   ;;  %s2694_s8 = inlined_call_operand.vmem [shape: f32[1,512], index: 8, kind: input, shape index: {}]   ;;  %s2695_s9 = inlined_call_operand.hbm [shape: f32[512,512], index: 9, kind: input, shape index: {}]   ;;  %s2696_s10 = inlined_call_operand.vmem [shape: f32[1,512], index: 10, kind: input, shape index: {}]   ;;  %s2697_s11 = inlined_call_operand.vmem [shape: f32[1,512], index: 11, kind: input, shape index: {}]   ;;  %s2698_s12 = inlined_call_operand.vmem [shape: f32[1,512], index: 12, kind: input, shape index: {}]   ;;  %s2699_s13 = inlined_call_operand.vmem [shape: f32[512,16], index: 13, kind: input, shape index: {}]   ;;  %s2700_s14 = inlined_call_operand.vmem [shape: f32[1,16], index: 14, kind: input, shape index: {}]   ;;  %s2701_s15 = inlined_call_operand.vmem [shape: f32[8,16], index: 15, kind: output, shape index: {}]  }
   0x1   :  { %21 = vsyncpa [#allocation5], 0  ;;  %s2165_s18 = smov [#allocation2]  }
   0x2   :  { %s37_s19 = sshll.u32 %s2165_s18, 4  ;;  %s38_s19 = int_to_ptr.vmem [resolvable:$true] %s37_s19 }
   0x3   :  { %s2129_s20 = scalar_lea.vmem %s38_s19, 32768  ;;  %p2134_p1 = scmp.lt.s32.totalorder %s38_s19, %s38_s19 }
   0x4   :  { %p2130_p0 = scmp.ne.s32.totalorder %s38_s19, %s2129_s20  ;;  %p2135_p2 = scmp.lt.s32.totalorder %s2129_s20, %s2129_s20 }
   0x6   :  { %p2136_p3 = por %p2135_p2, %p2134_p1 }
   0x8   :  { %p2137_p4 = pnand %p2136_p3, %p2130_p0 }
   0xa   :  { %2140 = shalt.err (!%p2137_p4)
}
   0xb   :  { %s2166_s21 = smov 512   ;;  %s2167_s22 = smov 32  }
   0xc   :  { %43 = dma.hbm_to_vmem [thread:$0]  %s2691_s5, 32768, %s38_s19, [#allocation3], %s2166_s21, %s2166_s21, %s2167_s22  }
   0xd   :  { %s2168_s25 = smov [#allocation4]  }
   0xe   :  { %s55_s26 = sshll.u32 %s2168_s25, 4  ;;  %s56_s26 = int_to_ptr.vmem [resolvable:$true] %s55_s26 }
   0xf   :  { %s2149_s27 = scalar_lea.vmem %s56_s26, 32768  ;;  %p2154_p6 = scmp.lt.s32.totalorder %s56_s26, %s56_s26 }
  0x10   :  { %p2150_p5 = scmp.ne.s32.totalorder %s56_s26, %s2149_s27  ;;  %p2155_p7 = scmp.lt.s32.totalorder %s2149_s27, %s2149_s27 }
  0x12   :  { %p2156_p8 = por %p2155_p7, %p2154_p6 }
  0x14   :  { %p2157_p9 = pnand %p2156_p8, %p2150_p5 }
  0x16   :  { %2160 = shalt.err (!%p2157_p9)
}
  0x17   :  { %61 = dma.hbm_to_vmem [thread:$0]  %s2695_s9, 32768, %s56_s26, [#allocation5], %s2166_s21, %s2166_s21, %s2167_s22  }
  0x18   :  { %2161 = dma.done.wait [#allocation3], 32768  }
  0x19   :  { %2162 = vsyncadd [#allocation3], 4294934528 }
  0x1a   :  { %2163 = dma.done.wait [#allocation5], 32768  }
  0x1b   :  { %2164 = vsyncadd [#allocation5], 4294934528  ;;  %v2169_v0 = vmov 0.0   ;;  %v108_v1 = vld [vmem:[%s2687_s1 + $0xe8] sm:$0xff]  ;;  %v110_v2 = vld [vmem:[%s2687_s1 + $0xf8] sm:$0xff]  ;;  %vm133_vm0 = vcmask 523264  }
  0x1c   :  { %201 = vmatprep.mubr.f32.mxu0 %v2169_v0  ;;  %272 = vmatprep.mubr.f32.mxu1 %v2169_v0  ;;  %v107_v3 = vld [vmem:[%s2687_s1 + $0xe0] sm:$0xff]  ;;  %v109_v4 = vld [vmem:[%s2687_s1 + $0xf0] sm:$0xff]  ;;  %v104_v5 = vld [vmem:[%s2687_s1 + $0xc8] sm:$0xff]  ;;  %vm2011_vm1 = vcmask 130048  }
  0x1d   :  { %153 = vmatprep.subr.mxu0 %v108_v1  ;;  %224 = vmatprep.subr.mxu1 %v110_v2  ;;  %v106_v6 = vld [vmem:[%s2687_s1 + $0xd8] sm:$0xff]  ;;  %v103_v7 = vld [vmem:[%s2687_s1 + $0xc0] sm:$0xff]  ;;  %v105_v8 = vld [vmem:[%s2687_s1 + $0xd0] sm:$0xff] }
  0x1e   :  { %154 = vmatpush1.msra.mxu0 %v107_v3  ;;  %225 = vmatpush1.msra.mxu1 %v109_v4  ;;  %v100_v9 = vld [vmem:[%s2687_s1 + $0xa8] sm:$0xff]  ;;  %v102_v10 = vld [vmem:[%s2687_s1 + $0xb8] sm:$0xff]  ;;  %v99_v11 = vld [vmem:[%s2687_s1 + $0xa0] sm:$0xff] }
  0x1f   :  { %155 = vmatprep.subr.mxu0 %v104_v5  ;;  %226 = vmatprep.subr.mxu1 %v106_v6  ;;  %v101_v12 = vld [vmem:[%s2687_s1 + $0xb0] sm:$0xff]  ;;  %v96_v13 = vld [vmem:[%s2687_s1 + $0x88] sm:$0xff]  ;;  %v98_v14 = vld [vmem:[%s2687_s1 + $0x98] sm:$0xff] }
  0x20   :  { %156 = vmatpush1.msra.mxu0 %v103_v7  ;;  %227 = vmatpush1.msra.mxu1 %v105_v8  ;;  %v95_v15 = vld [vmem:[%s2687_s1 + $0x80] sm:$0xff]  ;;  %v97_v16 = vld [vmem:[%s2687_s1 + $0x90] sm:$0xff]  ;;  %v92_v17 = vld [vmem:[%s2687_s1 + $0x68] sm:$0xff] }
  0x21   :  { %157 = vmatprep.subr.mxu0 %v100_v9  ;;  %228 = vmatprep.subr.mxu1 %v102_v10  ;;  %v94_v18 = vld [vmem:[%s2687_s1 + $0x78] sm:$0xff]  ;;  %v91_v19 = vld [vmem:[%s2687_s1 + $0x60] sm:$0xff]  ;;  %v93_v20 = vld [vmem:[%s2687_s1 + $0x70] sm:$0xff] }
  0x22   :  { %158 = vmatpush1.msra.mxu0 %v99_v11  ;;  %229 = vmatpush1.msra.mxu1 %v101_v12  ;;  %v88_v21 = vld [vmem:[%s2687_s1 + $0x48] sm:$0xff]  ;;  %v90_v22 = vld [vmem:[%s2687_s1 + $0x58] sm:$0xff]  ;;  %v87_v23 = vld [vmem:[%s2687_s1 + $0x40] sm:$0xff] }
  0x23   :  { %159 = vmatprep.subr.mxu0 %v96_v13  ;;  %230 = vmatprep.subr.mxu1 %v98_v14  ;;  %v89_v24 = vld [vmem:[%s2687_s1 + $0x50] sm:$0xff]  ;;  %v84_v25 = vld [vmem:[%s2687_s1 + $0x28] sm:$0xff]  ;;  %v86_v26 = vld [vmem:[%s2687_s1 + $0x38] sm:$0xff] }
  0x24   :  { %160 = vmatpush1.msra.mxu0 %v95_v15  ;;  %231 = vmatpush1.msra.mxu1 %v97_v16  ;;  %v83_v27 = vld [vmem:[%s2687_s1 + $0x20] sm:$0xff]  ;;  %v85_v28 = vld [vmem:[%s2687_s1 + $0x30] sm:$0xff]  ;;  %v80_v29 = vld [vmem:[%s2687_s1 + $0x8] sm:$0xff] }
  0x25   :  { %161 = vmatprep.subr.mxu0 %v92_v17  ;;  %232 = vmatprep.subr.mxu1 %v94_v18  ;;  %v82_v30 = vld [vmem:[%s2687_s1 + $0x18] sm:$0xff]  ;;  %v79_v31 = vld [vmem:[%s2687_s1] sm:$0xff]  ;;  %v81_v32 = vld [vmem:[%s2687_s1 + $0x10] sm:$0xff] }
  0x26   :  { %162 = vmatpush1.msra.mxu0 %v91_v19  ;;  %233 = vmatpush1.msra.mxu1 %v93_v20  ;;  %v78_v33 = vld [vmem:[%s2686_s0] sm:$0xff]  ;;  %v473_v34 = vld [vmem:[#allocation2 + $0x1e8] sm:$0xff] }
  0x27   :  { %163 = vmatprep.subr.mxu0 %v88_v21  ;;  %234 = vmatprep.subr.mxu1 %v90_v22  ;;  %v601_v35 = vld [vmem:[#allocation2 + $0x5e8] sm:$0xff]  ;;  %v472_v36 = vld [vmem:[#allocation2 + $0x1e0] sm:$0xff] }
  0x28   :  { %164 = vmatpush1.msra.mxu0 %v87_v23  ;;  %235 = vmatpush1.msra.mxu1 %v89_v24  ;;  %v600_v37 = vld [vmem:[#allocation2 + $0x5e0] sm:$0xff]  ;;  %v469_v38 = vld [vmem:[#allocation2 + $0x1c8] sm:$0xff] }
  0x29   :  { %165 = vmatprep.subr.mxu0 %v84_v25  ;;  %236 = vmatprep.subr.mxu1 %v86_v26  ;;  %v597_v39 = vld [vmem:[#allocation2 + $0x5c8] sm:$0xff]  ;;  %v468_v40 = vld [vmem:[#allocation2 + $0x1c0] sm:$0xff] }
  0x2a   :  { %166 = vmatpush1.msra.mxu0 %v83_v27  ;;  %237 = vmatpush1.msra.mxu1 %v85_v28  ;;  %v596_v41 = vld [vmem:[#allocation2 + $0x5c0] sm:$0xff]  ;;  %v465_v42 = vld [vmem:[#allocation2 + $0x1a8] sm:$0xff] }
  0x2b   :  { %167 = vmatprep.subr.mxu0 %v80_v29  ;;  %238 = vmatprep.subr.mxu1 %v82_v30  ;;  %v593_v43 = vld [vmem:[#allocation2 + $0x5a8] sm:$0xff]  ;;  %v464_v44 = vld [vmem:[#allocation2 + $0x1a0] sm:$0xff] }
  0x2c   :  { %168 = vmatpush1.msra.mxu0 %v79_v31  ;;  %239 = vmatpush1.msra.mxu1 %v81_v32  ;;  %v592_v45 = vld [vmem:[#allocation2 + $0x5a0] sm:$0xff]  ;;  %v461_v46 = vld [vmem:[#allocation2 + $0x188] sm:$0xff] }
  0x2d   :  { %2019 = vmatmul.mubr.msk.f32.vlgmr.msra.gmra.mxu0 %vm133_vm0, %v78_v33  ;;  %2020 = vmatmul.mubr.msk.f32.vlgmr.msra.gmra.mxu1 %vm133_vm0, %v78_v33  ;;  %v589_v47 = vld [vmem:[#allocation2 + $0x588] sm:$0xff]  ;;  %v460_v48 = vld [vmem:[#allocation2 + $0x180] sm:$0xff] }
  0x2e   :  { %690 = vmatprep.subr.mxu0 %v473_v34  ;;  %761 = vmatprep.subr.mxu1 %v601_v35  ;;  %v588_v49 = vld [vmem:[#allocation2 + $0x580] sm:$0xff]  ;;  %v457_v50 = vld [vmem:[#allocation2 + $0x168] sm:$0xff] }
  0x2f   :  { %691 = vmatpush1.msra.mxu0 %v472_v36  ;;  %762 = vmatpush1.msra.mxu1 %v600_v37  ;;  %v585_v51 = vld [vmem:[#allocation2 + $0x568] sm:$0xff]  ;;  %v456_v52 = vld [vmem:[#allocation2 + $0x160] sm:$0xff] }
  0x30   :  { %692 = vmatprep.subr.mxu0 %v469_v38  ;;  %763 = vmatprep.subr.mxu1 %v597_v39  ;;  %v584_v53 = vld [vmem:[#allocation2 + $0x560] sm:$0xff]  ;;  %v453_v54 = vld [vmem:[#allocation2 + $0x148] sm:$0xff] }
  0x31   :  { %693 = vmatpush1.msra.mxu0 %v468_v40  ;;  %764 = vmatpush1.msra.mxu1 %v596_v41  ;;  %v581_v55 = vld [vmem:[#allocation2 + $0x548] sm:$0xff]  ;;  %v452_v56 = vld [vmem:[#allocation2 + $0x140] sm:$0xff] }
  0x32   :  { %694 = vmatprep.subr.mxu0 %v465_v42  ;;  %765 = vmatprep.subr.mxu1 %v593_v43  ;;  %v580_v57 = vld [vmem:[#allocation2 + $0x540] sm:$0xff]  ;;  %v449_v58 = vld [vmem:[#allocation2 + $0x128] sm:$0xff] }
  0x33   :  { %695 = vmatpush1.msra.mxu0 %v464_v44  ;;  %766 = vmatpush1.msra.mxu1 %v592_v45  ;;  %v577_v59 = vld [vmem:[#allocation2 + $0x528] sm:$0xff]  ;;  %v448_v60 = vld [vmem:[#allocation2 + $0x120] sm:$0xff] }
  0x34   :  { %696 = vmatprep.subr.mxu0 %v461_v46  ;;  %767 = vmatprep.subr.mxu1 %v589_v47  ;;  %v576_v61 = vld [vmem:[#allocation2 + $0x520] sm:$0xff]  ;;  %v445_v62 = vld [vmem:[#allocation2 + $0x108] sm:$0xff] }
  0x35   :  { %697 = vmatpush1.msra.mxu0 %v460_v48  ;;  %768 = vmatpush1.msra.mxu1 %v588_v49  ;;  %v573_v63 = vld [vmem:[#allocation2 + $0x508] sm:$0xff]  ;;  %v444_v0 = vld [vmem:[#allocation2 + $0x100] sm:$0xff] }
  0x36   :  { %698 = vmatprep.subr.mxu0 %v457_v50  ;;  %769 = vmatprep.subr.mxu1 %v585_v51  ;;  %v572_v1 = vld [vmem:[#allocation2 + $0x500] sm:$0xff]  ;;  %v441_v2 = vld [vmem:[#allocation2 + $0xe8] sm:$0xff] }
  0x37   :  { %699 = vmatpush1.msra.mxu0 %v456_v52  ;;  %770 = vmatpush1.msra.mxu1 %v584_v53  ;;  %v569_v3 = vld [vmem:[#allocation2 + $0x4e8] sm:$0xff]  ;;  %v440_v4 = vld [vmem:[#allocation2 + $0xe0] sm:$0xff] }
  0x38   :  { %700 = vmatprep.subr.mxu0 %v453_v54  ;;  %771 = vmatprep.subr.mxu1 %v581_v55  ;;  %v568_v5 = vld [vmem:[#allocation2 + $0x4e0] sm:$0xff]  ;;  %v437_v6 = vld [vmem:[#allocation2 + $0xc8] sm:$0xff] }
  0x39   :  { %701 = vmatpush1.msra.mxu0 %v452_v56  ;;  %772 = vmatpush1.msra.mxu1 %v580_v57  ;;  %v565_v7 = vld [vmem:[#allocation2 + $0x4c8] sm:$0xff]  ;;  %v436_v8 = vld [vmem:[#allocation2 + $0xc0] sm:$0xff] }
  0x3a   :  { %702 = vmatprep.subr.mxu0 %v449_v58  ;;  %773 = vmatprep.subr.mxu1 %v577_v59  ;;  %v564_v9 = vld [vmem:[#allocation2 + $0x4c0] sm:$0xff]  ;;  %v433_v10 = vld [vmem:[#allocation2 + $0xa8] sm:$0xff] }
  0x3b   :  { %703 = vmatpush1.msra.mxu0 %v448_v60  ;;  %774 = vmatpush1.msra.mxu1 %v576_v61  ;;  %v561_v11 = vld [vmem:[#allocation2 + $0x4a8] sm:$0xff]  ;;  %v432_v12 = vld [vmem:[#allocation2 + $0xa0] sm:$0xff] }
  0x3c   :  { %704 = vmatprep.subr.mxu0 %v445_v62  ;;  %775 = vmatprep.subr.mxu1 %v573_v63  ;;  %v560_v13 = vld [vmem:[#allocation2 + $0x4a0] sm:$0xff]  ;;  %v429_v14 = vld [vmem:[#allocation2 + $0x88] sm:$0xff] }
  0x3d   :  { %705 = vmatpush1.msra.mxu0 %v444_v0  ;;  %776 = vmatpush1.msra.mxu1 %v572_v1  ;;  %v557_v15 = vld [vmem:[#allocation2 + $0x488] sm:$0xff]  ;;  %v428_v16 = vld [vmem:[#allocation2 + $0x80] sm:$0xff] }
  0x3e   :  { %706 = vmatprep.subr.mxu0 %v441_v2  ;;  %777 = vmatprep.subr.mxu1 %v569_v3  ;;  %v556_v17 = vld [vmem:[#allocation2 + $0x480] sm:$0xff]  ;;  %v425_v18 = vld [vmem:[#allocation2 + $0x68] sm:$0xff] }
  0x3f   :  { %707 = vmatpush1.msra.mxu0 %v440_v4  ;;  %778 = vmatpush1.msra.mxu1 %v568_v5  ;;  %v553_v19 = vld [vmem:[#allocation2 + $0x468] sm:$0xff]  ;;  %v424_v20 = vld [vmem:[#allocation2 + $0x60] sm:$0xff] }
  0x40   :  { %708 = vmatprep.subr.mxu0 %v437_v6  ;;  %779 = vmatprep.subr.mxu1 %v565_v7  ;;  %v552_v21 = vld [vmem:[#allocation2 + $0x460] sm:$0xff]  ;;  %v421_v22 = vld [vmem:[#allocation2 + $0x48] sm:$0xff] }
  0x41   :  { %709 = vmatpush1.msra.mxu0 %v436_v8  ;;  %780 = vmatpush1.msra.mxu1 %v564_v9  ;;  %v549_v23 = vld [vmem:[#allocation2 + $0x448] sm:$0xff]  ;;  %v420_v24 = vld [vmem:[#allocation2 + $0x40] sm:$0xff] }
  0x42   :  { %710 = vmatprep.subr.mxu0 %v433_v10  ;;  %781 = vmatprep.subr.mxu1 %v561_v11  ;;  %v548_v25 = vld [vmem:[#allocation2 + $0x440] sm:$0xff]  ;;  %v417_v26 = vld [vmem:[#allocation2 + $0x28] sm:$0xff] }
  0x43   :  { %711 = vmatpush1.msra.mxu0 %v432_v12  ;;  %782 = vmatpush1.msra.mxu1 %v560_v13  ;;  %v545_v27 = vld [vmem:[#allocation2 + $0x428] sm:$0xff]  ;;  %v416_v28 = vld [vmem:[#allocation2 + $0x20] sm:$0xff] }
  0x44   :  { %712 = vmatprep.subr.mxu0 %v429_v14  ;;  %783 = vmatprep.subr.mxu1 %v557_v15  ;;  %v544_v29 = vld [vmem:[#allocation2 + $0x420] sm:$0xff]  ;;  %v413_v30 = vld [vmem:[#allocation2 + $0x8] sm:$0xff] }
  0x45   :  { %713 = vmatpush1.msra.mxu0 %v428_v16  ;;  %784 = vmatpush1.msra.mxu1 %v556_v17  ;;  %v541_v31 = vld [vmem:[#allocation2 + $0x408] sm:$0xff]  ;;  %v412_v32 = vld [vmem:[#allocation2] sm:$0xff] }
  0x46   :  { %714 = vmatprep.subr.mxu0 %v425_v18  ;;  %785 = vmatprep.subr.mxu1 %v553_v19  ;;  %v540_v33 = vld [vmem:[#allocation2 + $0x400] sm:$0xff]  ;;  %v537_v34 = vld [vmem:[#allocation2 + $0x3e8] sm:$0xff] }
  0x47   :  { %715 = vmatpush1.msra.mxu0 %v424_v20  ;;  %786 = vmatpush1.msra.mxu1 %v552_v21  ;;  %v665_v35 = vld [vmem:[#allocation2 + $0x7e8] sm:$0xff]  ;;  %v536_v36 = vld [vmem:[#allocation2 + $0x3e0] sm:$0xff] }
  0x48   :  { %716 = vmatprep.subr.mxu0 %v421_v22  ;;  %787 = vmatprep.subr.mxu1 %v549_v23  ;;  %v664_v37 = vld [vmem:[#allocation2 + $0x7e0] sm:$0xff]  ;;  %v533_v38 = vld [vmem:[#allocation2 + $0x3c8] sm:$0xff] }
  0x49   :  { %717 = vmatpush1.msra.mxu0 %v420_v24  ;;  %788 = vmatpush1.msra.mxu1 %v548_v25  ;;  %v661_v39 = vld [vmem:[#allocation2 + $0x7c8] sm:$0xff]  ;;  %v532_v40 = vld [vmem:[#allocation2 + $0x3c0] sm:$0xff] }
  0x4a   :  { %718 = vmatprep.subr.mxu0 %v417_v26  ;;  %789 = vmatprep.subr.mxu1 %v545_v27  ;;  %v660_v41 = vld [vmem:[#allocation2 + $0x7c0] sm:$0xff]  ;;  %v529_v42 = vld [vmem:[#allocation2 + $0x3a8] sm:$0xff] }
  0x4b   :  { %719 = vmatpush1.msra.mxu0 %v416_v28  ;;  %790 = vmatpush1.msra.mxu1 %v544_v29  ;;  %v657_v43 = vld [vmem:[#allocation2 + $0x7a8] sm:$0xff]  ;;  %v528_v44 = vld [vmem:[#allocation2 + $0x3a0] sm:$0xff] }
  0x4c   :  { %720 = vmatprep.subr.mxu0 %v413_v30  ;;  %791 = vmatprep.subr.mxu1 %v541_v31  ;;  %v656_v45 = vld [vmem:[#allocation2 + $0x7a0] sm:$0xff]  ;;  %v525_v46 = vld [vmem:[#allocation2 + $0x388] sm:$0xff] }
  0x4d   :  { %721 = vmatpush1.msra.mxu0 %v412_v32  ;;  %792 = vmatpush1.msra.mxu1 %v540_v33  ;;  %v653_v47 = vld [vmem:[#allocation2 + $0x788] sm:$0xff]  ;;  %v524_v48 = vld [vmem:[#allocation2 + $0x380] sm:$0xff] }
  0x4e   :  { %722 = vmatprep.subr.mxu0 %v537_v34  ;;  %793 = vmatprep.subr.mxu1 %v665_v35  ;;  %v652_v49 = vld [vmem:[#allocation2 + $0x780] sm:$0xff]  ;;  %v521_v50 = vld [vmem:[#allocation2 + $0x368] sm:$0xff]  ;;  %v475_v34 = vld [vmem:[#allocation2 + $0x1f8] sm:$0xff] }
  0x4f   :  { %723 = vmatpush2.msra.mxu0 %v536_v36  ;;  %794 = vmatpush2.msra.mxu1 %v664_v37  ;;  %v649_v51 = vld [vmem:[#allocation2 + $0x768] sm:$0xff]  ;;  %v520_v52 = vld [vmem:[#allocation2 + $0x360] sm:$0xff]  ;;  %v603_v35 = vld [vmem:[#allocation2 + $0x5f8] sm:$0xff]  ;;  %v113_v36 = vlaneseq }
  0x50   :  { %724 = vmatprep.subr.mxu0 %v533_v38  ;;  %795 = vmatprep.subr.mxu1 %v661_v39  ;;  %v648_v53 = vld [vmem:[#allocation2 + $0x760] sm:$0xff]  ;;  %v517_v54 = vld [vmem:[#allocation2 + $0x348] sm:$0xff] }
  0x51   :  { %725 = vmatpush2.msra.mxu0 %v532_v40  ;;  %796 = vmatpush2.msra.mxu1 %v660_v41  ;;  %v645_v55 = vld [vmem:[#allocation2 + $0x748] sm:$0xff]  ;;  %v516_v56 = vld [vmem:[#allocation2 + $0x340] sm:$0xff]  ;;  %v114_v37 = vshrl.u32 %v113_v36, 7 }
  0x52   :  { %726 = vmatprep.subr.mxu0 %v529_v42  ;;  %797 = vmatprep.subr.mxu1 %v657_v43  ;;  %v644_v57 = vld [vmem:[#allocation2 + $0x740] sm:$0xff]  ;;  %v513_v58 = vld [vmem:[#allocation2 + $0x328] sm:$0xff] }
  0x53   :  { %727 = vmatpush2.msra.mxu0 %v528_v44  ;;  %798 = vmatpush2.msra.mxu1 %v656_v45  ;;  %v641_v59 = vld [vmem:[#allocation2 + $0x728] sm:$0xff]  ;;  %v512_v60 = vld [vmem:[#allocation2 + $0x320] sm:$0xff]  ;;  %v2355_v38 = vsub.s32 0, %v114_v37  ;;  %v2357_v39 = vsub.s32 2, %v114_v37  ;;  %v2362_v41 = vsub.s32 1, %v114_v37  ;;  %v2364_v42 = vsub.s32 3, %v114_v37 }
  0x54   :  { %728 = vmatprep.subr.mxu0 %v525_v46  ;;  %799 = vmatprep.subr.mxu1 %v653_v47  ;;  %v640_v61 = vld [vmem:[#allocation2 + $0x720] sm:$0xff]  ;;  %v509_v62 = vld [vmem:[#allocation2 + $0x308] sm:$0xff] }
  0x55   :  { %729 = vmatpush2.msra.mxu0 %v524_v48  ;;  %800 = vmatpush2.msra.mxu1 %v652_v49  ;;  %v637_v63 = vld [vmem:[#allocation2 + $0x708] sm:$0xff]  ;;  %v508_v0 = vld [vmem:[#allocation2 + $0x300] sm:$0xff] }
  0x56   :  { %730 = vmatprep.subr.mxu0 %v521_v50  ;;  %801 = vmatprep.subr.mxu1 %v649_v51  ;;  %v636_v1 = vld [vmem:[#allocation2 + $0x700] sm:$0xff]  ;;  %v505_v2 = vld [vmem:[#allocation2 + $0x2e8] sm:$0xff] }
  0x57   :  { %731 = vmatpush2.msra.mxu0 %v520_v52  ;;  %802 = vmatpush2.msra.mxu1 %v648_v53  ;;  %v633_v3 = vld [vmem:[#allocation2 + $0x6e8] sm:$0xff]  ;;  %v504_v4 = vld [vmem:[#allocation2 + $0x2e0] sm:$0xff] }
  0x58   :  { %732 = vmatprep.subr.mxu0 %v517_v54  ;;  %803 = vmatprep.subr.mxu1 %v645_v55  ;;  %v632_v5 = vld [vmem:[#allocation2 + $0x6e0] sm:$0xff]  ;;  %v501_v6 = vld [vmem:[#allocation2 + $0x2c8] sm:$0xff] }
  0x59   :  { %733 = vmatpush2.msra.mxu0 %v516_v56  ;;  %804 = vmatpush2.msra.mxu1 %v644_v57  ;;  %v629_v7 = vld [vmem:[#allocation2 + $0x6c8] sm:$0xff]  ;;  %v500_v8 = vld [vmem:[#allocation2 + $0x2c0] sm:$0xff] }
  0x5a   :  { %734 = vmatprep.subr.mxu0 %v513_v58  ;;  %805 = vmatprep.subr.mxu1 %v641_v59  ;;  %v628_v9 = vld [vmem:[#allocation2 + $0x6c0] sm:$0xff]  ;;  %v497_v10 = vld [vmem:[#allocation2 + $0x2a8] sm:$0xff] }
  0x5b   :  { %735 = vmatpush2.msra.mxu0 %v512_v60  ;;  %806 = vmatpush2.msra.mxu1 %v640_v61  ;;  %v625_v11 = vld [vmem:[#allocation2 + $0x6a8] sm:$0xff]  ;;  %v496_v12 = vld [vmem:[#allocation2 + $0x2a0] sm:$0xff] }
  0x5c   :  { %736 = vmatprep.subr.mxu0 %v509_v62  ;;  %807 = vmatprep.subr.mxu1 %v637_v63  ;;  %v624_v13 = vld [vmem:[#allocation2 + $0x6a0] sm:$0xff]  ;;  %v493_v14 = vld [vmem:[#allocation2 + $0x288] sm:$0xff] }
  0x5d   :  { %737 = vmatpush2.msra.mxu0 %v508_v0  ;;  %808 = vmatpush2.msra.mxu1 %v636_v1  ;;  %v621_v15 = vld [vmem:[#allocation2 + $0x688] sm:$0xff]  ;;  %v492_v16 = vld [vmem:[#allocation2 + $0x280] sm:$0xff] }
  0x5e   :  { %738 = vmatprep.subr.mxu0 %v505_v2  ;;  %809 = vmatprep.subr.mxu1 %v633_v3  ;;  %v620_v17 = vld [vmem:[#allocation2 + $0x680] sm:$0xff]  ;;  %v489_v18 = vld [vmem:[#allocation2 + $0x268] sm:$0xff] }
  0x5f   :  { %739 = vmatpush2.msra.mxu0 %v504_v4  ;;  %810 = vmatpush2.msra.mxu1 %v632_v5  ;;  %v617_v19 = vld [vmem:[#allocation2 + $0x668] sm:$0xff]  ;;  %v488_v20 = vld [vmem:[#allocation2 + $0x260] sm:$0xff] }
  0x60   :  { %740 = vmatprep.subr.mxu0 %v501_v6  ;;  %811 = vmatprep.subr.mxu1 %v629_v7  ;;  %v616_v21 = vld [vmem:[#allocation2 + $0x660] sm:$0xff]  ;;  %v485_v22 = vld [vmem:[#allocation2 + $0x248] sm:$0xff] }
  0x61   :  { %741 = vmatpush2.msra.mxu0 %v500_v8  ;;  %812 = vmatpush2.msra.mxu1 %v628_v9  ;;  %v613_v23 = vld [vmem:[#allocation2 + $0x648] sm:$0xff]  ;;  %v484_v24 = vld [vmem:[#allocation2 + $0x240] sm:$0xff] }
  0x62   :  { %742 = vmatprep.subr.mxu0 %v497_v10  ;;  %813 = vmatprep.subr.mxu1 %v625_v11  ;;  %v612_v25 = vld [vmem:[#allocation2 + $0x640] sm:$0xff]  ;;  %v481_v26 = vld [vmem:[#allocation2 + $0x228] sm:$0xff] }
  0x63   :  { %743 = vmatpush2.msra.mxu0 %v496_v12  ;;  %814 = vmatpush2.msra.mxu1 %v624_v13  ;;  %v609_v27 = vld [vmem:[#allocation2 + $0x628] sm:$0xff]  ;;  %v480_v28 = vld [vmem:[#allocation2 + $0x220] sm:$0xff] }
  0x64   :  { %744 = vmatprep.subr.mxu0 %v493_v14  ;;  %815 = vmatprep.subr.mxu1 %v621_v15  ;;  %v608_v29 = vld [vmem:[#allocation2 + $0x620] sm:$0xff]  ;;  %v477_v30 = vld [vmem:[#allocation2 + $0x208] sm:$0xff] }
  0x65   :  { %745 = vmatpush2.msra.mxu0 %v492_v16  ;;  %816 = vmatpush2.msra.mxu1 %v620_v17  ;;  %v605_v31 = vld [vmem:[#allocation2 + $0x608] sm:$0xff]  ;;  %v476_v32 = vld [vmem:[#allocation2 + $0x200] sm:$0xff] }
  0x66   :  { %746 = vmatprep.subr.mxu0 %v489_v18  ;;  %817 = vmatprep.subr.mxu1 %v617_v19  ;;  %v604_v33 = vld [vmem:[#allocation2 + $0x600] sm:$0xff] }
  0x67   :  { %747 = vmatpush2.msra.mxu0 %v488_v20  ;;  %818 = vmatpush2.msra.mxu1 %v616_v21  ;;  %v111_v40 = vld [vmem:[%s2688_s2] sm:$0xf] }
  0x68   :  { %748 = vmatprep.subr.mxu0 %v485_v22  ;;  %819 = vmatprep.subr.mxu1 %v613_v23  ;;  %v116_v43 = vrot.slane %v111_v40, %v2355_v38  ;;  %v124_v44 = vrot.slane %v111_v40, %v2357_v39  ;;  %v120_v45 = vrot.slane %v111_v40, %v2362_v41 }
  0x69   :  { %749 = vmatpush2.msra.mxu0 %v484_v24  ;;  %820 = vmatpush2.msra.mxu1 %v612_v25  ;;  %v128_v46 = vrot.slane %v111_v40, %v2364_v42 }
  0x6a   :  { %750 = vmatprep.subr.mxu0 %v481_v26  ;;  %821 = vmatprep.subr.mxu1 %v609_v27 }
  0x6b   :  { %751 = vmatpush2.msra.mxu0 %v480_v28  ;;  %822 = vmatpush2.msra.mxu1 %v608_v29 }
  0x6c   :  { %752 = vmatprep.subr.mxu0 %v477_v30  ;;  %823 = vmatprep.subr.mxu1 %v605_v31 }
  0x6d   :  { %753 = vmatpush2.msra.mxu0 %v476_v32  ;;  %824 = vmatpush2.msra.mxu1 %v604_v33 }
  0x6e   :  { %832 = vmatprep.subr.mxu0 %v475_v34  ;;  %903 = vmatprep.subr.mxu1 %v603_v35 }
  0xed   :  { %v203_v47 = vpop.f32.mrf.mxu0  ;;  %v274_v48 = vpop.f32.mrf.mxu1 }
  0xee   :  { %v204_v49 = vadd.f32 %v203_v47, %v116_v43  ;;  %v275_v50 = vadd.f32 %v274_v48, %v124_v44 }
  0xef   :  { %v205_v51 = vpop.f32.mrf.mxu0  ;;  %v276_v52 = vpop.f32.mrf.mxu1 }
  0xf0   :  { %v279_v53 = vmax.f32 %v204_v49, 0.0  ;;  %v281_v54 = vmax.f32 %v275_v50, 0.0  ;;  %v206_v55 = vadd.f32 %v205_v51, %v120_v45  ;;  %v277_v56 = vadd.f32 %v276_v52, %v128_v46 }
  0xf2   :  { %v283_v57 = vrot.slane %v279_v53, 4  ;;  %v295_v58 = vrot.slane %v281_v54, 4  ;;  %v280_v59 = vmax.f32 %v206_v55, 0.0  ;;  %v282_v60 = vmax.f32 %v277_v56, 0.0 }
  0xf4   :  { %v284_v61 = vadd.f32 %v283_v57, %v279_v53  ;;  %v296_v62 = vadd.f32 %v295_v58, %v281_v54  ;;  %v289_v63 = vrot.slane %v280_v59, 4  ;;  %v301_v0 = vrot.slane %v282_v60, 4 }
  0xf6   :  { %v285_v1 = vrot.slane %v284_v61, 2  ;;  %v297_v2 = vrot.slane %v296_v62, 2  ;;  %v290_v3 = vadd.f32 %v289_v63, %v280_v59  ;;  %v302_v4 = vadd.f32 %v301_v0, %v282_v60 }
  0xf8   :  { %v286_v5 = vadd.f32 %v285_v1, %v284_v61  ;;  %v298_v6 = vadd.f32 %v297_v2, %v296_v62  ;;  %v291_v7 = vrot.slane %v290_v3, 2  ;;  %v303_v8 = vrot.slane %v302_v4, 2 }
  0xfa   :  { %v287_v9 = vrot.slane %v286_v5, 1  ;;  %v299_v10 = vrot.slane %v298_v6, 1  ;;  %v292_v11 = vadd.f32 %v291_v7, %v290_v3  ;;  %v304_v12 = vadd.f32 %v303_v8, %v302_v4  ;;  %v360_v3 = vld [vmem:[%s2689_s3] sm:$0xf] }
  0xfb   :  { %v369_v8 = vrot.slane %v360_v3, %v2362_v41 }
  0xfc   :  { %v288_v13 = vadd.f32 %v287_v9, %v286_v5  ;;  %v300_v14 = vadd.f32 %v299_v10, %v298_v6  ;;  %v293_v15 = vrot.slane %v292_v11, 1  ;;  %v305_v16 = vrot.slane %v304_v12, 1  ;;  %v386_v9 = vld [vmem:[%s2690_s4] sm:$0xf] }
  0xfd   :  { %v365_v5 = vrot.slane %v360_v3, %v2355_v38  ;;  %v373_v10 = vrot.slane %v360_v3, %v2357_v39 }
  0xfe   :  { %v308_v17 = vmul.f32 0.125, %v288_v13  ;;  %v310_v18 = vmul.f32 0.125, %v300_v14  ;;  %v294_v19 = vadd.f32 %v293_v15, %v292_v11  ;;  %v306_v20 = vadd.f32 %v305_v16, %v304_v12 }
  0xff   :  { %v377_v13 = vrot.slane %v360_v3, %v2364_v42  ;;  %v395_v16 = vrot.slane %v386_v9, %v2362_v41  ;;  %v439_v3 = vld [vmem:[#allocation2 + $0xd8] sm:$0xff] }
 0x100   :  { %v312_v21 = vsub.f32 %v279_v53, %v308_v17  ;;  %v314_v22 = vsub.f32 %v281_v54, %v310_v18  ;;  %v309_v23 = vmul.f32 0.125, %v294_v19  ;;  %v311_v24 = vmul.f32 0.125, %v306_v20 }
 0x101   :  { %v403_v18 = vrot.slane %v386_v9, %v2364_v42  ;;  %v391_v20 = vrot.slane %v386_v9, %v2355_v38 }
 0x102   :  { %v316_v25 = vmul.f32 %v312_v21, %v312_v21  ;;  %v318_v26 = vmul.f32 %v314_v22, %v314_v22  ;;  %v313_v27 = vsub.f32 %v280_v59, %v309_v23  ;;  %v315_v28 = vsub.f32 %v282_v60, %v311_v24 }
 0x103   :  { %v399_v24 = vrot.slane %v386_v9, %v2357_v39  ;;  %v434_v9 = vld [vmem:[#allocation2 + $0xb0] sm:$0xff] }
 0x104   :  { %v320_v29 = vrot.slane %v316_v25, 4  ;;  %v332_v30 = vrot.slane %v318_v26, 4  ;;  %v317_v31 = vmul.f32 %v313_v27, %v313_v27  ;;  %v319_v32 = vmul.f32 %v315_v28, %v315_v28 }
 0x106   :  { %v321_v33 = vadd.f32 %v320_v29, %v316_v25  ;;  %v333_v34 = vadd.f32 %v332_v30, %v318_v26  ;;  %v326_v35 = vrot.slane %v317_v31, 4  ;;  %v338_v36 = vrot.slane %v319_v32, 4  ;;  %v474_v30 = vld [vmem:[#allocation2 + $0x1f0] sm:$0xff] }
 0x108   :  { %v322_v37 = vrot.slane %v321_v33, 2  ;;  %v334_v40 = vrot.slane %v333_v34, 2  ;;  %v327_v43 = vadd.f32 %v326_v35, %v317_v31  ;;  %v339_v44 = vadd.f32 %v338_v36, %v319_v32  ;;  %v602_v31 = vld [vmem:[#allocation2 + $0x5f0] sm:$0xff]  ;;  %v599_v32 = vld [vmem:[#allocation2 + $0x5d8] sm:$0xff] }
 0x109   :  { %v467_v35 = vld [vmem:[#allocation2 + $0x1b8] sm:$0xff] }
 0x10a   :  { %v323_v45 = vadd.f32 %v322_v37, %v321_v33  ;;  %v335_v46 = vadd.f32 %v334_v40, %v333_v34  ;;  %v328_v47 = vrot.slane %v327_v43, 2  ;;  %v340_v48 = vrot.slane %v339_v44, 2  ;;  %v470_v33 = vld [vmem:[#allocation2 + $0x1d0] sm:$0xff]  ;;  %v595_v36 = vld [vmem:[#allocation2 + $0x5b8] sm:$0xff] }
 0x10b   :  { %v598_v34 = vld [vmem:[#allocation2 + $0x5d0] sm:$0xff] }
 0x10c   :  { %v324_v49 = vrot.slane %v323_v45, 1  ;;  %v336_v50 = vrot.slane %v335_v46, 1  ;;  %v329_v51 = vadd.f32 %v328_v47, %v327_v43  ;;  %v341_v52 = vadd.f32 %v340_v48, %v339_v44  ;;  %v466_v37 = vld [vmem:[#allocation2 + $0x1b0] sm:$0xff]  ;;  %v463_v43 = vld [vmem:[#allocation2 + $0x198] sm:$0xff] }
 0x10d   :  { %v594_v40 = vld [vmem:[#allocation2 + $0x5b0] sm:$0xff]  ;;  %v591_v44 = vld [vmem:[#allocation2 + $0x598] sm:$0xff] }
 0x10e   :  { %v325_v53 = vadd.f32 %v324_v49, %v323_v45  ;;  %v337_v54 = vadd.f32 %v336_v50, %v335_v46  ;;  %v330_v55 = vrot.slane %v329_v51, 1  ;;  %v342_v56 = vrot.slane %v341_v52, 1  ;;  %v462_v45 = vld [vmem:[#allocation2 + $0x190] sm:$0xff]  ;;  %v459_v47 = vld [vmem:[#allocation2 + $0x178] sm:$0xff] }
 0x10f   :  { %v590_v46 = vld [vmem:[#allocation2 + $0x590] sm:$0xff]  ;;  %v587_v48 = vld [vmem:[#allocation2 + $0x578] sm:$0xff] }
 0x110   :  { %v344_v57 = vmul.f32 0.125, %v325_v53  ;;  %v346_v58 = vmul.f32 0.125, %v337_v54  ;;  %v331_v59 = vadd.f32 %v330_v55, %v329_v51  ;;  %v343_v60 = vadd.f32 %v342_v56, %v341_v52  ;;  %v458_v49 = vld [vmem:[#allocation2 + $0x170] sm:$0xff]  ;;  %v455_v51 = vld [vmem:[#allocation2 + $0x158] sm:$0xff] }
 0x111   :  { %v586_v50 = vld [vmem:[#allocation2 + $0x570] sm:$0xff]  ;;  %v583_v52 = vld [vmem:[#allocation2 + $0x558] sm:$0xff] }
 0x112   :  { %v348_v61 = vadd.f32 1e-05, %v344_v57  ;;  %v350_v62 = vadd.f32 1e-05, %v346_v58  ;;  %v345_v63 = vmul.f32 0.125, %v331_v59  ;;  %v347_v0 = vmul.f32 0.125, %v343_v60 }
 0x113   :  { %v454_v53 = vld [vmem:[#allocation2 + $0x150] sm:$0xff]  ;;  %v451_v55 = vld [vmem:[#allocation2 + $0x138] sm:$0xff] }
 0x114   :  { %2097 = vrsqrt.f32 %v348_v61  ;;  %v349_v1 = vadd.f32 1e-05, %v345_v63  ;;  %v351_v2 = vadd.f32 1e-05, %v347_v0  ;;  %v582_v54 = vld [vmem:[#allocation2 + $0x550] sm:$0xff]  ;;  %v579_v56 = vld [vmem:[#allocation2 + $0x538] sm:$0xff] }
 0x115   :  { %2099 = vrsqrt.f32 %v350_v62  ;;  %v450_v57 = vld [vmem:[#allocation2 + $0x130] sm:$0xff]  ;;  %v447_v59 = vld [vmem:[#allocation2 + $0x118] sm:$0xff] }
 0x116   :  { %2101 = vrsqrt.f32 %v349_v1  ;;  %v578_v58 = vld [vmem:[#allocation2 + $0x530] sm:$0xff]  ;;  %v575_v60 = vld [vmem:[#allocation2 + $0x518] sm:$0xff] }
 0x117   :  { %2103 = vrsqrt.f32 %v351_v2  ;;  %v446_v61 = vld [vmem:[#allocation2 + $0x110] sm:$0xff]  ;;  %v443_v63 = vld [vmem:[#allocation2 + $0xf8] sm:$0xff] }
 0x118   :  { %v574_v62 = vld [vmem:[#allocation2 + $0x510] sm:$0xff]  ;;  %v571_v0 = vld [vmem:[#allocation2 + $0x4f8] sm:$0xff] }
 0x119   :  { %v442_v1 = vld [vmem:[#allocation2 + $0xf0] sm:$0xff] }
 0x11a   :  { %v570_v2 = vld [vmem:[#allocation2 + $0x4f0] sm:$0xff] }
 0x121   :  { %v2098_v4 = vpop.eup %2097 }
 0x122   :  { %v2100_v6 = vpop.eup %2099  ;;  %v356_v7 = vmul.f32 %v2098_v4, %v312_v21  ;;  %v567_v4 = vld [vmem:[#allocation2 + $0x4d8] sm:$0xff] }
 0x123   :  { %v2102_v11 = vpop.eup %2101  ;;  %v358_v12 = vmul.f32 %v2100_v6, %v314_v22  ;;  %v566_v6 = vld [vmem:[#allocation2 + $0x4d0] sm:$0xff] }
 0x124   :  { %v2104_v14 = vpop.eup %2103  ;;  %v357_v15 = vmul.f32 %v2102_v11, %v313_v27  ;;  %v382_v19 = vmul.f32 %v365_v5, %v356_v7  ;;  %v438_v5 = vld [vmem:[#allocation2 + $0xd0] sm:$0xff]  ;;  %v435_v7 = vld [vmem:[#allocation2 + $0xb8] sm:$0xff] }
 0x125   :  { %v359_v17 = vmul.f32 %v2104_v14, %v315_v28  ;;  %v384_v23 = vmul.f32 %v373_v10, %v358_v12  ;;  %v471_v28 = vld [vmem:[#allocation2 + $0x1d8] sm:$0xff]  ;;  %v562_v10 = vld [vmem:[#allocation2 + $0x4b0] sm:$0xff] }
 0x126   :  { %v383_v21 = vmul.f32 %v369_v8, %v357_v15  ;;  %v2384_v22 = vadd.f32 %v391_v20, %v382_v19  ;;  %v563_v8 = vld [vmem:[#allocation2 + $0x4b8] sm:$0xff]  ;;  %v558_v14 = vld [vmem:[#allocation2 + $0x490] sm:$0xff] }
 0x127   :  { %v385_v25 = vmul.f32 %v377_v13, %v359_v17  ;;  %v2386_v27 = vadd.f32 %v399_v24, %v384_v23  ;;  %v431_v11 = vld [vmem:[#allocation2 + $0x98] sm:$0xff]  ;;  %v430_v13 = vld [vmem:[#allocation2 + $0x90] sm:$0xff] }
 0x128   :  { %v409_v26 = vadd.f32 %v395_v16, %v383_v21  ;;  %v559_v12 = vld [vmem:[#allocation2 + $0x498] sm:$0xff]  ;;  %v426_v17 = vld [vmem:[#allocation2 + $0x70] sm:$0xff] }
 0x129   :  { %v411_v29 = vadd.f32 %v403_v18, %v385_v25  ;;  %v427_v15 = vld [vmem:[#allocation2 + $0x78] sm:$0xff]  ;;  %v554_v18 = vld [vmem:[#allocation2 + $0x470] sm:$0xff] }
 0x12a   :  { %754 = vmatprep.mubr.f32.mxu0 %v409_v26  ;;  %v555_v16 = vld [vmem:[#allocation2 + $0x478] sm:$0xff]  ;;  %v422_v21 = vld [vmem:[#allocation2 + $0x50] sm:$0xff] }
 0x12b   :  { %825 = vmatprep.mubr.f32.mxu1 %v411_v29  ;;  %755 = vmatmul.mubr.f32.vlgmr.msra.gmra.mxu0 %v2384_v22  ;;  %v423_v19 = vld [vmem:[#allocation2 + $0x58] sm:$0xff]  ;;  %v550_v23 = vld [vmem:[#allocation2 + $0x450] sm:$0xff] }
 0x12c   :  { %826 = vmatmul.mubr.f32.vlgmr.msra.gmra.mxu1 %v2386_v27  ;;  %833 = vmatpush1.msra.mxu0 %v474_v30  ;;  %v551_v20 = vld [vmem:[#allocation2 + $0x458] sm:$0xff] }
 0x12d   :  { %904 = vmatpush1.msra.mxu1 %v602_v31  ;;  %834 = vmatprep.subr.mxu0 %v471_v28  ;;  %v419_v24 = vld [vmem:[#allocation2 + $0x38] sm:$0xff]  ;;  %v414_v28 = vld [vmem:[#allocation2 + $0x10] sm:$0xff] }
 0x12e   :  { %896 = vmatprep.mubr.f32.mxu0 %v409_v26  ;;  %905 = vmatprep.subr.mxu1 %v599_v32  ;;  %v547_v25 = vld [vmem:[#allocation2 + $0x438] sm:$0xff]  ;;  %v418_v26 = vld [vmem:[#allocation2 + $0x30] sm:$0xff] }
 0x12f   :  { %967 = vmatprep.mubr.f32.mxu1 %v411_v29  ;;  %835 = vmatpush1.msra.mxu0 %v470_v33  ;;  %v546_v29 = vld [vmem:[#allocation2 + $0x430] sm:$0xff]  ;;  %v415_v30 = vld [vmem:[#allocation2 + $0x18] sm:$0xff] }
 0x130   :  { %906 = vmatpush1.msra.mxu1 %v598_v34  ;;  %836 = vmatprep.subr.mxu0 %v467_v35  ;;  %v543_v31 = vld [vmem:[#allocation2 + $0x418] sm:$0xff]  ;;  %v542_v32 = vld [vmem:[#allocation2 + $0x410] sm:$0xff] }
 0x131   :  { %907 = vmatprep.subr.mxu1 %v595_v36  ;;  %837 = vmatpush1.msra.mxu0 %v466_v37  ;;  %v539_v33 = vld [vmem:[#allocation2 + $0x3f8] sm:$0xff]  ;;  %v538_v35 = vld [vmem:[#allocation2 + $0x3f0] sm:$0xff] }
 0x132   :  { %908 = vmatpush1.msra.mxu1 %v594_v40  ;;  %838 = vmatprep.subr.mxu0 %v463_v43  ;;  %v667_v34 = vld [vmem:[#allocation2 + $0x7f8] sm:$0xff]  ;;  %v666_v36 = vld [vmem:[#allocation2 + $0x7f0] sm:$0xff] }
 0x133   :  { %909 = vmatprep.subr.mxu1 %v591_v44  ;;  %839 = vmatpush1.msra.mxu0 %v462_v45  ;;  %v535_v37 = vld [vmem:[#allocation2 + $0x3d8] sm:$0xff]  ;;  %v534_v43 = vld [vmem:[#allocation2 + $0x3d0] sm:$0xff] }
 0x134   :  { %910 = vmatpush1.msra.mxu1 %v590_v46  ;;  %840 = vmatprep.subr.mxu0 %v459_v47  ;;  %v663_v40 = vld [vmem:[#allocation2 + $0x7d8] sm:$0xff]  ;;  %v662_v44 = vld [vmem:[#allocation2 + $0x7d0] sm:$0xff] }
 0x135   :  { %911 = vmatprep.subr.mxu1 %v587_v48  ;;  %841 = vmatpush1.msra.mxu0 %v458_v49  ;;  %v531_v45 = vld [vmem:[#allocation2 + $0x3b8] sm:$0xff]  ;;  %v530_v47 = vld [vmem:[#allocation2 + $0x3b0] sm:$0xff] }
 0x136   :  { %912 = vmatpush1.msra.mxu1 %v586_v50  ;;  %842 = vmatprep.subr.mxu0 %v455_v51  ;;  %v659_v46 = vld [vmem:[#allocation2 + $0x7b8] sm:$0xff]  ;;  %v658_v48 = vld [vmem:[#allocation2 + $0x7b0] sm:$0xff] }
 0x137   :  { %913 = vmatprep.subr.mxu1 %v583_v52  ;;  %843 = vmatpush1.msra.mxu0 %v454_v53  ;;  %v527_v49 = vld [vmem:[#allocation2 + $0x398] sm:$0xff]  ;;  %v526_v51 = vld [vmem:[#allocation2 + $0x390] sm:$0xff] }
 0x138   :  { %914 = vmatpush1.msra.mxu1 %v582_v54  ;;  %844 = vmatprep.subr.mxu0 %v451_v55  ;;  %v655_v50 = vld [vmem:[#allocation2 + $0x798] sm:$0xff]  ;;  %v654_v52 = vld [vmem:[#allocation2 + $0x790] sm:$0xff] }
 0x139   :  { %915 = vmatprep.subr.mxu1 %v579_v56  ;;  %845 = vmatpush1.msra.mxu0 %v450_v57  ;;  %v523_v53 = vld [vmem:[#allocation2 + $0x378] sm:$0xff]  ;;  %v522_v55 = vld [vmem:[#allocation2 + $0x370] sm:$0xff] }
 0x13a   :  { %916 = vmatpush1.msra.mxu1 %v578_v58  ;;  %846 = vmatprep.subr.mxu0 %v447_v59  ;;  %v651_v54 = vld [vmem:[#allocation2 + $0x778] sm:$0xff]  ;;  %v650_v56 = vld [vmem:[#allocation2 + $0x770] sm:$0xff] }
 0x13b   :  { %917 = vmatprep.subr.mxu1 %v575_v60  ;;  %847 = vmatpush1.msra.mxu0 %v446_v61  ;;  %v519_v57 = vld [vmem:[#allocation2 + $0x358] sm:$0xff]  ;;  %v518_v59 = vld [vmem:[#allocation2 + $0x350] sm:$0xff] }
 0x13c   :  { %918 = vmatpush1.msra.mxu1 %v574_v62  ;;  %848 = vmatprep.subr.mxu0 %v443_v63  ;;  %v647_v58 = vld [vmem:[#allocation2 + $0x758] sm:$0xff]  ;;  %v646_v60 = vld [vmem:[#allocation2 + $0x750] sm:$0xff] }
 0x13d   :  { %919 = vmatprep.subr.mxu1 %v571_v0  ;;  %849 = vmatpush1.msra.mxu0 %v442_v1  ;;  %v515_v61 = vld [vmem:[#allocation2 + $0x338] sm:$0xff]  ;;  %v514_v63 = vld [vmem:[#allocation2 + $0x330] sm:$0xff] }
 0x13e   :  { %920 = vmatpush1.msra.mxu1 %v570_v2  ;;  %850 = vmatprep.subr.mxu0 %v439_v3  ;;  %v643_v62 = vld [vmem:[#allocation2 + $0x738] sm:$0xff]  ;;  %v642_v0 = vld [vmem:[#allocation2 + $0x730] sm:$0xff] }
 0x13f   :  { %921 = vmatprep.subr.mxu1 %v567_v4  ;;  %851 = vmatpush1.msra.mxu0 %v438_v5  ;;  %v511_v1 = vld [vmem:[#allocation2 + $0x318] sm:$0xff]  ;;  %v510_v3 = vld [vmem:[#allocation2 + $0x310] sm:$0xff] }
 0x140   :  { %922 = vmatpush1.msra.mxu1 %v566_v6  ;;  %852 = vmatprep.subr.mxu0 %v435_v7  ;;  %v639_v2 = vld [vmem:[#allocation2 + $0x718] sm:$0xff]  ;;  %v638_v4 = vld [vmem:[#allocation2 + $0x710] sm:$0xff] }
 0x141   :  { %923 = vmatprep.subr.mxu1 %v563_v8  ;;  %853 = vmatpush1.msra.mxu0 %v434_v9  ;;  %v507_v5 = vld [vmem:[#allocation2 + $0x2f8] sm:$0xff]  ;;  %v506_v7 = vld [vmem:[#allocation2 + $0x2f0] sm:$0xff] }
 0x142   :  { %924 = vmatpush1.msra.mxu1 %v562_v10  ;;  %854 = vmatprep.subr.mxu0 %v431_v11  ;;  %v635_v6 = vld [vmem:[#allocation2 + $0x6f8] sm:$0xff]  ;;  %v634_v8 = vld [vmem:[#allocation2 + $0x6f0] sm:$0xff] }
 0x143   :  { %925 = vmatprep.subr.mxu1 %v559_v12  ;;  %855 = vmatpush1.msra.mxu0 %v430_v13  ;;  %v503_v9 = vld [vmem:[#allocation2 + $0x2d8] sm:$0xff]  ;;  %v502_v11 = vld [vmem:[#allocation2 + $0x2d0] sm:$0xff] }
 0x144   :  { %926 = vmatpush1.msra.mxu1 %v558_v14  ;;  %856 = vmatprep.subr.mxu0 %v427_v15  ;;  %v631_v10 = vld [vmem:[#allocation2 + $0x6d8] sm:$0xff]  ;;  %v630_v12 = vld [vmem:[#allocation2 + $0x6d0] sm:$0xff] }
 0x145   :  { %927 = vmatprep.subr.mxu1 %v555_v16  ;;  %857 = vmatpush1.msra.mxu0 %v426_v17  ;;  %v499_v13 = vld [vmem:[#allocation2 + $0x2b8] sm:$0xff]  ;;  %v498_v15 = vld [vmem:[#allocation2 + $0x2b0] sm:$0xff] }
 0x146   :  { %928 = vmatpush1.msra.mxu1 %v554_v18  ;;  %858 = vmatprep.subr.mxu0 %v423_v19  ;;  %v627_v14 = vld [vmem:[#allocation2 + $0x6b8] sm:$0xff]  ;;  %v626_v16 = vld [vmem:[#allocation2 + $0x6b0] sm:$0xff] }
 0x147   :  { %929 = vmatprep.subr.mxu1 %v551_v20  ;;  %859 = vmatpush1.msra.mxu0 %v422_v21  ;;  %v495_v17 = vld [vmem:[#allocation2 + $0x298] sm:$0xff]  ;;  %v494_v19 = vld [vmem:[#allocation2 + $0x290] sm:$0xff] }
 0x148   :  { %930 = vmatpush1.msra.mxu1 %v550_v23  ;;  %860 = vmatprep.subr.mxu0 %v419_v24  ;;  %v623_v18 = vld [vmem:[#allocation2 + $0x698] sm:$0xff]  ;;  %v622_v20 = vld [vmem:[#allocation2 + $0x690] sm:$0xff] }
 0x149   :  { %931 = vmatprep.subr.mxu1 %v547_v25  ;;  %861 = vmatpush1.msra.mxu0 %v418_v26  ;;  %v491_v21 = vld [vmem:[#allocation2 + $0x278] sm:$0xff]  ;;  %v490_v24 = vld [vmem:[#allocation2 + $0x270] sm:$0xff] }
 0x14a   :  { %932 = vmatpush1.msra.mxu1 %v546_v29  ;;  %862 = vmatprep.subr.mxu0 %v415_v30  ;;  %v619_v23 = vld [vmem:[#allocation2 + $0x678] sm:$0xff]  ;;  %v618_v25 = vld [vmem:[#allocation2 + $0x670] sm:$0xff] }
 0x14b   :  { %933 = vmatprep.subr.mxu1 %v543_v31  ;;  %863 = vmatpush1.msra.mxu0 %v414_v28  ;;  %v487_v26 = vld [vmem:[#allocation2 + $0x258] sm:$0xff]  ;;  %v486_v30 = vld [vmem:[#allocation2 + $0x250] sm:$0xff] }
 0x14c   :  { %934 = vmatpush1.msra.mxu1 %v542_v32  ;;  %864 = vmatprep.subr.mxu0 %v539_v33  ;;  %v615_v29 = vld [vmem:[#allocation2 + $0x658] sm:$0xff]  ;;  %v614_v31 = vld [vmem:[#allocation2 + $0x650] sm:$0xff] }
 0x14d   :  { %935 = vmatprep.subr.mxu1 %v667_v34  ;;  %865 = vmatpush2.msra.mxu0 %v538_v35  ;;  %v483_v28 = vld [vmem:[#allocation2 + $0x238] sm:$0xff]  ;;  %v482_v33 = vld [vmem:[#allocation2 + $0x230] sm:$0xff] }
 0x14e   :  { %936 = vmatpush2.msra.mxu1 %v666_v36  ;;  %866 = vmatprep.subr.mxu0 %v535_v37  ;;  %v611_v32 = vld [vmem:[#allocation2 + $0x638] sm:$0xff]  ;;  %v610_v34 = vld [vmem:[#allocation2 + $0x630] sm:$0xff] }
 0x14f   :  { %937 = vmatprep.subr.mxu1 %v663_v40  ;;  %867 = vmatpush2.msra.mxu0 %v534_v43  ;;  %v479_v35 = vld [vmem:[#allocation2 + $0x218] sm:$0xff]  ;;  %v478_v37 = vld [vmem:[#allocation2 + $0x210] sm:$0xff]  ;;  %v1167_v43 = vld [vmem:[#allocation4 + $0x1e8] sm:$0xff] }
 0x150   :  { %938 = vmatpush2.msra.mxu1 %v662_v44  ;;  %868 = vmatprep.subr.mxu0 %v531_v45  ;;  %v607_v36 = vld [vmem:[#allocation2 + $0x618] sm:$0xff]  ;;  %v606_v40 = vld [vmem:[#allocation2 + $0x610] sm:$0xff]  ;;  %v1166_v44 = vld [vmem:[#allocation4 + $0x1e0] sm:$0xff] }
 0x151   :  { %939 = vmatprep.subr.mxu1 %v659_v46  ;;  %869 = vmatpush2.msra.mxu0 %v530_v47  ;;  %v1163_v45 = vld [vmem:[#allocation4 + $0x1c8] sm:$0xff]  ;;  %v1162_v46 = vld [vmem:[#allocation4 + $0x1c0] sm:$0xff] }
 0x152   :  { %940 = vmatpush2.msra.mxu1 %v658_v48  ;;  %870 = vmatprep.subr.mxu0 %v527_v49  ;;  %v1159_v47 = vld [vmem:[#allocation4 + $0x1a8] sm:$0xff]  ;;  %v1158_v48 = vld [vmem:[#allocation4 + $0x1a0] sm:$0xff] }
 0x153   :  { %941 = vmatprep.subr.mxu1 %v655_v50  ;;  %871 = vmatpush2.msra.mxu0 %v526_v51  ;;  %v1155_v49 = vld [vmem:[#allocation4 + $0x188] sm:$0xff]  ;;  %v1154_v50 = vld [vmem:[#allocation4 + $0x180] sm:$0xff] }
 0x154   :  { %942 = vmatpush2.msra.mxu1 %v654_v52  ;;  %872 = vmatprep.subr.mxu0 %v523_v53  ;;  %v1151_v51 = vld [vmem:[#allocation4 + $0x168] sm:$0xff]  ;;  %v1146_v52 = vld [vmem:[#allocation4 + $0x140] sm:$0xff] }
 0x155   :  { %943 = vmatprep.subr.mxu1 %v651_v54  ;;  %873 = vmatpush2.msra.mxu0 %v522_v55  ;;  %v1143_v53 = vld [vmem:[#allocation4 + $0x128] sm:$0xff]  ;;  %v1142_v54 = vld [vmem:[#allocation4 + $0x120] sm:$0xff] }
 0x156   :  { %944 = vmatpush2.msra.mxu1 %v650_v56  ;;  %874 = vmatprep.subr.mxu0 %v519_v57  ;;  %v1139_v55 = vld [vmem:[#allocation4 + $0x108] sm:$0xff]  ;;  %v1138_v56 = vld [vmem:[#allocation4 + $0x100] sm:$0xff] }
 0x157   :  { %945 = vmatprep.subr.mxu1 %v647_v58  ;;  %875 = vmatpush2.msra.mxu0 %v518_v59  ;;  %v1135_v57 = vld [vmem:[#allocation4 + $0xe8] sm:$0xff]  ;;  %v1134_v58 = vld [vmem:[#allocation4 + $0xe0] sm:$0xff] }
 0x158   :  { %946 = vmatpush2.msra.mxu1 %v646_v60  ;;  %876 = vmatprep.subr.mxu0 %v515_v61  ;;  %v1131_v59 = vld [vmem:[#allocation4 + $0xc8] sm:$0xff]  ;;  %v1130_v60 = vld [vmem:[#allocation4 + $0xc0] sm:$0xff] }
 0x159   :  { %947 = vmatprep.subr.mxu1 %v643_v62  ;;  %877 = vmatpush2.msra.mxu0 %v514_v63  ;;  %v1127_v61 = vld [vmem:[#allocation4 + $0xa8] sm:$0xff]  ;;  %v1126_v62 = vld [vmem:[#allocation4 + $0xa0] sm:$0xff] }
 0x15a   :  { %948 = vmatpush2.msra.mxu1 %v642_v0  ;;  %878 = vmatprep.subr.mxu0 %v511_v1  ;;  %v1123_v63 = vld [vmem:[#allocation4 + $0x88] sm:$0xff]  ;;  %v1122_v0 = vld [vmem:[#allocation4 + $0x80] sm:$0xff] }
 0x15b   :  { %949 = vmatprep.subr.mxu1 %v639_v2  ;;  %879 = vmatpush2.msra.mxu0 %v510_v3  ;;  %v1119_v1 = vld [vmem:[#allocation4 + $0x68] sm:$0xff]  ;;  %v1118_v2 = vld [vmem:[#allocation4 + $0x60] sm:$0xff] }
 0x15c   :  { %950 = vmatpush2.msra.mxu1 %v638_v4  ;;  %880 = vmatprep.subr.mxu0 %v507_v5  ;;  %v1115_v3 = vld [vmem:[#allocation4 + $0x48] sm:$0xff]  ;;  %v1114_v4 = vld [vmem:[#allocation4 + $0x40] sm:$0xff] }
 0x15d   :  { %951 = vmatprep.subr.mxu1 %v635_v6  ;;  %881 = vmatpush2.msra.mxu0 %v506_v7  ;;  %v1111_v5 = vld [vmem:[#allocation4 + $0x28] sm:$0xff]  ;;  %v1110_v6 = vld [vmem:[#allocation4 + $0x20] sm:$0xff] }
 0x15e   :  { %952 = vmatpush2.msra.mxu1 %v634_v8  ;;  %882 = vmatprep.subr.mxu0 %v503_v9  ;;  %v1107_v7 = vld [vmem:[#allocation4 + $0x8] sm:$0xff]  ;;  %v1106_v8 = vld [vmem:[#allocation4] sm:$0xff] }
 0x15f   :  { %953 = vmatprep.subr.mxu1 %v631_v10  ;;  %883 = vmatpush2.msra.mxu0 %v502_v11  ;;  %v1231_v9 = vld [vmem:[#allocation4 + $0x3e8] sm:$0xff]  ;;  %v1230_v10 = vld [vmem:[#allocation4 + $0x3e0] sm:$0xff] }
 0x160   :  { %954 = vmatpush2.msra.mxu1 %v630_v12  ;;  %884 = vmatprep.subr.mxu0 %v499_v13  ;;  %v1227_v11 = vld [vmem:[#allocation4 + $0x3c8] sm:$0xff]  ;;  %v1226_v12 = vld [vmem:[#allocation4 + $0x3c0] sm:$0xff] }
 0x161   :  { %955 = vmatprep.subr.mxu1 %v627_v14  ;;  %885 = vmatpush2.msra.mxu0 %v498_v15  ;;  %v1223_v13 = vld [vmem:[#allocation4 + $0x3a8] sm:$0xff]  ;;  %v1222_v14 = vld [vmem:[#allocation4 + $0x3a0] sm:$0xff] }
 0x162   :  { %956 = vmatpush2.msra.mxu1 %v626_v16  ;;  %886 = vmatprep.subr.mxu0 %v495_v17  ;;  %v1219_v15 = vld [vmem:[#allocation4 + $0x388] sm:$0xff]  ;;  %v1218_v16 = vld [vmem:[#allocation4 + $0x380] sm:$0xff] }
 0x163   :  { %957 = vmatprep.subr.mxu1 %v623_v18  ;;  %887 = vmatpush2.msra.mxu0 %v494_v19  ;;  %v1215_v17 = vld [vmem:[#allocation4 + $0x368] sm:$0xff]  ;;  %v1214_v18 = vld [vmem:[#allocation4 + $0x360] sm:$0xff] }
 0x164   :  { %958 = vmatpush2.msra.mxu1 %v622_v20  ;;  %888 = vmatprep.subr.mxu0 %v491_v21  ;;  %v1211_v19 = vld [vmem:[#allocation4 + $0x348] sm:$0xff]  ;;  %v1210_v20 = vld [vmem:[#allocation4 + $0x340] sm:$0xff] }
 0x165   :  { %959 = vmatprep.subr.mxu1 %v619_v23  ;;  %889 = vmatpush2.msra.mxu0 %v490_v24  ;;  %v1207_v21 = vld [vmem:[#allocation4 + $0x328] sm:$0xff]  ;;  %v1206_v23 = vld [vmem:[#allocation4 + $0x320] sm:$0xff] }
 0x166   :  { %960 = vmatpush2.msra.mxu1 %v618_v25  ;;  %890 = vmatprep.subr.mxu0 %v487_v26  ;;  %v1203_v24 = vld [vmem:[#allocation4 + $0x308] sm:$0xff]  ;;  %v1202_v25 = vld [vmem:[#allocation4 + $0x300] sm:$0xff] }
 0x167   :  { %961 = vmatprep.subr.mxu1 %v615_v29  ;;  %891 = vmatpush2.msra.mxu0 %v486_v30  ;;  %v1199_v26 = vld [vmem:[#allocation4 + $0x2e8] sm:$0xff]  ;;  %v1198_v29 = vld [vmem:[#allocation4 + $0x2e0] sm:$0xff] }
 0x168   :  { %962 = vmatpush2.msra.mxu1 %v614_v31  ;;  %892 = vmatprep.subr.mxu0 %v483_v28  ;;  %v1195_v30 = vld [vmem:[#allocation4 + $0x2c8] sm:$0xff]  ;;  %v1194_v31 = vld [vmem:[#allocation4 + $0x2c0] sm:$0xff] }
 0x169   :  { %963 = vmatprep.subr.mxu1 %v611_v32  ;;  %893 = vmatpush2.msra.mxu0 %v482_v33  ;;  %v1191_v28 = vld [vmem:[#allocation4 + $0x2a8] sm:$0xff]  ;;  %v1190_v32 = vld [vmem:[#allocation4 + $0x2a0] sm:$0xff] }
 0x16a   :  { %964 = vmatpush2.msra.mxu1 %v610_v34  ;;  %894 = vmatprep.subr.mxu0 %v479_v35  ;;  %v1187_v33 = vld [vmem:[#allocation4 + $0x288] sm:$0xff]  ;;  %v1186_v34 = vld [vmem:[#allocation4 + $0x280] sm:$0xff] }
 0x16b   :  { %965 = vmatprep.subr.mxu1 %v607_v36  ;;  %895 = vmatpush2.msra.mxu0 %v478_v37  ;;  %v1183_v35 = vld [vmem:[#allocation4 + $0x268] sm:$0xff]  ;;  %v1182_v36 = vld [vmem:[#allocation4 + $0x260] sm:$0xff] }
 0x16c   :  { %966 = vmatpush2.msra.mxu1 %v606_v40  ;;  %897 = vmatmul.mubr.f32.vlgmr.msra.gmra.mxu0 %v2384_v22  ;;  %v1150_v22 = vld [vmem:[#allocation4 + $0x160] sm:$0xff]  ;;  %v1179_v37 = vld [vmem:[#allocation4 + $0x248] sm:$0xff] }
 0x16d   :  { %968 = vmatmul.mubr.f32.vlgmr.msra.gmra.mxu1 %v2386_v27  ;;  %1384 = vmatprep.subr.mxu0 %v1167_v43  ;;  %v1147_v27 = vld [vmem:[#allocation4 + $0x148] sm:$0xff]  ;;  %v1178_v40 = vld [vmem:[#allocation4 + $0x240] sm:$0xff] }
 0x16e   :  { %1385 = vmatpush1.msra.mxu0 %v1166_v44  ;;  %v1175_v43 = vld [vmem:[#allocation4 + $0x228] sm:$0xff] }
 0x16f   :  { %1386 = vmatprep.subr.mxu0 %v1163_v45  ;;  %v1295_v44 = vld [vmem:[#allocation4 + $0x5e8] sm:$0xff]  ;;  %v1174_v45 = vld [vmem:[#allocation4 + $0x220] sm:$0xff] }
 0x170   :  { %1387 = vmatpush1.msra.mxu0 %v1162_v46  ;;  %1455 = vmatprep.subr.mxu1 %v1295_v44  ;;  %v1171_v46 = vld [vmem:[#allocation4 + $0x208] sm:$0xff] }
 0x171   :  { %1388 = vmatprep.subr.mxu0 %v1159_v47  ;;  %v1170_v47 = vld [vmem:[#allocation4 + $0x200] sm:$0xff]  ;;  %v1311_v44 = vld [vmem:[#allocation4 + $0x668] sm:$0xff] }
 0x172   :  { %1389 = vmatpush1.msra.mxu0 %v1158_v48  ;;  %v1294_v48 = vld [vmem:[#allocation4 + $0x5e0] sm:$0xff] }
 0x173   :  { %1390 = vmatprep.subr.mxu0 %v1155_v49  ;;  %v1169_v49 = vld [vmem:[#allocation4 + $0x1f8] sm:$0xff]  ;;  %1456 = vmatpush1.msra.mxu1 %v1294_v48  ;;  %v1306_v48 = vld [vmem:[#allocation4 + $0x640] sm:$0xff] }
 0x174   :  { %1391 = vmatpush1.msra.mxu0 %v1154_v50  ;;  %v1291_v50 = vld [vmem:[#allocation4 + $0x5c8] sm:$0xff] }
 0x175   :  { %1392 = vmatprep.subr.mxu0 %v1151_v51  ;;  %1457 = vmatprep.subr.mxu1 %v1291_v50  ;;  %v1290_v51 = vld [vmem:[#allocation4 + $0x5c0] sm:$0xff] }
 0x176   :  { %1393 = vmatpush1.msra.mxu0 %v1150_v22  ;;  %1458 = vmatpush1.msra.mxu1 %v1290_v51  ;;  %v1287_v22 = vld [vmem:[#allocation4 + $0x5a8] sm:$0xff]  ;;  %v1302_v50 = vld [vmem:[#allocation4 + $0x620] sm:$0xff] }
 0x177   :  { %1394 = vmatprep.subr.mxu0 %v1147_v27  ;;  %1459 = vmatprep.subr.mxu1 %v1287_v22  ;;  %v1286_v27 = vld [vmem:[#allocation4 + $0x5a0] sm:$0xff]  ;;  %v1299_v51 = vld [vmem:[#allocation4 + $0x608] sm:$0xff] }
 0x178   :  { %1395 = vmatpush1.msra.mxu0 %v1146_v52  ;;  %1460 = vmatpush1.msra.mxu1 %v1286_v27  ;;  %v1283_v52 = vld [vmem:[#allocation4 + $0x588] sm:$0xff]  ;;  %v1298_v27 = vld [vmem:[#allocation4 + $0x600] sm:$0xff] }
 0x179   :  { %1396 = vmatprep.subr.mxu0 %v1143_v53  ;;  %1461 = vmatprep.subr.mxu1 %v1283_v52  ;;  %v1282_v53 = vld [vmem:[#allocation4 + $0x580] sm:$0xff] }
 0x17a   :  { %1397 = vmatpush1.msra.mxu0 %v1142_v54  ;;  %1462 = vmatpush1.msra.mxu1 %v1282_v53  ;;  %v1279_v54 = vld [vmem:[#allocation4 + $0x568] sm:$0xff] }
 0x17b   :  { %1398 = vmatprep.subr.mxu0 %v1139_v55  ;;  %1463 = vmatprep.subr.mxu1 %v1279_v54  ;;  %v1278_v55 = vld [vmem:[#allocation4 + $0x560] sm:$0xff]  ;;  %v1297_v54 = vld [vmem:[#allocation4 + $0x5f8] sm:$0xff] }
 0x17c   :  { %1399 = vmatpush1.msra.mxu0 %v1138_v56  ;;  %1464 = vmatpush1.msra.mxu1 %v1278_v55  ;;  %v1275_v56 = vld [vmem:[#allocation4 + $0x548] sm:$0xff] }
 0x17d   :  { %1400 = vmatprep.subr.mxu0 %v1135_v57  ;;  %1465 = vmatprep.subr.mxu1 %v1275_v56  ;;  %v1274_v57 = vld [vmem:[#allocation4 + $0x540] sm:$0xff] }
 0x17e   :  { %1401 = vmatpush1.msra.mxu0 %v1134_v58  ;;  %1466 = vmatpush1.msra.mxu1 %v1274_v57  ;;  %v1271_v58 = vld [vmem:[#allocation4 + $0x528] sm:$0xff] }
 0x17f   :  { %1402 = vmatprep.subr.mxu0 %v1131_v59  ;;  %1467 = vmatprep.subr.mxu1 %v1271_v58  ;;  %v1270_v59 = vld [vmem:[#allocation4 + $0x520] sm:$0xff] }
 0x180   :  { %1403 = vmatpush1.msra.mxu0 %v1130_v60  ;;  %1468 = vmatpush1.msra.mxu1 %v1270_v59  ;;  %v1267_v60 = vld [vmem:[#allocation4 + $0x508] sm:$0xff] }
 0x181   :  { %1404 = vmatprep.subr.mxu0 %v1127_v61  ;;  %1469 = vmatprep.subr.mxu1 %v1267_v60  ;;  %v1266_v61 = vld [vmem:[#allocation4 + $0x500] sm:$0xff] }
 0x182   :  { %1405 = vmatpush1.msra.mxu0 %v1126_v62  ;;  %1470 = vmatpush1.msra.mxu1 %v1266_v61  ;;  %v1263_v62 = vld [vmem:[#allocation4 + $0x4e8] sm:$0xff] }
 0x183   :  { %1406 = vmatprep.subr.mxu0 %v1123_v63  ;;  %1471 = vmatprep.subr.mxu1 %v1263_v62  ;;  %v1262_v63 = vld [vmem:[#allocation4 + $0x4e0] sm:$0xff] }
 0x184   :  { %1407 = vmatpush1.msra.mxu0 %v1122_v0  ;;  %1472 = vmatpush1.msra.mxu1 %v1262_v63  ;;  %v1259_v0 = vld [vmem:[#allocation4 + $0x4c8] sm:$0xff] }
 0x185   :  { %1408 = vmatprep.subr.mxu0 %v1119_v1  ;;  %1473 = vmatprep.subr.mxu1 %v1259_v0  ;;  %v1258_v1 = vld [vmem:[#allocation4 + $0x4c0] sm:$0xff] }
 0x186   :  { %1409 = vmatpush1.msra.mxu0 %v1118_v2  ;;  %1474 = vmatpush1.msra.mxu1 %v1258_v1  ;;  %v1255_v2 = vld [vmem:[#allocation4 + $0x4a8] sm:$0xff] }
 0x187   :  { %1410 = vmatprep.subr.mxu0 %v1115_v3  ;;  %1475 = vmatprep.subr.mxu1 %v1255_v2  ;;  %v1254_v3 = vld [vmem:[#allocation4 + $0x4a0] sm:$0xff] }
 0x188   :  { %1411 = vmatpush1.msra.mxu0 %v1114_v4  ;;  %1476 = vmatpush1.msra.mxu1 %v1254_v3  ;;  %v1251_v4 = vld [vmem:[#allocation4 + $0x488] sm:$0xff] }
 0x189   :  { %1412 = vmatprep.subr.mxu0 %v1111_v5  ;;  %1477 = vmatprep.subr.mxu1 %v1251_v4  ;;  %v1250_v5 = vld [vmem:[#allocation4 + $0x480] sm:$0xff] }
 0x18a   :  { %1413 = vmatpush1.msra.mxu0 %v1110_v6  ;;  %1478 = vmatpush1.msra.mxu1 %v1250_v5  ;;  %v1247_v6 = vld [vmem:[#allocation4 + $0x468] sm:$0xff] }
 0x18b   :  { %1414 = vmatprep.subr.mxu0 %v1107_v7  ;;  %1479 = vmatprep.subr.mxu1 %v1247_v6  ;;  %v1246_v7 = vld [vmem:[#allocation4 + $0x460] sm:$0xff] }
 0x18c   :  { %1415 = vmatpush1.msra.mxu0 %v1106_v8  ;;  %1480 = vmatpush1.msra.mxu1 %v1246_v7  ;;  %v1243_v8 = vld [vmem:[#allocation4 + $0x448] sm:$0xff] }
 0x18d   :  { %1416 = vmatprep.subr.mxu0 %v1231_v9  ;;  %1481 = vmatprep.subr.mxu1 %v1243_v8  ;;  %v1242_v9 = vld [vmem:[#allocation4 + $0x440] sm:$0xff] }
 0x18e   :  { %1417 = vmatpush2.msra.mxu0 %v1230_v10  ;;  %1482 = vmatpush1.msra.mxu1 %v1242_v9  ;;  %v1239_v10 = vld [vmem:[#allocation4 + $0x428] sm:$0xff] }
 0x18f   :  { %1418 = vmatprep.subr.mxu0 %v1227_v11  ;;  %1483 = vmatprep.subr.mxu1 %v1239_v10  ;;  %v1238_v11 = vld [vmem:[#allocation4 + $0x420] sm:$0xff] }
 0x190   :  { %1419 = vmatpush2.msra.mxu0 %v1226_v12  ;;  %1484 = vmatpush1.msra.mxu1 %v1238_v11  ;;  %v1235_v12 = vld [vmem:[#allocation4 + $0x408] sm:$0xff] }
 0x191   :  { %1420 = vmatprep.subr.mxu0 %v1223_v13  ;;  %1485 = vmatprep.subr.mxu1 %v1235_v12  ;;  %v1234_v13 = vld [vmem:[#allocation4 + $0x400] sm:$0xff] }
 0x192   :  { %1421 = vmatpush2.msra.mxu0 %v1222_v14  ;;  %1486 = vmatpush1.msra.mxu1 %v1234_v13  ;;  %v1359_v14 = vld [vmem:[#allocation4 + $0x7e8] sm:$0xff] }
 0x193   :  { %1422 = vmatprep.subr.mxu0 %v1219_v15  ;;  %1487 = vmatprep.subr.mxu1 %v1359_v14  ;;  %v1358_v15 = vld [vmem:[#allocation4 + $0x7e0] sm:$0xff] }
 0x194   :  { %1423 = vmatpush2.msra.mxu0 %v1218_v16  ;;  %1488 = vmatpush2.msra.mxu1 %v1358_v15  ;;  %v1355_v16 = vld [vmem:[#allocation4 + $0x7c8] sm:$0xff] }
 0x195   :  { %1424 = vmatprep.subr.mxu0 %v1215_v17  ;;  %1489 = vmatprep.subr.mxu1 %v1355_v16  ;;  %v1354_v17 = vld [vmem:[#allocation4 + $0x7c0] sm:$0xff] }
 0x196   :  { %1425 = vmatpush2.msra.mxu0 %v1214_v18  ;;  %1490 = vmatpush2.msra.mxu1 %v1354_v17  ;;  %v1351_v18 = vld [vmem:[#allocation4 + $0x7a8] sm:$0xff] }
 0x197   :  { %1426 = vmatprep.subr.mxu0 %v1211_v19  ;;  %1491 = vmatprep.subr.mxu1 %v1351_v18  ;;  %v1350_v19 = vld [vmem:[#allocation4 + $0x7a0] sm:$0xff] }
 0x198   :  { %1427 = vmatpush2.msra.mxu0 %v1210_v20  ;;  %1492 = vmatpush2.msra.mxu1 %v1350_v19  ;;  %v1347_v20 = vld [vmem:[#allocation4 + $0x788] sm:$0xff] }
 0x199   :  { %1428 = vmatprep.subr.mxu0 %v1207_v21  ;;  %1493 = vmatprep.subr.mxu1 %v1347_v20  ;;  %v1346_v21 = vld [vmem:[#allocation4 + $0x780] sm:$0xff] }
 0x19a   :  { %1429 = vmatpush2.msra.mxu0 %v1206_v23  ;;  %1494 = vmatpush2.msra.mxu1 %v1346_v21  ;;  %v1343_v23 = vld [vmem:[#allocation4 + $0x768] sm:$0xff] }
 0x19b   :  { %1430 = vmatprep.subr.mxu0 %v1203_v24  ;;  %1495 = vmatprep.subr.mxu1 %v1343_v23  ;;  %v1342_v24 = vld [vmem:[#allocation4 + $0x760] sm:$0xff] }
 0x19c   :  { %1431 = vmatpush2.msra.mxu0 %v1202_v25  ;;  %1496 = vmatpush2.msra.mxu1 %v1342_v24  ;;  %v1339_v25 = vld [vmem:[#allocation4 + $0x748] sm:$0xff] }
 0x19d   :  { %1432 = vmatprep.subr.mxu0 %v1199_v26  ;;  %1497 = vmatprep.subr.mxu1 %v1339_v25  ;;  %v1338_v26 = vld [vmem:[#allocation4 + $0x740] sm:$0xff] }
 0x19e   :  { %1433 = vmatpush2.msra.mxu0 %v1198_v29  ;;  %1498 = vmatpush2.msra.mxu1 %v1338_v26  ;;  %v1335_v29 = vld [vmem:[#allocation4 + $0x728] sm:$0xff] }
 0x19f   :  { %1434 = vmatprep.subr.mxu0 %v1195_v30  ;;  %1499 = vmatprep.subr.mxu1 %v1335_v29  ;;  %v1334_v30 = vld [vmem:[#allocation4 + $0x720] sm:$0xff] }
 0x1a0   :  { %1435 = vmatpush2.msra.mxu0 %v1194_v31  ;;  %1500 = vmatpush2.msra.mxu1 %v1334_v30  ;;  %v1331_v31 = vld [vmem:[#allocation4 + $0x708] sm:$0xff] }
 0x1a1   :  { %1436 = vmatprep.subr.mxu0 %v1191_v28  ;;  %1501 = vmatprep.subr.mxu1 %v1331_v31  ;;  %v1330_v28 = vld [vmem:[#allocation4 + $0x700] sm:$0xff] }
 0x1a2   :  { %1437 = vmatpush2.msra.mxu0 %v1190_v32  ;;  %1502 = vmatpush2.msra.mxu1 %v1330_v28  ;;  %v1327_v32 = vld [vmem:[#allocation4 + $0x6e8] sm:$0xff] }
 0x1a3   :  { %1438 = vmatprep.subr.mxu0 %v1187_v33  ;;  %1503 = vmatprep.subr.mxu1 %v1327_v32  ;;  %v1326_v33 = vld [vmem:[#allocation4 + $0x6e0] sm:$0xff] }
 0x1a4   :  { %1439 = vmatpush2.msra.mxu0 %v1186_v34  ;;  %1504 = vmatpush2.msra.mxu1 %v1326_v33  ;;  %v1323_v34 = vld [vmem:[#allocation4 + $0x6c8] sm:$0xff] }
 0x1a5   :  { %1440 = vmatprep.subr.mxu0 %v1183_v35  ;;  %1505 = vmatprep.subr.mxu1 %v1323_v34  ;;  %v1322_v35 = vld [vmem:[#allocation4 + $0x6c0] sm:$0xff] }
 0x1a6   :  { %1441 = vmatpush2.msra.mxu0 %v1182_v36  ;;  %1506 = vmatpush2.msra.mxu1 %v1322_v35  ;;  %v1319_v36 = vld [vmem:[#allocation4 + $0x6a8] sm:$0xff] }
 0x1a7   :  { %1442 = vmatprep.subr.mxu0 %v1179_v37  ;;  %1507 = vmatprep.subr.mxu1 %v1319_v36  ;;  %v1318_v37 = vld [vmem:[#allocation4 + $0x6a0] sm:$0xff] }
 0x1a8   :  { %1443 = vmatpush2.msra.mxu0 %v1178_v40  ;;  %1508 = vmatpush2.msra.mxu1 %v1318_v37  ;;  %v1315_v40 = vld [vmem:[#allocation4 + $0x688] sm:$0xff]  ;;  %v2404_v36 = vld [vmem:[%s2693_s7] sm:$0xf] }
 0x1a9   :  { %1444 = vmatprep.subr.mxu0 %v1175_v43  ;;  %1509 = vmatprep.subr.mxu1 %v1315_v40  ;;  %v1314_v43 = vld [vmem:[#allocation4 + $0x680] sm:$0xff]  ;;  %v1059_v40 = vrot.slane %v2404_v36, %v2355_v38 }
 0x1aa   :  { %1445 = vmatpush2.msra.mxu0 %v1174_v45  ;;  %1510 = vmatpush2.msra.mxu1 %v1314_v43  ;;  %v1310_v45 = vld [vmem:[#allocation4 + $0x660] sm:$0xff] }
 0x1ab   :  { %1446 = vmatprep.subr.mxu0 %v1171_v46  ;;  %1511 = vmatprep.subr.mxu1 %v1311_v44  ;;  %v2395_v46 = vld [vmem:[%s2692_s6] sm:$0xf]  ;;  %v1063_v44 = vrot.slane %v2404_v36, %v2362_v41 }
 0x1ac   :  { %1447 = vmatpush2.msra.mxu0 %v1170_v47  ;;  %1512 = vmatpush2.msra.mxu1 %v1310_v45  ;;  %v1307_v47 = vld [vmem:[#allocation4 + $0x648] sm:$0xff]  ;;  %v673_v22 = vrot.slane %v2395_v46, %v2355_v38  ;;  %v677_v52 = vrot.slane %v2395_v46, %v2362_v41  ;;  %v2413_v45 = vld [vmem:[%s2694_s8] sm:$0xf] }
 0x1ad   :  { %1526 = vmatprep.subr.mxu0 %v1169_v49  ;;  %1513 = vmatprep.subr.mxu1 %v1307_v47  ;;  %v1303_v49 = vld [vmem:[#allocation4 + $0x628] sm:$0xff] }
 0x1ae   :  { %1514 = vmatpush2.msra.mxu1 %v1306_v48 }
 0x1af   :  { %1515 = vmatprep.subr.mxu1 %v1303_v49  ;;  %v1089_v49 = vrot.slane %v2413_v45, %v2362_v41 }
 0x1b0   :  { %1516 = vmatpush2.msra.mxu1 %v1302_v50 }
 0x1b1   :  { %1517 = vmatprep.subr.mxu1 %v1299_v51  ;;  %v1085_v51 = vrot.slane %v2413_v45, %v2355_v38 }
 0x1b2   :  { %1518 = vmatpush2.msra.mxu1 %v1298_v27 }
 0x1b3   :  { %1597 = vmatprep.subr.mxu1 %v1297_v54  ;;  %v1168_v54 = vld [vmem:[#allocation4 + $0x1f0] sm:$0xff] }
 0x1eb   :  { %v756_v53 = vpop.f32.mrf.mxu0 }
 0x1ec   :  { %v757_v55 = vadd.f32 %v756_v53, %v673_v22  ;;  %v827_v56 = vpop.f32.mrf.mxu1 }
 0x1ed   :  { %v758_v57 = vpop.f32.mrf.mxu0 }
 0x1ee   :  { %v828_v58 = vadd.f32 %v827_v56, %v757_v55  ;;  %v759_v59 = vadd.f32 %v758_v57, %v677_v52  ;;  %v829_v60 = vpop.f32.mrf.mxu1  ;;  %v681_v52 = vrot.slane %v2395_v46, %v2357_v39  ;;  %v1165_v55 = vld [vmem:[#allocation4 + $0x1d8] sm:$0xff]  ;;  %v685_v56 = vrot.slane %v2395_v46, %v2364_v42  ;;  %v1164_v57 = vld [vmem:[#allocation4 + $0x1d0] sm:$0xff] }
 0x1f0   :  { %v974_v61 = vmax.f32 %v828_v58, 0.0  ;;  %v830_v62 = vadd.f32 %v829_v60, %v759_v59  ;;  %v1161_v59 = vld [vmem:[#allocation4 + $0x1b8] sm:$0xff] }
 0x1f2   :  { %v978_v63 = vrot.slane %v974_v61, 4  ;;  %v975_v0 = vmax.f32 %v830_v62, 0.0  ;;  %v1160_v62 = vld [vmem:[#allocation4 + $0x1b0] sm:$0xff] }
 0x1f4   :  { %v979_v1 = vadd.f32 %v978_v63, %v974_v61  ;;  %v984_v2 = vrot.slane %v975_v0, 4 }
 0x1f6   :  { %v980_v3 = vrot.slane %v979_v1, 2  ;;  %v985_v4 = vadd.f32 %v984_v2, %v975_v0 }
 0x1f8   :  { %v981_v5 = vadd.f32 %v980_v3, %v979_v1  ;;  %v986_v6 = vrot.slane %v985_v4, 2  ;;  %v1156_v3 = vld [vmem:[#allocation4 + $0x190] sm:$0xff] }
 0x1fa   :  { %v982_v7 = vrot.slane %v981_v5, 1  ;;  %v987_v8 = vadd.f32 %v986_v6, %v985_v4 }
 0x1fc   :  { %v983_v9 = vadd.f32 %v982_v7, %v981_v5  ;;  %v988_v10 = vrot.slane %v987_v8, 1  ;;  %v1153_v5 = vld [vmem:[#allocation4 + $0x178] sm:$0xff]  ;;  %v1152_v7 = vld [vmem:[#allocation4 + $0x170] sm:$0xff] }
 0x1fe   :  { %v1002_v11 = vmul.f32 0.125, %v983_v9  ;;  %v989_v12 = vadd.f32 %v988_v10, %v987_v8  ;;  %v1149_v8 = vld [vmem:[#allocation4 + $0x158] sm:$0xff] }
 0x200   :  { %v1006_v13 = vsub.f32 %v974_v61, %v1002_v11  ;;  %v1003_v14 = vmul.f32 0.125, %v989_v12  ;;  %v1148_v11 = vld [vmem:[#allocation4 + $0x150] sm:$0xff]  ;;  %v1145_v12 = vld [vmem:[#allocation4 + $0x138] sm:$0xff] }
 0x202   :  { %v1010_v15 = vmul.f32 %v1006_v13, %v1006_v13  ;;  %v1007_v16 = vsub.f32 %v975_v0, %v1003_v14  ;;  %v1157_v0 = vld [vmem:[#allocation4 + $0x198] sm:$0xff] }
 0x204   :  { %v1014_v17 = vrot.slane %v1010_v15, 4  ;;  %v1011_v18 = vmul.f32 %v1007_v16, %v1007_v16 }
 0x206   :  { %v1015_v19 = vadd.f32 %v1014_v17, %v1010_v15  ;;  %v1020_v20 = vrot.slane %v1011_v18, 4  ;;  %v1144_v15 = vld [vmem:[#allocation4 + $0x130] sm:$0xff] }
 0x208   :  { %v1016_v21 = vrot.slane %v1015_v19, 2  ;;  %v1021_v23 = vadd.f32 %v1020_v20, %v1011_v18  ;;  %v1137_v20 = vld [vmem:[#allocation4 + $0xf8] sm:$0xff] }
 0x20a   :  { %v1017_v24 = vadd.f32 %v1016_v21, %v1015_v19  ;;  %v1022_v25 = vrot.slane %v1021_v23, 2  ;;  %v1140_v19 = vld [vmem:[#allocation4 + $0x110] sm:$0xff] }
 0x20c   :  { %v1018_v26 = vrot.slane %v1017_v24, 1  ;;  %v1023_v29 = vadd.f32 %v1022_v25, %v1021_v23  ;;  %v1133_v25 = vld [vmem:[#allocation4 + $0xd8] sm:$0xff] }
 0x20e   :  { %v1019_v30 = vadd.f32 %v1018_v26, %v1017_v24  ;;  %v1024_v31 = vrot.slane %v1023_v29, 1  ;;  %v1136_v24 = vld [vmem:[#allocation4 + $0xf0] sm:$0xff] }
 0x210   :  { %v1038_v28 = vmul.f32 0.125, %v1019_v30  ;;  %v1025_v32 = vadd.f32 %v1024_v31, %v1023_v29  ;;  %v1132_v30 = vld [vmem:[#allocation4 + $0xd0] sm:$0xff]  ;;  %v1129_v31 = vld [vmem:[#allocation4 + $0xb8] sm:$0xff] }
 0x212   :  { %v1042_v33 = vadd.f32 1e-05, %v1038_v28  ;;  %v1039_v34 = vmul.f32 0.125, %v1025_v32 }
 0x214   :  { %2105 = vrsqrt.f32 %v1042_v33  ;;  %v1043_v35 = vadd.f32 1e-05, %v1039_v34  ;;  %v1128_v33 = vld [vmem:[#allocation4 + $0xb0] sm:$0xff]  ;;  %v1125_v34 = vld [vmem:[#allocation4 + $0x98] sm:$0xff] }
 0x216   :  { %2107 = vrsqrt.f32 %v1043_v35 }
 0x221   :  { %v2106_v37 = vpop.eup %2105 }
 0x222   :  { %v1050_v43 = vmul.f32 %v2106_v37, %v1006_v13 }
 0x223   :  { %v2108_v47 = vpop.eup %2107 }
 0x224   :  { %v1051_v48 = vmul.f32 %v2108_v47, %v1007_v16  ;;  %v1076_v50 = vmul.f32 %v1059_v40, %v1050_v43  ;;  %v1141_v16 = vld [vmem:[#allocation4 + $0x118] sm:$0xff]  ;;  %v1124_v40 = vld [vmem:[#allocation4 + $0x90] sm:$0xff] }
 0x225   :  { %v1121_v43 = vld [vmem:[#allocation4 + $0x78] sm:$0xff] }
 0x226   :  { %v1077_v22 = vmul.f32 %v1063_v44, %v1051_v48  ;;  %v2421_v53 = vadd.f32 %v1085_v51, %v1076_v50  ;;  %v1120_v48 = vld [vmem:[#allocation4 + $0x70] sm:$0xff] }
 0x228   :  { %v1103_v27 = vadd.f32 %v1089_v49, %v1077_v22  ;;  %v1117_v49 = vld [vmem:[#allocation4 + $0x58] sm:$0xff]  ;;  %v1116_v22 = vld [vmem:[#allocation4 + $0x50] sm:$0xff] }
 0x22a   :  { %1448 = vmatprep.mubr.f32.mxu0 %v1103_v27 }
 0x22b   :  { %1449 = vmatmul.mubr.f32.vlgmr.msra.gmra.mxu0 %v2421_v53 }
 0x22c   :  { %v898_v58 = vpop.f32.mrf.mxu0  ;;  %1527 = vmatpush1.msra.mxu0 %v1168_v54  ;;  %1590 = vmatprep.mubr.f32.mxu0 %v1103_v27  ;;  %v1113_v27 = vld [vmem:[#allocation4 + $0x38] sm:$0xff] }
 0x22d   :  { %v899_v60 = vadd.f32 %v898_v58, %v681_v52  ;;  %v969_v61 = vpop.f32.mrf.mxu1  ;;  %1528 = vmatprep.subr.mxu0 %v1165_v55  ;;  %v1112_v55 = vld [vmem:[#allocation4 + $0x30] sm:$0xff] }
 0x22e   :  { %v900_v63 = vpop.f32.mrf.mxu0  ;;  %1529 = vmatpush1.msra.mxu0 %v1164_v57 }
 0x22f   :  { %v970_v1 = vadd.f32 %v969_v61, %v899_v60  ;;  %v901_v2 = vadd.f32 %v900_v63, %v685_v56  ;;  %1530 = vmatprep.subr.mxu0 %v1161_v59  ;;  %v971_v4 = vpop.f32.mrf.mxu1  ;;  %v1109_v56 = vld [vmem:[#allocation4 + $0x18] sm:$0xff]  ;;  %v1108_v59 = vld [vmem:[#allocation4 + $0x10] sm:$0xff] }
 0x230   :  { %1531 = vmatpush1.msra.mxu0 %v1160_v62  ;;  %v1233_v60 = vld [vmem:[#allocation4 + $0x3f8] sm:$0xff]  ;;  %v1232_v63 = vld [vmem:[#allocation4 + $0x3f0] sm:$0xff] }
 0x231   :  { %v976_v46 = vmax.f32 %v970_v1, 0.0  ;;  %v972_v6 = vadd.f32 %v971_v4, %v901_v2  ;;  %1532 = vmatprep.subr.mxu0 %v1157_v0  ;;  %v1229_v0 = vld [vmem:[#allocation4 + $0x3d8] sm:$0xff] }
 0x232   :  { %1533 = vmatpush1.msra.mxu0 %v1156_v3  ;;  %v1228_v3 = vld [vmem:[#allocation4 + $0x3d0] sm:$0xff]  ;;  %v1225_v4 = vld [vmem:[#allocation4 + $0x3b8] sm:$0xff] }
 0x233   :  { %v990_v9 = vrot.slane %v976_v46, 4  ;;  %v977_v10 = vmax.f32 %v972_v6, 0.0  ;;  %1534 = vmatprep.subr.mxu0 %v1153_v5  ;;  %v1224_v6 = vld [vmem:[#allocation4 + $0x3b0] sm:$0xff] }
 0x234   :  { %1535 = vmatpush1.msra.mxu0 %v1152_v7  ;;  %v1221_v7 = vld [vmem:[#allocation4 + $0x398] sm:$0xff] }
 0x235   :  { %v991_v13 = vadd.f32 %v990_v9, %v976_v46  ;;  %v996_v14 = vrot.slane %v977_v10, 4  ;;  %1536 = vmatprep.subr.mxu0 %v1149_v8 }
 0x236   :  { %1537 = vmatpush1.msra.mxu0 %v1148_v11  ;;  %v1217_v11 = vld [vmem:[#allocation4 + $0x378] sm:$0xff] }
 0x237   :  { %v992_v17 = vrot.slane %v991_v13, 2  ;;  %v997_v18 = vadd.f32 %v996_v14, %v977_v10  ;;  %1538 = vmatprep.subr.mxu0 %v1145_v12  ;;  %v1216_v14 = vld [vmem:[#allocation4 + $0x370] sm:$0xff] }
 0x238   :  { %1539 = vmatpush1.msra.mxu0 %v1144_v15  ;;  %v1213_v15 = vld [vmem:[#allocation4 + $0x358] sm:$0xff] }
 0x239   :  { %v993_v21 = vadd.f32 %v992_v17, %v991_v13  ;;  %v998_v23 = vrot.slane %v997_v18, 2  ;;  %1540 = vmatprep.subr.mxu0 %v1141_v16 }
 0x23a   :  { %1541 = vmatpush1.msra.mxu0 %v1140_v19  ;;  %v1209_v19 = vld [vmem:[#allocation4 + $0x338] sm:$0xff] }
 0x23b   :  { %v994_v26 = vrot.slane %v993_v21, 1  ;;  %v999_v29 = vadd.f32 %v998_v23, %v997_v18  ;;  %1542 = vmatprep.subr.mxu0 %v1137_v20  ;;  %v1212_v18 = vld [vmem:[#allocation4 + $0x350] sm:$0xff]  ;;  %v1205_v23 = vld [vmem:[#allocation4 + $0x318] sm:$0xff] }
 0x23c   :  { %1543 = vmatpush1.msra.mxu0 %v1136_v24  ;;  %v1204_v24 = vld [vmem:[#allocation4 + $0x310] sm:$0xff] }
 0x23d   :  { %v995_v28 = vadd.f32 %v994_v26, %v993_v21  ;;  %v1000_v32 = vrot.slane %v999_v29, 1  ;;  %1544 = vmatprep.subr.mxu0 %v1133_v25  ;;  %v1208_v21 = vld [vmem:[#allocation4 + $0x330] sm:$0xff]  ;;  %v1201_v25 = vld [vmem:[#allocation4 + $0x2f8] sm:$0xff] }
 0x23e   :  { %1545 = vmatpush1.msra.mxu0 %v1132_v30  ;;  %v1200_v26 = vld [vmem:[#allocation4 + $0x2f0] sm:$0xff] }
 0x23f   :  { %v1004_v35 = vmul.f32 0.125, %v995_v28  ;;  %v1001_v37 = vadd.f32 %v1000_v32, %v999_v29  ;;  %1546 = vmatprep.subr.mxu0 %v1129_v31  ;;  %v1197_v29 = vld [vmem:[#allocation4 + $0x2d8] sm:$0xff]  ;;  %v1196_v30 = vld [vmem:[#allocation4 + $0x2d0] sm:$0xff] }
 0x240   :  { %1547 = vmatpush1.msra.mxu0 %v1128_v33  ;;  %v1193_v31 = vld [vmem:[#allocation4 + $0x2b8] sm:$0xff]  ;;  %v1192_v28 = vld [vmem:[#allocation4 + $0x2b0] sm:$0xff] }
 0x241   :  { %v2426_v44 = vsub.f32 %v976_v46, %v1004_v35  ;;  %v1005_v47 = vmul.f32 0.125, %v1001_v37  ;;  %1548 = vmatprep.subr.mxu0 %v1125_v34  ;;  %v1189_v32 = vld [vmem:[#allocation4 + $0x298] sm:$0xff]  ;;  %v1188_v33 = vld [vmem:[#allocation4 + $0x290] sm:$0xff]  ;;  %v1067_v37 = vrot.slane %v2404_v36, %v2357_v39 }
 0x242   :  { %1549 = vmatpush1.msra.mxu0 %v1124_v40  ;;  %v1185_v34 = vld [vmem:[#allocation4 + $0x278] sm:$0xff]  ;;  %v1184_v35 = vld [vmem:[#allocation4 + $0x270] sm:$0xff] }
 0x243   :  { %v1012_v50 = vmul.f32 %v2426_v44, %v2426_v44  ;;  %v2430_v51 = vsub.f32 %v977_v10, %v1005_v47  ;;  %1550 = vmatprep.subr.mxu0 %v1121_v43  ;;  %v1220_v10 = vld [vmem:[#allocation4 + $0x390] sm:$0xff]  ;;  %v1181_v43 = vld [vmem:[#allocation4 + $0x258] sm:$0xff] }
 0x244   :  { %1551 = vmatpush1.msra.mxu0 %v1120_v48  ;;  %v1180_v48 = vld [vmem:[#allocation4 + $0x250] sm:$0xff] }
 0x245   :  { %v1026_v52 = vrot.slane %v1012_v50, 4  ;;  %v1013_v54 = vmul.f32 %v2430_v51, %v2430_v51  ;;  %1552 = vmatprep.subr.mxu0 %v1117_v49  ;;  %v1071_v49 = vrot.slane %v2404_v36, %v2364_v42 }
 0x246   :  { %1553 = vmatpush1.msra.mxu0 %v1116_v22 }
 0x247   :  { %v1027_v57 = vadd.f32 %v1026_v52, %v1012_v50  ;;  %v1032_v58 = vrot.slane %v1013_v54, 4  ;;  %1554 = vmatprep.subr.mxu0 %v1113_v27  ;;  %v1093_v50 = vrot.slane %v2413_v45, %v2357_v39  ;;  %v1177_v27 = vld [vmem:[#allocation4 + $0x238] sm:$0xff] }
 0x248   :  { %1555 = vmatpush1.msra.mxu0 %v1112_v55  ;;  %v1097_v55 = vrot.slane %v2413_v45, %v2364_v42  ;;  %v1292_v45 = vld [vmem:[#allocation4 + $0x5d0] sm:$0xff] }
 0x249   :  { %v1028_v61 = vrot.slane %v1027_v57, 2  ;;  %v1033_v62 = vadd.f32 %v1032_v58, %v1013_v54  ;;  %1556 = vmatprep.subr.mxu0 %v1109_v56  ;;  %v1176_v54 = vld [vmem:[#allocation4 + $0x230] sm:$0xff] }
 0x24a   :  { %1557 = vmatpush1.msra.mxu0 %v1108_v59  ;;  %v1172_v58 = vld [vmem:[#allocation4 + $0x210] sm:$0xff] }
 0x24b   :  { %v1029_v1 = vadd.f32 %v1028_v61, %v1027_v57  ;;  %v1034_v2 = vrot.slane %v1033_v62, 2  ;;  %1558 = vmatprep.subr.mxu0 %v1233_v60  ;;  %v1296_v60 = vld [vmem:[#allocation4 + $0x5f0] sm:$0xff]  ;;  %v1289_v61 = vld [vmem:[#allocation4 + $0x5b8] sm:$0xff] }
 0x24c   :  { %1559 = vmatpush2.msra.mxu0 %v1232_v63  ;;  %v1285_v63 = vld [vmem:[#allocation4 + $0x598] sm:$0xff] }
 0x24d   :  { %v1030_v5 = vrot.slane %v1029_v1, 1  ;;  %v1035_v46 = vadd.f32 %v1034_v2, %v1033_v62  ;;  %1560 = vmatprep.subr.mxu0 %v1229_v0  ;;  %v1288_v62 = vld [vmem:[#allocation4 + $0x5b0] sm:$0xff] }
 0x24e   :  { %1561 = vmatpush2.msra.mxu0 %v1228_v3  ;;  %v1284_v0 = vld [vmem:[#allocation4 + $0x590] sm:$0xff]  ;;  %v1277_v3 = vld [vmem:[#allocation4 + $0x558] sm:$0xff] }
 0x24f   :  { %v1031_v8 = vadd.f32 %v1030_v5, %v1029_v1  ;;  %v1036_v9 = vrot.slane %v1035_v46, 1  ;;  %1562 = vmatprep.subr.mxu0 %v1225_v4  ;;  %v1281_v1 = vld [vmem:[#allocation4 + $0x578] sm:$0xff]  ;;  %v1280_v2 = vld [vmem:[#allocation4 + $0x570] sm:$0xff] }
 0x250   :  { %1563 = vmatpush2.msra.mxu0 %v1224_v6  ;;  %v1273_v4 = vld [vmem:[#allocation4 + $0x538] sm:$0xff]  ;;  %v1272_v5 = vld [vmem:[#allocation4 + $0x530] sm:$0xff] }
 0x251   :  { %v1040_v12 = vmul.f32 0.125, %v1031_v8  ;;  %v1037_v13 = vadd.f32 %v1036_v9, %v1035_v46  ;;  %1564 = vmatprep.subr.mxu0 %v1221_v7  ;;  %v1269_v46 = vld [vmem:[#allocation4 + $0x518] sm:$0xff]  ;;  %v1268_v6 = vld [vmem:[#allocation4 + $0x510] sm:$0xff] }
 0x252   :  { %1565 = vmatpush2.msra.mxu0 %v1220_v10  ;;  %v1265_v7 = vld [vmem:[#allocation4 + $0x4f8] sm:$0xff]  ;;  %v1264_v8 = vld [vmem:[#allocation4 + $0x4f0] sm:$0xff] }
 0x253   :  { %v1044_v16 = vadd.f32 1e-05, %v1040_v12  ;;  %v1041_v17 = vmul.f32 0.125, %v1037_v13  ;;  %1566 = vmatprep.subr.mxu0 %v1217_v11  ;;  %v1261_v9 = vld [vmem:[#allocation4 + $0x4d8] sm:$0xff]  ;;  %v1260_v10 = vld [vmem:[#allocation4 + $0x4d0] sm:$0xff] }
 0x254   :  { %1567 = vmatpush2.msra.mxu0 %v1216_v14  ;;  %v1257_v11 = vld [vmem:[#allocation4 + $0x4b8] sm:$0xff]  ;;  %v1256_v12 = vld [vmem:[#allocation4 + $0x4b0] sm:$0xff] }
 0x255   :  { %2109 = vrsqrt.f32 %v1044_v16  ;;  %v1045_v20 = vadd.f32 1e-05, %v1041_v17  ;;  %1568 = vmatprep.subr.mxu0 %v1213_v15  ;;  %v1253_v13 = vld [vmem:[#allocation4 + $0x498] sm:$0xff]  ;;  %v1252_v14 = vld [vmem:[#allocation4 + $0x490] sm:$0xff] }
 0x256   :  { %1569 = vmatpush2.msra.mxu0 %v1212_v18  ;;  %v1249_v15 = vld [vmem:[#allocation4 + $0x478] sm:$0xff]  ;;  %v1248_v16 = vld [vmem:[#allocation4 + $0x470] sm:$0xff] }
 0x257   :  { %2111 = vrsqrt.f32 %v1045_v20  ;;  %1570 = vmatprep.subr.mxu0 %v1209_v19  ;;  %v1245_v17 = vld [vmem:[#allocation4 + $0x458] sm:$0xff]  ;;  %v1244_v18 = vld [vmem:[#allocation4 + $0x450] sm:$0xff] }
 0x258   :  { %1571 = vmatpush2.msra.mxu0 %v1208_v21  ;;  %v1241_v19 = vld [vmem:[#allocation4 + $0x438] sm:$0xff]  ;;  %v1240_v20 = vld [vmem:[#allocation4 + $0x430] sm:$0xff] }
 0x259   :  { %1572 = vmatprep.subr.mxu0 %v1205_v23  ;;  %v1237_v21 = vld [vmem:[#allocation4 + $0x418] sm:$0xff]  ;;  %v1236_v23 = vld [vmem:[#allocation4 + $0x410] sm:$0xff] }
 0x25a   :  { %1573 = vmatpush2.msra.mxu0 %v1204_v24  ;;  %v1361_v24 = vld [vmem:[#allocation4 + $0x7f8] sm:$0xff] }
 0x25b   :  { %1574 = vmatprep.subr.mxu0 %v1201_v25  ;;  %v1360_v25 = vld [vmem:[#allocation4 + $0x7f0] sm:$0xff] }
 0x25c   :  { %1575 = vmatpush2.msra.mxu0 %v1200_v26  ;;  %v1357_v26 = vld [vmem:[#allocation4 + $0x7d8] sm:$0xff] }
 0x25d   :  { %1576 = vmatprep.subr.mxu0 %v1197_v29  ;;  %v1356_v29 = vld [vmem:[#allocation4 + $0x7d0] sm:$0xff] }
 0x25e   :  { %1577 = vmatpush2.msra.mxu0 %v1196_v30  ;;  %v1353_v30 = vld [vmem:[#allocation4 + $0x7b8] sm:$0xff] }
 0x25f   :  { %1578 = vmatprep.subr.mxu0 %v1193_v31  ;;  %v1352_v31 = vld [vmem:[#allocation4 + $0x7b0] sm:$0xff] }
 0x260   :  { %1579 = vmatpush2.msra.mxu0 %v1192_v28  ;;  %v1349_v28 = vld [vmem:[#allocation4 + $0x798] sm:$0xff] }
 0x261   :  { %1580 = vmatprep.subr.mxu0 %v1189_v32  ;;  %v1348_v32 = vld [vmem:[#allocation4 + $0x790] sm:$0xff] }
 0x262   :  { %v2110_v40 = vpop.eup %2109  ;;  %1581 = vmatpush2.msra.mxu0 %v1188_v33  ;;  %v1345_v33 = vld [vmem:[#allocation4 + $0x778] sm:$0xff] }
 0x263   :  { %v1052_v47 = vmul.f32 %v2110_v40, %v2426_v44  ;;  %1582 = vmatprep.subr.mxu0 %v1185_v34  ;;  %v1173_v44 = vld [vmem:[#allocation4 + $0x218] sm:$0xff]  ;;  %v1344_v34 = vld [vmem:[#allocation4 + $0x770] sm:$0xff] }
 0x264   :  { %v2112_v22 = vpop.eup %2111  ;;  %1583 = vmatpush2.msra.mxu0 %v1184_v35  ;;  %v1341_v35 = vld [vmem:[#allocation4 + $0x758] sm:$0xff] }
 0x265   :  { %v1053_v52 = vmul.f32 %v2112_v22, %v2430_v51  ;;  %1584 = vmatprep.subr.mxu0 %v1181_v43  ;;  %v1078_v56 = vmul.f32 %v1067_v37, %v1052_v47  ;;  %v1293_v51 = vld [vmem:[#allocation4 + $0x5d8] sm:$0xff]  ;;  %v1340_v37 = vld [vmem:[#allocation4 + $0x750] sm:$0xff] }
 0x266   :  { %1585 = vmatpush2.msra.mxu0 %v1180_v48  ;;  %v1337_v40 = vld [vmem:[#allocation4 + $0x738] sm:$0xff]  ;;  %v1336_v43 = vld [vmem:[#allocation4 + $0x730] sm:$0xff] }
 0x267   :  { %1586 = vmatprep.subr.mxu0 %v1177_v27  ;;  %v1079_v57 = vmul.f32 %v1071_v49, %v1053_v52  ;;  %v2444_v36 = vadd.f32 %v1093_v50, %v1078_v56  ;;  %v1333_v47 = vld [vmem:[#allocation4 + $0x718] sm:$0xff]  ;;  %v1332_v48 = vld [vmem:[#allocation4 + $0x710] sm:$0xff] }
 0x268   :  { %1587 = vmatpush2.msra.mxu0 %v1176_v54  ;;  %v1329_v49 = vld [vmem:[#allocation4 + $0x6f8] sm:$0xff]  ;;  %v1328_v50 = vld [vmem:[#allocation4 + $0x6f0] sm:$0xff] }
 0x269   :  { %1588 = vmatprep.subr.mxu0 %v1173_v44  ;;  %v1105_v59 = vadd.f32 %v1097_v55, %v1079_v57  ;;  %v1325_v22 = vld [vmem:[#allocation4 + $0x6d8] sm:$0xff]  ;;  %v1324_v27 = vld [vmem:[#allocation4 + $0x6d0] sm:$0xff] }
 0x26a   :  { %1589 = vmatpush2.msra.mxu0 %v1172_v58  ;;  %v1321_v52 = vld [vmem:[#allocation4 + $0x6b8] sm:$0xff]  ;;  %v1320_v54 = vld [vmem:[#allocation4 + $0x6b0] sm:$0xff] }
 0x26b   :  { %1519 = vmatprep.mubr.f32.mxu1 %v1105_v59  ;;  %1591 = vmatmul.mubr.f32.vlgmr.msra.gmra.mxu0 %v2421_v53  ;;  %v1276_v53 = vld [vmem:[#allocation4 + $0x550] sm:$0xff]  ;;  %v1317_v55 = vld [vmem:[#allocation4 + $0x698] sm:$0xff] }
 0x26c   :  { %1520 = vmatmul.mubr.f32.vlgmr.msra.gmra.mxu1 %v2444_v36  ;;  %v1316_v56 = vld [vmem:[#allocation4 + $0x690] sm:$0xff]  ;;  %v1313_v44 = vld [vmem:[#allocation4 + $0x678] sm:$0xff] }
 0x26d   :  { %1598 = vmatpush1.msra.mxu1 %v1296_v60  ;;  %1661 = vmatprep.mubr.f32.mxu1 %v1105_v59  ;;  %v1312_v57 = vld [vmem:[#allocation4 + $0x670] sm:$0xff]  ;;  %v1309_v58 = vld [vmem:[#allocation4 + $0x658] sm:$0xff] }
 0x26e   :  { %1599 = vmatprep.subr.mxu1 %v1293_v51  ;;  %v1308_v59 = vld [vmem:[#allocation4 + $0x650] sm:$0xff]  ;;  %v1305_v60 = vld [vmem:[#allocation4 + $0x638] sm:$0xff] }
 0x26f   :  { %1600 = vmatpush1.msra.mxu1 %v1292_v45  ;;  %v1304_v51 = vld [vmem:[#allocation4 + $0x630] sm:$0xff]  ;;  %v1301_v45 = vld [vmem:[#allocation4 + $0x618] sm:$0xff] }
 0x270   :  { %1601 = vmatprep.subr.mxu1 %v1289_v61  ;;  %v1300_v61 = vld [vmem:[#allocation4 + $0x610] sm:$0xff] }
 0x271   :  { %1602 = vmatpush1.msra.mxu1 %v1288_v62  ;;  %v1831_v62 = vld [vmem:[%s2699_s13 + $0xf8] sm:$0xff] }
 0x272   :  { %1603 = vmatprep.subr.mxu1 %v1285_v63  ;;  %2022 = vmatprep.subr.mxu0 %v1831_v62  ;;  %v1815_v63 = vld [vmem:[%s2699_s13 + $0x78] sm:$0xff]  ;;  %v1849_v62 = vld [vmem:[%s2699_s13 + $0x188] sm:$0xff] }
 0x273   :  { %1604 = vmatpush1.msra.mxu1 %v1284_v0  ;;  %2023 = vmatpush3.msra.mxu0 %v1815_v63  ;;  %v1830_v0 = vld [vmem:[%s2699_s13 + $0xf0] sm:$0xff]  ;;  %v2635_v63 = vld [vmem:[%s2696_s10] sm:$0xf] }
 0x274   :  { %1605 = vmatprep.subr.mxu1 %v1281_v1  ;;  %2024 = vmatprep.subr.mxu0 %v1830_v0  ;;  %v1814_v1 = vld [vmem:[%s2699_s13 + $0x70] sm:$0xff]  ;;  %v1833_v0 = vld [vmem:[%s2699_s13 + $0x108] sm:$0xff] }
 0x275   :  { %1606 = vmatpush1.msra.mxu1 %v1280_v2  ;;  %2025 = vmatpush3.msra.mxu0 %v1814_v1  ;;  %v1813_v2 = vld [vmem:[%s2699_s13 + $0x68] sm:$0xff]  ;;  %v1848_v1 = vld [vmem:[%s2699_s13 + $0x180] sm:$0xff] }
 0x276   :  { %1607 = vmatprep.subr.mxu1 %v1277_v3  ;;  %v1828_v3 = vld [vmem:[%s2699_s13 + $0xe0] sm:$0xff] }
 0x277   :  { %1608 = vmatpush1.msra.mxu1 %v1276_v53  ;;  %v1812_v53 = vld [vmem:[%s2699_s13 + $0x60] sm:$0xff] }
 0x278   :  { %1609 = vmatprep.subr.mxu1 %v1273_v4  ;;  %v1827_v4 = vld [vmem:[%s2699_s13 + $0xd8] sm:$0xff] }
 0x279   :  { %1610 = vmatpush1.msra.mxu1 %v1272_v5  ;;  %v1811_v5 = vld [vmem:[%s2699_s13 + $0x58] sm:$0xff] }
 0x27a   :  { %1611 = vmatprep.subr.mxu1 %v1269_v46  ;;  %v1826_v46 = vld [vmem:[%s2699_s13 + $0xd0] sm:$0xff] }
 0x27b   :  { %1612 = vmatpush1.msra.mxu1 %v1268_v6  ;;  %v1810_v6 = vld [vmem:[%s2699_s13 + $0x50] sm:$0xff] }
 0x27c   :  { %1613 = vmatprep.subr.mxu1 %v1265_v7  ;;  %v1825_v7 = vld [vmem:[%s2699_s13 + $0xc8] sm:$0xff] }
 0x27d   :  { %1614 = vmatpush1.msra.mxu1 %v1264_v8  ;;  %v1809_v8 = vld [vmem:[%s2699_s13 + $0x48] sm:$0xff] }
 0x27e   :  { %1615 = vmatprep.subr.mxu1 %v1261_v9  ;;  %v1824_v9 = vld [vmem:[%s2699_s13 + $0xc0] sm:$0xff] }
 0x27f   :  { %1616 = vmatpush1.msra.mxu1 %v1260_v10  ;;  %v1808_v10 = vld [vmem:[%s2699_s13 + $0x40] sm:$0xff] }
 0x280   :  { %1617 = vmatprep.subr.mxu1 %v1257_v11  ;;  %v1823_v11 = vld [vmem:[%s2699_s13 + $0xb8] sm:$0xff] }
 0x281   :  { %1618 = vmatpush1.msra.mxu1 %v1256_v12  ;;  %v1807_v12 = vld [vmem:[%s2699_s13 + $0x38] sm:$0xff] }
 0x282   :  { %1619 = vmatprep.subr.mxu1 %v1253_v13  ;;  %v1822_v13 = vld [vmem:[%s2699_s13 + $0xb0] sm:$0xff] }
 0x283   :  { %1620 = vmatpush1.msra.mxu1 %v1252_v14  ;;  %v1806_v14 = vld [vmem:[%s2699_s13 + $0x30] sm:$0xff] }
 0x284   :  { %1621 = vmatprep.subr.mxu1 %v1249_v15  ;;  %v1821_v15 = vld [vmem:[%s2699_s13 + $0xa8] sm:$0xff] }
 0x285   :  { %1622 = vmatpush1.msra.mxu1 %v1248_v16  ;;  %v1805_v16 = vld [vmem:[%s2699_s13 + $0x28] sm:$0xff] }
 0x286   :  { %1623 = vmatprep.subr.mxu1 %v1245_v17  ;;  %v1820_v17 = vld [vmem:[%s2699_s13 + $0xa0] sm:$0xff] }
 0x287   :  { %1624 = vmatpush1.msra.mxu1 %v1244_v18  ;;  %v1804_v18 = vld [vmem:[%s2699_s13 + $0x20] sm:$0xff] }
 0x288   :  { %1625 = vmatprep.subr.mxu1 %v1241_v19  ;;  %v1819_v19 = vld [vmem:[%s2699_s13 + $0x98] sm:$0xff] }
 0x289   :  { %1626 = vmatpush1.msra.mxu1 %v1240_v20  ;;  %v1803_v20 = vld [vmem:[%s2699_s13 + $0x18] sm:$0xff] }
 0x28a   :  { %1627 = vmatprep.subr.mxu1 %v1237_v21  ;;  %v1818_v21 = vld [vmem:[%s2699_s13 + $0x90] sm:$0xff] }
 0x28b   :  { %1628 = vmatpush1.msra.mxu1 %v1236_v23  ;;  %v1802_v23 = vld [vmem:[%s2699_s13 + $0x10] sm:$0xff] }
 0x28c   :  { %1629 = vmatprep.subr.mxu1 %v1361_v24  ;;  %v1817_v24 = vld [vmem:[%s2699_s13 + $0x88] sm:$0xff] }
 0x28d   :  { %1630 = vmatpush2.msra.mxu1 %v1360_v25  ;;  %v1801_v25 = vld [vmem:[%s2699_s13 + $0x8] sm:$0xff] }
 0x28e   :  { %1631 = vmatprep.subr.mxu1 %v1357_v26  ;;  %v1816_v26 = vld [vmem:[%s2699_s13 + $0x80] sm:$0xff] }
 0x28f   :  { %1632 = vmatpush2.msra.mxu1 %v1356_v29  ;;  %v1800_v29 = vld [vmem:[%s2699_s13] sm:$0xff] }
 0x290   :  { %1633 = vmatprep.subr.mxu1 %v1353_v30  ;;  %v1863_v30 = vld [vmem:[%s2699_s13 + $0x1f8] sm:$0xff] }
 0x291   :  { %1634 = vmatpush2.msra.mxu1 %v1352_v31  ;;  %v1847_v31 = vld [vmem:[%s2699_s13 + $0x178] sm:$0xff] }
 0x292   :  { %1635 = vmatprep.subr.mxu1 %v1349_v28  ;;  %v1862_v28 = vld [vmem:[%s2699_s13 + $0x1f0] sm:$0xff] }
 0x293   :  { %1636 = vmatpush2.msra.mxu1 %v1348_v32  ;;  %v1846_v32 = vld [vmem:[%s2699_s13 + $0x170] sm:$0xff] }
 0x294   :  { %1637 = vmatprep.subr.mxu1 %v1345_v33  ;;  %v1861_v33 = vld [vmem:[%s2699_s13 + $0x1e8] sm:$0xff] }
 0x295   :  { %1638 = vmatpush2.msra.mxu1 %v1344_v34  ;;  %v1845_v34 = vld [vmem:[%s2699_s13 + $0x168] sm:$0xff] }
 0x296   :  { %1639 = vmatprep.subr.mxu1 %v1341_v35  ;;  %v1860_v35 = vld [vmem:[%s2699_s13 + $0x1e0] sm:$0xff] }
 0x297   :  { %1640 = vmatpush2.msra.mxu1 %v1340_v37  ;;  %v1844_v37 = vld [vmem:[%s2699_s13 + $0x160] sm:$0xff] }
 0x298   :  { %1641 = vmatprep.subr.mxu1 %v1337_v40  ;;  %v1859_v40 = vld [vmem:[%s2699_s13 + $0x1d8] sm:$0xff] }
 0x299   :  { %1642 = vmatpush2.msra.mxu1 %v1336_v43  ;;  %v1843_v43 = vld [vmem:[%s2699_s13 + $0x158] sm:$0xff] }
 0x29a   :  { %1643 = vmatprep.subr.mxu1 %v1333_v47  ;;  %v1858_v47 = vld [vmem:[%s2699_s13 + $0x1d0] sm:$0xff] }
 0x29b   :  { %1644 = vmatpush2.msra.mxu1 %v1332_v48  ;;  %v1842_v48 = vld [vmem:[%s2699_s13 + $0x150] sm:$0xff] }
 0x29c   :  { %1645 = vmatprep.subr.mxu1 %v1329_v49  ;;  %v1857_v49 = vld [vmem:[%s2699_s13 + $0x1c8] sm:$0xff] }
 0x29d   :  { %1646 = vmatpush2.msra.mxu1 %v1328_v50  ;;  %v1841_v50 = vld [vmem:[%s2699_s13 + $0x148] sm:$0xff] }
 0x29e   :  { %1647 = vmatprep.subr.mxu1 %v1325_v22  ;;  %v1856_v22 = vld [vmem:[%s2699_s13 + $0x1c0] sm:$0xff] }
 0x29f   :  { %1648 = vmatpush2.msra.mxu1 %v1324_v27  ;;  %v1840_v27 = vld [vmem:[%s2699_s13 + $0x140] sm:$0xff] }
 0x2a0   :  { %1649 = vmatprep.subr.mxu1 %v1321_v52  ;;  %v1855_v52 = vld [vmem:[%s2699_s13 + $0x1b8] sm:$0xff] }
 0x2a1   :  { %1650 = vmatpush2.msra.mxu1 %v1320_v54  ;;  %v1839_v54 = vld [vmem:[%s2699_s13 + $0x138] sm:$0xff] }
 0x2a2   :  { %1651 = vmatprep.subr.mxu1 %v1317_v55  ;;  %v1854_v55 = vld [vmem:[%s2699_s13 + $0x1b0] sm:$0xff] }
 0x2a3   :  { %1652 = vmatpush2.msra.mxu1 %v1316_v56  ;;  %v1838_v56 = vld [vmem:[%s2699_s13 + $0x130] sm:$0xff] }
 0x2a4   :  { %1653 = vmatprep.subr.mxu1 %v1313_v44  ;;  %v1853_v44 = vld [vmem:[%s2699_s13 + $0x1a8] sm:$0xff] }
 0x2a5   :  { %1654 = vmatpush2.msra.mxu1 %v1312_v57  ;;  %v1837_v57 = vld [vmem:[%s2699_s13 + $0x128] sm:$0xff] }
 0x2a6   :  { %1655 = vmatprep.subr.mxu1 %v1309_v58  ;;  %v1852_v58 = vld [vmem:[%s2699_s13 + $0x1a0] sm:$0xff] }
 0x2a7   :  { %1656 = vmatpush2.msra.mxu1 %v1308_v59  ;;  %v1836_v59 = vld [vmem:[%s2699_s13 + $0x120] sm:$0xff] }
 0x2a8   :  { %1657 = vmatprep.subr.mxu1 %v1305_v60  ;;  %v1851_v60 = vld [vmem:[%s2699_s13 + $0x198] sm:$0xff] }
 0x2a9   :  { %1658 = vmatpush2.msra.mxu1 %v1304_v51  ;;  %v1835_v51 = vld [vmem:[%s2699_s13 + $0x118] sm:$0xff] }
 0x2aa   :  { %1659 = vmatprep.subr.mxu1 %v1301_v45  ;;  %v1850_v45 = vld [vmem:[%s2699_s13 + $0x190] sm:$0xff] }
 0x2ab   :  { %1660 = vmatpush2.msra.mxu1 %v1300_v61  ;;  %v1834_v61 = vld [vmem:[%s2699_s13 + $0x110] sm:$0xff] }
 0x2ac   :  { %1662 = vmatmul.mubr.f32.vlgmr.msra.gmra.mxu1 %v2444_v36  ;;  %v1829_v36 = vld [vmem:[%s2699_s13 + $0xe8] sm:$0xff]  ;;  %2057 = vmatprep.subr.mxu1 %v1863_v30 }
 0x2ad   :  { %2026 = vmatprep.subr.mxu0 %v1829_v36  ;;  %2058 = vmatpush3.msra.mxu1 %v1847_v31 }
 0x2ae   :  { %2027 = vmatpush3.msra.mxu0 %v1813_v2  ;;  %2059 = vmatprep.subr.mxu1 %v1862_v28  ;;  %v1832_v2 = vld [vmem:[%s2699_s13 + $0x100] sm:$0xff] }
 0x2af   :  { %2028 = vmatprep.subr.mxu0 %v1828_v3  ;;  %2060 = vmatpush3.msra.mxu1 %v1846_v32  ;;  %v1367_v3 = vrot.slane %v2635_v63, %v2355_v38 }
 0x2b0   :  { %2029 = vmatpush3.msra.mxu0 %v1812_v53  ;;  %2061 = vmatprep.subr.mxu1 %v1861_v33  ;;  %v1371_v53 = vrot.slane %v2635_v63, %v2362_v41 }
 0x2b1   :  { %2030 = vmatprep.subr.mxu0 %v1827_v4  ;;  %2062 = vmatpush3.msra.mxu1 %v1845_v34 }
 0x2b2   :  { %2031 = vmatpush3.msra.mxu0 %v1811_v5  ;;  %2063 = vmatprep.subr.mxu1 %v1860_v35 }
 0x2b3   :  { %2032 = vmatprep.subr.mxu0 %v1826_v46  ;;  %2064 = vmatpush3.msra.mxu1 %v1844_v37 }
 0x2b4   :  { %2033 = vmatpush3.msra.mxu0 %v1810_v6  ;;  %2065 = vmatprep.subr.mxu1 %v1859_v40 }
 0x2b5   :  { %2034 = vmatprep.subr.mxu0 %v1825_v7  ;;  %2066 = vmatpush3.msra.mxu1 %v1843_v43 }
 0x2b6   :  { %2035 = vmatpush3.msra.mxu0 %v1809_v8  ;;  %2067 = vmatprep.subr.mxu1 %v1858_v47 }
 0x2b7   :  { %2036 = vmatprep.subr.mxu0 %v1824_v9  ;;  %2068 = vmatpush3.msra.mxu1 %v1842_v48 }
 0x2b8   :  { %2037 = vmatpush3.msra.mxu0 %v1808_v10  ;;  %2069 = vmatprep.subr.mxu1 %v1857_v49 }
 0x2b9   :  { %2038 = vmatprep.subr.mxu0 %v1823_v11  ;;  %2070 = vmatpush3.msra.mxu1 %v1841_v50 }
 0x2ba   :  { %2039 = vmatpush3.msra.mxu0 %v1807_v12  ;;  %2071 = vmatprep.subr.mxu1 %v1856_v22 }
 0x2bb   :  { %2040 = vmatprep.subr.mxu0 %v1822_v13  ;;  %2072 = vmatpush3.msra.mxu1 %v1840_v27 }
 0x2bc   :  { %2041 = vmatpush3.msra.mxu0 %v1806_v14  ;;  %2073 = vmatprep.subr.mxu1 %v1855_v52 }
 0x2bd   :  { %2042 = vmatprep.subr.mxu0 %v1821_v15  ;;  %2074 = vmatpush3.msra.mxu1 %v1839_v54 }
 0x2be   :  { %2043 = vmatpush3.msra.mxu0 %v1805_v16  ;;  %2075 = vmatprep.subr.mxu1 %v1854_v55 }
 0x2bf   :  { %2044 = vmatprep.subr.mxu0 %v1820_v17  ;;  %2076 = vmatpush3.msra.mxu1 %v1838_v56  ;;  %v2653_v56 = vld [vmem:[%s2697_s11] sm:$0xf] }
 0x2c0   :  { %2045 = vmatpush3.msra.mxu0 %v1804_v18  ;;  %2077 = vmatprep.subr.mxu1 %v1853_v44 }
 0x2c1   :  { %2046 = vmatprep.subr.mxu0 %v1819_v19  ;;  %2078 = vmatpush3.msra.mxu1 %v1837_v57  ;;  %v1753_v57 = vrot.slane %v2653_v56, %v2355_v38 }
 0x2c2   :  { %2047 = vmatpush3.msra.mxu0 %v1803_v20  ;;  %2079 = vmatprep.subr.mxu1 %v1852_v58 }
 0x2c3   :  { %2048 = vmatprep.subr.mxu0 %v1818_v21  ;;  %2080 = vmatpush3.msra.mxu1 %v1836_v59  ;;  %v1757_v59 = vrot.slane %v2653_v56, %v2362_v41 }
 0x2c4   :  { %2049 = vmatpush3.msra.mxu0 %v1802_v23  ;;  %2081 = vmatprep.subr.mxu1 %v1851_v60  ;;  %v2662_v60 = vld [vmem:[%s2698_s12] sm:$0xf] }
 0x2c5   :  { %2050 = vmatprep.subr.mxu0 %v1817_v24  ;;  %2082 = vmatpush3.msra.mxu1 %v1835_v51 }
 0x2c6   :  { %2051 = vmatpush3.msra.mxu0 %v1801_v25  ;;  %2083 = vmatprep.subr.mxu1 %v1850_v45 }
 0x2c7   :  { %2052 = vmatprep.subr.mxu0 %v1816_v26  ;;  %2084 = vmatpush3.msra.mxu1 %v1834_v61  ;;  %v1783_v61 = vrot.slane %v2662_v60, %v2362_v41 }
 0x2c8   :  { %2053 = vmatpush3.msra.mxu0 %v1800_v29  ;;  %2085 = vmatprep.subr.mxu1 %v1849_v62 }
 0x2c9   :  { %2086 = vmatpush3.msra.mxu1 %v1833_v0  ;;  %v1779_v0 = vrot.slane %v2662_v60, %v2355_v38 }
 0x2ca   :  { %2087 = vmatprep.subr.mxu1 %v1848_v1 }
 0x2cb   :  { %2088 = vmatpush3.msra.mxu1 %v1832_v2  ;;  %v1375_v2 = vrot.slane %v2635_v63, %v2357_v39 }
 0x2eb   :  { %v1450_v36 = vpop.f32.mrf.mxu0 }
 0x2ec   :  { %v1451_v5 = vadd.f32 %v1450_v36, %v1367_v3 }
 0x2ed   :  { %v1452_v4 = vpop.f32.mrf.mxu0 }
 0x2ee   :  { %v1453_v6 = vadd.f32 %v1452_v4, %v1371_v53  ;;  %v1379_v4 = vrot.slane %v2635_v63, %v2364_v42 }
 0x32b   :  { %v1592_v36 = vpop.f32.mrf.mxu0 }
 0x32c   :  { %v1521_v46 = vpop.f32.mrf.mxu1 }
 0x32d   :  { %v1522_v7 = vadd.f32 %v1521_v46, %v1451_v5  ;;  %v1594_v5 = vpop.f32.mrf.mxu0  ;;  %v1593_v46 = vadd.f32 %v1592_v36, %v1375_v2 }
 0x32e   :  { %v1523_v8 = vpop.f32.mrf.mxu1  ;;  %v1595_v41 = vadd.f32 %v1594_v5, %v1379_v4 }
 0x32f   :  { %v1668_v9 = vmax.f32 %v1522_v7, 0.0  ;;  %v1524_v10 = vadd.f32 %v1523_v8, %v1453_v6 }
 0x331   :  { %v1672_v11 = vrot.slane %v1668_v9, 4  ;;  %v1669_v12 = vmax.f32 %v1524_v10, 0.0 }
 0x333   :  { %v1673_v13 = vadd.f32 %v1672_v11, %v1668_v9  ;;  %v1678_v14 = vrot.slane %v1669_v12, 4 }
 0x335   :  { %v1674_v15 = vrot.slane %v1673_v13, 2  ;;  %v1679_v16 = vadd.f32 %v1678_v14, %v1669_v12 }
 0x337   :  { %v1675_v17 = vadd.f32 %v1674_v15, %v1673_v13  ;;  %v1680_v18 = vrot.slane %v1679_v16, 2 }
 0x339   :  { %v1676_v19 = vrot.slane %v1675_v17, 1  ;;  %v1681_v20 = vadd.f32 %v1680_v18, %v1679_v16 }
 0x33b   :  { %v1677_v21 = vadd.f32 %v1676_v19, %v1675_v17  ;;  %v1682_v23 = vrot.slane %v1681_v20, 1 }
 0x33d   :  { %v1696_v24 = vmul.f32 0.125, %v1677_v21  ;;  %v1683_v25 = vadd.f32 %v1682_v23, %v1681_v20 }
 0x33f   :  { %v1700_v26 = vsub.f32 %v1668_v9, %v1696_v24  ;;  %v1697_v29 = vmul.f32 0.125, %v1683_v25 }
 0x341   :  { %v1704_v30 = vmul.f32 %v1700_v26, %v1700_v26  ;;  %v1701_v31 = vsub.f32 %v1669_v12, %v1697_v29 }
 0x343   :  { %v1708_v28 = vrot.slane %v1704_v30, 4  ;;  %v1705_v32 = vmul.f32 %v1701_v31, %v1701_v31 }
 0x345   :  { %v1709_v33 = vadd.f32 %v1708_v28, %v1704_v30  ;;  %v1714_v34 = vrot.slane %v1705_v32, 4 }
 0x347   :  { %v1710_v35 = vrot.slane %v1709_v33, 2  ;;  %v1715_v37 = vadd.f32 %v1714_v34, %v1705_v32 }
 0x349   :  { %v1711_v40 = vadd.f32 %v1710_v35, %v1709_v33  ;;  %v1716_v43 = vrot.slane %v1715_v37, 2 }
 0x34b   :  { %v1712_v47 = vrot.slane %v1711_v40, 1  ;;  %v1717_v48 = vadd.f32 %v1716_v43, %v1715_v37 }
 0x34d   :  { %v1713_v49 = vadd.f32 %v1712_v47, %v1711_v40  ;;  %v1718_v50 = vrot.slane %v1717_v48, 1 }
 0x34f   :  { %v1732_v22 = vmul.f32 0.125, %v1713_v49  ;;  %v1719_v27 = vadd.f32 %v1718_v50, %v1717_v48 }
 0x351   :  { %v1736_v52 = vadd.f32 1e-05, %v1732_v22  ;;  %v1733_v54 = vmul.f32 0.125, %v1719_v27 }
 0x353   :  { %2113 = vrsqrt.f32 %v1736_v52  ;;  %v1737_v55 = vadd.f32 1e-05, %v1733_v54 }
 0x355   :  { %2115 = vrsqrt.f32 %v1737_v55  ;;  %v1761_v55 = vrot.slane %v2653_v56, %v2357_v39 }
 0x360   :  { %v2114_v44 = vpop.eup %2113 }
 0x361   :  { %v1744_v58 = vmul.f32 %v2114_v44, %v1700_v26 }
 0x362   :  { %v2116_v51 = vpop.eup %2115 }
 0x363   :  { %v1745_v45 = vmul.f32 %v2116_v51, %v1701_v31  ;;  %v1770_v62 = vmul.f32 %v1753_v57, %v1744_v58  ;;  %v1765_v57 = vrot.slane %v2653_v56, %v2364_v42  ;;  %v1791_v51 = vrot.slane %v2662_v60, %v2364_v42  ;;  %v2021_v56 = vld [vmem:[%s2700_s14] ss:$0 sm:$0xff] }
 0x365   :  { %v1771_v1 = vmul.f32 %v1757_v59, %v1745_v45  ;;  %v1796_v53 = vadd.f32 %v1779_v0, %v1770_v62 }
 0x367   :  { %v1797_v3 = vadd.f32 %v1783_v61, %v1771_v1  ;;  %v1787_v61 = vrot.slane %v2662_v60, %v2357_v39 }
 0x369   :  { %1935 = vmatprep.mubr.f32.mxu0 %v1797_v3 }
 0x36a   :  { %1936 = vmatmul.mubr.f32.vlgmr.msra.gmra.mxu0 %v1796_v53 }
 0x36c   :  { %v1663_v6 = vpop.f32.mrf.mxu1 }
 0x36d   :  { %v1664_v7 = vadd.f32 %v1663_v6, %v1593_v46 }
 0x36e   :  { %v1665_v8 = vpop.f32.mrf.mxu1 }
 0x36f   :  { %v1670_v9 = vmax.f32 %v1664_v7, 0.0  ;;  %v1666_v38 = vadd.f32 %v1665_v8, %v1595_v41 }
 0x371   :  { %v1684_v10 = vrot.slane %v1670_v9, 4  ;;  %v1671_v11 = vmax.f32 %v1666_v38, 0.0 }
 0x373   :  { %v1685_v12 = vadd.f32 %v1684_v10, %v1670_v9  ;;  %v1690_v13 = vrot.slane %v1671_v11, 4 }
 0x375   :  { %v1686_v14 = vrot.slane %v1685_v12, 2  ;;  %v1691_v15 = vadd.f32 %v1690_v13, %v1671_v11 }
 0x377   :  { %v1687_v16 = vadd.f32 %v1686_v14, %v1685_v12  ;;  %v1692_v17 = vrot.slane %v1691_v15, 2 }
 0x379   :  { %v1688_v18 = vrot.slane %v1687_v16, 1  ;;  %v1693_v63 = vadd.f32 %v1692_v17, %v1691_v15 }
 0x37b   :  { %v1689_v19 = vadd.f32 %v1688_v18, %v1687_v16  ;;  %v1694_v20 = vrot.slane %v1693_v63, 1 }
 0x37d   :  { %v1698_v21 = vmul.f32 0.125, %v1689_v19  ;;  %v1695_v23 = vadd.f32 %v1694_v20, %v1693_v63 }
 0x37f   :  { %v1702_v24 = vsub.f32 %v1670_v9, %v1698_v21  ;;  %v1699_v25 = vmul.f32 0.125, %v1695_v23 }
 0x381   :  { %v1706_v26 = vmul.f32 %v1702_v24, %v1702_v24  ;;  %v1703_v29 = vsub.f32 %v1671_v11, %v1699_v25 }
 0x383   :  { %v1720_v30 = vrot.slane %v1706_v26, 4  ;;  %v1707_v31 = vmul.f32 %v1703_v29, %v1703_v29 }
 0x385   :  { %v1721_v28 = vadd.f32 %v1720_v30, %v1706_v26  ;;  %v1726_v32 = vrot.slane %v1707_v31, 4 }
 0x387   :  { %v1722_v33 = vrot.slane %v1721_v28, 2  ;;  %v1727_v34 = vadd.f32 %v1726_v32, %v1707_v31 }
 0x389   :  { %v1723_v35 = vadd.f32 %v1722_v33, %v1721_v28  ;;  %v1728_v37 = vrot.slane %v1727_v34, 2 }
 0x38b   :  { %v1724_v40 = vrot.slane %v1723_v35, 1  ;;  %v1729_v43 = vadd.f32 %v1728_v37, %v1727_v34 }
 0x38d   :  { %v1725_v47 = vadd.f32 %v1724_v40, %v1723_v35  ;;  %v1730_v48 = vrot.slane %v1729_v43, 1 }
 0x38f   :  { %v1734_v49 = vmul.f32 0.125, %v1725_v47  ;;  %v1731_v50 = vadd.f32 %v1730_v48, %v1729_v43 }
 0x391   :  { %v1738_v22 = vadd.f32 1e-05, %v1734_v49  ;;  %v1735_v27 = vmul.f32 0.125, %v1731_v50 }
 0x393   :  { %2117 = vrsqrt.f32 %v1738_v22  ;;  %v1739_v52 = vadd.f32 1e-05, %v1735_v27 }
 0x395   :  { %2119 = vrsqrt.f32 %v1739_v52 }
 0x3a0   :  { %v2118_v54 = vpop.eup %2117 }
 0x3a1   :  { %v1746_v44 = vmul.f32 %v2118_v54, %v1702_v24 }
 0x3a2   :  { %v2120_v58 = vpop.eup %2119 }
 0x3a3   :  { %v1747_v59 = vmul.f32 %v2120_v58, %v1703_v29  ;;  %v1772_v45 = vmul.f32 %v1761_v55, %v1746_v44 }
 0x3a5   :  { %v1773_v62 = vmul.f32 %v1765_v57, %v1747_v59  ;;  %v1798_v1 = vadd.f32 %v1787_v61, %v1772_v45 }
 0x3a7   :  { %v1799_v0 = vadd.f32 %v1791_v51, %v1773_v62 }
 0x3a9   :  { %2005 = vmatprep.mubr.f32.mxu1 %v1799_v0 }
 0x3aa   :  { %2006 = vmatmul.mubr.f32.vlgmr.msra.gmra.mxu1 %v1798_v1 }
 0x42a   :  { %v2054_v36 = vpop.f32.mrf.mxu0 }
 0x42c   :  { %v2055_v2 = vpop.f32.mrf.mxu0 }
 0x42d   :  { %v2056_v3 = vadd.f32 %v2055_v2, %v2054_v36 }
 0x42f   :  { %v1938_v5 = vadd.f32 %v2056_v3, %v2021_v56 }
 0x46a   :  { %v2089_v53 = vpop.f32.mrf.mxu1 }
 0x46c   :  { %v2090_v4 = vpop.f32.mrf.mxu1 }
 0x46d   :  { %v2091_v42 = vadd.f32 %v2090_v4, %v2089_v53 }
 0x46f   :  { %v2008_v46 = vadd.f32 %v2091_v42, %v1938_v5 }
 0x471   :  { %2012 = vst.msk [vmem:[%s2701_s15] sm:$0xff] %vm2011_vm1, %v2008_v46 }
 0x472   :  { %2017 = vsyncpa [#allocation3], 1 }
 0x473   :  { %2018 = vsyncpa [#allocation5], 1 }

</bundles_post_ra>
